<compile_context>
chip_gen: v7x
topology: tpu7x:2x2x1
jax: 0.10.0
libtpu: 0.0.40
codegen_flags: <defaults>
</compile_context>

<pallas_src>
from functools import partial

import jax
import jax.numpy as jnp
from jax.experimental import pallas as pl
from jax.experimental.pallas import tpu as pltpu

D = 16                       # generator width multiplier (matches G(d=16))
BN_EPS = 1e-5
LEAKY_SLOPE = 0.01           # F.leaky_relu default
LANE = 128
BF16_SUBLANE = 16

LAYER_CFG = (
    dict(cin=10,    cout=100,   K=1, stride=1, pad=0, act="relu",    bn=True),
    dict(cin=100,   cout=D * 8, K=4, stride=1, pad=0, act="leaky",   bn=True),
    dict(cin=D * 8, cout=D * 4, K=4, stride=2, pad=1, act="leaky",   bn=True),
    dict(cin=D * 4, cout=D * 2, K=4, stride=2, pad=1, act="leaky",   bn=True),
    dict(cin=D * 2, cout=1,     K=4, stride=2, pad=1, act="sigmoid", bn=False),
)

_VMEM_SPEC = pl.BlockSpec(memory_space=pltpu.MemorySpace.VMEM)


def _round_up(x, m):
    return (x + m - 1) // m * m


def _apply_act(y, act):
    if act == "relu":
        return jnp.maximum(y, 0.0)
    if act == "leaky":
        return jnp.where(y >= 0.0, y, LEAKY_SLOPE * y)
    if act == "sigmoid":
        return jax.nn.sigmoid(y)
    return y


# ------------------------------ Pallas kernels -------------------------------
def _convt_bn_act_kernel(p_ref, w_ref, g_ref, b_ref, o_ref, *, n_rows, act):
    """Fused (patches @ W) + training-mode BatchNorm + activation, entirely in VMEM.

    p_ref: (P, Rp, Kp) bf16 patches   w_ref: (P, Kp, Cp) bf16 weights
    g_ref / b_ref: (1, Cp) f32 gamma / beta   o_ref: (P, Rp, Cp) bf16 output.
    ConvTranspose bias is dropped: it is cancelled exactly by the BN mean subtraction.
    """
    P, Rp, _ = p_ref.shape
    Cp = o_ref.shape[-1]
    cnt = float(P * n_rows)

    mask = None
    if n_rows < Rp:  # keep zero-padded rows out of the batch statistics
        mask = jax.lax.broadcasted_iota(jnp.int32, (Rp, Cp), 0) < n_rows

    ys = []
    acc = jnp.zeros((1, Cp), jnp.float32)
    for p in range(P):                                    # static unroll, P in {1, 4}
        y = jnp.dot(p_ref[p], w_ref[p], preferred_element_type=jnp.float32)
        ys.append(y)
        ym = y if mask is None else jnp.where(mask, y, 0.0)
        acc = acc + jnp.sum(ym, axis=0, keepdims=True)
    mean = acc / cnt

    acc = jnp.zeros((1, Cp), jnp.float32)
    for p in range(P):                                    # centered (cancellation-safe) variance
        d = ys[p] - mean
        if mask is not None:
            d = jnp.where(mask, d, 0.0)
        acc = acc + jnp.sum(d * d, axis=0, keepdims=True)
    inv = jax.lax.rsqrt(acc / cnt + BN_EPS)

    scale = g_ref[...] * inv                              # (1, Cp)
    shift = b_ref[...] - mean * scale                     # (1, Cp)
    for p in range(P):
        o_ref[p] = _apply_act(ys[p] * scale + shift, act).astype(o_ref.dtype)


def _convt_bias_act_kernel(p_ref, w_ref, b_ref, o_ref, *, act):
    """(patches @ W) + bias + activation (no BatchNorm; final sigmoid layer)."""
    P = p_ref.shape[0]
    for p in range(P):
        y = jnp.dot(p_ref[p], w_ref[p], preferred_element_type=jnp.float32)
        o_ref[p] = _apply_act(y + b_ref[...], act).astype(o_ref.dtype)


# ------------------------------ JAX glue (patch extraction) -------------------
def _patches_stride1(x_cl, cin, K, conv_pad):
    """Channels-last im2col for a stride-1 ConvTranspose lowered to a full convolution
    (weights pre-flipped). x_cl: (N, H, W, Cs) with Cs >= cin. Returns (1, R, K*K*cin)."""
    N, H, W, _ = x_cl.shape
    OH, OW = H + 2 * conv_pad - K + 1, W + 2 * conv_pad - K + 1
    xp = jnp.pad(x_cl[..., :cin],
                 ((0, 0), (conv_pad, conv_pad), (conv_pad, conv_pad), (0, 0)))
    taps = [xp[:, kh:kh + OH, kw:kw + OW, :] for kh in range(K) for kw in range(K)]
    p = jnp.stack(taps, axis=3)                           # (N, OH, OW, K*K, cin)
    return p.reshape(1, N * OH * OW, K * K * cin), OH, OW


def _patches_stride2(x_cl, cin):
    """Sub-pixel patches for stride-2 / pad-1 / K=4 ConvTranspose: 4 phases of 2x2 taps,
    built from ONE shared padded copy of x. Returns (4, N*H*W, 4*cin)."""
    N, H, W, _ = x_cl.shape
    xp = jnp.pad(x_cl[..., :cin], ((0, 0), (1, 1), (1, 1), (0, 0)))
    view = [[xp[:, dh:dh + H, dw:dw + W, :] for dw in range(3)] for dh in range(3)]
    phases = []
    for ph in (0, 1):
        for pw in (0, 1):
            taps = [view[ph + kh][pw + kw] for kh in (0, 1) for kw in (0, 1)]
            phases.append(jnp.stack(taps, axis=3))        # (N, H, W, 4, cin)
    p = jnp.stack(phases, axis=0).reshape(4, N * H * W, 4 * cin)
    return p, 2 * H, 2 * W


def _run_layer(x_cl, w, cfg):
    """x_cl: (N, H, W, Cs) channels-last bf16 (Cs >= cfg['cin'], lane-padded).
    Returns channels-last, lane-padded (Cp=128) output (N, OH, OW, Cp)."""
    N = x_cl.shape[0]
    if cfg["stride"] == 1:
        patches, OH, OW = _patches_stride1(x_cl, cfg["cin"], cfg["K"],
                                           cfg["K"] - 1 - cfg["pad"])
    else:
        patches, OH, OW = _patches_stride2(x_cl, cfg["cin"])
    P, R, Kdim = patches.shape
    Kp, Cp = w["Wm"].shape[1], w["Wm"].shape[2]
    Rp = _round_up(R, BF16_SUBLANE)                       # bf16 sublane pack
    patches = jnp.pad(patches, ((0, 0), (0, Rp - R), (0, Kp - Kdim))).astype(jnp.bfloat16)

    flops = 2 * P * Rp * Kp * Cp
    if cfg["bn"]:
        out = pl.pallas_call(
            partial(_convt_bn_act_kernel, n_rows=R, act=cfg["act"]),
            out_shape=jax.ShapeDtypeStruct((P, Rp, Cp), jnp.bfloat16),
            in_specs=[_VMEM_SPEC] * 4,
            out_specs=_VMEM_SPEC,
            cost_estimate=pl.CostEstimate(
                flops=flops, transcendentals=Cp,
                bytes_accessed=patches.size * 2 + w["Wm"].size * 2 + P * Rp * Cp * 2),
        )(patches, w["Wm"], w["gamma"], w["beta"])
    else:
        out = pl.pallas_call(
            partial(_convt_bias_act_kernel, act=cfg["act"]),
            out_shape=jax.ShapeDtypeStruct((P, Rp, Cp), jnp.float32),
            in_specs=[_VMEM_SPEC] * 3,
            out_specs=_VMEM_SPEC,
            cost_estimate=pl.CostEstimate(
                flops=flops, transcendentals=P * Rp * Cp,
                bytes_accessed=patches.size * 2 + w["Wm"].size * 2 + P * Rp * Cp * 4),
        )(patches, w["Wm"], w["b"])

    if P == 1:
        return out[:, :R].reshape(N, OH, OW, Cp)
    Hh, Wh = OH // 2, OW // 2
    out = out[:, :R].reshape(2, 2, N, Hh, Wh, Cp)         # (ph, pw, n, oh, ow, c)
    return out.transpose(2, 3, 0, 4, 1, 5).reshape(N, OH, OW, Cp)


# ------------------------------ Model: G(d=16) --------------------------------
def init_params(key, std=0.02):
    """PyTorch-layout params: ConvTranspose2d weight (Cin,Cout,K,K) ~ N(0, 0.02), zero bias;
    BatchNorm2d gamma=1 / beta=0 (fresh-module defaults; training-mode batch statistics)."""
    keys = jax.random.split(key, len(LAYER_CFG))
    params = []
    for k, cfg in zip(keys, LAYER_CFG):
        Wshape = (cfg["cin"], cfg["cout"], cfg["K"], cfg["K"])
        params.append((std * jax.random.normal(k, Wshape, dtype=jnp.float32),
                       jnp.zeros((cfg["cout"],), jnp.float32),
                       jnp.ones((cfg["cout"],), jnp.float32),
                       jnp.zeros((cfg["cout"],), jnp.float32)))
    return params


def prepare_params(raw_params):
    """One-time weight re-layout (hoisted out of the forward): stride-1 layers -> flipped
    im2col GEMM matrix; stride-2 layers -> 4 sub-pixel 2x2 GEMM matrices. Rows are ordered
    (tap-major, cin-minor) to match patch columns; rows/cols zero-padded to 128-lane multiples."""
    prepped = []
    for (W, b, gamma, beta), cfg in zip(raw_params, LAYER_CFG):
        Cin, Cout, K, _ = W.shape
        if cfg["stride"] == 1:
            Wf = W[:, :, ::-1, ::-1]                      # spatial flip -> full conv
            Wm = Wf.transpose(2, 3, 0, 1).reshape(1, K * K * Cin, Cout)
        else:
            mats = []
            for ph in (0, 1):
                rsel = jnp.array((3, 1) if ph == 0 else (2, 0))
                for pw in (0, 1):
                    csel = jnp.array((3, 1) if pw == 0 else (2, 0))
                    Wp = jnp.take(jnp.take(W, rsel, axis=2), csel, axis=3)  # (Cin,Cout,2,2)
                    mats.append(Wp.transpose(2, 3, 0, 1).reshape(4 * Cin, Cout))
            Wm = jnp.stack(mats, axis=0)                  # (4, 4*Cin, Cout)
        Kdim = Wm.shape[1]
        Kp, Cp = _round_up(Kdim, LANE), _round_up(Cout, LANE)
        Wm = jnp.pad(Wm, ((0, 0), (0, Kp - Kdim), (0, Cp - Cout))).astype(jnp.bfloat16)
        ent = dict(Wm=Wm)
        if cfg["bn"]:
            ent["gamma"] = jnp.pad(gamma, (0, Cp - Cout)).reshape(1, Cp).astype(jnp.float32)
            ent["beta"] = jnp.pad(beta, (0, Cp - Cout)).reshape(1, Cp).astype(jnp.float32)
        else:
            ent["b"] = jnp.pad(b, (0, Cp - Cout)).reshape(1, Cp).astype(jnp.float32)
        prepped.append(ent)
    return prepped


def g_forward(prepped, x):
    """x: (N, 10, 1, 1) NCHW latent. Inter-layer activations stay channels-last lane-padded
    bf16; only the final output is converted back to NCHW."""
    x_cl = x.transpose(0, 2, 3, 1).astype(jnp.bfloat16)   # (N, 1, 1, 10) channels-last
    for w, cfg in zip(prepped, LAYER_CFG):
        x_cl = _run_layer(x_cl, w, cfg)
    return x_cl[..., :1].transpose(0, 3, 1, 2)            # (N, 1, 32, 32)


if __name__ == "__main__":
    key = jax.random.PRNGKey(0)
    pkey, xkey = jax.random.split(key)

    raw_params = init_params(pkey)
    prepped = prepare_params(raw_params)                  # one-time weight re-layout (hoisted)

    # DCGAN latent: (N, 10, 1, 1) NCHW
    x = jax.random.normal(xkey, (2, 10, 1, 1), dtype=jnp.float32)

    out = jax.jit(g_forward)(prepped, x)
    out = jax.block_until_ready(out)

    assert out.shape == (2, 1, 32, 32), out.shape
    assert bool(jnp.all(jnp.isfinite(out)))
    assert bool(jnp.all((out >= 0.0) & (out <= 1.0)))     # sigmoid output range
    print("KERNEL_OK")
</pallas_src>

<mosaic_0001>
module attributes {stable_mosaic.version = 11 : i64} {
  func.func @_convt_bn_act_kernel(%arg0: memref<1x16x128xbf16, #tpu.memory_space<vmem>>, %arg1: memref<1x128x128xbf16, #tpu.memory_space<vmem>>, %arg2: memref<1x128xf32, #tpu.memory_space<vmem>>, %arg3: memref<1x128xf32, #tpu.memory_space<vmem>>, %arg4: memref<1x16x128xbf16, #tpu.memory_space<vmem>>) attributes {dimension_semantics = [], scalar_prefetch = 0 : i64, scratch_operands = 0 : i64, tpu.core_type = #tpu.core_type<tc>} {
    %0 = tpu.iota {dimensions = array<i32: 0>} : vector<16x128xi32>
    %c2_i32 = arith.constant 2 : i32
    %1 = vector.broadcast %c2_i32 : i32 to vector<16x128xi32>
    %2 = arith.cmpi slt, %0, %1 : vector<16x128xi32>
    %cst = arith.constant 0.000000e+00 : f32
    %3 = vector.broadcast %cst : f32 to vector<1x128xf32>
    %c0 = arith.constant 0 : index
    %c0_0 = arith.constant 0 : index
    %c0_1 = arith.constant 0 : index
    %4 = vector.load %arg0[%c0, %c0_0, %c0_1] : memref<1x16x128xbf16, #tpu.memory_space<vmem>>, vector<1x16x128xbf16>
    %5 = vector.shape_cast %4 : vector<1x16x128xbf16> to vector<16x128xbf16>
    %c0_2 = arith.constant 0 : index
    %c0_3 = arith.constant 0 : index
    %c0_4 = arith.constant 0 : index
    %6 = vector.load %arg1[%c0_2, %c0_3, %c0_4] : memref<1x128x128xbf16, #tpu.memory_space<vmem>>, vector<1x128x128xbf16>
    %7 = vector.shape_cast %6 : vector<1x128x128xbf16> to vector<128x128xbf16>
    %cst_5 = arith.constant dense<0.000000e+00> : vector<16x128xf32>
    %8 = tpu.matmul %5, %7, %cst_5 {dimension_numbers = #tpu.dot_dimension_numbers<[1], [0], [0], [1], [0, 0, 1, 1], [], []>} : vector<16x128xbf16>, vector<128x128xbf16>, vector<16x128xf32> -> vector<16x128xf32>
    %cst_6 = arith.constant 0.000000e+00 : f32
    %9 = vector.broadcast %cst_6 : f32 to vector<16x128xf32>
    %10 = arith.select %2, %8, %9 : vector<16x128xi1>, vector<16x128xf32>
    %cst_7 = arith.constant dense<0.000000e+00> : vector<128xf32>
    %11 = vector.multi_reduction <add>, %10, %cst_7 [0] : vector<16x128xf32> to vector<128xf32>
    %12 = vector.shape_cast %11 : vector<128xf32> to vector<1x128xf32>
    %13 = arith.addf %3, %12 : vector<1x128xf32>
    %cst_8 = arith.constant 2.000000e+00 : f32
    %14 = vector.broadcast %cst_8 : f32 to vector<1x128xf32>
    %15 = arith.divf %13, %14 : vector<1x128xf32>
    %cst_9 = arith.constant 0.000000e+00 : f32
    %16 = vector.broadcast %cst_9 : f32 to vector<1x128xf32>
    %17 = vector.broadcast %15 : vector<1x128xf32> to vector<16x128xf32>
    %18 = arith.subf %8, %17 : vector<16x128xf32>
    %cst_10 = arith.constant 0.000000e+00 : f32
    %19 = vector.broadcast %cst_10 : f32 to vector<16x128xf32>
    %20 = arith.select %2, %18, %19 : vector<16x128xi1>, vector<16x128xf32>
    %21 = arith.mulf %20, %20 : vector<16x128xf32>
    %cst_11 = arith.constant dense<0.000000e+00> : vector<128xf32>
    %22 = vector.multi_reduction <add>, %21, %cst_11 [0] : vector<16x128xf32> to vector<128xf32>
    %23 = vector.shape_cast %22 : vector<128xf32> to vector<1x128xf32>
    %24 = arith.addf %16, %23 : vector<1x128xf32>
    %cst_12 = arith.constant 2.000000e+00 : f32
    %25 = vector.broadcast %cst_12 : f32 to vector<1x128xf32>
    %26 = arith.divf %24, %25 : vector<1x128xf32>
    %cst_13 = arith.constant 9.99999974E-6 : f32
    %27 = vector.broadcast %cst_13 : f32 to vector<1x128xf32>
    %28 = arith.addf %26, %27 : vector<1x128xf32>
    %29 = math.rsqrt %28 : vector<1x128xf32>
    %c0_14 = arith.constant 0 : index
    %c0_15 = arith.constant 0 : index
    %30 = vector.load %arg2[%c0_14, %c0_15] : memref<1x128xf32, #tpu.memory_space<vmem>>, vector<1x128xf32>
    %31 = arith.mulf %30, %29 : vector<1x128xf32>
    %c0_16 = arith.constant 0 : index
    %c0_17 = arith.constant 0 : index
    %32 = vector.load %arg3[%c0_16, %c0_17] : memref<1x128xf32, #tpu.memory_space<vmem>>, vector<1x128xf32>
    %33 = arith.mulf %15, %31 : vector<1x128xf32>
    %34 = arith.subf %32, %33 : vector<1x128xf32>
    %35 = vector.broadcast %31 : vector<1x128xf32> to vector<16x128xf32>
    %36 = arith.mulf %8, %35 : vector<16x128xf32>
    %37 = vector.broadcast %34 : vector<1x128xf32> to vector<16x128xf32>
    %38 = arith.addf %36, %37 : vector<16x128xf32>
    %cst_18 = arith.constant 0.000000e+00 : f32
    %39 = vector.broadcast %cst_18 : f32 to vector<16x128xf32>
    %40 = arith.maximumf %38, %39 : vector<16x128xf32>
    %41 = arith.truncf %40 : vector<16x128xf32> to vector<16x128xbf16>
    %c0_19 = arith.constant 0 : index
    %c0_20 = arith.constant 0 : index
    %c0_21 = arith.constant 0 : index
    %42 = vector.load %arg4[%c0_19, %c0_20, %c0_21] : memref<1x16x128xbf16, #tpu.memory_space<vmem>>, vector<1x16x128xbf16>
    %43 = vector.shape_cast %42 : vector<1x16x128xbf16> to vector<16x128xbf16>
    %44 = vector.shape_cast %41 : vector<16x128xbf16> to vector<1x16x128xbf16>
    tpu.vector_store %arg4[%c0_19, %c0_20, %c0_21], %44 {strides = array<i32>} : memref<1x16x128xbf16, #tpu.memory_space<vmem>>, vector<1x16x128xbf16>,
    return
  }
}

module attributes {stable_mosaic.version = 11 : i64} {
  func.func @_convt_bn_act_kernel(%arg0: memref<1x32x1664xbf16, #tpu.memory_space<vmem>>, %arg1: memref<1x1664x128xbf16, #tpu.memory_space<vmem>>, %arg2: memref<1x128xf32, #tpu.memory_space<vmem>>, %arg3: memref<1x128xf32, #tpu.memory_space<vmem>>, %arg4: memref<1x32x128xbf16, #tpu.memory_space<vmem>>) attributes {dimension_semantics = [], scalar_prefetch = 0 : i64, scratch_operands = 0 : i64, tpu.core_type = #tpu.core_type<tc>} {
    %cst = arith.constant 0.000000e+00 : f32
    %0 = vector.broadcast %cst : f32 to vector<1x128xf32>
    %c0 = arith.constant 0 : index
    %c0_0 = arith.constant 0 : index
    %c0_1 = arith.constant 0 : index
    %1 = vector.load %arg0[%c0, %c0_0, %c0_1] : memref<1x32x1664xbf16, #tpu.memory_space<vmem>>, vector<1x32x1664xbf16>
    %2 = vector.shape_cast %1 : vector<1x32x1664xbf16> to vector<32x1664xbf16>
    %c0_2 = arith.constant 0 : index
    %c0_3 = arith.constant 0 : index
    %c0_4 = arith.constant 0 : index
    %3 = vector.load %arg1[%c0_2, %c0_3, %c0_4] : memref<1x1664x128xbf16, #tpu.memory_space<vmem>>, vector<1x1664x128xbf16>
    %4 = vector.shape_cast %3 : vector<1x1664x128xbf16> to vector<1664x128xbf16>
    %cst_5 = arith.constant dense<0.000000e+00> : vector<32x128xf32>
    %5 = tpu.matmul %2, %4, %cst_5 {dimension_numbers = #tpu.dot_dimension_numbers<[1], [0], [0], [1], [0, 0, 1, 1], [], []>} : vector<32x1664xbf16>, vector<1664x128xbf16>, vector<32x128xf32> -> vector<32x128xf32>
    %cst_6 = arith.constant dense<0.000000e+00> : vector<128xf32>
    %6 = vector.multi_reduction <add>, %5, %cst_6 [0] : vector<32x128xf32> to vector<128xf32>
    %7 = vector.shape_cast %6 : vector<128xf32> to vector<1x128xf32>
    %8 = arith.addf %0, %7 : vector<1x128xf32>
    %cst_7 = arith.constant 3.200000e+01 : f32
    %9 = vector.broadcast %cst_7 : f32 to vector<1x128xf32>
    %10 = arith.divf %8, %9 : vector<1x128xf32>
    %cst_8 = arith.constant 0.000000e+00 : f32
    %11 = vector.broadcast %cst_8 : f32 to vector<1x128xf32>
    %12 = vector.broadcast %10 : vector<1x128xf32> to vector<32x128xf32>
    %13 = arith.subf %5, %12 : vector<32x128xf32>
    %14 = arith.mulf %13, %13 : vector<32x128xf32>
    %cst_9 = arith.constant dense<0.000000e+00> : vector<128xf32>
    %15 = vector.multi_reduction <add>, %14, %cst_9 [0] : vector<32x128xf32> to vector<128xf32>
    %16 = vector.shape_cast %15 : vector<128xf32> to vector<1x128xf32>
    %17 = arith.addf %11, %16 : vector<1x128xf32>
    %cst_10 = arith.constant 3.200000e+01 : f32
    %18 = vector.broadcast %cst_10 : f32 to vector<1x128xf32>
    %19 = arith.divf %17, %18 : vector<1x128xf32>
    %cst_11 = arith.constant 9.99999974E-6 : f32
    %20 = vector.broadcast %cst_11 : f32 to vector<1x128xf32>
    %21 = arith.addf %19, %20 : vector<1x128xf32>
    %22 = math.rsqrt %21 : vector<1x128xf32>
    %c0_12 = arith.constant 0 : index
    %c0_13 = arith.constant 0 : index
    %23 = vector.load %arg2[%c0_12, %c0_13] : memref<1x128xf32, #tpu.memory_space<vmem>>, vector<1x128xf32>
    %24 = arith.mulf %23, %22 : vector<1x128xf32>
    %c0_14 = arith.constant 0 : index
    %c0_15 = arith.constant 0 : index
    %25 = vector.load %arg3[%c0_14, %c0_15] : memref<1x128xf32, #tpu.memory_space<vmem>>, vector<1x128xf32>
    %26 = arith.mulf %10, %24 : vector<1x128xf32>
    %27 = arith.subf %25, %26 : vector<1x128xf32>
    %28 = vector.broadcast %24 : vector<1x128xf32> to vector<32x128xf32>
    %29 = arith.mulf %5, %28 : vector<32x128xf32>
    %30 = vector.broadcast %27 : vector<1x128xf32> to vector<32x128xf32>
    %31 = arith.addf %29, %30 : vector<32x128xf32>
    %cst_16 = arith.constant 0.000000e+00 : f32
    %32 = vector.broadcast %cst_16 : f32 to vector<32x128xf32>
    %33 = arith.cmpf oge, %31, %32 : vector<32x128xf32>
    %cst_17 = arith.constant 0.00999999977 : f32
    %34 = vector.broadcast %cst_17 : f32 to vector<32x128xf32>
    %35 = arith.mulf %34, %31 : vector<32x128xf32>
    %36 = arith.select %33, %31, %35 : vector<32x128xi1>, vector<32x128xf32>
    %37 = arith.truncf %36 : vector<32x128xf32> to vector<32x128xbf16>
    %c0_18 = arith.constant 0 : index
    %c0_19 = arith.constant 0 : index
    %c0_20 = arith.constant 0 : index
    %38 = vector.load %arg4[%c0_18, %c0_19, %c0_20] : memref<1x32x128xbf16, #tpu.memory_space<vmem>>, vector<1x32x128xbf16>
    %39 = vector.shape_cast %38 : vector<1x32x128xbf16> to vector<32x128xbf16>
    %40 = vector.shape_cast %37 : vector<32x128xbf16> to vector<1x32x128xbf16>
    tpu.vector_store %arg4[%c0_18, %c0_19, %c0_20], %40 {strides = array<i32>} : memref<1x32x128xbf16, #tpu.memory_space<vmem>>, vector<1x32x128xbf16>,
    return
  }
}

module attributes {stable_mosaic.version = 11 : i64} {
  func.func @_convt_bn_act_kernel(%arg0: memref<4x32x512xbf16, #tpu.memory_space<vmem>>, %arg1: memref<4x512x128xbf16, #tpu.memory_space<vmem>>, %arg2: memref<1x128xf32, #tpu.memory_space<vmem>>, %arg3: memref<1x128xf32, #tpu.memory_space<vmem>>, %arg4: memref<4x32x128xbf16, #tpu.memory_space<vmem>>) attributes {dimension_semantics = [], scalar_prefetch = 0 : i64, scratch_operands = 0 : i64, tpu.core_type = #tpu.core_type<tc>} {
    %cst = arith.constant 0.000000e+00 : f32
    %0 = vector.broadcast %cst : f32 to vector<1x128xf32>
    %c0 = arith.constant 0 : index
    %c0_0 = arith.constant 0 : index
    %c0_1 = arith.constant 0 : index
    %1 = vector.load %arg0[%c0, %c0_0, %c0_1] : memref<4x32x512xbf16, #tpu.memory_space<vmem>>, vector<1x32x512xbf16>
    %2 = vector.shape_cast %1 : vector<1x32x512xbf16> to vector<32x512xbf16>
    %c0_2 = arith.constant 0 : index
    %c0_3 = arith.constant 0 : index
    %c0_4 = arith.constant 0 : index
    %3 = vector.load %arg1[%c0_2, %c0_3, %c0_4] : memref<4x512x128xbf16, #tpu.memory_space<vmem>>, vector<1x512x128xbf16>
    %4 = vector.shape_cast %3 : vector<1x512x128xbf16> to vector<512x128xbf16>
    %cst_5 = arith.constant dense<0.000000e+00> : vector<32x128xf32>
    %5 = tpu.matmul %2, %4, %cst_5 {dimension_numbers = #tpu.dot_dimension_numbers<[1], [0], [0], [1], [0, 0, 1, 1], [], []>} : vector<32x512xbf16>, vector<512x128xbf16>, vector<32x128xf32> -> vector<32x128xf32>
    %cst_6 = arith.constant dense<0.000000e+00> : vector<128xf32>
    %6 = vector.multi_reduction <add>, %5, %cst_6 [0] : vector<32x128xf32> to vector<128xf32>
    %7 = vector.shape_cast %6 : vector<128xf32> to vector<1x128xf32>
    %8 = arith.addf %0, %7 : vector<1x128xf32>
    %c1 = arith.constant 1 : index
    %c0_7 = arith.constant 0 : index
    %c0_8 = arith.constant 0 : index
    %9 = vector.load %arg0[%c1, %c0_7, %c0_8] : memref<4x32x512xbf16, #tpu.memory_space<vmem>>, vector<1x32x512xbf16>
    %10 = vector.shape_cast %9 : vector<1x32x512xbf16> to vector<32x512xbf16>
    %c1_9 = arith.constant 1 : index
    %c0_10 = arith.constant 0 : index
    %c0_11 = arith.constant 0 : index
    %11 = vector.load %arg1[%c1_9, %c0_10, %c0_11] : memref<4x512x128xbf16, #tpu.memory_space<vmem>>, vector<1x512x128xbf16>
    %12 = vector.shape_cast %11 : vector<1x512x128xbf16> to vector<512x128xbf16>
    %cst_12 = arith.constant dense<0.000000e+00> : vector<32x128xf32>
    %13 = tpu.matmul %10, %12, %cst_12 {dimension_numbers = #tpu.dot_dimension_numbers<[1], [0], [0], [1], [0, 0, 1, 1], [], []>} : vector<32x512xbf16>, vector<512x128xbf16>, vector<32x128xf32> -> vector<32x128xf32>
    %cst_13 = arith.constant dense<0.000000e+00> : vector<128xf32>
    %14 = vector.multi_reduction <add>, %13, %cst_13 [0] : vector<32x128xf32> to vector<128xf32>
    %15 = vector.shape_cast %14 : vector<128xf32> to vector<1x128xf32>
    %16 = arith.addf %8, %15 : vector<1x128xf32>
    %c2 = arith.constant 2 : index
    %c0_14 = arith.constant 0 : index
    %c0_15 = arith.constant 0 : index
    %17 = vector.load %arg0[%c2, %c0_14, %c0_15] : memref<4x32x512xbf16, #tpu.memory_space<vmem>>, vector<1x32x512xbf16>
    %18 = vector.shape_cast %17 : vector<1x32x512xbf16> to vector<32x512xbf16>
    %c2_16 = arith.constant 2 : index
    %c0_17 = arith.constant 0 : index
    %c0_18 = arith.constant 0 : index
    %19 = vector.load %arg1[%c2_16, %c0_17, %c0_18] : memref<4x512x128xbf16, #tpu.memory_space<vmem>>, vector<1x512x128xbf16>
    %20 = vector.shape_cast %19 : vector<1x512x128xbf16> to vector<512x128xbf16>
    %cst_19 = arith.constant dense<0.000000e+00> : vector<32x128xf32>
    %21 = tpu.matmul %18, %20, %cst_19 {dimension_numbers = #tpu.dot_dimension_numbers<[1], [0], [0], [1], [0, 0, 1, 1], [], []>} : vector<32x512xbf16>, vector<512x128xbf16>, vector<32x128xf32> -> vector<32x128xf32>
    %cst_20 = arith.constant dense<0.000000e+00> : vector<128xf32>
    %22 = vector.multi_reduction <add>, %21, %cst_20 [0] : vector<32x128xf32> to vector<128xf32>
    %23 = vector.shape_cast %22 : vector<128xf32> to vector<1x128xf32>
    %24 = arith.addf %16, %23 : vector<1x128xf32>
    %c3 = arith.constant 3 : index
    %c0_21 = arith.constant 0 : index
    %c0_22 = arith.constant 0 : index
    %25 = vector.load %arg0[%c3, %c0_21, %c0_22] : memref<4x32x512xbf16, #tpu.memory_space<vmem>>, vector<1x32x512xbf16>
    %26 = vector.shape_cast %25 : vector<1x32x512xbf16> to vector<32x512xbf16>
    %c3_23 = arith.constant 3 : index
    %c0_24 = arith.constant 0 : index
    %c0_25 = arith.constant 0 : index
    %27 = vector.load %arg1[%c3_23, %c0_24, %c0_25] : memref<4x512x128xbf16, #tpu.memory_space<vmem>>, vector<1x512x128xbf16>
    %28 = vector.shape_cast %27 : vector<1x512x128xbf16> to vector<512x128xbf16>
    %cst_26 = arith.constant dense<0.000000e+00> : vector<32x128xf32>
    %29 = tpu.matmul %26, %28, %cst_26 {dimension_numbers = #tpu.dot_dimension_numbers<[1], [0], [0], [1], [0, 0, 1, 1], [], []>} : vector<32x512xbf16>, vector<512x128xbf16>, vector<32x128xf32> -> vector<32x128xf32>
    %cst_27 = arith.constant dense<0.000000e+00> : vector<128xf32>
    %30 = vector.multi_reduction <add>, %29, %cst_27 [0] : vector<32x128xf32> to vector<128xf32>
    %31 = vector.shape_cast %30 : vector<128xf32> to vector<1x128xf32>
    %32 = arith.addf %24, %31 : vector<1x128xf32>
    %cst_28 = arith.constant 1.280000e+02 : f32
    %33 = vector.broadcast %cst_28 : f32 to vector<1x128xf32>
    %34 = arith.divf %32, %33 : vector<1x128xf32>
    %cst_29 = arith.constant 0.000000e+00 : f32
    %35 = vector.broadcast %cst_29 : f32 to vector<1x128xf32>
    %36 = vector.broadcast %34 : vector<1x128xf32> to vector<32x128xf32>
    %37 = arith.subf %5, %36 : vector<32x128xf32>
    %38 = arith.mulf %37, %37 : vector<32x128xf32>
    %cst_30 = arith.constant dense<0.000000e+00> : vector<128xf32>
    %39 = vector.multi_reduction <add>, %38, %cst_30 [0] : vector<32x128xf32> to vector<128xf32>
    %40 = vector.shape_cast %39 : vector<128xf32> to vector<1x128xf32>
    %41 = arith.addf %35, %40 : vector<1x128xf32>
    %42 = vector.broadcast %34 : vector<1x128xf32> to vector<32x128xf32>
    %43 = arith.subf %13, %42 : vector<32x128xf32>
    %44 = arith.mulf %43, %43 : vector<32x128xf32>
    %cst_31 = arith.constant dense<0.000000e+00> : vector<128xf32>
    %45 = vector.multi_reduction <add>, %44, %cst_31 [0] : vector<32x128xf32> to vector<128xf32>
    %46 = vector.shape_cast %45 : vector<128xf32> to vector<1x128xf32>
    %47 = arith.addf %41, %46 : vector<1x128xf32>
    %48 = vector.broadcast %34 : vector<1x128xf32> to vector<32x128xf32>
    %49 = arith.subf %21, %48 : vector<32x128xf32>
    %50 = arith.mulf %49, %49 : vector<32x128xf32>
    %cst_32 = arith.constant dense<0.000000e+00> : vector<128xf32>
    %51 = vector.multi_reduction <add>, %50, %cst_32 [0] : vector<32x128xf32> to vector<128xf32>
    %52 = vector.shape_cast %51 : vector<128xf32> to vector<1x128xf32>
    %53 = arith.addf %47, %52 : vector<1x128xf32>
    %54 = vector.broadcast %34 : vector<1x128xf32> to vector<32x128xf32>
    %55 = arith.subf %29, %54 : vector<32x128xf32>
    %56 = arith.mulf %55, %55 : vector<32x128xf32>
    %cst_33 = arith.constant dense<0.000000e+00> : vector<128xf32>
    %57 = vector.multi_reduction <add>, %56, %cst_33 [0] : vector<32x128xf32> to vector<128xf32>
    %58 = vector.shape_cast %57 : vector<128xf32> to vector<1x128xf32>
    %59 = arith.addf %53, %58 : vector<1x128xf32>
    %cst_34 = arith.constant 1.280000e+02 : f32
    %60 = vector.broadcast %cst_34 : f32 to vector<1x128xf32>
    %61 = arith.divf %59, %60 : vector<1x128xf32>
    %cst_35 = arith.constant 9.99999974E-6 : f32
    %62 = vector.broadcast %cst_35 : f32 to vector<1x128xf32>
    %63 = arith.addf %61, %62 : vector<1x128xf32>
    %64 = math.rsqrt %63 : vector<1x128xf32>
    %c0_36 = arith.constant 0 : index
    %c0_37 = arith.constant 0 : index
    %65 = vector.load %arg2[%c0_36, %c0_37] : memref<1x128xf32, #tpu.memory_space<vmem>>, vector<1x128xf32>
    %66 = arith.mulf %65, %64 : vector<1x128xf32>
    %c0_38 = arith.constant 0 : index
    %c0_39 = arith.constant 0 : index
    %67 = vector.load %arg3[%c0_38, %c0_39] : memref<1x128xf32, #tpu.memory_space<vmem>>, vector<1x128xf32>
    %68 = arith.mulf %34, %66 : vector<1x128xf32>
    %69 = arith.subf %67, %68 : vector<1x128xf32>
    %70 = vector.broadcast %66 : vector<1x128xf32> to vector<32x128xf32>
    %71 = arith.mulf %5, %70 : vector<32x128xf32>
    %72 = vector.broadcast %69 : vector<1x128xf32> to vector<32x128xf32>
    %73 = arith.addf %71, %72 : vector<32x128xf32>
    %cst_40 = arith.constant 0.000000e+00 : f32
    %74 = vector.broadcast %cst_40 : f32 to vector<32x128xf32>
    %75 = arith.cmpf oge, %73, %74 : vector<32x128xf32>
    %cst_41 = arith.constant 0.00999999977 : f32
    %76 = vector.broadcast %cst_41 : f32 to vector<32x128xf32>
    %77 = arith.mulf %76, %73 : vector<32x128xf32>
    %78 = arith.select %75, %73, %77 : vector<32x128xi1>, vector<32x128xf32>
    %79 = arith.truncf %78 : vector<32x128xf32> to vector<32x128xbf16>
    %c0_42 = arith.constant 0 : index
    %c0_43 = arith.constant 0 : index
    %c0_44 = arith.constant 0 : index
    %80 = vector.load %arg4[%c0_42, %c0_43, %c0_44] : memref<4x32x128xbf16, #tpu.memory_space<vmem>>, vector<1x32x128xbf16>
    %81 = vector.shape_cast %80 : vector<1x32x128xbf16> to vector<32x128xbf16>
    %82 = vector.shape_cast %79 : vector<32x128xbf16> to vector<1x32x128xbf16>
    tpu.vector_store %arg4[%c0_42, %c0_43, %c0_44], %82 {strides = array<i32>} : memref<4x32x128xbf16, #tpu.memory_space<vmem>>, vector<1x32x128xbf16>,
    %83 = vector.broadcast %66 : vector<1x128xf32> to vector<32x128xf32>
    %84 = arith.mulf %13, %83 : vector<32x128xf32>
    %85 = vector.broadcast %69 : vector<1x128xf32> to vector<32x128xf32>
    %86 = arith.addf %84, %85 : vector<32x128xf32>
    %cst_45 = arith.constant 0.000000e+00 : f32
    %87 = vector.broadcast %cst_45 : f32 to vector<32x128xf32>
    %88 = arith.cmpf oge, %86, %87 : vector<32x128xf32>
    %cst_46 = arith.constant 0.00999999977 : f32
    %89 = vector.broadcast %cst_46 : f32 to vector<32x128xf32>
    %90 = arith.mulf %89, %86 : vector<32x128xf32>
    %91 = arith.select %88, %86, %90 : vector<32x128xi1>, vector<32x128xf32>
    %92 = arith.truncf %91 : vector<32x128xf32> to vector<32x128xbf16>
    %c1_47 = arith.constant 1 : index
    %c0_48 = arith.constant 0 : index
    %c0_49 = arith.constant 0 : index
    %93 = vector.load %arg4[%c1_47, %c0_48, %c0_49] : memref<4x32x128xbf16, #tpu.memory_space<vmem>>, vector<1x32x128xbf16>
    %94 = vector.shape_cast %93 : vector<1x32x128xbf16> to vector<32x128xbf16>
    %95 = vector.shape_cast %92 : vector<32x128xbf16> to vector<1x32x128xbf16>
    tpu.vector_store %arg4[%c1_47, %c0_48, %c0_49], %95 {strides = array<i32>} : memref<4x32x128xbf16, #tpu.memory_space<vmem>>, vector<1x32x128xbf16>,
    %96 = vector.broadcast %66 : vector<1x128xf32> to vector<32x128xf32>
    %97 = arith.mulf %21, %96 : vector<32x128xf32>
    %98 = vector.broadcast %69 : vector<1x128xf32> to vector<32x128xf32>
    %99 = arith.addf %97, %98 : vector<32x128xf32>
    %cst_50 = arith.constant 0.000000e+00 : f32
    %100 = vector.broadcast %cst_50 : f32 to vector<32x128xf32>
    %101 = arith.cmpf oge, %99, %100 : vector<32x128xf32>
    %cst_51 = arith.constant 0.00999999977 : f32
    %102 = vector.broadcast %cst_51 : f32 to vector<32x128xf32>
    %103 = arith.mulf %102, %99 : vector<32x128xf32>
    %104 = arith.select %101, %99, %103 : vector<32x128xi1>, vector<32x128xf32>
    %105 = arith.truncf %104 : vector<32x128xf32> to vector<32x128xbf16>
    %c2_52 = arith.constant 2 : index
    %c0_53 = arith.constant 0 : index
    %c0_54 = arith.constant 0 : index
    %106 = vector.load %arg4[%c2_52, %c0_53, %c0_54] : memref<4x32x128xbf16, #tpu.memory_space<vmem>>, vector<1x32x128xbf16>
    %107 = vector.shape_cast %106 : vector<1x32x128xbf16> to vector<32x128xbf16>
    %108 = vector.shape_cast %105 : vector<32x128xbf16> to vector<1x32x128xbf16>
    tpu.vector_store %arg4[%c2_52, %c0_53, %c0_54], %108 {strides = array<i32>} : memref<4x32x128xbf16, #tpu.memory_space<vmem>>, vector<1x32x128xbf16>,
    %109 = vector.broadcast %66 : vector<1x128xf32> to vector<32x128xf32>
    %110 = arith.mulf %29, %109 : vector<32x128xf32>
    %111 = vector.broadcast %69 : vector<1x128xf32> to vector<32x128xf32>
    %112 = arith.addf %110, %111 : vector<32x128xf32>
    %cst_55 = arith.constant 0.000000e+00 : f32
    %113 = vector.broadcast %cst_55 : f32 to vector<32x128xf32>
    %114 = arith.cmpf oge, %112, %113 : vector<32x128xf32>
    %cst_56 = arith.constant 0.00999999977 : f32
    %115 = vector.broadcast %cst_56 : f32 to vector<32x128xf32>
    %116 = arith.mulf %115, %112 : vector<32x128xf32>
    %117 = arith.select %114, %112, %116 : vector<32x128xi1>, vector<32x128xf32>
    %118 = arith.truncf %117 : vector<32x128xf32> to vector<32x128xbf16>
    %c3_57 = arith.constant 3 : index
    %c0_58 = arith.constant 0 : index
    %c0_59 = arith.constant 0 : index
    %119 = vector.load %arg4[%c3_57, %c0_58, %c0_59] : memref<4x32x128xbf16, #tpu.memory_space<vmem>>, vector<1x32x128xbf16>
    %120 = vector.shape_cast %119 : vector<1x32x128xbf16> to vector<32x128xbf16>
    %121 = vector.shape_cast %118 : vector<32x128xbf16> to vector<1x32x128xbf16>
    tpu.vector_store %arg4[%c3_57, %c0_58, %c0_59], %121 {strides = array<i32>} : memref<4x32x128xbf16, #tpu.memory_space<vmem>>, vector<1x32x128xbf16>,
    return
  }
}

module attributes {stable_mosaic.version = 11 : i64} {
  func.func @_convt_bn_act_kernel(%arg0: memref<4x128x256xbf16, #tpu.memory_space<vmem>>, %arg1: memref<4x256x128xbf16, #tpu.memory_space<vmem>>, %arg2: memref<1x128xf32, #tpu.memory_space<vmem>>, %arg3: memref<1x128xf32, #tpu.memory_space<vmem>>, %arg4: memref<4x128x128xbf16, #tpu.memory_space<vmem>>) attributes {dimension_semantics = [], scalar_prefetch = 0 : i64, scratch_operands = 0 : i64, tpu.core_type = #tpu.core_type<tc>} {
    %cst = arith.constant 0.000000e+00 : f32
    %0 = vector.broadcast %cst : f32 to vector<1x128xf32>
    %c0 = arith.constant 0 : index
    %c0_0 = arith.constant 0 : index
    %c0_1 = arith.constant 0 : index
    %1 = vector.load %arg0[%c0, %c0_0, %c0_1] : memref<4x128x256xbf16, #tpu.memory_space<vmem>>, vector<1x128x256xbf16>
    %2 = vector.shape_cast %1 : vector<1x128x256xbf16> to vector<128x256xbf16>
    %c0_2 = arith.constant 0 : index
    %c0_3 = arith.constant 0 : index
    %c0_4 = arith.constant 0 : index
    %3 = vector.load %arg1[%c0_2, %c0_3, %c0_4] : memref<4x256x128xbf16, #tpu.memory_space<vmem>>, vector<1x256x128xbf16>
    %4 = vector.shape_cast %3 : vector<1x256x128xbf16> to vector<256x128xbf16>
    %cst_5 = arith.constant dense<0.000000e+00> : vector<128x128xf32>
    %5 = tpu.matmul %2, %4, %cst_5 {dimension_numbers = #tpu.dot_dimension_numbers<[1], [0], [0], [1], [0, 0, 1, 1], [], []>} : vector<128x256xbf16>, vector<256x128xbf16>, vector<128x128xf32> -> vector<128x128xf32>
    %cst_6 = arith.constant dense<0.000000e+00> : vector<128xf32>
    %6 = vector.multi_reduction <add>, %5, %cst_6 [0] : vector<128x128xf32> to vector<128xf32>
    %7 = vector.shape_cast %6 : vector<128xf32> to vector<1x128xf32>
    %8 = arith.addf %0, %7 : vector<1x128xf32>
    %c1 = arith.constant 1 : index
    %c0_7 = arith.constant 0 : index
    %c0_8 = arith.constant 0 : index
    %9 = vector.load %arg0[%c1, %c0_7, %c0_8] : memref<4x128x256xbf16, #tpu.memory_space<vmem>>, vector<1x128x256xbf16>
    %10 = vector.shape_cast %9 : vector<1x128x256xbf16> to vector<128x256xbf16>
    %c1_9 = arith.constant 1 : index
    %c0_10 = arith.constant 0 : index
    %c0_11 = arith.constant 0 : index
    %11 = vector.load %arg1[%c1_9, %c0_10, %c0_11] : memref<4x256x128xbf16, #tpu.memory_space<vmem>>, vector<1x256x128xbf16>
    %12 = vector.shape_cast %11 : vector<1x256x128xbf16> to vector<256x128xbf16>
    %cst_12 = arith.constant dense<0.000000e+00> : vector<128x128xf32>
    %13 = tpu.matmul %10, %12, %cst_12 {dimension_numbers = #tpu.dot_dimension_numbers<[1], [0], [0], [1], [0, 0, 1, 1], [], []>} : vector<128x256xbf16>, vector<256x128xbf16>, vector<128x128xf32> -> vector<128x128xf32>
    %cst_13 = arith.constant dense<0.000000e+00> : vector<128xf32>
    %14 = vector.multi_reduction <add>, %13, %cst_13 [0] : vector<128x128xf32> to vector<128xf32>
    %15 = vector.shape_cast %14 : vector<128xf32> to vector<1x128xf32>
    %16 = arith.addf %8, %15 : vector<1x128xf32>
    %c2 = arith.constant 2 : index
    %c0_14 = arith.constant 0 : index
    %c0_15 = arith.constant 0 : index
    %17 = vector.load %arg0[%c2, %c0_14, %c0_15] : memref<4x128x256xbf16, #tpu.memory_space<vmem>>, vector<1x128x256xbf16>
    %18 = vector.shape_cast %17 : vector<1x128x256xbf16> to vector<128x256xbf16>
    %c2_16 = arith.constant 2 : index
    %c0_17 = arith.constant 0 : index
    %c0_18 = arith.constant 0 : index
    %19 = vector.load %arg1[%c2_16, %c0_17, %c0_18] : memref<4x256x128xbf16, #tpu.memory_space<vmem>>, vector<1x256x128xbf16>
    %20 = vector.shape_cast %19 : vector<1x256x128xbf16> to vector<256x128xbf16>
    %cst_19 = arith.constant dense<0.000000e+00> : vector<128x128xf32>
    %21 = tpu.matmul %18, %20, %cst_19 {dimension_numbers = #tpu.dot_dimension_numbers<[1], [0], [0], [1], [0, 0, 1, 1], [], []>} : vector<128x256xbf16>, vector<256x128xbf16>, vector<128x128xf32> -> vector<128x128xf32>
    %cst_20 = arith.constant dense<0.000000e+00> : vector<128xf32>
    %22 = vector.multi_reduction <add>, %21, %cst_20 [0] : vector<128x128xf32> to vector<128xf32>
    %23 = vector.shape_cast %22 : vector<128xf32> to vector<1x128xf32>
    %24 = arith.addf %16, %23 : vector<1x128xf32>
    %c3 = arith.constant 3 : index
    %c0_21 = arith.constant 0 : index
    %c0_22 = arith.constant 0 : index
    %25 = vector.load %arg0[%c3, %c0_21, %c0_22] : memref<4x128x256xbf16, #tpu.memory_space<vmem>>, vector<1x128x256xbf16>
    %26 = vector.shape_cast %25 : vector<1x128x256xbf16> to vector<128x256xbf16>
    %c3_23 = arith.constant 3 : index
    %c0_24 = arith.constant 0 : index
    %c0_25 = arith.constant 0 : index
    %27 = vector.load %arg1[%c3_23, %c0_24, %c0_25] : memref<4x256x128xbf16, #tpu.memory_space<vmem>>, vector<1x256x128xbf16>
    %28 = vector.shape_cast %27 : vector<1x256x128xbf16> to vector<256x128xbf16>
    %cst_26 = arith.constant dense<0.000000e+00> : vector<128x128xf32>
    %29 = tpu.matmul %26, %28, %cst_26 {dimension_numbers = #tpu.dot_dimension_numbers<[1], [0], [0], [1], [0, 0, 1, 1], [], []>} : vector<128x256xbf16>, vector<256x128xbf16>, vector<128x128xf32> -> vector<128x128xf32>
    %cst_27 = arith.constant dense<0.000000e+00> : vector<128xf32>
    %30 = vector.multi_reduction <add>, %29, %cst_27 [0] : vector<128x128xf32> to vector<128xf32>
    %31 = vector.shape_cast %30 : vector<128xf32> to vector<1x128xf32>
    %32 = arith.addf %24, %31 : vector<1x128xf32>
    %cst_28 = arith.constant 5.120000e+02 : f32
    %33 = vector.broadcast %cst_28 : f32 to vector<1x128xf32>
    %34 = arith.divf %32, %33 : vector<1x128xf32>
    %cst_29 = arith.constant 0.000000e+00 : f32
    %35 = vector.broadcast %cst_29 : f32 to vector<1x128xf32>
    %36 = vector.broadcast %34 : vector<1x128xf32> to vector<128x128xf32>
    %37 = arith.subf %5, %36 : vector<128x128xf32>
    %38 = arith.mulf %37, %37 : vector<128x128xf32>
    %cst_30 = arith.constant dense<0.000000e+00> : vector<128xf32>
    %39 = vector.multi_reduction <add>, %38, %cst_30 [0] : vector<128x128xf32> to vector<128xf32>
    %40 = vector.shape_cast %39 : vector<128xf32> to vector<1x128xf32>
    %41 = arith.addf %35, %40 : vector<1x128xf32>
    %42 = vector.broadcast %34 : vector<1x128xf32> to vector<128x128xf32>
    %43 = arith.subf %13, %42 : vector<128x128xf32>
    %44 = arith.mulf %43, %43 : vector<128x128xf32>
    %cst_31 = arith.constant dense<0.000000e+00> : vector<128xf32>
    %45 = vector.multi_reduction <add>, %44, %cst_31 [0] : vector<128x128xf32> to vector<128xf32>
    %46 = vector.shape_cast %45 : vector<128xf32> to vector<1x128xf32>
    %47 = arith.addf %41, %46 : vector<1x128xf32>
    %48 = vector.broadcast %34 : vector<1x128xf32> to vector<128x128xf32>
    %49 = arith.subf %21, %48 : vector<128x128xf32>
    %50 = arith.mulf %49, %49 : vector<128x128xf32>
    %cst_32 = arith.constant dense<0.000000e+00> : vector<128xf32>
    %51 = vector.multi_reduction <add>, %50, %cst_32 [0] : vector<128x128xf32> to vector<128xf32>
    %52 = vector.shape_cast %51 : vector<128xf32> to vector<1x128xf32>
    %53 = arith.addf %47, %52 : vector<1x128xf32>
    %54 = vector.broadcast %34 : vector<1x128xf32> to vector<128x128xf32>
    %55 = arith.subf %29, %54 : vector<128x128xf32>
    %56 = arith.mulf %55, %55 : vector<128x128xf32>
    %cst_33 = arith.constant dense<0.000000e+00> : vector<128xf32>
    %57 = vector.multi_reduction <add>, %56, %cst_33 [0] : vector<128x128xf32> to vector<128xf32>
    %58 = vector.shape_cast %57 : vector<128xf32> to vector<1x128xf32>
    %59 = arith.addf %53, %58 : vector<1x128xf32>
    %cst_34 = arith.constant 5.120000e+02 : f32
    %60 = vector.broadcast %cst_34 : f32 to vector<1x128xf32>
    %61 = arith.divf %59, %60 : vector<1x128xf32>
    %cst_35 = arith.constant 9.99999974E-6 : f32
    %62 = vector.broadcast %cst_35 : f32 to vector<1x128xf32>
    %63 = arith.addf %61, %62 : vector<1x128xf32>
    %64 = math.rsqrt %63 : vector<1x128xf32>
    %c0_36 = arith.constant 0 : index
    %c0_37 = arith.constant 0 : index
    %65 = vector.load %arg2[%c0_36, %c0_37] : memref<1x128xf32, #tpu.memory_space<vmem>>, vector<1x128xf32>
    %66 = arith.mulf %65, %64 : vector<1x128xf32>
    %c0_38 = arith.constant 0 : index
    %c0_39 = arith.constant 0 : index
    %67 = vector.load %arg3[%c0_38, %c0_39] : memref<1x128xf32, #tpu.memory_space<vmem>>, vector<1x128xf32>
    %68 = arith.mulf %34, %66 : vector<1x128xf32>
    %69 = arith.subf %67, %68 : vector<1x128xf32>
    %70 = vector.broadcast %66 : vector<1x128xf32> to vector<128x128xf32>
    %71 = arith.mulf %5, %70 : vector<128x128xf32>
    %72 = vector.broadcast %69 : vector<1x128xf32> to vector<128x128xf32>
    %73 = arith.addf %71, %72 : vector<128x128xf32>
    %cst_40 = arith.constant 0.000000e+00 : f32
    %74 = vector.broadcast %cst_40 : f32 to vector<128x128xf32>
    %75 = arith.cmpf oge, %73, %74 : vector<128x128xf32>
    %cst_41 = arith.constant 0.00999999977 : f32
    %76 = vector.broadcast %cst_41 : f32 to vector<128x128xf32>
    %77 = arith.mulf %76, %73 : vector<128x128xf32>
    %78 = arith.select %75, %73, %77 : vector<128x128xi1>, vector<128x128xf32>
    %79 = arith.truncf %78 : vector<128x128xf32> to vector<128x128xbf16>
    %c0_42 = arith.constant 0 : index
    %c0_43 = arith.constant 0 : index
    %c0_44 = arith.constant 0 : index
    %80 = vector.load %arg4[%c0_42, %c0_43, %c0_44] : memref<4x128x128xbf16, #tpu.memory_space<vmem>>, vector<1x128x128xbf16>
    %81 = vector.shape_cast %80 : vector<1x128x128xbf16> to vector<128x128xbf16>
    %82 = vector.shape_cast %79 : vector<128x128xbf16> to vector<1x128x128xbf16>
    tpu.vector_store %arg4[%c0_42, %c0_43, %c0_44], %82 {strides = array<i32>} : memref<4x128x128xbf16, #tpu.memory_space<vmem>>, vector<1x128x128xbf16>,
    %83 = vector.broadcast %66 : vector<1x128xf32> to vector<128x128xf32>
    %84 = arith.mulf %13, %83 : vector<128x128xf32>
    %85 = vector.broadcast %69 : vector<1x128xf32> to vector<128x128xf32>
    %86 = arith.addf %84, %85 : vector<128x128xf32>
    %cst_45 = arith.constant 0.000000e+00 : f32
    %87 = vector.broadcast %cst_45 : f32 to vector<128x128xf32>
    %88 = arith.cmpf oge, %86, %87 : vector<128x128xf32>
    %cst_46 = arith.constant 0.00999999977 : f32
    %89 = vector.broadcast %cst_46 : f32 to vector<128x128xf32>
    %90 = arith.mulf %89, %86 : vector<128x128xf32>
    %91 = arith.select %88, %86, %90 : vector<128x128xi1>, vector<128x128xf32>
    %92 = arith.truncf %91 : vector<128x128xf32> to vector<128x128xbf16>
    %c1_47 = arith.constant 1 : index
    %c0_48 = arith.constant 0 : index
    %c0_49 = arith.constant 0 : index
    %93 = vector.load %arg4[%c1_47, %c0_48, %c0_49] : memref<4x128x128xbf16, #tpu.memory_space<vmem>>, vector<1x128x128xbf16>
    %94 = vector.shape_cast %93 : vector<1x128x128xbf16> to vector<128x128xbf16>
    %95 = vector.shape_cast %92 : vector<128x128xbf16> to vector<1x128x128xbf16>
    tpu.vector_store %arg4[%c1_47, %c0_48, %c0_49], %95 {strides = array<i32>} : memref<4x128x128xbf16, #tpu.memory_space<vmem>>, vector<1x128x128xbf16>,
    %96 = vector.broadcast %66 : vector<1x128xf32> to vector<128x128xf32>
    %97 = arith.mulf %21, %96 : vector<128x128xf32>
    %98 = vector.broadcast %69 : vector<1x128xf32> to vector<128x128xf32>
    %99 = arith.addf %97, %98 : vector<128x128xf32>
    %cst_50 = arith.constant 0.000000e+00 : f32
    %100 = vector.broadcast %cst_50 : f32 to vector<128x128xf32>
    %101 = arith.cmpf oge, %99, %100 : vector<128x128xf32>
    %cst_51 = arith.constant 0.00999999977 : f32
    %102 = vector.broadcast %cst_51 : f32 to vector<128x128xf32>
    %103 = arith.mulf %102, %99 : vector<128x128xf32>
    %104 = arith.select %101, %99, %103 : vector<128x128xi1>, vector<128x128xf32>
    %105 = arith.truncf %104 : vector<128x128xf32> to vector<128x128xbf16>
    %c2_52 = arith.constant 2 : index
    %c0_53 = arith.constant 0 : index
    %c0_54 = arith.constant 0 : index
    %106 = vector.load %arg4[%c2_52, %c0_53, %c0_54] : memref<4x128x128xbf16, #tpu.memory_space<vmem>>, vector<1x128x128xbf16>
    %107 = vector.shape_cast %106 : vector<1x128x128xbf16> to vector<128x128xbf16>
    %108 = vector.shape_cast %105 : vector<128x128xbf16> to vector<1x128x128xbf16>
    tpu.vector_store %arg4[%c2_52, %c0_53, %c0_54], %108 {strides = array<i32>} : memref<4x128x128xbf16, #tpu.memory_space<vmem>>, vector<1x128x128xbf16>,
    %109 = vector.broadcast %66 : vector<1x128xf32> to vector<128x128xf32>
    %110 = arith.mulf %29, %109 : vector<128x128xf32>
    %111 = vector.broadcast %69 : vector<1x128xf32> to vector<128x128xf32>
    %112 = arith.addf %110, %111 : vector<128x128xf32>
    %cst_55 = arith.constant 0.000000e+00 : f32
    %113 = vector.broadcast %cst_55 : f32 to vector<128x128xf32>
    %114 = arith.cmpf oge, %112, %113 : vector<128x128xf32>
    %cst_56 = arith.constant 0.00999999977 : f32
    %115 = vector.broadcast %cst_56 : f32 to vector<128x128xf32>
    %116 = arith.mulf %115, %112 : vector<128x128xf32>
    %117 = arith.select %114, %112, %116 : vector<128x128xi1>, vector<128x128xf32>
    %118 = arith.truncf %117 : vector<128x128xf32> to vector<128x128xbf16>
    %c3_57 = arith.constant 3 : index
    %c0_58 = arith.constant 0 : index
    %c0_59 = arith.constant 0 : index
    %119 = vector.load %arg4[%c3_57, %c0_58, %c0_59] : memref<4x128x128xbf16, #tpu.memory_space<vmem>>, vector<1x128x128xbf16>
    %120 = vector.shape_cast %119 : vector<1x128x128xbf16> to vector<128x128xbf16>
    %121 = vector.shape_cast %118 : vector<128x128xbf16> to vector<1x128x128xbf16>
    tpu.vector_store %arg4[%c3_57, %c0_58, %c0_59], %121 {strides = array<i32>} : memref<4x128x128xbf16, #tpu.memory_space<vmem>>, vector<1x128x128xbf16>,
    return
  }
}

module attributes {stable_mosaic.version = 11 : i64} {
  func.func @_convt_bias_act_kernel(%arg0: memref<4x512x128xbf16, #tpu.memory_space<vmem>>, %arg1: memref<4x128x128xbf16, #tpu.memory_space<vmem>>, %arg2: memref<1x128xf32, #tpu.memory_space<vmem>>, %arg3: memref<4x512x128xf32, #tpu.memory_space<vmem>>) attributes {dimension_semantics = [], scalar_prefetch = 0 : i64, scratch_operands = 0 : i64, tpu.core_type = #tpu.core_type<tc>} {
    %c0 = arith.constant 0 : index
    %c0_0 = arith.constant 0 : index
    %c0_1 = arith.constant 0 : index
    %0 = vector.load %arg0[%c0, %c0_0, %c0_1] : memref<4x512x128xbf16, #tpu.memory_space<vmem>>, vector<1x512x128xbf16>
    %1 = vector.shape_cast %0 : vector<1x512x128xbf16> to vector<512x128xbf16>
    %c0_2 = arith.constant 0 : index
    %c0_3 = arith.constant 0 : index
    %c0_4 = arith.constant 0 : index
    %2 = vector.load %arg1[%c0_2, %c0_3, %c0_4] : memref<4x128x128xbf16, #tpu.memory_space<vmem>>, vector<1x128x128xbf16>
    %3 = vector.shape_cast %2 : vector<1x128x128xbf16> to vector<128x128xbf16>
    %cst = arith.constant dense<0.000000e+00> : vector<512x128xf32>
    %4 = tpu.matmul %1, %3, %cst {dimension_numbers = #tpu.dot_dimension_numbers<[1], [0], [0], [1], [0, 0, 1, 1], [], []>} : vector<512x128xbf16>, vector<128x128xbf16>, vector<512x128xf32> -> vector<512x128xf32>
    %c0_5 = arith.constant 0 : index
    %c0_6 = arith.constant 0 : index
    %5 = vector.load %arg2[%c0_5, %c0_6] : memref<1x128xf32, #tpu.memory_space<vmem>>, vector<1x128xf32>
    %6 = vector.broadcast %5 : vector<1x128xf32> to vector<512x128xf32>
    %7 = arith.addf %4, %6 : vector<512x128xf32>
    %8 = arith.negf %7 : vector<512x128xf32>
    %9 = math.exp %8 : vector<512x128xf32>
    %cst_7 = arith.constant 1.000000e+00 : f32
    %10 = vector.broadcast %cst_7 : f32 to vector<512x128xf32>
    %11 = arith.addf %10, %9 : vector<512x128xf32>
    %12 = arith.divf %10, %11 : vector<512x128xf32>
    %c0_8 = arith.constant 0 : index
    %c0_9 = arith.constant 0 : index
    %c0_10 = arith.constant 0 : index
    %13 = vector.load %arg3[%c0_8, %c0_9, %c0_10] : memref<4x512x128xf32, #tpu.memory_space<vmem>>, vector<1x512x128xf32>
    %14 = vector.shape_cast %13 : vector<1x512x128xf32> to vector<512x128xf32>
    %15 = vector.shape_cast %12 : vector<512x128xf32> to vector<1x512x128xf32>
    tpu.vector_store %arg3[%c0_8, %c0_9, %c0_10], %15 {strides = array<i32>} : memref<4x512x128xf32, #tpu.memory_space<vmem>>, vector<1x512x128xf32>,
    %c1 = arith.constant 1 : index
    %c0_11 = arith.constant 0 : index
    %c0_12 = arith.constant 0 : index
    %16 = vector.load %arg0[%c1, %c0_11, %c0_12] : memref<4x512x128xbf16, #tpu.memory_space<vmem>>, vector<1x512x128xbf16>
    %17 = vector.shape_cast %16 : vector<1x512x128xbf16> to vector<512x128xbf16>
    %c1_13 = arith.constant 1 : index
    %c0_14 = arith.constant 0 : index
    %c0_15 = arith.constant 0 : index
    %18 = vector.load %arg1[%c1_13, %c0_14, %c0_15] : memref<4x128x128xbf16, #tpu.memory_space<vmem>>, vector<1x128x128xbf16>
    %19 = vector.shape_cast %18 : vector<1x128x128xbf16> to vector<128x128xbf16>
    %cst_16 = arith.constant dense<0.000000e+00> : vector<512x128xf32>
    %20 = tpu.matmul %17, %19, %cst_16 {dimension_numbers = #tpu.dot_dimension_numbers<[1], [0], [0], [1], [0, 0, 1, 1], [], []>} : vector<512x128xbf16>, vector<128x128xbf16>, vector<512x128xf32> -> vector<512x128xf32>
    %c0_17 = arith.constant 0 : index
    %c0_18 = arith.constant 0 : index
    %21 = vector.load %arg2[%c0_17, %c0_18] : memref<1x128xf32, #tpu.memory_space<vmem>>, vector<1x128xf32>
    %22 = vector.broadcast %21 : vector<1x128xf32> to vector<512x128xf32>
    %23 = arith.addf %20, %22 : vector<512x128xf32>
    %24 = arith.negf %23 : vector<512x128xf32>
    %25 = math.exp %24 : vector<512x128xf32>
    %cst_19 = arith.constant 1.000000e+00 : f32
    %26 = vector.broadcast %cst_19 : f32 to vector<512x128xf32>
    %27 = arith.addf %26, %25 : vector<512x128xf32>
    %28 = arith.divf %26, %27 : vector<512x128xf32>
    %c1_20 = arith.constant 1 : index
    %c0_21 = arith.constant 0 : index
    %c0_22 = arith.constant 0 : index
    %29 = vector.load %arg3[%c1_20, %c0_21, %c0_22] : memref<4x512x128xf32, #tpu.memory_space<vmem>>, vector<1x512x128xf32>
    %30 = vector.shape_cast %29 : vector<1x512x128xf32> to vector<512x128xf32>
    %31 = vector.shape_cast %28 : vector<512x128xf32> to vector<1x512x128xf32>
    tpu.vector_store %arg3[%c1_20, %c0_21, %c0_22], %31 {strides = array<i32>} : memref<4x512x128xf32, #tpu.memory_space<vmem>>, vector<1x512x128xf32>,
    %c2 = arith.constant 2 : index
    %c0_23 = arith.constant 0 : index
    %c0_24 = arith.constant 0 : index
    %32 = vector.load %arg0[%c2, %c0_23, %c0_24] : memref<4x512x128xbf16, #tpu.memory_space<vmem>>, vector<1x512x128xbf16>
    %33 = vector.shape_cast %32 : vector<1x512x128xbf16> to vector<512x128xbf16>
    %c2_25 = arith.constant 2 : index
    %c0_26 = arith.constant 0 : index
    %c0_27 = arith.constant 0 : index
    %34 = vector.load %arg1[%c2_25, %c0_26, %c0_27] : memref<4x128x128xbf16, #tpu.memory_space<vmem>>, vector<1x128x128xbf16>
    %35 = vector.shape_cast %34 : vector<1x128x128xbf16> to vector<128x128xbf16>
    %cst_28 = arith.constant dense<0.000000e+00> : vector<512x128xf32>
    %36 = tpu.matmul %33, %35, %cst_28 {dimension_numbers = #tpu.dot_dimension_numbers<[1], [0], [0], [1], [0, 0, 1, 1], [], []>} : vector<512x128xbf16>, vector<128x128xbf16>, vector<512x128xf32> -> vector<512x128xf32>
    %c0_29 = arith.constant 0 : index
    %c0_30 = arith.constant 0 : index
    %37 = vector.load %arg2[%c0_29, %c0_30] : memref<1x128xf32, #tpu.memory_space<vmem>>, vector<1x128xf32>
    %38 = vector.broadcast %37 : vector<1x128xf32> to vector<512x128xf32>
    %39 = arith.addf %36, %38 : vector<512x128xf32>
    %40 = arith.negf %39 : vector<512x128xf32>
    %41 = math.exp %40 : vector<512x128xf32>
    %cst_31 = arith.constant 1.000000e+00 : f32
    %42 = vector.broadcast %cst_31 : f32 to vector<512x128xf32>
    %43 = arith.addf %42, %41 : vector<512x128xf32>
    %44 = arith.divf %42, %43 : vector<512x128xf32>
    %c2_32 = arith.constant 2 : index
    %c0_33 = arith.constant 0 : index
    %c0_34 = arith.constant 0 : index
    %45 = vector.load %arg3[%c2_32, %c0_33, %c0_34] : memref<4x512x128xf32, #tpu.memory_space<vmem>>, vector<1x512x128xf32>
    %46 = vector.shape_cast %45 : vector<1x512x128xf32> to vector<512x128xf32>
    %47 = vector.shape_cast %44 : vector<512x128xf32> to vector<1x512x128xf32>
    tpu.vector_store %arg3[%c2_32, %c0_33, %c0_34], %47 {strides = array<i32>} : memref<4x512x128xf32, #tpu.memory_space<vmem>>, vector<1x512x128xf32>,
    %c3 = arith.constant 3 : index
    %c0_35 = arith.constant 0 : index
    %c0_36 = arith.constant 0 : index
    %48 = vector.load %arg0[%c3, %c0_35, %c0_36] : memref<4x512x128xbf16, #tpu.memory_space<vmem>>, vector<1x512x128xbf16>
    %49 = vector.shape_cast %48 : vector<1x512x128xbf16> to vector<512x128xbf16>
    %c3_37 = arith.constant 3 : index
    %c0_38 = arith.constant 0 : index
    %c0_39 = arith.constant 0 : index
    %50 = vector.load %arg1[%c3_37, %c0_38, %c0_39] : memref<4x128x128xbf16, #tpu.memory_space<vmem>>, vector<1x128x128xbf16>
    %51 = vector.shape_cast %50 : vector<1x128x128xbf16> to vector<128x128xbf16>
    %cst_40 = arith.constant dense<0.000000e+00> : vector<512x128xf32>
    %52 = tpu.matmul %49, %51, %cst_40 {dimension_numbers = #tpu.dot_dimension_numbers<[1], [0], [0], [1], [0, 0, 1, 1], [], []>} : vector<512x128xbf16>, vector<128x128xbf16>, vector<512x128xf32> -> vector<512x128xf32>
    %c0_41 = arith.constant 0 : index
    %c0_42 = arith.constant 0 : index
    %53 = vector.load %arg2[%c0_41, %c0_42] : memref<1x128xf32, #tpu.memory_space<vmem>>, vector<1x128xf32>
    %54 = vector.broadcast %53 : vector<1x128xf32> to vector<512x128xf32>
    %55 = arith.addf %52, %54 : vector<512x128xf32>
    %56 = arith.negf %55 : vector<512x128xf32>
    %57 = math.exp %56 : vector<512x128xf32>
    %cst_43 = arith.constant 1.000000e+00 : f32
    %58 = vector.broadcast %cst_43 : f32 to vector<512x128xf32>
    %59 = arith.addf %58, %57 : vector<512x128xf32>
    %60 = arith.divf %58, %59 : vector<512x128xf32>
    %c3_44 = arith.constant 3 : index
    %c0_45 = arith.constant 0 : index
    %c0_46 = arith.constant 0 : index
    %61 = vector.load %arg3[%c3_44, %c0_45, %c0_46] : memref<4x512x128xf32, #tpu.memory_space<vmem>>, vector<1x512x128xf32>
    %62 = vector.shape_cast %61 : vector<1x512x128xf32> to vector<512x128xf32>
    %63 = vector.shape_cast %60 : vector<512x128xf32> to vector<1x512x128xf32>
    tpu.vector_store %arg3[%c3_44, %c0_45, %c0_46], %63 {strides = array<i32>} : memref<4x512x128xf32, #tpu.memory_space<vmem>>, vector<1x512x128xf32>,
    return
  }
}

</mosaic_0001>

<bundles_post_ra>
// kernel: g_forward.5
= control target key start
LH: loop header
LB: loop body
LE: loop exit
PB: predicated region body
PF: predicated region fallthrough
CT: control target
= control target key end

     0   :  { %9 = vsyncpa [#allocation3], 0  ;;  %s304_s15 = smov [#allocation2]   ;;  %s358_s0 = inlined_call_operand.vmem [shape: bf16[1,16,128], index: 0, kind: input, shape index: {}]   ;;  %s359_s1 = inlined_call_operand.hbm [shape: bf16[1,128,128], index: 1, kind: input, shape index: {}]   ;;  %s360_s2 = inlined_call_operand.vmem [shape: f32[1,128], index: 2, kind: input, shape index: {}]   ;;  %s361_s3 = inlined_call_operand.vmem [shape: f32[1,128], index: 3, kind: input, shape index: {}]   ;;  %s362_s4 = inlined_call_operand.vmem [shape: bf16[1,16,128], index: 4, kind: output, shape index: {}]  }
   0x1   :  { %s17_s16 = sshll.u32 %s304_s15, 4  ;;  %s280_s19 = scalar_lea.hbm %s359_s1, 1024  ;;  %s18_s16 = int_to_ptr.vmem [resolvable:$true] %s17_s16 }
   0x2   :  { %p281_p0 = scmp.ne.s32.totalorder %s359_s1, %s280_s19  ;;  %p284_p1 = scmp.lt.u32.totalorder %s280_s19, %s359_s1 }
   0x4   :  { %p286_p2 = pnand %p284_p1, %p281_p0 }
   0x6   :  { %289 = shalt.err (!%p286_p2)
}
   0x7   :  { %s290_s24 = scalar_lea.vmem %s18_s16, 1024  ;;  %p295_p4 = scmp.lt.s32.totalorder %s18_s16, %s18_s16 }
   0x8   :  { %p291_p3 = scmp.ne.s32.totalorder %s18_s16, %s290_s24  ;;  %p296_p5 = scmp.lt.s32.totalorder %s290_s24, %s290_s24 }
   0xa   :  { %p297_p6 = por %p296_p5, %p295_p4 }
   0xc   :  { %p298_p7 = pnand %p297_p6, %p291_p3 }
   0xe   :  { %301 = shalt.err (!%p298_p7)
}
   0xf   :  { %s305_s25 = smov 64   ;;  %s306_s26 = smov 4  }
  0x10   :  { %23 = dma.hbm_to_vmem [thread:$0]  %s359_s1, 1024, %s18_s16, [#allocation3], %s305_s25, %s305_s25, %s306_s26  }
  0x11   :  { %302 = dma.done.wait [#allocation3], 1024  }
  0x12   :  { %303 = vsyncadd [#allocation3], 4294966272  ;;  %v307_v0 = vmov 0.0   ;;  %vm308_vm0 = vmmov 0   ;;  %v269_v1 = vld [vmem:[#allocation2] sm:$0xff]   ;;  %v270_v2 = vld [vmem:[#allocation2 + $0x8] sm:$0xff]   ;;  %v32_v10 = vlaneseq }
  0x13   :  { %244 = vmatprep.subr.bf16.mxu0 %v307_v0  ;;  %260 = vmatprep.mubr.msk.bf16.mxu0 %vm308_vm0, %v307_v0  ;;  %v271_v3 = vld [vmem:[#allocation2 + $0x10] sm:$0xff]   ;;  %v272_v4 = vld [vmem:[#allocation2 + $0x18] sm:$0xff]   ;;  %v273_v5 = vld [vmem:[#allocation2 + $0x20] sm:$0xff]  }
  0x14   :  { %245 = vmatpush3.bf16.msra.mxu0 %v269_v1  ;;  %v274_v6 = vld [vmem:[#allocation2 + $0x28] sm:$0xff]   ;;  %v275_v7 = vld [vmem:[#allocation2 + $0x30] sm:$0xff]   ;;  %v276_v8 = vld [vmem:[#allocation2 + $0x38] sm:$0xff]   ;;  %v33_v11 = vshrl.u32 %v32_v10, 7 }
  0x15   :  { %246 = vmatprep.subr.bf16.mxu0 %v307_v0  ;;  %v277_v9 = vld [vmem:[%s358_s0] sm:$0xff]  }
  0x16   :  { %vm35_vm1 = vcmp.lt.s32.totalorder %v33_v11, 2  ;;  %v179_v35 = vld [vmem:[%s360_s2] sm:$0x1]  ;;  %v187_v36 = vsub.s32 0, %v33_v11 }
  0x17   :  { %v181_v39 = vld [vmem:[%s361_s3] sm:$0x1] }
  0x18   :  { %247 = vmatpush3.bf16.msra.mxu0 %v270_v2 }
  0x19   :  { %248 = vmatprep.subr.bf16.mxu0 %v307_v0 }
  0x1c   :  { %249 = vmatpush3.bf16.msra.mxu0 %v271_v3 }
  0x1d   :  { %250 = vmatprep.subr.bf16.mxu0 %v307_v0 }
  0x20   :  { %251 = vmatpush3.bf16.msra.mxu0 %v272_v4 }
  0x21   :  { %252 = vmatprep.subr.bf16.mxu0 %v307_v0 }
  0x24   :  { %253 = vmatpush3.bf16.msra.mxu0 %v273_v5 }
  0x25   :  { %254 = vmatprep.subr.bf16.mxu0 %v307_v0 }
  0x28   :  { %255 = vmatpush3.bf16.msra.mxu0 %v274_v6 }
  0x29   :  { %256 = vmatprep.subr.bf16.mxu0 %v307_v0 }
  0x2c   :  { %257 = vmatpush3.bf16.msra.mxu0 %v275_v7 }
  0x2d   :  { %258 = vmatprep.subr.bf16.mxu0 %v307_v0 }
  0x30   :  { %259 = vmatpush3.bf16.msra.mxu0 %v276_v8 }
  0x33   :  { %261 = vmatmul.mubr.bf16.vlgmr.msra.gmra.mrb[0].mxu0 %v277_v9 }
 0x106   :  { %v143_v12 = vpop.f32.mrb[0].mxu0 }
 0x107   :  { %v150_v13 = vsel %vm35_vm1, %v143_v12, 0.0  ;;  %v262_v14 = vpop.f32.mrb[1].mxu0 }
 0x108   :  { %v153_v15 = vrot.slane %v150_v13, 4  ;;  %v146_v16 = vpop.f32.mrb[2].mxu0 }
 0x109   :  { %v263_v17 = vpop.f32.mrb[3].mxu0 }
 0x10a   :  { %v154_v18 = vadd.f32 %v153_v15, %v150_v13 }
 0x10c   :  { %v155_v19 = vrot.slane %v154_v18, 2 }
 0x10e   :  { %v156_v20 = vadd.f32 %v155_v19, %v154_v18 }
 0x110   :  { %v157_v21 = vrot.slane %v156_v20, 1 }
 0x112   :  { %v158_v22 = vadd.f32 %v157_v21, %v156_v20 }
 0x114   :  { %v161_v23 = vmul.f32 0.5, %v158_v22 }
 0x116   :  { %v162_v24 = vsub.f32 %v143_v12, %v161_v23 }
 0x118   :  { %v164_v25 = vsel %vm35_vm1, %v162_v24, 0.0 }
 0x119   :  { %v166_v26 = vmul.f32 %v164_v25, %v164_v25 }
 0x11b   :  { %v169_v27 = vrot.slane %v166_v26, 4 }
 0x11d   :  { %v170_v28 = vadd.f32 %v169_v27, %v166_v26 }
 0x11f   :  { %v171_v29 = vrot.slane %v170_v28, 2 }
 0x121   :  { %v172_v30 = vadd.f32 %v171_v29, %v170_v28 }
 0x123   :  { %v173_v31 = vrot.slane %v172_v30, 1 }
 0x125   :  { %v174_v32 = vadd.f32 %v173_v31, %v172_v30 }
 0x127   :  { %v176_v33 = vmul.f32 0.5, %v174_v32 }
 0x129   :  { %v177_v34 = vadd.f32 1e-05, %v176_v33 }
 0x12b   :  { %278 = vrsqrt.f32 %v177_v34 }
 0x135   :  { %v279_v37 = vpop.eup %278 }
 0x136   :  { %v180_v38 = vmul.f32 %v279_v37, %v179_v35 }
 0x138   :  { %v182_v40 = vmul.f32 %v180_v38, %v161_v23  ;;  %v188_v41 = vrot.slane %v180_v38, %v187_v36 }
 0x13a   :  { %v183_v42 = vsub.f32 %v181_v39, %v182_v40  ;;  %v191_v43 = vmul.f32 %v188_v41, %v146_v16  ;;  %v190_v44 = vmul.f32 %v188_v41, %v143_v12 }
 0x13c   :  { %v196_v45 = vrot.slane %v183_v42, %v187_v36 }
 0x13e   :  { %v198_v46 = vadd.f32 %v196_v45, %v190_v44  ;;  %v199_v47 = vadd.f32 %v196_v45, %v191_v43 }
 0x140   :  { %v200_v48 = vmax.f32 %v198_v46, 0.0  ;;  %v201_v49 = vmax.f32 %v199_v47, 0.0 }
 0x142   :  { %v233_v50 = vpack.c.bf16 %v201_v49, %v200_v48 }
 0x144   :  { %234 = vst [vmem:[%s362_s4] sm:$0xff] %v233_v50  }
 0x145   :  { %216 = vsyncpa [#allocation3], 1 }

// kernel: g_forward.6
= control target key start
LH: loop header
LB: loop body
LE: loop exit
PB: predicated region body
PF: predicated region fallthrough
CT: control target
= control target key end

     0   :  { %s2365_s1 = inlined_call_operand.vmem [shape: bf16[1,1664,128], index: 1, kind: input, shape index: {}]   ;;  %s2366_s0 = inlined_call_operand.vmem [shape: bf16[1,32,1664], index: 0, kind: input, shape index: {}]   ;;  %s2367_s2 = inlined_call_operand.vmem [shape: f32[1,128], index: 2, kind: input, shape index: {}]   ;;  %s2368_s3 = inlined_call_operand.vmem [shape: f32[1,128], index: 3, kind: input, shape index: {}]   ;;  %s2369_s4 = inlined_call_operand.vmem [shape: bf16[1,32,128], index: 4, kind: output, shape index: {}]  }
   0x1   :  { %v1794_v0 = vld [vmem:[%s2365_s1 + $0x40] sm:$0xff]   ;;  %v1798_v4 = vld [vmem:[%s2365_s1 + $0x48] sm:$0xff]   ;;  %v1802_v8 = vld [vmem:[%s2365_s1 + $0x50] sm:$0xff]  }
   0x2   :  { %v1795_v1 = vld [vmem:[%s2365_s1 + $0xc0] sm:$0xff]   ;;  %1596 = vmatprep.subr.bf16.mxu0 %v1794_v0  ;;  %v1799_v5 = vld [vmem:[%s2365_s1 + $0xc8] sm:$0xff]   ;;  %v1803_v9 = vld [vmem:[%s2365_s1 + $0xd0] sm:$0xff]  }
   0x3   :  { %v1796_v2 = vld [vmem:[%s2365_s1] sm:$0xff]   ;;  %1624 = vmatprep.subr.bf16.mxu1 %v1795_v1  ;;  %v1800_v6 = vld [vmem:[%s2365_s1 + $0x8] sm:$0xff]   ;;  %v1804_v10 = vld [vmem:[%s2365_s1 + $0x10] sm:$0xff]  }
   0x4   :  { %v1797_v3 = vld [vmem:[%s2365_s1 + $0x80] sm:$0xff]   ;;  %1597 = vmatpush3.bf16.msra.mxu0 %v1796_v2  ;;  %v1801_v7 = vld [vmem:[%s2365_s1 + $0x88] sm:$0xff]   ;;  %v1805_v11 = vld [vmem:[%s2365_s1 + $0x90] sm:$0xff]  }
   0x5   :  { %1625 = vmatpush3.bf16.msra.mxu1 %v1797_v3  ;;  %1598 = vmatprep.subr.bf16.mxu0 %v1798_v4  ;;  %v1806_v12 = vld [vmem:[%s2365_s1 + $0x58] sm:$0xff]   ;;  %v1810_v16 = vld [vmem:[%s2365_s1 + $0x60] sm:$0xff]   ;;  %v1814_v20 = vld [vmem:[%s2365_s1 + $0x68] sm:$0xff]  }
   0x6   :  { %1626 = vmatprep.subr.bf16.mxu1 %v1799_v5  ;;  %v1807_v13 = vld [vmem:[%s2365_s1 + $0xd8] sm:$0xff]   ;;  %v1811_v17 = vld [vmem:[%s2365_s1 + $0xe0] sm:$0xff]   ;;  %v1815_v21 = vld [vmem:[%s2365_s1 + $0xe8] sm:$0xff]  }
   0x7   :  { %v1808_v14 = vld [vmem:[%s2365_s1 + $0x18] sm:$0xff]   ;;  %v1812_v18 = vld [vmem:[%s2365_s1 + $0x20] sm:$0xff]   ;;  %v1816_v22 = vld [vmem:[%s2365_s1 + $0x28] sm:$0xff]  }
   0x8   :  { %1599 = vmatpush3.bf16.msra.mxu0 %v1800_v6  ;;  %v1809_v15 = vld [vmem:[%s2365_s1 + $0x98] sm:$0xff]   ;;  %v1813_v19 = vld [vmem:[%s2365_s1 + $0xa0] sm:$0xff]   ;;  %v1817_v23 = vld [vmem:[%s2365_s1 + $0xa8] sm:$0xff]  }
   0x9   :  { %1627 = vmatpush3.bf16.msra.mxu1 %v1801_v7  ;;  %1600 = vmatprep.subr.bf16.mxu0 %v1802_v8  ;;  %v1818_v24 = vld [vmem:[%s2365_s1 + $0x70] sm:$0xff]   ;;  %v1822_v28 = vld [vmem:[%s2365_s1 + $0x78] sm:$0xff]   ;;  %v1831_v35 = vld [vmem:[%s2366_s0 + $0xc] ss:$52 sps:$4 sm:$0xff]  }
   0xa   :  { %1628 = vmatprep.subr.bf16.mxu1 %v1803_v9  ;;  %v1819_v25 = vld [vmem:[%s2365_s1 + $0xf0] sm:$0xff]   ;;  %v1823_v29 = vld [vmem:[%s2365_s1 + $0xf8] sm:$0xff]   ;;  %v1832_v36 = vld [vmem:[%s2365_s1 + $0x140] sm:$0xff]   ;;  %1091 = vmatprep.mubr.bf16.mxu1 %v1831_v35 }
   0xb   :  { %v1820_v26 = vld [vmem:[%s2365_s1 + $0x30] sm:$0xff]   ;;  %v1824_v30 = vld [vmem:[%s2365_s1 + $0x38] sm:$0xff]   ;;  %v1833_v37 = vld [vmem:[%s2365_s1 + $0x100] sm:$0xff]  }
   0xc   :  { %1601 = vmatpush3.bf16.msra.mxu0 %v1804_v10  ;;  %v1821_v27 = vld [vmem:[%s2365_s1 + $0xb0] sm:$0xff]   ;;  %v1825_v31 = vld [vmem:[%s2365_s1 + $0xb8] sm:$0xff]   ;;  %v1834_v38 = vld [vmem:[%s2365_s1 + $0x1c0] sm:$0xff]  }
   0xd   :  { %1629 = vmatpush3.bf16.msra.mxu1 %v1805_v11  ;;  %1602 = vmatprep.subr.bf16.mxu0 %v1806_v12  ;;  %v1826_v32 = vld [vmem:[%s2366_s0] ss:$52 sps:$4 sm:$0xff]   ;;  %v1828_v33 = vld [vmem:[%s2366_s0 + $0x4] ss:$52 sps:$4 sm:$0xff]   ;;  %v1829_v34 = vld [vmem:[%s2366_s0 + $0x8] ss:$52 sps:$4 sm:$0xff]  }
   0xe   :  { %1630 = vmatprep.subr.bf16.mxu1 %v1807_v13  ;;  %1042 = vmatprep.mubr.bf16.mxu0 %v1828_v33  ;;  %v1835_v39 = vld [vmem:[%s2365_s1 + $0x180] sm:$0xff]   ;;  %v1836_v40 = vld [vmem:[%s2365_s1 + $0x148] sm:$0xff]   ;;  %v1840_v44 = vld [vmem:[%s2365_s1 + $0x150] sm:$0xff]  }
   0xf   :  { %v1837_v41 = vld [vmem:[%s2365_s1 + $0x108] sm:$0xff]   ;;  %v1841_v45 = vld [vmem:[%s2365_s1 + $0x110] sm:$0xff]   ;;  %v1844_v48 = vld [vmem:[%s2365_s1 + $0x158] sm:$0xff]  }
  0x10   :  { %1603 = vmatpush3.bf16.msra.mxu0 %v1808_v14  ;;  %v1838_v42 = vld [vmem:[%s2365_s1 + $0x1c8] sm:$0xff]   ;;  %v1842_v46 = vld [vmem:[%s2365_s1 + $0x1d0] sm:$0xff]   ;;  %v1845_v49 = vld [vmem:[%s2365_s1 + $0x118] sm:$0xff]  }
  0x11   :  { %1631 = vmatpush3.bf16.msra.mxu1 %v1809_v15  ;;  %1604 = vmatprep.subr.bf16.mxu0 %v1810_v16  ;;  %v1839_v43 = vld [vmem:[%s2365_s1 + $0x188] sm:$0xff]   ;;  %v1843_v47 = vld [vmem:[%s2365_s1 + $0x190] sm:$0xff]   ;;  %v1846_v50 = vld [vmem:[%s2365_s1 + $0x1d8] sm:$0xff]  }
  0x12   :  { %1632 = vmatprep.subr.bf16.mxu1 %v1811_v17  ;;  %v1847_v51 = vld [vmem:[%s2365_s1 + $0x198] sm:$0xff]   ;;  %v1848_v52 = vld [vmem:[%s2365_s1 + $0x160] sm:$0xff]   ;;  %v1852_v56 = vld [vmem:[%s2365_s1 + $0x168] sm:$0xff]  }
  0x13   :  { %v1849_v53 = vld [vmem:[%s2365_s1 + $0x120] sm:$0xff]   ;;  %v1855_v58 = vld [vmem:[%s2366_s0 + $0x74] ss:$52 sps:$4 sm:$0xff]   ;;  %v1866_v4 = vld [vmem:[%s2365_s1 + $0x178] sm:$0xff]  }
  0x14   :  { %1605 = vmatpush3.bf16.msra.mxu0 %v1812_v18  ;;  %v1850_v54 = vld [vmem:[%s2365_s1 + $0x1e0] sm:$0xff]   ;;  %v1857_v59 = vld [vmem:[%s2365_s1 + $0x128] sm:$0xff]   ;;  %v1862_v0 = vld [vmem:[%s2365_s1 + $0x170] sm:$0xff]  }
  0x15   :  { %1633 = vmatpush3.bf16.msra.mxu1 %v1813_v19  ;;  %1606 = vmatprep.subr.bf16.mxu0 %v1814_v20  ;;  %v1851_v55 = vld [vmem:[%s2365_s1 + $0x1a0] sm:$0xff]   ;;  %v1858_v60 = vld [vmem:[%s2366_s0 + $0x68] ss:$52 sps:$4 sm:$0xff]   ;;  %v1863_v1 = vld [vmem:[%s2365_s1 + $0x130] sm:$0xff]  }
  0x16   :  { %1634 = vmatprep.subr.bf16.mxu1 %v1815_v21  ;;  %v1853_v57 = vld [vmem:[%s2366_s0 + $0x6c] ss:$52 sps:$4 sm:$0xff]   ;;  %v1859_v61 = vld [vmem:[%s2366_s0 + $0x70] ss:$52 sps:$4 sm:$0xff]   ;;  %v1867_v5 = vld [vmem:[%s2365_s1 + $0x138] sm:$0xff]  }
  0x17   :  { %v1860_v62 = vld [vmem:[%s2365_s1 + $0x1e8] sm:$0xff]   ;;  %v1864_v2 = vld [vmem:[%s2365_s1 + $0x1f0] sm:$0xff]   ;;  %v1868_v6 = vld [vmem:[%s2365_s1 + $0x1f8] sm:$0xff]  }
  0x18   :  { %1607 = vmatpush3.bf16.msra.mxu0 %v1816_v22  ;;  %v1861_v63 = vld [vmem:[%s2365_s1 + $0x1a8] sm:$0xff]   ;;  %v1865_v3 = vld [vmem:[%s2365_s1 + $0x1b0] sm:$0xff]   ;;  %v1872_v9 = vld [vmem:[%s2365_s1 + $0x1b8] sm:$0xff]  }
  0x19   :  { %1635 = vmatpush3.bf16.msra.mxu1 %v1817_v23  ;;  %1608 = vmatprep.subr.bf16.mxu0 %v1818_v24  ;;  %v1869_v7 = vld [vmem:[%s2366_s0 + $0x10] ss:$52 sps:$4 sm:$0xff]   ;;  %v1871_v8 = vld [vmem:[%s2366_s0 + $0x14] ss:$52 sps:$4 sm:$0xff]   ;;  %v1874_v11 = vld [vmem:[%s2366_s0 + $0x18] ss:$52 sps:$4 sm:$0xff]  }
  0x1a   :  { %1636 = vmatprep.subr.bf16.mxu1 %v1819_v25  ;;  %v1873_v10 = vld [vmem:[%s2365_s1 + $0x240] sm:$0xff]   ;;  %v1876_v12 = vld [vmem:[%s2366_s0 + $0x1c] ss:$52 sps:$4 sm:$0xff]   ;;  %v1880_v16 = vld [vmem:[%s2365_s1 + $0x248] sm:$0xff]  }
  0x1b   :  { %v1877_v13 = vld [vmem:[%s2365_s1 + $0x200] sm:$0xff]   ;;  %v1881_v17 = vld [vmem:[%s2365_s1 + $0x208] sm:$0xff]   ;;  %v1883_v19 = vld [vmem:[%s2366_s0 + $0x7c] ss:$52 sps:$4 sm:$0xff]  }
  0x1c   :  { %1609 = vmatpush3.bf16.msra.mxu0 %v1820_v26  ;;  %v1878_v14 = vld [vmem:[%s2365_s1 + $0x2c0] sm:$0xff]   ;;  %v1882_v18 = vld [vmem:[%s2365_s1 + $0x2c8] sm:$0xff]   ;;  %v1887_v22 = vld [vmem:[%s2365_s1 + $0x250] sm:$0xff]  }
  0x1d   :  { %1637 = vmatpush3.bf16.msra.mxu1 %v1821_v27  ;;  %1610 = vmatprep.subr.bf16.mxu0 %v1822_v28  ;;  %v1879_v15 = vld [vmem:[%s2365_s1 + $0x280] sm:$0xff]   ;;  %v1885_v20 = vld [vmem:[%s2365_s1 + $0x288] sm:$0xff]   ;;  %v1890_v24 = vld [vmem:[%s2365_s1 + $0x210] sm:$0xff]  }
  0x1e   :  { %1638 = vmatprep.subr.bf16.mxu1 %v1823_v29  ;;  %v1886_v21 = vld [vmem:[%s2366_s0 + $0x78] ss:$52 sps:$4 sm:$0xff]   ;;  %v1891_v25 = vld [vmem:[%s2366_s0 + $0x80] ss:$52 sps:$4 sm:$0xff]  }
  0x1f   :  { %v1888_v23 = vld [vmem:[%s2366_s0 + $0x84] ss:$52 sps:$4 sm:$0xff]   ;;  %v1892_v26 = vld [vmem:[%s2365_s1 + $0x2d0] sm:$0xff]  }
  0x20   :  { %1611 = vmatpush3.bf16.msra.mxu0 %v1824_v30  ;;  %v1893_v27 = vld [vmem:[%s2365_s1 + $0x290] sm:$0xff]   ;;  %v1894_v28 = vld [vmem:[%s2365_s1 + $0x258] sm:$0xff]   ;;  %v1899_v33 = vld [vmem:[%s2365_s1 + $0x220] sm:$0xff]  }
  0x21   :  { %1639 = vmatpush3.bf16.msra.mxu1 %v1825_v31  ;;  %1652 = vmatprep.subr.bf16.mxu0 %v1832_v36  ;;  %v1895_v29 = vld [vmem:[%s2365_s1 + $0x218] sm:$0xff]   ;;  %v1901_v35 = vld [vmem:[%s2365_s1 + $0x2a0] sm:$0xff]   ;;  %v1902_v36 = vld [vmem:[%s2365_s1 + $0x268] sm:$0xff]  }
  0x22   :  { %1680 = vmatprep.subr.bf16.mxu1 %v1834_v38  ;;  %v1896_v30 = vld [vmem:[%s2365_s1 + $0x2d8] sm:$0xff]   ;;  %v1904_v38 = vld [vmem:[%s2365_s1 + $0x2e8] sm:$0xff]  }
  0x23   :  { %1043 = vmatmul.mubr.bf16.vlgmr.msra.gmra.mrb[0].mxu0 %v1826_v32  ;;  %v1897_v31 = vld [vmem:[%s2365_s1 + $0x298] sm:$0xff]   ;;  %v1898_v32 = vld [vmem:[%s2365_s1 + $0x260] sm:$0xff]  }
  0x24   :  { %1092 = vmatmul.mubr.bf16.vlgmr.msra.gmra.mrb[0].mxu1 %v1829_v34  ;;  %1653 = vmatpush3.bf16.msra.mxu0 %v1833_v37  ;;  %v1900_v34 = vld [vmem:[%s2365_s1 + $0x2e0] sm:$0xff]   ;;  %v1903_v37 = vld [vmem:[%s2365_s1 + $0x228] sm:$0xff]  }
  0x25   :  { %1681 = vmatpush3.bf16.msra.mxu1 %v1835_v39  ;;  %1654 = vmatprep.subr.bf16.mxu0 %v1836_v40  ;;  %v1905_v39 = vld [vmem:[%s2365_s1 + $0x2a8] sm:$0xff]   ;;  %v1906_v40 = vld [vmem:[%s2365_s1 + $0x270] sm:$0xff]  }
  0x26   :  { %1682 = vmatprep.subr.bf16.mxu1 %v1838_v42  ;;  %1050 = vmatprep.mubr.bf16.mxu0 %v1853_v57  ;;  %v1908_v42 = vld [vmem:[%s2365_s1 + $0x2f0] sm:$0xff]  }
  0x27   :  { %1099 = vmatprep.mubr.bf16.mxu1 %v1855_v58  ;;  %v1926_v57 = vld [vmem:[%s2366_s0 + $0x94] ss:$52 sps:$4 sm:$0xff]   ;;  %v1929_v58 = vld [vmem:[%s2365_s1 + $0x318] sm:$0xff]  }
  0x28   :  { %1655 = vmatpush3.bf16.msra.mxu0 %v1837_v41  ;;  %v1907_v41 = vld [vmem:[%s2365_s1 + $0x230] sm:$0xff]  }
  0x29   :  { %1683 = vmatpush3.bf16.msra.mxu1 %v1839_v43  ;;  %1656 = vmatprep.subr.bf16.mxu0 %v1840_v44  ;;  %v1909_v43 = vld [vmem:[%s2365_s1 + $0x2b0] sm:$0xff]   ;;  %v1910_v44 = vld [vmem:[%s2365_s1 + $0x278] sm:$0xff]  }
  0x2a   :  { %1684 = vmatprep.subr.bf16.mxu1 %v1842_v46  ;;  %v1912_v46 = vld [vmem:[%s2365_s1 + $0x2f8] sm:$0xff]  }
  0x2b   :  { %1051 = vmatmul.mubr.bf16.gmra.mrb[4].mxu0 %v1858_v60  ;;  %v1930_v60 = vld [vmem:[%s2365_s1 + $0x320] sm:$0xff]  }
  0x2c   :  { %1657 = vmatpush3.bf16.msra.mxu0 %v1841_v45  ;;  %1100 = vmatmul.mubr.bf16.gmra.mrb[4].mxu1 %v1859_v61  ;;  %v1911_v45 = vld [vmem:[%s2365_s1 + $0x238] sm:$0xff]   ;;  %v1934_v61 = vld [vmem:[%s2366_s0 + $0x30] ss:$52 sps:$4 sm:$0xff]  }
  0x2d   :  { %1685 = vmatpush3.bf16.msra.mxu1 %v1843_v47  ;;  %1658 = vmatprep.subr.bf16.mxu0 %v1844_v48  ;;  %v1913_v47 = vld [vmem:[%s2366_s0 + $0x20] ss:$52 sps:$4 sm:$0xff]   ;;  %v1915_v48 = vld [vmem:[%s2366_s0 + $0x24] ss:$52 sps:$4 sm:$0xff]  }
  0x2e   :  { %1686 = vmatprep.subr.bf16.mxu1 %v1846_v50  ;;  %1140 = vmatprep.mubr.bf16.mxu0 %v1871_v8  ;;  %v1917_v50 = vld [vmem:[%s2365_s1 + $0x300] sm:$0xff]  }
  0x2f   :  { %1189 = vmatprep.mubr.bf16.mxu1 %v1876_v12 }
  0x30   :  { %1659 = vmatpush3.bf16.msra.mxu0 %v1845_v49  ;;  %v1916_v49 = vld [vmem:[%s2365_s1 + $0x2b8] sm:$0xff]  }
  0x31   :  { %1687 = vmatpush3.bf16.msra.mxu1 %v1847_v51  ;;  %1660 = vmatprep.subr.bf16.mxu0 %v1848_v52  ;;  %v1918_v51 = vld [vmem:[%s2366_s0 + $0x28] ss:$52 sps:$4 sm:$0xff]   ;;  %v1920_v52 = vld [vmem:[%s2366_s0 + $0x2c] ss:$52 sps:$4 sm:$0xff]  }
  0x32   :  { %1688 = vmatprep.subr.bf16.mxu1 %v1850_v54  ;;  %v1922_v54 = vld [vmem:[%s2366_s0 + $0x8c] ss:$52 sps:$4 sm:$0xff]  }
  0x34   :  { %1661 = vmatpush3.bf16.msra.mxu0 %v1849_v53  ;;  %v1921_v53 = vld [vmem:[%s2365_s1 + $0x308] sm:$0xff]  }
  0x35   :  { %1689 = vmatpush3.bf16.msra.mxu1 %v1851_v55  ;;  %1662 = vmatprep.subr.bf16.mxu0 %v1852_v56  ;;  %v1924_v55 = vld [vmem:[%s2366_s0 + $0x88] ss:$52 sps:$4 sm:$0xff]   ;;  %v1925_v56 = vld [vmem:[%s2365_s1 + $0x310] sm:$0xff]  }
  0x36   :  { %1690 = vmatprep.subr.bf16.mxu1 %v1860_v62  ;;  %v1931_v62 = vld [vmem:[%s2365_s1 + $0x328] sm:$0xff]  }
  0x38   :  { %1663 = vmatpush3.bf16.msra.mxu0 %v1857_v59  ;;  %v1928_v59 = vld [vmem:[%s2366_s0 + $0x90] ss:$52 sps:$4 sm:$0xff]  }
  0x39   :  { %1691 = vmatpush3.bf16.msra.mxu1 %v1861_v63  ;;  %1664 = vmatprep.subr.bf16.mxu0 %v1862_v0  ;;  %v1932_v63 = vld [vmem:[%s2365_s1 + $0x330] sm:$0xff]   ;;  %v1933_v0 = vld [vmem:[%s2365_s1 + $0x338] sm:$0xff]  }
  0x3a   :  { %1692 = vmatprep.subr.bf16.mxu1 %v1864_v2 }
  0x3c   :  { %1665 = vmatpush3.bf16.msra.mxu0 %v1863_v1  ;;  %v1935_v1 = vld [vmem:[%s2366_s0 + $0x98] ss:$52 sps:$4 sm:$0xff]  }
  0x3d   :  { %1693 = vmatpush3.bf16.msra.mxu1 %v1865_v3  ;;  %1666 = vmatprep.subr.bf16.mxu0 %v1866_v4 }
  0x3e   :  { %1694 = vmatprep.subr.bf16.mxu1 %v1868_v6 }
  0x40   :  { %1667 = vmatpush3.bf16.msra.mxu0 %v1867_v5 }
  0x41   :  { %1695 = vmatpush3.bf16.msra.mxu1 %v1872_v9  ;;  %1708 = vmatprep.subr.bf16.mxu0 %v1873_v10 }
  0x42   :  { %1736 = vmatprep.subr.bf16.mxu1 %v1878_v14 }
  0x43   :  { %1141 = vmatmul.mubr.bf16.vlgmr.msra.gmra.mrb[8].mxu0 %v1869_v7 }
  0x44   :  { %1709 = vmatpush3.bf16.msra.mxu0 %v1877_v13  ;;  %1190 = vmatmul.mubr.bf16.vlgmr.msra.gmra.mrb[8].mxu1 %v1874_v11 }
  0x45   :  { %1737 = vmatpush3.bf16.msra.mxu1 %v1879_v15  ;;  %1710 = vmatprep.subr.bf16.mxu0 %v1880_v16 }
  0x46   :  { %1738 = vmatprep.subr.bf16.mxu1 %v1882_v18  ;;  %1148 = vmatprep.mubr.bf16.mxu0 %v1883_v19 }
  0x47   :  { %1197 = vmatprep.mubr.bf16.mxu1 %v1888_v23 }
  0x48   :  { %1711 = vmatpush3.bf16.msra.mxu0 %v1881_v17 }
  0x49   :  { %1739 = vmatpush3.bf16.msra.mxu1 %v1885_v20  ;;  %1712 = vmatprep.subr.bf16.mxu0 %v1887_v22 }
  0x4a   :  { %1740 = vmatprep.subr.bf16.mxu1 %v1892_v26 }
  0x4b   :  { %1149 = vmatmul.mubr.bf16.gmra.mrb[12].mxu0 %v1886_v21 }
  0x4c   :  { %1713 = vmatpush3.bf16.msra.mxu0 %v1890_v24  ;;  %1198 = vmatmul.mubr.bf16.gmra.mrb[12].mxu1 %v1891_v25 }
  0x4d   :  { %1741 = vmatpush3.bf16.msra.mxu1 %v1893_v27  ;;  %1714 = vmatprep.subr.bf16.mxu0 %v1894_v28 }
  0x4e   :  { %1742 = vmatprep.subr.bf16.mxu1 %v1896_v30  ;;  %1238 = vmatprep.mubr.bf16.mxu0 %v1915_v48 }
  0x4f   :  { %1287 = vmatprep.mubr.bf16.mxu1 %v1920_v52 }
  0x50   :  { %1715 = vmatpush3.bf16.msra.mxu0 %v1895_v29 }
  0x51   :  { %1743 = vmatpush3.bf16.msra.mxu1 %v1897_v31  ;;  %1716 = vmatprep.subr.bf16.mxu0 %v1898_v32 }
  0x52   :  { %1744 = vmatprep.subr.bf16.mxu1 %v1900_v34 }
  0x54   :  { %1717 = vmatpush3.bf16.msra.mxu0 %v1899_v33 }
  0x55   :  { %1745 = vmatpush3.bf16.msra.mxu1 %v1901_v35  ;;  %1718 = vmatprep.subr.bf16.mxu0 %v1902_v36 }
  0x56   :  { %1746 = vmatprep.subr.bf16.mxu1 %v1904_v38 }
  0x58   :  { %1719 = vmatpush3.bf16.msra.mxu0 %v1903_v37 }
  0x59   :  { %1747 = vmatpush3.bf16.msra.mxu1 %v1905_v39  ;;  %1720 = vmatprep.subr.bf16.mxu0 %v1906_v40 }
  0x5a   :  { %1748 = vmatprep.subr.bf16.mxu1 %v1908_v42 }
  0x5c   :  { %1721 = vmatpush3.bf16.msra.mxu0 %v1907_v41 }
  0x5d   :  { %1749 = vmatpush3.bf16.msra.mxu1 %v1909_v43  ;;  %1722 = vmatprep.subr.bf16.mxu0 %v1910_v44 }
  0x5e   :  { %1750 = vmatprep.subr.bf16.mxu1 %v1912_v46 }
  0x60   :  { %1723 = vmatpush3.bf16.msra.mxu0 %v1911_v45 }
  0x61   :  { %1751 = vmatpush3.bf16.msra.mxu1 %v1916_v49  ;;  %1774 = vmatprep.subr.bf16.mxu0 %v1917_v50 }
  0x63   :  { %1239 = vmatmul.mubr.bf16.vlgmr.msra.gmra.mrb[16].mxu0 %v1913_v47 }
  0x64   :  { %1775 = vmatpush3.bf16.msra.mxu0 %v1917_v50  ;;  %1288 = vmatmul.mubr.bf16.vlgmr.msra.gmra.mrb[16].mxu1 %v1918_v51 }
  0x65   :  { %1776 = vmatprep.subr.bf16.mxu0 %v1921_v53  ;;  %1246 = vmatprep.mubr.bf16.mxu0 %v1922_v54 }
  0x66   :  { %1295 = vmatprep.mubr.bf16.mxu1 %v1926_v57 }
  0x68   :  { %1777 = vmatpush3.bf16.msra.mxu0 %v1921_v53 }
  0x69   :  { %1778 = vmatprep.subr.bf16.mxu0 %v1925_v56 }
  0x6b   :  { %1247 = vmatmul.mubr.bf16.gmra.mrb[20].mxu0 %v1924_v55 }
  0x6c   :  { %1779 = vmatpush3.bf16.msra.mxu0 %v1925_v56  ;;  %1296 = vmatmul.mubr.bf16.gmra.mrb[20].mxu1 %v1928_v59 }
  0x6d   :  { %1780 = vmatprep.subr.bf16.mxu0 %v1929_v58  ;;  %1790 = vmatprep.mubr.bf16.mxu0 %v1934_v61 }
  0x70   :  { %1781 = vmatpush3.bf16.msra.mxu0 %v1929_v58 }
  0x71   :  { %1782 = vmatprep.subr.bf16.mxu0 %v1930_v60 }
  0x74   :  { %1783 = vmatpush3.bf16.msra.mxu0 %v1930_v60 }
  0x75   :  { %1784 = vmatprep.subr.bf16.mxu0 %v1931_v62 }
  0x78   :  { %1785 = vmatpush3.bf16.msra.mxu0 %v1931_v62 }
  0x79   :  { %1786 = vmatprep.subr.bf16.mxu0 %v1932_v63 }
  0x7c   :  { %1787 = vmatpush3.bf16.msra.mxu0 %v1932_v63 }
  0x7d   :  { %1788 = vmatprep.subr.bf16.mxu0 %v1933_v0 }
  0x80   :  { %1789 = vmatpush3.bf16.msra.mxu0 %v1933_v0 }
  0x83   :  { %1791 = vmatmul.mubr.bf16.vlgmr.msra.gmra.mrb[24].mxu0 %v1935_v1 }
  0xf6   :  { %v1612_v2 = vpop.f32.mrb[0].mxu0 }
  0xf7   :  { %v1640_v3 = vpop.f32.mrb[0].mxu1  ;;  %v1613_v4 = vpop.f32.mrb[1].mxu0 }
  0xf8   :  { %v1614_v5 = vadd.f32 %v1613_v4, %v1612_v2  ;;  %v1641_v6 = vpop.f32.mrb[1].mxu1  ;;  %v1615_v7 = vpop.f32.mrb[2].mxu0 }
  0xf9   :  { %v1642_v8 = vadd.f32 %v1641_v6, %v1640_v3  ;;  %v1643_v9 = vpop.f32.mrb[2].mxu1  ;;  %v1616_v10 = vpop.f32.mrb[3].mxu0 }
  0xfa   :  { %v1617_v11 = vadd.f32 %v1616_v10, %v1615_v7  ;;  %v1644_v12 = vpop.f32.mrb[3].mxu1 }
  0xfb   :  { %v1094_v13 = vadd.f32 %v1642_v8, %v1614_v5  ;;  %v1645_v14 = vadd.f32 %v1644_v12, %v1643_v9 }
  0xfd   :  { %v1097_v15 = vadd.f32 %v1645_v14, %v1617_v11 }
  0xfe   :  { %v1618_v16 = vpop.f32.mrb[4].mxu0 }
  0xff   :  { %v1646_v17 = vpop.f32.mrb[4].mxu1  ;;  %v1619_v18 = vpop.f32.mrb[5].mxu0 }
 0x100   :  { %v1647_v19 = vpop.f32.mrb[5].mxu1  ;;  %v1620_v20 = vadd.f32 %v1619_v18, %v1618_v16  ;;  %v1621_v22 = vpop.f32.mrb[6].mxu0 }
 0x101   :  { %v1648_v21 = vadd.f32 %v1647_v19, %v1646_v17  ;;  %v1649_v23 = vpop.f32.mrb[6].mxu1  ;;  %v1622_v24 = vpop.f32.mrb[7].mxu0 }
 0x102   :  { %v1650_v25 = vpop.f32.mrb[7].mxu1  ;;  %v1623_v27 = vadd.f32 %v1622_v24, %v1621_v22 }
 0x103   :  { %v1102_v26 = vadd.f32 %v1648_v21, %v1620_v20  ;;  %v1651_v28 = vadd.f32 %v1650_v25, %v1649_v23 }
 0x105   :  { %v1105_v29 = vadd.f32 %v1651_v28, %v1623_v27 }
 0x116   :  { %v1668_v30 = vpop.f32.mrb[8].mxu0 }
 0x117   :  { %v1669_v31 = vpop.f32.mrb[9].mxu0  ;;  %v1696_v34 = vpop.f32.mrb[8].mxu1 }
 0x118   :  { %v1670_v32 = vadd.f32 %v1669_v31, %v1668_v30  ;;  %v1671_v33 = vpop.f32.mrb[10].mxu0  ;;  %v1697_v38 = vpop.f32.mrb[9].mxu1 }
 0x119   :  { %v1672_v35 = vpop.f32.mrb[11].mxu0  ;;  %v1698_v39 = vadd.f32 %v1697_v38, %v1696_v34  ;;  %v1699_v40 = vpop.f32.mrb[10].mxu1 }
 0x11a   :  { %v1143_v36 = vadd.f32 %v1670_v32, %v1094_v13  ;;  %v1673_v37 = vadd.f32 %v1672_v35, %v1671_v33  ;;  %v1700_v42 = vpop.f32.mrb[11].mxu1 }
 0x11b   :  { %v1701_v44 = vadd.f32 %v1700_v42, %v1699_v40 }
 0x11c   :  { %v1146_v41 = vadd.f32 %v1673_v37, %v1097_v15  ;;  %v1192_v43 = vadd.f32 %v1698_v39, %v1143_v36 }
 0x11e   :  { %v1195_v45 = vadd.f32 %v1701_v44, %v1146_v41  ;;  %v1674_v46 = vpop.f32.mrb[12].mxu0 }
 0x11f   :  { %v1675_v47 = vpop.f32.mrb[13].mxu0  ;;  %v1702_v50 = vpop.f32.mrb[12].mxu1 }
 0x120   :  { %v1676_v48 = vadd.f32 %v1675_v47, %v1674_v46  ;;  %v1677_v49 = vpop.f32.mrb[14].mxu0  ;;  %v1703_v54 = vpop.f32.mrb[13].mxu1 }
 0x121   :  { %v1678_v51 = vpop.f32.mrb[15].mxu0  ;;  %v1704_v55 = vadd.f32 %v1703_v54, %v1702_v50  ;;  %v1705_v56 = vpop.f32.mrb[14].mxu1 }
 0x122   :  { %v1151_v52 = vadd.f32 %v1676_v48, %v1102_v26  ;;  %v1679_v53 = vadd.f32 %v1678_v51, %v1677_v49  ;;  %v1706_v58 = vpop.f32.mrb[15].mxu1 }
 0x123   :  { %v1707_v60 = vadd.f32 %v1706_v58, %v1705_v56 }
 0x124   :  { %v1154_v57 = vadd.f32 %v1679_v53, %v1105_v29  ;;  %v1200_v59 = vadd.f32 %v1704_v55, %v1151_v52 }
 0x126   :  { %v1203_v61 = vadd.f32 %v1707_v60, %v1154_v57 }
 0x136   :  { %v1724_v62 = vpop.f32.mrb[16].mxu0 }
 0x137   :  { %v1725_v63 = vpop.f32.mrb[17].mxu0  ;;  %v1752_v4 = vpop.f32.mrb[16].mxu1 }
 0x138   :  { %v1726_v0 = vadd.f32 %v1725_v63, %v1724_v62  ;;  %v1727_v1 = vpop.f32.mrb[18].mxu0  ;;  %v1753_v6 = vpop.f32.mrb[17].mxu1 }
 0x139   :  { %v1728_v2 = vpop.f32.mrb[19].mxu0  ;;  %v1754_v8 = vadd.f32 %v1753_v6, %v1752_v4  ;;  %v1755_v9 = vpop.f32.mrb[18].mxu1 }
 0x13a   :  { %v1241_v3 = vadd.f32 %v1726_v0, %v1192_v43  ;;  %v1729_v5 = vadd.f32 %v1728_v2, %v1727_v1  ;;  %v1756_v10 = vpop.f32.mrb[19].mxu1 }
 0x13b   :  { %v1757_v11 = vadd.f32 %v1756_v10, %v1755_v9  ;;  %v1388_v9 = vld [vmem:[%s2368_s3] sm:$0x1] }
 0x13c   :  { %v1244_v7 = vadd.f32 %v1729_v5, %v1195_v45  ;;  %v1290_v13 = vadd.f32 %v1754_v8, %v1241_v3  ;;  %v1392_v3 = vlaneseq  ;;  %v1386_v5 = vld [vmem:[%s2367_s2] sm:$0x1] }
 0x13e   :  { %v1730_v12 = vpop.f32.mrb[20].mxu0  ;;  %v1293_v17 = vadd.f32 %v1757_v11, %v1244_v7  ;;  %v1393_v4 = vshrl.u32 %v1392_v3, 7 }
 0x13f   :  { %v1731_v14 = vpop.f32.mrb[21].mxu0  ;;  %v1758_v20 = vpop.f32.mrb[20].mxu1 }
 0x140   :  { %v1732_v15 = vadd.f32 %v1731_v14, %v1730_v12  ;;  %v1733_v16 = vpop.f32.mrb[22].mxu0  ;;  %v1759_v22 = vpop.f32.mrb[21].mxu1  ;;  %v1394_v6 = vsub.s32 0, %v1393_v4 }
 0x141   :  { %v1734_v18 = vpop.f32.mrb[23].mxu0  ;;  %v1760_v24 = vadd.f32 %v1759_v22, %v1758_v20  ;;  %v1761_v25 = vpop.f32.mrb[22].mxu1 }
 0x142   :  { %v1249_v19 = vadd.f32 %v1732_v15, %v1200_v59  ;;  %v1735_v21 = vadd.f32 %v1734_v18, %v1733_v16  ;;  %v1762_v26 = vpop.f32.mrb[23].mxu1 }
 0x143   :  { %v1763_v27 = vadd.f32 %v1762_v26, %v1761_v25 }
 0x144   :  { %v1252_v23 = vadd.f32 %v1735_v21, %v1203_v61  ;;  %v1298_v28 = vadd.f32 %v1760_v24, %v1249_v19 }
 0x146   :  { %v1301_v29 = vadd.f32 %v1763_v27, %v1252_v23 }
 0x156   :  { %v1792_v30 = vpop.f32.mrb[24].mxu0 }
 0x157   :  { %v1347_v31 = vadd.f32 %v1792_v30, %v1298_v28  ;;  %v1338_v32 = vpop.f32.mrb[25].mxu0 }
 0x158   :  { %v1339_v33 = vadd.f32 %v1338_v32, %v1290_v13  ;;  %v1793_v34 = vpop.f32.mrb[26].mxu0 }
 0x159   :  { %v1350_v35 = vadd.f32 %v1793_v34, %v1301_v29  ;;  %v1341_v36 = vpop.f32.mrb[27].mxu0 }
 0x15a   :  { %v1342_v37 = vadd.f32 %v1341_v36, %v1293_v17 }
 0x15c   :  { %v1353_v38 = vadd.f32 %v1342_v37, %v1339_v33 }
 0x15e   :  { %v1354_v39 = vadd.f32 %v1353_v38, %v1347_v31 }
 0x160   :  { %v1355_v40 = vadd.f32 %v1354_v39, %v1350_v35 }
 0x162   :  { %v1356_v41 = vrot.slane %v1355_v40, 4 }
 0x164   :  { %v1357_v42 = vadd.f32 %v1356_v41, %v1355_v40 }
 0x166   :  { %v1358_v43 = vrot.slane %v1357_v42, 2 }
 0x168   :  { %v1359_v44 = vadd.f32 %v1358_v43, %v1357_v42 }
 0x16a   :  { %v1360_v45 = vrot.slane %v1359_v44, 1 }
 0x16c   :  { %v1361_v46 = vadd.f32 %v1360_v45, %v1359_v44 }
 0x16e   :  { %v1364_v47 = vmul.f32 0.03125, %v1361_v46 }
 0x170   :  { %v1365_v48 = vsub.f32 %v1339_v33, %v1364_v47  ;;  %v1366_v49 = vsub.f32 %v1342_v37, %v1364_v47  ;;  %v1367_v50 = vsub.f32 %v1347_v31, %v1364_v47  ;;  %v1368_v51 = vsub.f32 %v1350_v35, %v1364_v47 }
 0x172   :  { %v1369_v52 = vmul.f32 %v1365_v48, %v1365_v48  ;;  %v1370_v53 = vmul.f32 %v1366_v49, %v1366_v49  ;;  %v1371_v54 = vmul.f32 %v1367_v50, %v1367_v50  ;;  %v1372_v56 = vmul.f32 %v1368_v51, %v1368_v51 }
 0x174   :  { %v1373_v55 = vadd.f32 %v1370_v53, %v1369_v52 }
 0x176   :  { %v1374_v57 = vadd.f32 %v1373_v55, %v1371_v54 }
 0x178   :  { %v1375_v58 = vadd.f32 %v1374_v57, %v1372_v56 }
 0x17a   :  { %v1376_v59 = vrot.slane %v1375_v58, 4 }
 0x17c   :  { %v1377_v60 = vadd.f32 %v1376_v59, %v1375_v58 }
 0x17e   :  { %v1378_v61 = vrot.slane %v1377_v60, 2 }
 0x180   :  { %v1379_v62 = vadd.f32 %v1378_v61, %v1377_v60 }
 0x182   :  { %v1380_v63 = vrot.slane %v1379_v62, 1 }
 0x184   :  { %v1381_v0 = vadd.f32 %v1380_v63, %v1379_v62 }
 0x186   :  { %v1383_v1 = vmul.f32 0.03125, %v1381_v0 }
 0x188   :  { %v1384_v2 = vadd.f32 1e-05, %v1383_v1 }
 0x18a   :  { %1936 = vrsqrt.f32 %v1384_v2 }
 0x194   :  { %v1937_v7 = vpop.eup %1936 }
 0x195   :  { %v1387_v8 = vmul.f32 %v1937_v7, %v1386_v5 }
 0x197   :  { %v1389_v10 = vmul.f32 %v1387_v8, %v1364_v47  ;;  %v1395_v11 = vrot.slane %v1387_v8, %v1394_v6 }
 0x199   :  { %v1390_v12 = vsub.f32 %v1388_v9, %v1389_v10  ;;  %v1397_v13 = vmul.f32 %v1395_v11, %v1339_v33  ;;  %v1398_v14 = vmul.f32 %v1395_v11, %v1342_v37  ;;  %v1399_v15 = vmul.f32 %v1395_v11, %v1347_v31 }
 0x19a   :  { %v1400_v16 = vmul.f32 %v1395_v11, %v1350_v35 }
 0x19b   :  { %v1405_v17 = vrot.slane %v1390_v12, %v1394_v6 }
 0x19d   :  { %v1407_v18 = vadd.f32 %v1405_v17, %v1397_v13  ;;  %v1408_v19 = vadd.f32 %v1405_v17, %v1398_v14  ;;  %v1409_v20 = vadd.f32 %v1405_v17, %v1399_v15  ;;  %v1410_v21 = vadd.f32 %v1405_v17, %v1400_v16 }
 0x19f   :  { %vm1411_vm0 = vcmp.ge.f32.partialorder %v1407_v18, 0.0  ;;  %vm1412_vm1 = vcmp.ge.f32.partialorder %v1408_v19, 0.0  ;;  %vm1413_vm2 = vcmp.ge.f32.partialorder %v1409_v20, 0.0  ;;  %vm1414_vm3 = vcmp.ge.f32.partialorder %v1410_v21, 0.0 }
 0x1a0   :  { %v1415_v22 = vmul.f32 0.01, %v1407_v18  ;;  %v1416_v23 = vmul.f32 0.01, %v1408_v19  ;;  %v1417_v24 = vmul.f32 0.01, %v1409_v20 }
 0x1a1   :  { %v1418_v25 = vmul.f32 0.01, %v1410_v21 }
 0x1a2   :  { %v1419_v26 = vsel %vm1411_vm0, %v1407_v18, %v1415_v22  ;;  %v1420_v27 = vsel %vm1412_vm1, %v1408_v19, %v1416_v23  ;;  %v1421_v28 = vsel %vm1413_vm2, %v1409_v20, %v1417_v24 }
 0x1a3   :  { %v1422_v29 = vsel %vm1414_vm3, %v1410_v21, %v1418_v25  ;;  %v1588_v30 = vpack.c.bf16 %v1420_v27, %v1419_v26 }
 0x1a4   :  { %v1593_v31 = vpack.c.bf16 %v1422_v29, %v1421_v28 }
 0x1a5   :  { %1589 = vst [vmem:[%s2369_s4] sm:$0xff] %v1588_v30  }
 0x1a6   :  { %1595 = vst [vmem:[%s2369_s4 + $0x8] sm:$0xff] %v1593_v31  }

// kernel: g_forward.7
= control target key start
LH: loop header
LB: loop body
LE: loop exit
PB: predicated region body
PF: predicated region fallthrough
CT: control target
= control target key end

     0   :  { %s3476_s1 = inlined_call_operand.vmem [shape: bf16[4,512,128], index: 1, kind: input, shape index: {}]   ;;  %s3477_s0 = inlined_call_operand.vmem [shape: bf16[4,32,512], index: 0, kind: input, shape index: {}]   ;;  %s3478_s2 = inlined_call_operand.vmem [shape: f32[1,128], index: 2, kind: input, shape index: {}]   ;;  %s3479_s3 = inlined_call_operand.vmem [shape: f32[1,128], index: 3, kind: input, shape index: {}]   ;;  %s3480_s4 = inlined_call_operand.vmem [shape: bf16[4,32,128], index: 4, kind: output, shape index: {}]  }
   0x1   :  { %v2624_v0 = vld [vmem:[%s3476_s1 + $0x40] sm:$0xff]   ;;  %v2628_v4 = vld [vmem:[%s3476_s1 + $0x48] sm:$0xff]   ;;  %v2632_v8 = vld [vmem:[%s3476_s1 + $0x50] sm:$0xff]  }
   0x2   :  { %v2625_v1 = vld [vmem:[%s3476_s1 + $0xc0] sm:$0xff]   ;;  %2400 = vmatprep.subr.bf16.mxu0 %v2624_v0  ;;  %v2629_v5 = vld [vmem:[%s3476_s1 + $0xc8] sm:$0xff]   ;;  %v2633_v9 = vld [vmem:[%s3476_s1 + $0xd0] sm:$0xff]  }
   0x3   :  { %v2626_v2 = vld [vmem:[%s3476_s1] sm:$0xff]   ;;  %2428 = vmatprep.subr.bf16.mxu1 %v2625_v1  ;;  %v2630_v6 = vld [vmem:[%s3476_s1 + $0x8] sm:$0xff]   ;;  %v2634_v10 = vld [vmem:[%s3476_s1 + $0x10] sm:$0xff]  }
   0x4   :  { %v2627_v3 = vld [vmem:[%s3476_s1 + $0x80] sm:$0xff]   ;;  %2401 = vmatpush3.bf16.msra.mxu0 %v2626_v2  ;;  %v2631_v7 = vld [vmem:[%s3476_s1 + $0x88] sm:$0xff]   ;;  %v2635_v11 = vld [vmem:[%s3476_s1 + $0x90] sm:$0xff]  }
   0x5   :  { %2429 = vmatpush3.bf16.msra.mxu1 %v2627_v3  ;;  %2402 = vmatprep.subr.bf16.mxu0 %v2628_v4  ;;  %v2636_v12 = vld [vmem:[%s3476_s1 + $0x58] sm:$0xff]   ;;  %v2640_v16 = vld [vmem:[%s3476_s1 + $0x60] sm:$0xff]   ;;  %v2644_v20 = vld [vmem:[%s3476_s1 + $0x68] sm:$0xff]  }
   0x6   :  { %2430 = vmatprep.subr.bf16.mxu1 %v2629_v5  ;;  %v2637_v13 = vld [vmem:[%s3476_s1 + $0xd8] sm:$0xff]   ;;  %v2641_v17 = vld [vmem:[%s3476_s1 + $0xe0] sm:$0xff]   ;;  %v2645_v21 = vld [vmem:[%s3476_s1 + $0xe8] sm:$0xff]  }
   0x7   :  { %v2638_v14 = vld [vmem:[%s3476_s1 + $0x18] sm:$0xff]   ;;  %v2642_v18 = vld [vmem:[%s3476_s1 + $0x20] sm:$0xff]   ;;  %v2646_v22 = vld [vmem:[%s3476_s1 + $0x28] sm:$0xff]  }
   0x8   :  { %2403 = vmatpush3.bf16.msra.mxu0 %v2630_v6  ;;  %v2639_v15 = vld [vmem:[%s3476_s1 + $0x98] sm:$0xff]   ;;  %v2643_v19 = vld [vmem:[%s3476_s1 + $0xa0] sm:$0xff]   ;;  %v2647_v23 = vld [vmem:[%s3476_s1 + $0xa8] sm:$0xff]  }
   0x9   :  { %2431 = vmatpush3.bf16.msra.mxu1 %v2631_v7  ;;  %2404 = vmatprep.subr.bf16.mxu0 %v2632_v8  ;;  %v2648_v24 = vld [vmem:[%s3476_s1 + $0x70] sm:$0xff]   ;;  %v2652_v28 = vld [vmem:[%s3476_s1 + $0x78] sm:$0xff]   ;;  %v2662_v36 = vld [vmem:[%s3476_s1 + $0x140] sm:$0xff]  }
   0xa   :  { %2432 = vmatprep.subr.bf16.mxu1 %v2633_v9  ;;  %v2649_v25 = vld [vmem:[%s3476_s1 + $0xf0] sm:$0xff]   ;;  %v2653_v29 = vld [vmem:[%s3476_s1 + $0xf8] sm:$0xff]   ;;  %v2663_v37 = vld [vmem:[%s3476_s1 + $0x1c0] sm:$0xff]  }
   0xb   :  { %v2650_v26 = vld [vmem:[%s3476_s1 + $0x30] sm:$0xff]   ;;  %v2654_v30 = vld [vmem:[%s3476_s1 + $0x38] sm:$0xff]   ;;  %v2664_v38 = vld [vmem:[%s3476_s1 + $0x100] sm:$0xff]  }
   0xc   :  { %2405 = vmatpush3.bf16.msra.mxu0 %v2634_v10  ;;  %v2651_v27 = vld [vmem:[%s3476_s1 + $0xb0] sm:$0xff]   ;;  %v2655_v31 = vld [vmem:[%s3476_s1 + $0xb8] sm:$0xff]   ;;  %v2665_v39 = vld [vmem:[%s3476_s1 + $0x180] sm:$0xff]  }
   0xd   :  { %2433 = vmatpush3.bf16.msra.mxu1 %v2635_v11  ;;  %2406 = vmatprep.subr.bf16.mxu0 %v2636_v12  ;;  %v2656_v32 = vld [vmem:[%s3477_s0] ss:$16 sps:$4 sm:$0xff]   ;;  %v2658_v33 = vld [vmem:[%s3477_s0 + $0x4] ss:$16 sps:$4 sm:$0xff]   ;;  %v2659_v34 = vld [vmem:[%s3477_s0 + $0x8] ss:$16 sps:$4 sm:$0xff]  }
   0xe   :  { %2434 = vmatprep.subr.bf16.mxu1 %v2637_v13  ;;  %v2661_v35 = vld [vmem:[%s3477_s0 + $0xc] ss:$16 sps:$4 sm:$0xff]   ;;  %354 = vmatprep.mubr.bf16.mxu0 %v2658_v33  ;;  %v2670_v44 = vld [vmem:[%s3477_s0 + $0x24] ss:$16 sps:$4 sm:$0xff]   ;;  %v2674_v46 = vld [vmem:[%s3477_s0 + $0x20] ss:$16 sps:$4 sm:$0xff]  }
   0xf   :  { %403 = vmatprep.mubr.bf16.mxu1 %v2661_v35  ;;  %v2666_v40 = vld [vmem:[%s3476_s1 + $0x148] sm:$0xff]   ;;  %v2676_v48 = vld [vmem:[%s3476_s1 + $0x150] sm:$0xff]   ;;  %v2680_v52 = vld [vmem:[%s3476_s1 + $0x158] sm:$0xff]  }
  0x10   :  { %2407 = vmatpush3.bf16.msra.mxu0 %v2638_v14  ;;  %v2667_v41 = vld [vmem:[%s3476_s1 + $0x1c8] sm:$0xff]   ;;  %v2677_v49 = vld [vmem:[%s3476_s1 + $0x1d0] sm:$0xff]   ;;  %v2681_v53 = vld [vmem:[%s3476_s1 + $0x1d8] sm:$0xff]  }
  0x11   :  { %2435 = vmatpush3.bf16.msra.mxu1 %v2639_v15  ;;  %2408 = vmatprep.subr.bf16.mxu0 %v2640_v16  ;;  %v2668_v42 = vld [vmem:[%s3476_s1 + $0x108] sm:$0xff]   ;;  %v2678_v50 = vld [vmem:[%s3476_s1 + $0x110] sm:$0xff]   ;;  %v2682_v54 = vld [vmem:[%s3476_s1 + $0x118] sm:$0xff]  }
  0x12   :  { %2436 = vmatprep.subr.bf16.mxu1 %v2641_v17  ;;  %v2669_v43 = vld [vmem:[%s3476_s1 + $0x188] sm:$0xff]   ;;  %v2679_v51 = vld [vmem:[%s3476_s1 + $0x190] sm:$0xff]   ;;  %v2683_v55 = vld [vmem:[%s3476_s1 + $0x198] sm:$0xff]  }
  0x13   :  { %v2672_v45 = vld [vmem:[%s3477_s0 + $0x2c] ss:$16 sps:$4 sm:$0xff]   ;;  %v2675_v47 = vld [vmem:[%s3477_s0 + $0x28] ss:$16 sps:$4 sm:$0xff]   ;;  %v2684_v56 = vld [vmem:[%s3476_s1 + $0x160] sm:$0xff]  }
  0x14   :  { %2409 = vmatpush3.bf16.msra.mxu0 %v2642_v18  ;;  %v2685_v57 = vld [vmem:[%s3476_s1 + $0x1e0] sm:$0xff]   ;;  %v2688_v60 = vld [vmem:[%s3476_s1 + $0x168] sm:$0xff]   ;;  %v2692_v0 = vld [vmem:[%s3476_s1 + $0x170] sm:$0xff]  }
  0x15   :  { %2437 = vmatpush3.bf16.msra.mxu1 %v2643_v19  ;;  %2410 = vmatprep.subr.bf16.mxu0 %v2644_v20  ;;  %v2686_v58 = vld [vmem:[%s3476_s1 + $0x120] sm:$0xff]   ;;  %v2689_v61 = vld [vmem:[%s3476_s1 + $0x1e8] sm:$0xff]   ;;  %v2693_v1 = vld [vmem:[%s3476_s1 + $0x1f0] sm:$0xff]  }
  0x16   :  { %2438 = vmatprep.subr.bf16.mxu1 %v2645_v21  ;;  %v2687_v59 = vld [vmem:[%s3476_s1 + $0x1a0] sm:$0xff]   ;;  %v2690_v62 = vld [vmem:[%s3476_s1 + $0x128] sm:$0xff]   ;;  %v2694_v2 = vld [vmem:[%s3476_s1 + $0x130] sm:$0xff]  }
  0x17   :  { %v2691_v63 = vld [vmem:[%s3476_s1 + $0x1a8] sm:$0xff]   ;;  %v2695_v3 = vld [vmem:[%s3476_s1 + $0x1b0] sm:$0xff]   ;;  %v2696_v4 = vld [vmem:[%s3476_s1 + $0x178] sm:$0xff]  }
  0x18   :  { %2411 = vmatpush3.bf16.msra.mxu0 %v2646_v22  ;;  %v2697_v5 = vld [vmem:[%s3476_s1 + $0x1f8] sm:$0xff]   ;;  %v2700_v8 = vld [vmem:[%s3477_s0 + $0x40] ss:$16 sps:$4 sm:$0xff]   ;;  %v2702_v9 = vld [vmem:[%s3477_s0 + $0x44] ss:$16 sps:$4 sm:$0xff]  }
  0x19   :  { %2439 = vmatpush3.bf16.msra.mxu1 %v2647_v23  ;;  %2412 = vmatprep.subr.bf16.mxu0 %v2648_v24  ;;  %v2698_v6 = vld [vmem:[%s3476_s1 + $0x138] sm:$0xff]   ;;  %v2706_v12 = vld [vmem:[%s3476_s1 + $0x240] sm:$0xff]   ;;  %v2710_v16 = vld [vmem:[%s3476_s1 + $0x248] sm:$0xff]  }
  0x1a   :  { %2440 = vmatprep.subr.bf16.mxu1 %v2649_v25  ;;  %v2699_v7 = vld [vmem:[%s3476_s1 + $0x1b8] sm:$0xff]   ;;  %v2707_v13 = vld [vmem:[%s3476_s1 + $0x2c0] sm:$0xff]   ;;  %v2711_v17 = vld [vmem:[%s3476_s1 + $0x2c8] sm:$0xff]  }
  0x1b   :  { %v2703_v10 = vld [vmem:[%s3477_s0 + $0x48] ss:$16 sps:$4 sm:$0xff]   ;;  %v2705_v11 = vld [vmem:[%s3477_s0 + $0x4c] ss:$16 sps:$4 sm:$0xff]   ;;  %v2708_v14 = vld [vmem:[%s3476_s1 + $0x200] sm:$0xff]  }
  0x1c   :  { %2413 = vmatpush3.bf16.msra.mxu0 %v2650_v26  ;;  %v2709_v15 = vld [vmem:[%s3476_s1 + $0x280] sm:$0xff]   ;;  %v2712_v18 = vld [vmem:[%s3476_s1 + $0x208] sm:$0xff]   ;;  %v2720_v24 = vld [vmem:[%s3476_s1 + $0x250] sm:$0xff]  }
  0x1d   :  { %2441 = vmatpush3.bf16.msra.mxu1 %v2651_v27  ;;  %2414 = vmatprep.subr.bf16.mxu0 %v2652_v28  ;;  %v2713_v19 = vld [vmem:[%s3476_s1 + $0x288] sm:$0xff]   ;;  %v2714_v20 = vld [vmem:[%s3477_s0 + $0x64] ss:$16 sps:$4 sm:$0xff]   ;;  %v2718_v22 = vld [vmem:[%s3477_s0 + $0x60] ss:$16 sps:$4 sm:$0xff]  }
  0x1e   :  { %2442 = vmatprep.subr.bf16.mxu1 %v2653_v29  ;;  %v2716_v21 = vld [vmem:[%s3477_s0 + $0x6c] ss:$16 sps:$4 sm:$0xff]   ;;  %v2719_v23 = vld [vmem:[%s3477_s0 + $0x68] ss:$16 sps:$4 sm:$0xff]   ;;  %v2721_v25 = vld [vmem:[%s3476_s1 + $0x2d0] sm:$0xff]  }
  0x1f   :  { %v2722_v26 = vld [vmem:[%s3476_s1 + $0x210] sm:$0xff]   ;;  %v2724_v28 = vld [vmem:[%s3476_s1 + $0x258] sm:$0xff]   ;;  %v2729_v33 = vld [vmem:[%s3476_s1 + $0x2e0] sm:$0xff]  }
  0x20   :  { %2415 = vmatpush3.bf16.msra.mxu0 %v2654_v30  ;;  %v2723_v27 = vld [vmem:[%s3476_s1 + $0x290] sm:$0xff]   ;;  %v2725_v29 = vld [vmem:[%s3476_s1 + $0x2d8] sm:$0xff]   ;;  %v2731_v35 = vld [vmem:[%s3476_s1 + $0x2a0] sm:$0xff]  }
  0x21   :  { %2443 = vmatpush3.bf16.msra.mxu1 %v2655_v31  ;;  %2456 = vmatprep.subr.bf16.mxu0 %v2662_v36  ;;  %v2726_v30 = vld [vmem:[%s3476_s1 + $0x218] sm:$0xff]   ;;  %v2732_v36 = vld [vmem:[%s3476_s1 + $0x268] sm:$0xff]  }
  0x22   :  { %2484 = vmatprep.subr.bf16.mxu1 %v2663_v37  ;;  %v2727_v31 = vld [vmem:[%s3476_s1 + $0x298] sm:$0xff]   ;;  %v2733_v37 = vld [vmem:[%s3476_s1 + $0x2e8] sm:$0xff]  }
  0x23   :  { %355 = vmatmul.mubr.bf16.vlgmr.msra.gmra.mrb[0].mxu0 %v2656_v32  ;;  %v2728_v32 = vld [vmem:[%s3476_s1 + $0x260] sm:$0xff]  }
  0x24   :  { %404 = vmatmul.mubr.bf16.vlgmr.msra.gmra.mrb[0].mxu1 %v2659_v34  ;;  %2457 = vmatpush3.bf16.msra.mxu0 %v2664_v38  ;;  %v2730_v34 = vld [vmem:[%s3476_s1 + $0x220] sm:$0xff]   ;;  %v2734_v38 = vld [vmem:[%s3476_s1 + $0x228] sm:$0xff]  }
  0x25   :  { %2485 = vmatpush3.bf16.msra.mxu1 %v2665_v39  ;;  %2458 = vmatprep.subr.bf16.mxu0 %v2666_v40  ;;  %v2735_v39 = vld [vmem:[%s3476_s1 + $0x2a8] sm:$0xff]   ;;  %v2736_v40 = vld [vmem:[%s3476_s1 + $0x270] sm:$0xff]  }
  0x26   :  { %2486 = vmatprep.subr.bf16.mxu1 %v2667_v41  ;;  %362 = vmatprep.mubr.bf16.mxu0 %v2670_v44  ;;  %v2737_v41 = vld [vmem:[%s3476_s1 + $0x2f0] sm:$0xff]   ;;  %v2740_v44 = vld [vmem:[%s3476_s1 + $0x278] sm:$0xff]  }
  0x27   :  { %411 = vmatprep.mubr.bf16.mxu1 %v2672_v45  ;;  %v2741_v45 = vld [vmem:[%s3476_s1 + $0x2f8] sm:$0xff]  }
  0x28   :  { %2459 = vmatpush3.bf16.msra.mxu0 %v2668_v42  ;;  %v2738_v42 = vld [vmem:[%s3476_s1 + $0x230] sm:$0xff]  }
  0x29   :  { %2487 = vmatpush3.bf16.msra.mxu1 %v2669_v43  ;;  %2460 = vmatprep.subr.bf16.mxu0 %v2676_v48  ;;  %v2739_v43 = vld [vmem:[%s3476_s1 + $0x2b0] sm:$0xff]  }
  0x2a   :  { %2488 = vmatprep.subr.bf16.mxu1 %v2677_v49  ;;  %v2744_v48 = vld [vmem:[%s3477_s0 + $0x80] ss:$16 sps:$4 sm:$0xff]   ;;  %v2746_v49 = vld [vmem:[%s3477_s0 + $0x84] ss:$16 sps:$4 sm:$0xff]  }
  0x2b   :  { %363 = vmatmul.mubr.bf16.gmra.mrb[4].mxu0 %v2674_v46  ;;  %v2742_v46 = vld [vmem:[%s3476_s1 + $0x238] sm:$0xff]  }
  0x2c   :  { %412 = vmatmul.mubr.bf16.gmra.mrb[4].mxu1 %v2675_v47  ;;  %2461 = vmatpush3.bf16.msra.mxu0 %v2678_v50  ;;  %v2743_v47 = vld [vmem:[%s3476_s1 + $0x2b8] sm:$0xff]  }
  0x2d   :  { %2489 = vmatpush3.bf16.msra.mxu1 %v2679_v51  ;;  %2462 = vmatprep.subr.bf16.mxu0 %v2680_v52  ;;  %v2747_v50 = vld [vmem:[%s3477_s0 + $0x88] ss:$16 sps:$4 sm:$0xff]   ;;  %v2749_v51 = vld [vmem:[%s3477_s0 + $0x8c] ss:$16 sps:$4 sm:$0xff]   ;;  %v2750_v52 = vld [vmem:[%s3476_s1 + $0x340] sm:$0xff]  }
  0x2e   :  { %2490 = vmatprep.subr.bf16.mxu1 %v2681_v53  ;;  %768 = vmatprep.mubr.bf16.mxu0 %v2702_v9  ;;  %v2751_v53 = vld [vmem:[%s3476_s1 + $0x3c0] sm:$0xff]  }
  0x2f   :  { %817 = vmatprep.mubr.bf16.mxu1 %v2705_v11  ;;  %v2773_v9 = vld [vmem:[%s3476_s1 + $0x3e0] sm:$0xff]  }
  0x30   :  { %2463 = vmatpush3.bf16.msra.mxu0 %v2682_v54  ;;  %v2752_v54 = vld [vmem:[%s3476_s1 + $0x300] sm:$0xff]  }
  0x31   :  { %2491 = vmatpush3.bf16.msra.mxu1 %v2683_v55  ;;  %2464 = vmatprep.subr.bf16.mxu0 %v2684_v56  ;;  %v2753_v55 = vld [vmem:[%s3476_s1 + $0x380] sm:$0xff]   ;;  %v2754_v56 = vld [vmem:[%s3476_s1 + $0x348] sm:$0xff]  }
  0x32   :  { %2492 = vmatprep.subr.bf16.mxu1 %v2685_v57  ;;  %v2755_v57 = vld [vmem:[%s3476_s1 + $0x3c8] sm:$0xff]   ;;  %v2775_v11 = vld [vmem:[%s3476_s1 + $0x3a0] sm:$0xff]  }
  0x34   :  { %2465 = vmatpush3.bf16.msra.mxu0 %v2686_v58  ;;  %v2756_v58 = vld [vmem:[%s3476_s1 + $0x308] sm:$0xff]  }
  0x35   :  { %2493 = vmatpush3.bf16.msra.mxu1 %v2687_v59  ;;  %2466 = vmatprep.subr.bf16.mxu0 %v2688_v60  ;;  %v2757_v59 = vld [vmem:[%s3476_s1 + $0x388] sm:$0xff]   ;;  %v2758_v60 = vld [vmem:[%s3477_s0 + $0xa4] ss:$16 sps:$4 sm:$0xff]  }
  0x36   :  { %2494 = vmatprep.subr.bf16.mxu1 %v2689_v61  ;;  %v2760_v61 = vld [vmem:[%s3477_s0 + $0xac] ss:$16 sps:$4 sm:$0xff]  }
  0x38   :  { %2467 = vmatpush3.bf16.msra.mxu0 %v2690_v62  ;;  %v2762_v62 = vld [vmem:[%s3477_s0 + $0xa0] ss:$16 sps:$4 sm:$0xff]  }
  0x39   :  { %2495 = vmatpush3.bf16.msra.mxu1 %v2691_v63  ;;  %2468 = vmatprep.subr.bf16.mxu0 %v2692_v0  ;;  %v2763_v63 = vld [vmem:[%s3477_s0 + $0xa8] ss:$16 sps:$4 sm:$0xff]   ;;  %v2764_v0 = vld [vmem:[%s3476_s1 + $0x350] sm:$0xff]  }
  0x3a   :  { %2496 = vmatprep.subr.bf16.mxu1 %v2693_v1  ;;  %v2765_v1 = vld [vmem:[%s3476_s1 + $0x3d0] sm:$0xff]  }
  0x3c   :  { %2469 = vmatpush3.bf16.msra.mxu0 %v2694_v2  ;;  %v2766_v2 = vld [vmem:[%s3476_s1 + $0x310] sm:$0xff]  }
  0x3d   :  { %2497 = vmatpush3.bf16.msra.mxu1 %v2695_v3  ;;  %2470 = vmatprep.subr.bf16.mxu0 %v2696_v4  ;;  %v2767_v3 = vld [vmem:[%s3476_s1 + $0x390] sm:$0xff]   ;;  %v2768_v4 = vld [vmem:[%s3476_s1 + $0x358] sm:$0xff]  }
  0x3e   :  { %2498 = vmatprep.subr.bf16.mxu1 %v2697_v5  ;;  %v2769_v5 = vld [vmem:[%s3476_s1 + $0x3d8] sm:$0xff]  }
  0x40   :  { %2471 = vmatpush3.bf16.msra.mxu0 %v2698_v6  ;;  %v2770_v6 = vld [vmem:[%s3476_s1 + $0x318] sm:$0xff]  }
  0x41   :  { %2499 = vmatpush3.bf16.msra.mxu1 %v2699_v7  ;;  %2512 = vmatprep.subr.bf16.mxu0 %v2706_v12  ;;  %v2771_v7 = vld [vmem:[%s3476_s1 + $0x398] sm:$0xff]   ;;  %v2776_v12 = vld [vmem:[%s3476_s1 + $0x368] sm:$0xff]  }
  0x42   :  { %2540 = vmatprep.subr.bf16.mxu1 %v2707_v13  ;;  %v2777_v13 = vld [vmem:[%s3476_s1 + $0x3e8] sm:$0xff]  }
  0x43   :  { %769 = vmatmul.mubr.bf16.vlgmr.msra.gmra.mrb[8].mxu0 %v2700_v8  ;;  %v2772_v8 = vld [vmem:[%s3476_s1 + $0x360] sm:$0xff]  }
  0x44   :  { %818 = vmatmul.mubr.bf16.vlgmr.msra.gmra.mrb[8].mxu1 %v2703_v10  ;;  %2513 = vmatpush3.bf16.msra.mxu0 %v2708_v14  ;;  %v2774_v10 = vld [vmem:[%s3476_s1 + $0x320] sm:$0xff]   ;;  %v2778_v14 = vld [vmem:[%s3476_s1 + $0x328] sm:$0xff]  }
  0x45   :  { %2541 = vmatpush3.bf16.msra.mxu1 %v2709_v15  ;;  %2514 = vmatprep.subr.bf16.mxu0 %v2710_v16  ;;  %v2779_v15 = vld [vmem:[%s3476_s1 + $0x3a8] sm:$0xff]   ;;  %v2780_v16 = vld [vmem:[%s3476_s1 + $0x370] sm:$0xff]  }
  0x46   :  { %2542 = vmatprep.subr.bf16.mxu1 %v2711_v17  ;;  %776 = vmatprep.mubr.bf16.mxu0 %v2714_v20  ;;  %v2781_v17 = vld [vmem:[%s3476_s1 + $0x3f0] sm:$0xff]   ;;  %v2784_v20 = vld [vmem:[%s3476_s1 + $0x378] sm:$0xff]  }
  0x47   :  { %825 = vmatprep.mubr.bf16.mxu1 %v2716_v21  ;;  %v2785_v21 = vld [vmem:[%s3476_s1 + $0x3f8] sm:$0xff]  }
  0x48   :  { %2515 = vmatpush3.bf16.msra.mxu0 %v2712_v18  ;;  %v2782_v18 = vld [vmem:[%s3476_s1 + $0x330] sm:$0xff]  }
  0x49   :  { %2543 = vmatpush3.bf16.msra.mxu1 %v2713_v19  ;;  %2516 = vmatprep.subr.bf16.mxu0 %v2720_v24  ;;  %v2783_v19 = vld [vmem:[%s3476_s1 + $0x3b0] sm:$0xff]  }
  0x4a   :  { %2544 = vmatprep.subr.bf16.mxu1 %v2721_v25  ;;  %v2788_v24 = vld [vmem:[%s3477_s0 + $0xc0] ss:$16 sps:$4 sm:$0xff]   ;;  %v2790_v25 = vld [vmem:[%s3477_s0 + $0xc4] ss:$16 sps:$4 sm:$0xff]  }
  0x4b   :  { %777 = vmatmul.mubr.bf16.gmra.mrb[12].mxu0 %v2718_v22  ;;  %v2786_v22 = vld [vmem:[%s3476_s1 + $0x338] sm:$0xff]  }
  0x4c   :  { %826 = vmatmul.mubr.bf16.gmra.mrb[12].mxu1 %v2719_v23  ;;  %2517 = vmatpush3.bf16.msra.mxu0 %v2722_v26  ;;  %v2787_v23 = vld [vmem:[%s3476_s1 + $0x3b8] sm:$0xff]  }
  0x4d   :  { %2545 = vmatpush3.bf16.msra.mxu1 %v2723_v27  ;;  %2518 = vmatprep.subr.bf16.mxu0 %v2724_v28  ;;  %v2791_v26 = vld [vmem:[%s3477_s0 + $0xc8] ss:$16 sps:$4 sm:$0xff]   ;;  %v2793_v27 = vld [vmem:[%s3477_s0 + $0xcc] ss:$16 sps:$4 sm:$0xff]   ;;  %v2794_v28 = vld [vmem:[%s3477_s0 + $0xe4] ss:$16 sps:$4 sm:$0xff]  }
  0x4e   :  { %2546 = vmatprep.subr.bf16.mxu1 %v2725_v29  ;;  %1182 = vmatprep.mubr.bf16.mxu0 %v2746_v49  ;;  %v2796_v29 = vld [vmem:[%s3477_s0 + $0xec] ss:$16 sps:$4 sm:$0xff]  }
  0x4f   :  { %1231 = vmatprep.mubr.bf16.mxu1 %v2749_v51 }
  0x50   :  { %2519 = vmatpush3.bf16.msra.mxu0 %v2726_v30  ;;  %v2798_v30 = vld [vmem:[%s3477_s0 + $0xe0] ss:$16 sps:$4 sm:$0xff]  }
  0x51   :  { %2547 = vmatpush3.bf16.msra.mxu1 %v2727_v31  ;;  %2520 = vmatprep.subr.bf16.mxu0 %v2728_v32  ;;  %v2799_v31 = vld [vmem:[%s3477_s0 + $0xe8] ss:$16 sps:$4 sm:$0xff]  }
  0x52   :  { %2548 = vmatprep.subr.bf16.mxu1 %v2729_v33 }
  0x54   :  { %2521 = vmatpush3.bf16.msra.mxu0 %v2730_v34 }
  0x55   :  { %2549 = vmatpush3.bf16.msra.mxu1 %v2731_v35  ;;  %2522 = vmatprep.subr.bf16.mxu0 %v2732_v36 }
  0x56   :  { %2550 = vmatprep.subr.bf16.mxu1 %v2733_v37 }
  0x58   :  { %2523 = vmatpush3.bf16.msra.mxu0 %v2734_v38 }
  0x59   :  { %2551 = vmatpush3.bf16.msra.mxu1 %v2735_v39  ;;  %2524 = vmatprep.subr.bf16.mxu0 %v2736_v40 }
  0x5a   :  { %2552 = vmatprep.subr.bf16.mxu1 %v2737_v41 }
  0x5c   :  { %2525 = vmatpush3.bf16.msra.mxu0 %v2738_v42 }
  0x5d   :  { %2553 = vmatpush3.bf16.msra.mxu1 %v2739_v43  ;;  %2526 = vmatprep.subr.bf16.mxu0 %v2740_v44 }
  0x5e   :  { %2554 = vmatprep.subr.bf16.mxu1 %v2741_v45 }
  0x60   :  { %2527 = vmatpush3.bf16.msra.mxu0 %v2742_v46 }
  0x61   :  { %2555 = vmatpush3.bf16.msra.mxu1 %v2743_v47  ;;  %2568 = vmatprep.subr.bf16.mxu0 %v2750_v52 }
  0x62   :  { %2596 = vmatprep.subr.bf16.mxu1 %v2751_v53 }
  0x63   :  { %1183 = vmatmul.mubr.bf16.vlgmr.msra.gmra.mrb[16].mxu0 %v2744_v48 }
  0x64   :  { %1232 = vmatmul.mubr.bf16.vlgmr.msra.gmra.mrb[16].mxu1 %v2747_v50  ;;  %2569 = vmatpush3.bf16.msra.mxu0 %v2752_v54 }
  0x65   :  { %2597 = vmatpush3.bf16.msra.mxu1 %v2753_v55  ;;  %2570 = vmatprep.subr.bf16.mxu0 %v2754_v56 }
  0x66   :  { %2598 = vmatprep.subr.bf16.mxu1 %v2755_v57  ;;  %1190 = vmatprep.mubr.bf16.mxu0 %v2758_v60 }
  0x67   :  { %1239 = vmatprep.mubr.bf16.mxu1 %v2760_v61 }
  0x68   :  { %2571 = vmatpush3.bf16.msra.mxu0 %v2756_v58 }
  0x69   :  { %2599 = vmatpush3.bf16.msra.mxu1 %v2757_v59  ;;  %2572 = vmatprep.subr.bf16.mxu0 %v2764_v0 }
  0x6a   :  { %2600 = vmatprep.subr.bf16.mxu1 %v2765_v1 }
  0x6b   :  { %1191 = vmatmul.mubr.bf16.gmra.mrb[20].mxu0 %v2762_v62 }
  0x6c   :  { %1240 = vmatmul.mubr.bf16.gmra.mrb[20].mxu1 %v2763_v63  ;;  %2573 = vmatpush3.bf16.msra.mxu0 %v2766_v2 }
  0x6d   :  { %2601 = vmatpush3.bf16.msra.mxu1 %v2767_v3  ;;  %2574 = vmatprep.subr.bf16.mxu0 %v2768_v4 }
  0x6e   :  { %2602 = vmatprep.subr.bf16.mxu1 %v2769_v5  ;;  %1596 = vmatprep.mubr.bf16.mxu0 %v2790_v25 }
  0x6f   :  { %1645 = vmatprep.mubr.bf16.mxu1 %v2793_v27 }
  0x70   :  { %2575 = vmatpush3.bf16.msra.mxu0 %v2770_v6 }
  0x71   :  { %2603 = vmatpush3.bf16.msra.mxu1 %v2771_v7  ;;  %2576 = vmatprep.subr.bf16.mxu0 %v2772_v8 }
  0x72   :  { %2604 = vmatprep.subr.bf16.mxu1 %v2773_v9 }
  0x74   :  { %2577 = vmatpush3.bf16.msra.mxu0 %v2774_v10 }
  0x75   :  { %2605 = vmatpush3.bf16.msra.mxu1 %v2775_v11  ;;  %2578 = vmatprep.subr.bf16.mxu0 %v2776_v12 }
  0x76   :  { %2606 = vmatprep.subr.bf16.mxu1 %v2777_v13 }
  0x78   :  { %2579 = vmatpush3.bf16.msra.mxu0 %v2778_v14 }
  0x79   :  { %2607 = vmatpush3.bf16.msra.mxu1 %v2779_v15  ;;  %2580 = vmatprep.subr.bf16.mxu0 %v2780_v16 }
  0x7a   :  { %2608 = vmatprep.subr.bf16.mxu1 %v2781_v17 }
  0x7c   :  { %2581 = vmatpush3.bf16.msra.mxu0 %v2782_v18 }
  0x7d   :  { %2609 = vmatpush3.bf16.msra.mxu1 %v2783_v19  ;;  %2582 = vmatprep.subr.bf16.mxu0 %v2784_v20 }
  0x7e   :  { %2610 = vmatprep.subr.bf16.mxu1 %v2785_v21 }
  0x80   :  { %2583 = vmatpush3.bf16.msra.mxu0 %v2786_v22 }
  0x81   :  { %2611 = vmatpush3.bf16.msra.mxu1 %v2787_v23 }
  0x83   :  { %1597 = vmatmul.mubr.bf16.vlgmr.msra.gmra.mrb[24].mxu0 %v2788_v24 }
  0x84   :  { %1646 = vmatmul.mubr.bf16.vlgmr.msra.gmra.mrb[24].mxu1 %v2791_v26  ;;  %1604 = vmatprep.mubr.bf16.mxu0 %v2794_v28 }
  0x85   :  { %1653 = vmatprep.mubr.bf16.mxu1 %v2796_v29 }
  0x8b   :  { %1605 = vmatmul.mubr.bf16.gmra.mrb[28].mxu0 %v2798_v30 }
  0x8c   :  { %1654 = vmatmul.mubr.bf16.gmra.mrb[28].mxu1 %v2799_v31 }
  0xf6   :  { %v2416_v32 = vpop.f32.mrb[0].mxu0 }
  0xf7   :  { %v2444_v33 = vpop.f32.mrb[0].mxu1  ;;  %v2417_v34 = vpop.f32.mrb[1].mxu0 }
  0xf8   :  { %v2418_v35 = vadd.f32 %v2417_v34, %v2416_v32  ;;  %v2445_v36 = vpop.f32.mrb[1].mxu1  ;;  %v2419_v37 = vpop.f32.mrb[2].mxu0 }
  0xf9   :  { %v2446_v38 = vadd.f32 %v2445_v36, %v2444_v33  ;;  %v2447_v39 = vpop.f32.mrb[2].mxu1  ;;  %v2420_v40 = vpop.f32.mrb[3].mxu0 }
  0xfa   :  { %v2421_v41 = vadd.f32 %v2420_v40, %v2419_v37  ;;  %v2448_v42 = vpop.f32.mrb[3].mxu1 }
  0xfb   :  { %v3307_v43 = vadd.f32 %v2446_v38, %v2418_v35  ;;  %v2449_v44 = vadd.f32 %v2448_v42, %v2447_v39 }
  0xfd   :  { %v3309_v45 = vadd.f32 %v2449_v44, %v2421_v41 }
  0xfe   :  { %v2422_v46 = vpop.f32.mrb[4].mxu0 }
  0xff   :  { %v2450_v47 = vpop.f32.mrb[4].mxu1  ;;  %v2423_v48 = vpop.f32.mrb[5].mxu0 }
 0x100   :  { %v2424_v49 = vadd.f32 %v2423_v48, %v2422_v46  ;;  %v2451_v50 = vpop.f32.mrb[5].mxu1  ;;  %v2425_v51 = vpop.f32.mrb[6].mxu0 }
 0x101   :  { %v2452_v52 = vadd.f32 %v2451_v50, %v2450_v47  ;;  %v2453_v53 = vpop.f32.mrb[6].mxu1  ;;  %v2426_v54 = vpop.f32.mrb[7].mxu0 }
 0x102   :  { %v2427_v55 = vadd.f32 %v2426_v54, %v2425_v51  ;;  %v2454_v56 = vpop.f32.mrb[7].mxu1 }
 0x103   :  { %v3311_v57 = vadd.f32 %v2452_v52, %v2424_v49  ;;  %v2455_v58 = vadd.f32 %v2454_v56, %v2453_v53 }
 0x105   :  { %v3313_v59 = vadd.f32 %v2455_v58, %v2427_v55  ;;  %v420_v55 = vadd.f32 %v3309_v45, %v3307_v43 }
 0x116   :  { %v2472_v60 = vpop.f32.mrb[8].mxu0 }
 0x117   :  { %v2500_v61 = vpop.f32.mrb[8].mxu1  ;;  %v2473_v62 = vpop.f32.mrb[9].mxu0 }
 0x118   :  { %v2474_v63 = vadd.f32 %v2473_v62, %v2472_v60  ;;  %v2501_v0 = vpop.f32.mrb[9].mxu1  ;;  %v2475_v1 = vpop.f32.mrb[10].mxu0  ;;  %v421_v60 = vadd.f32 %v420_v55, %v3311_v57 }
 0x119   :  { %v2502_v2 = vadd.f32 %v2501_v0, %v2500_v61  ;;  %v2503_v3 = vpop.f32.mrb[10].mxu1  ;;  %v2476_v4 = vpop.f32.mrb[11].mxu0 }
 0x11a   :  { %v2477_v5 = vadd.f32 %v2476_v4, %v2475_v1  ;;  %v2504_v6 = vpop.f32.mrb[11].mxu1 }
 0x11b   :  { %v3315_v7 = vadd.f32 %v2502_v2, %v2474_v63  ;;  %v2505_v8 = vadd.f32 %v2504_v6, %v2503_v3  ;;  %v422_v63 = vadd.f32 %v421_v60, %v3313_v59 }
 0x11d   :  { %v3317_v9 = vadd.f32 %v2505_v8, %v2477_v5 }
 0x11e   :  { %v2478_v10 = vpop.f32.mrb[12].mxu0 }
 0x11f   :  { %v2506_v11 = vpop.f32.mrb[12].mxu1  ;;  %v2479_v12 = vpop.f32.mrb[13].mxu0  ;;  %v834_v54 = vadd.f32 %v3317_v9, %v3315_v7 }
 0x120   :  { %v2507_v13 = vpop.f32.mrb[13].mxu1  ;;  %v2480_v14 = vadd.f32 %v2479_v12, %v2478_v10  ;;  %v2481_v16 = vpop.f32.mrb[14].mxu0 }
 0x121   :  { %v2508_v15 = vadd.f32 %v2507_v13, %v2506_v11  ;;  %v2509_v17 = vpop.f32.mrb[14].mxu1  ;;  %v2482_v18 = vpop.f32.mrb[15].mxu0  ;;  %v423_v13 = vrot.slane %v422_v63, 4 }
 0x122   :  { %v2510_v19 = vpop.f32.mrb[15].mxu1  ;;  %v2483_v21 = vadd.f32 %v2482_v18, %v2481_v16 }
 0x123   :  { %v3319_v20 = vadd.f32 %v2508_v15, %v2480_v14  ;;  %v2511_v22 = vadd.f32 %v2510_v19, %v2509_v17 }
 0x125   :  { %v3321_v23 = vadd.f32 %v2511_v22, %v2483_v21  ;;  %v835_v56 = vadd.f32 %v834_v54, %v3319_v20  ;;  %v424_v22 = vadd.f32 %v423_v13, %v422_v63 }
 0x127   :  { %v836_v62 = vadd.f32 %v835_v56, %v3321_v23 }
 0x129   :  { %v837_v8 = vrot.slane %v836_v62, 4 }
 0x12b   :  { %v838_v19 = vadd.f32 %v837_v8, %v836_v62 }
 0x136   :  { %v2528_v24 = vpop.f32.mrb[16].mxu0 }
 0x137   :  { %v2529_v25 = vpop.f32.mrb[17].mxu0  ;;  %v2556_v26 = vpop.f32.mrb[16].mxu1 }
 0x138   :  { %v2530_v27 = vadd.f32 %v2529_v25, %v2528_v24  ;;  %v2531_v28 = vpop.f32.mrb[18].mxu0  ;;  %v2557_v29 = vpop.f32.mrb[17].mxu1 }
 0x139   :  { %v2532_v30 = vpop.f32.mrb[19].mxu0  ;;  %v2558_v31 = vadd.f32 %v2557_v29, %v2556_v26  ;;  %v2559_v32 = vpop.f32.mrb[18].mxu1 }
 0x13a   :  { %v2533_v33 = vadd.f32 %v2532_v30, %v2531_v28  ;;  %v2560_v34 = vpop.f32.mrb[19].mxu1 }
 0x13b   :  { %v3323_v35 = vadd.f32 %v2558_v31, %v2530_v27  ;;  %v2561_v36 = vadd.f32 %v2560_v34, %v2559_v32  ;;  %v839_v31 = vrot.slane %v838_v19, 2 }
 0x13d   :  { %v3325_v37 = vadd.f32 %v2561_v36, %v2533_v33  ;;  %v425_v36 = vrot.slane %v424_v22, 2 }
 0x13e   :  { %v2534_v38 = vpop.f32.mrb[20].mxu0 }
 0x13f   :  { %v2562_v39 = vpop.f32.mrb[20].mxu1  ;;  %v2535_v40 = vpop.f32.mrb[21].mxu0  ;;  %v1248_v58 = vadd.f32 %v3325_v37, %v3323_v35 }
 0x140   :  { %v2536_v41 = vadd.f32 %v2535_v40, %v2534_v38  ;;  %v2563_v42 = vpop.f32.mrb[21].mxu1  ;;  %v2537_v44 = vpop.f32.mrb[22].mxu0 }
 0x141   :  { %v2564_v46 = vadd.f32 %v2563_v42, %v2562_v39  ;;  %v2565_v47 = vpop.f32.mrb[22].mxu1  ;;  %v2538_v48 = vpop.f32.mrb[23].mxu0 }
 0x142   :  { %v2539_v49 = vadd.f32 %v2538_v48, %v2537_v44  ;;  %v2566_v50 = vpop.f32.mrb[23].mxu1 }
 0x143   :  { %v3327_v51 = vadd.f32 %v2564_v46, %v2536_v41  ;;  %v2567_v52 = vadd.f32 %v2566_v50, %v2565_v47  ;;  %v840_v46 = vadd.f32 %v839_v31, %v838_v19 }
 0x145   :  { %v3329_v53 = vadd.f32 %v2567_v52, %v2539_v49  ;;  %v1249_v61 = vadd.f32 %v1248_v58, %v3327_v51  ;;  %v426_v49 = vadd.f32 %v425_v36, %v424_v22  ;;  %v841_v54 = vrot.slane %v840_v46, 1 }
 0x147   :  { %v1250_v1 = vadd.f32 %v1249_v61, %v3329_v53  ;;  %v427_v56 = vrot.slane %v426_v49, 1  ;;  %v842_v61 = vadd.f32 %v841_v54, %v840_v46 }
 0x149   :  { %v1251_v16 = vrot.slane %v1250_v1, 4  ;;  %v428_v63 = vadd.f32 %v427_v56, %v426_v49 }
 0x14b   :  { %v1252_v25 = vadd.f32 %v1251_v16, %v1250_v1 }
 0x14d   :  { %v1253_v40 = vrot.slane %v1252_v25, 2 }
 0x14f   :  { %v1254_v50 = vadd.f32 %v1253_v40, %v1252_v25 }
 0x151   :  { %v1255_v58 = vrot.slane %v1254_v50, 1 }
 0x156   :  { %v2584_v0 = vpop.f32.mrb[24].mxu0 }
 0x157   :  { %v2612_v2 = vpop.f32.mrb[24].mxu1  ;;  %v2585_v3 = vpop.f32.mrb[25].mxu0 }
 0x158   :  { %v2586_v4 = vadd.f32 %v2585_v3, %v2584_v0  ;;  %v2613_v5 = vpop.f32.mrb[25].mxu1  ;;  %v2587_v6 = vpop.f32.mrb[26].mxu0  ;;  %v1256_v0 = vadd.f32 %v1255_v58, %v1254_v50 }
 0x159   :  { %v2614_v10 = vadd.f32 %v2613_v5, %v2612_v2  ;;  %v2615_v11 = vpop.f32.mrb[26].mxu1  ;;  %v2588_v12 = vpop.f32.mrb[27].mxu0  ;;  %v843_v2 = vadd.f32 %v842_v61, %v428_v63 }
 0x15a   :  { %v2589_v14 = vadd.f32 %v2588_v12, %v2587_v6  ;;  %v2616_v15 = vpop.f32.mrb[27].mxu1 }
 0x15b   :  { %v3343_v17 = vadd.f32 %v2614_v10, %v2586_v4  ;;  %v2617_v18 = vadd.f32 %v2616_v15, %v2615_v11  ;;  %v1257_v4 = vadd.f32 %v1256_v0, %v843_v2 }
 0x15d   :  { %v3345_v21 = vadd.f32 %v2617_v18, %v2589_v14 }
 0x15e   :  { %v2590_v24 = vpop.f32.mrb[28].mxu0 }
 0x15f   :  { %v2618_v26 = vpop.f32.mrb[28].mxu1  ;;  %v2591_v27 = vpop.f32.mrb[29].mxu0  ;;  %v1662_v41 = vadd.f32 %v3345_v21, %v3343_v17 }
 0x160   :  { %v2592_v28 = vadd.f32 %v2591_v27, %v2590_v24  ;;  %v2619_v29 = vpop.f32.mrb[29].mxu1  ;;  %v2593_v30 = vpop.f32.mrb[30].mxu0 }
 0x161   :  { %v2620_v32 = vadd.f32 %v2619_v29, %v2618_v26  ;;  %v2621_v33 = vpop.f32.mrb[30].mxu1  ;;  %v2594_v34 = vpop.f32.mrb[31].mxu0 }
 0x162   :  { %v2595_v38 = vadd.f32 %v2594_v34, %v2593_v30  ;;  %v2622_v39 = vpop.f32.mrb[31].mxu1 }
 0x163   :  { %v3349_v42 = vadd.f32 %v2620_v32, %v2592_v28  ;;  %v2623_v44 = vadd.f32 %v2622_v39, %v2621_v33 }
 0x165   :  { %v1663_v47 = vadd.f32 %v1662_v41, %v3349_v42  ;;  %v3352_v48 = vadd.f32 %v2623_v44, %v2595_v38 }
 0x167   :  { %v1664_v52 = vadd.f32 %v1663_v47, %v3352_v48 }
 0x169   :  { %v1665_v55 = vrot.slane %v1664_v52, 4 }
 0x16b   :  { %v1666_v60 = vadd.f32 %v1665_v55, %v1664_v52 }
 0x16d   :  { %v1667_v62 = vrot.slane %v1666_v60, 2 }
 0x16f   :  { %v1668_v1 = vadd.f32 %v1667_v62, %v1666_v60 }
 0x171   :  { %v1669_v3 = vrot.slane %v1668_v1, 1 }
 0x173   :  { %v1670_v5 = vadd.f32 %v1669_v3, %v1668_v1 }
 0x175   :  { %v1671_v6 = vadd.f32 %v1670_v5, %v1257_v4 }
 0x177   :  { %v3355_v8 = vmul.f32 0.0078125, %v1671_v6 }
 0x179   :  { %v1674_v10 = vsub.f32 %v3307_v43, %v3355_v8  ;;  %v1675_v11 = vsub.f32 %v3309_v45, %v3355_v8  ;;  %v1676_v12 = vsub.f32 %v3311_v57, %v3355_v8  ;;  %v1677_v13 = vsub.f32 %v3313_v59, %v3355_v8 }
 0x17a   :  { %v1692_v14 = vsub.f32 %v3315_v7, %v3355_v8  ;;  %v1693_v15 = vsub.f32 %v3317_v9, %v3355_v8  ;;  %v1694_v16 = vsub.f32 %v3319_v20, %v3355_v8  ;;  %v1695_v24 = vsub.f32 %v3321_v23, %v3355_v8 }
 0x17b   :  { %v1678_v18 = vmul.f32 %v1674_v10, %v1674_v10  ;;  %v1679_v19 = vmul.f32 %v1675_v11, %v1675_v11  ;;  %v1680_v22 = vmul.f32 %v1676_v12, %v1676_v12  ;;  %v1681_v25 = vmul.f32 %v1677_v13, %v1677_v13 }
 0x17c   :  { %v1696_v26 = vmul.f32 %v1692_v14, %v1692_v14  ;;  %v1697_v27 = vmul.f32 %v1693_v15, %v1693_v15  ;;  %v1698_v28 = vmul.f32 %v1694_v16, %v1694_v16  ;;  %v1710_v30 = vsub.f32 %v3323_v35, %v3355_v8 }
 0x17d   :  { %v1682_v29 = vadd.f32 %v1679_v19, %v1678_v18  ;;  %v1711_v31 = vsub.f32 %v3325_v37, %v3355_v8  ;;  %v1712_v32 = vsub.f32 %v3327_v51, %v3355_v8  ;;  %v1713_v34 = vsub.f32 %v3329_v53, %v3355_v8 }
 0x17e   :  { %v1700_v33 = vadd.f32 %v1697_v27, %v1696_v26  ;;  %v1728_v36 = vsub.f32 %v3343_v17, %v3355_v8  ;;  %v1729_v38 = vsub.f32 %v3345_v21, %v3355_v8  ;;  %v1699_v40 = vmul.f32 %v1695_v24, %v1695_v24 }
 0x17f   :  { %v1683_v39 = vadd.f32 %v1682_v29, %v1680_v22  ;;  %v1714_v41 = vmul.f32 %v1710_v30, %v1710_v30  ;;  %v1715_v44 = vmul.f32 %v1711_v31, %v1711_v31  ;;  %v1716_v47 = vmul.f32 %v1712_v32, %v1712_v32 }
 0x180   :  { %v1701_v46 = vadd.f32 %v1700_v33, %v1698_v28  ;;  %v1730_v49 = vsub.f32 %v3349_v42, %v3355_v8  ;;  %v1731_v50 = vsub.f32 %v3352_v48, %v3355_v8  ;;  %v1732_v55 = vmul.f32 %v1728_v36, %v1728_v36 }
 0x181   :  { %v1684_v52 = vadd.f32 %v1683_v39, %v1681_v25  ;;  %v1718_v54 = vadd.f32 %v1715_v44, %v1714_v41  ;;  %v1733_v56 = vmul.f32 %v1729_v38, %v1729_v38  ;;  %v1717_v60 = vmul.f32 %v1713_v34, %v1713_v34 }
 0x182   :  { %v1702_v58 = vadd.f32 %v1701_v46, %v1699_v40  ;;  %v1734_v63 = vmul.f32 %v1730_v49, %v1730_v49  ;;  %v1735_v4 = vmul.f32 %v1731_v50, %v1731_v50  ;;  %v1755_v44 = vlaneseq }
 0x183   :  { %v1685_v61 = vrot.slane %v1684_v52, 4  ;;  %v1719_v62 = vadd.f32 %v1718_v54, %v1716_v47  ;;  %v1736_v0 = vadd.f32 %v1733_v56, %v1732_v55  ;;  %v1749_v47 = vld [vmem:[%s3478_s2] sm:$0x1] }
 0x184   :  { %v1703_v1 = vrot.slane %v1702_v58, 4  ;;  %v1756_v46 = vshrl.u32 %v1755_v44, 7  ;;  %v1751_v54 = vld [vmem:[%s3479_s3] sm:$0x1] }
 0x185   :  { %v1686_v2 = vadd.f32 %v1685_v61, %v1684_v52  ;;  %v1720_v3 = vadd.f32 %v1719_v62, %v1717_v60  ;;  %v1737_v5 = vadd.f32 %v1736_v0, %v1734_v63 }
 0x186   :  { %v1704_v6 = vadd.f32 %v1703_v1, %v1702_v58  ;;  %v1757_v49 = vsub.s32 0, %v1756_v46 }
 0x187   :  { %v1687_v10 = vrot.slane %v1686_v2, 2  ;;  %v1721_v11 = vrot.slane %v1720_v3, 4  ;;  %v1738_v12 = vadd.f32 %v1737_v5, %v1735_v4 }
 0x188   :  { %v1705_v13 = vrot.slane %v1704_v6, 2 }
 0x189   :  { %v1688_v14 = vadd.f32 %v1687_v10, %v1686_v2  ;;  %v1722_v15 = vadd.f32 %v1721_v11, %v1720_v3  ;;  %v1739_v16 = vrot.slane %v1738_v12, 4 }
 0x18a   :  { %v1706_v18 = vadd.f32 %v1705_v13, %v1704_v6 }
 0x18b   :  { %v1689_v19 = vrot.slane %v1688_v14, 1  ;;  %v1723_v22 = vrot.slane %v1722_v15, 2  ;;  %v1740_v24 = vadd.f32 %v1739_v16, %v1738_v12 }
 0x18c   :  { %v1707_v25 = vrot.slane %v1706_v18, 1 }
 0x18d   :  { %v1690_v26 = vadd.f32 %v1689_v19, %v1688_v14  ;;  %v1724_v27 = vadd.f32 %v1723_v22, %v1722_v15  ;;  %v1741_v28 = vrot.slane %v1740_v24, 2 }
 0x18e   :  { %v1708_v29 = vadd.f32 %v1707_v25, %v1706_v18 }
 0x18f   :  { %v1725_v30 = vrot.slane %v1724_v27, 1  ;;  %v1742_v31 = vadd.f32 %v1741_v28, %v1740_v24 }
 0x190   :  { %v1709_v32 = vadd.f32 %v1708_v29, %v1690_v26 }
 0x191   :  { %v1726_v33 = vadd.f32 %v1725_v30, %v1724_v27  ;;  %v1743_v34 = vrot.slane %v1742_v31, 1 }
 0x193   :  { %v1727_v36 = vadd.f32 %v1726_v33, %v1709_v32  ;;  %v1744_v38 = vadd.f32 %v1743_v34, %v1742_v31 }
 0x195   :  { %v1745_v39 = vadd.f32 %v1744_v38, %v1727_v36 }
 0x197   :  { %v1746_v40 = vmul.f32 0.0078125, %v1745_v39 }
 0x199   :  { %v1747_v41 = vadd.f32 1e-05, %v1746_v40 }
 0x19b   :  { %2800 = vrsqrt.f32 %v1747_v41 }
 0x1a5   :  { %v2801_v50 = vpop.eup %2800 }
 0x1a6   :  { %v1750_v52 = vmul.f32 %v2801_v50, %v1749_v47 }
 0x1a8   :  { %v1752_v55 = vmul.f32 %v1750_v52, %v3355_v8  ;;  %v3396_v56 = vrot.slane %v1750_v52, %v1757_v49 }
 0x1aa   :  { %v1753_v58 = vsub.f32 %v1751_v54, %v1752_v55  ;;  %v1760_v60 = vmul.f32 %v3396_v56, %v3307_v43  ;;  %v1761_v61 = vmul.f32 %v3396_v56, %v3309_v45  ;;  %v1762_v62 = vmul.f32 %v3396_v56, %v3311_v57 }
 0x1ab   :  { %v1763_v63 = vmul.f32 %v3396_v56, %v3313_v59  ;;  %v1806_v0 = vmul.f32 %v3396_v56, %v3315_v7  ;;  %v1807_v8 = vmul.f32 %v3396_v56, %v3317_v9  ;;  %v1808_v1 = vmul.f32 %v3396_v56, %v3319_v20 }
 0x1ac   :  { %v3412_v2 = vrot.slane %v1753_v58, %v1757_v49  ;;  %v1809_v43 = vmul.f32 %v3396_v56, %v3321_v23  ;;  %v1847_v45 = vmul.f32 %v3396_v56, %v3323_v35  ;;  %v1848_v57 = vmul.f32 %v3396_v56, %v3325_v37 }
 0x1ad   :  { %v1849_v59 = vmul.f32 %v3396_v56, %v3327_v51  ;;  %v1850_v7 = vmul.f32 %v3396_v56, %v3329_v53  ;;  %v1888_v9 = vmul.f32 %v3396_v56, %v3343_v17  ;;  %v1889_v20 = vmul.f32 %v3396_v56, %v3345_v21 }
 0x1ae   :  { %v1770_v23 = vadd.f32 %v3412_v2, %v1760_v60  ;;  %v1771_v3 = vadd.f32 %v3412_v2, %v1761_v61  ;;  %v1772_v35 = vadd.f32 %v3412_v2, %v1762_v62  ;;  %v1773_v37 = vadd.f32 %v3412_v2, %v1763_v63 }
 0x1af   :  { %v1810_v4 = vadd.f32 %v1806_v0, %v3412_v2  ;;  %v1811_v51 = vadd.f32 %v1807_v8, %v3412_v2  ;;  %v1812_v53 = vadd.f32 %v1808_v1, %v3412_v2  ;;  %v1813_v5 = vadd.f32 %v1809_v43, %v3412_v2 }
 0x1b0   :  { %vm1774_vm0 = vcmp.ge.f32.partialorder %v1770_v23, 0.0  ;;  %vm1775_vm1 = vcmp.ge.f32.partialorder %v1771_v3, 0.0  ;;  %vm1776_vm2 = vcmp.ge.f32.partialorder %v1772_v35, 0.0  ;;  %vm1777_vm3 = vcmp.ge.f32.partialorder %v1773_v37, 0.0 }
 0x1b1   :  { %v1778_v17 = vmul.f32 0.01, %v1770_v23  ;;  %v1779_v21 = vmul.f32 0.01, %v1771_v3  ;;  %v1780_v6 = vmul.f32 0.01, %v1772_v35  ;;  %v1851_v10 = vadd.f32 %v1847_v45, %v3412_v2 }
 0x1b2   :  { %v1781_v11 = vmul.f32 0.01, %v1773_v37  ;;  %vm1814_vm4 = vcmp.ge.f32.partialorder %v1810_v4, 0.0  ;;  %vm1815_vm5 = vcmp.ge.f32.partialorder %v1811_v51, 0.0  ;;  %vm1816_vm6 = vcmp.ge.f32.partialorder %v1812_v53, 0.0 }
 0x1b3   :  { %v1782_v12 = vsel %vm1774_vm0, %v1770_v23, %v1778_v17  ;;  %v1783_v13 = vsel %vm1775_vm1, %v1771_v3, %v1779_v21  ;;  %v1784_v14 = vsel %vm1776_vm2, %v1772_v35, %v1780_v6  ;;  %vm1817_vm7 = vcmp.ge.f32.partialorder %v1813_v5, 0.0 }
 0x1b4   :  { %v1785_v15 = vsel %vm1777_vm3, %v1773_v37, %v1781_v11  ;;  %v2356_v16 = vpack.c.bf16 %v1783_v13, %v1782_v12  ;;  %v1818_v18 = vmul.f32 0.01, %v1810_v4  ;;  %v1819_v19 = vmul.f32 0.01, %v1811_v51 }
 0x1b5   :  { %v2361_v22 = vpack.c.bf16 %v1785_v15, %v1784_v14  ;;  %v1820_v24 = vmul.f32 0.01, %v1812_v53  ;;  %v1821_v25 = vmul.f32 0.01, %v1813_v5  ;;  %v1852_v26 = vadd.f32 %v1848_v57, %v3412_v2 }
 0x1b6   :  { %2357 = vst [vmem:[%s3480_s4] sm:$0xff] %v2356_v16   ;;  %v1822_v27 = vsel %vm1814_vm4, %v1810_v4, %v1818_v18  ;;  %v1823_v28 = vsel %vm1815_vm5, %v1811_v51, %v1819_v19  ;;  %v1853_v29 = vadd.f32 %v1849_v59, %v3412_v2  ;;  %v1854_v30 = vadd.f32 %v1850_v7, %v3412_v2 }
 0x1b7   :  { %2393 = vst [vmem:[%s3480_s4 + $0x8] sm:$0xff] %v2361_v22   ;;  %v1824_v31 = vsel %vm1816_vm6, %v1812_v53, %v1820_v24  ;;  %v1825_v32 = vsel %vm1817_vm7, %v1813_v5, %v1821_v25  ;;  %v2366_v33 = vpack.c.bf16 %v1823_v28, %v1822_v27  ;;  %vm1855_vm8 = vcmp.ge.f32.partialorder %v1851_v10, 0.0 }
 0x1b8   :  { %v2371_v34 = vpack.c.bf16 %v1825_v32, %v1824_v31  ;;  %vm1856_vm9 = vcmp.ge.f32.partialorder %v1852_v26, 0.0  ;;  %vm1857_vm10 = vcmp.ge.f32.partialorder %v1853_v29, 0.0  ;;  %vm1858_vm11 = vcmp.ge.f32.partialorder %v1854_v30, 0.0 }
 0x1b9   :  { %2394 = vst [vmem:[%s3480_s4 + $0x10] sm:$0xff] %v2366_v33   ;;  %v1859_v36 = vmul.f32 0.01, %v1851_v10  ;;  %v1860_v38 = vmul.f32 0.01, %v1852_v26  ;;  %v1890_v40 = vmul.f32 %v3396_v56, %v3349_v42  ;;  %v1891_v44 = vmul.f32 %v3396_v56, %v3352_v48 }
 0x1ba   :  { %v1861_v39 = vmul.f32 0.01, %v1853_v29  ;;  %2395 = vst [vmem:[%s3480_s4 + $0x18] sm:$0xff] %v2371_v34   ;;  %v1862_v41 = vmul.f32 0.01, %v1854_v30  ;;  %v1892_v46 = vadd.f32 %v1888_v9, %v3412_v2  ;;  %v1893_v47 = vadd.f32 %v1889_v20, %v3412_v2 }
 0x1bb   :  { %v1863_v49 = vsel %vm1855_vm8, %v1851_v10, %v1859_v36  ;;  %v1864_v50 = vsel %vm1856_vm9, %v1852_v26, %v1860_v38  ;;  %v1894_v54 = vadd.f32 %v1890_v40, %v3412_v2  ;;  %v1895_v42 = vadd.f32 %v1891_v44, %v3412_v2 }
 0x1bc   :  { %v1865_v52 = vsel %vm1857_vm10, %v1853_v29, %v1861_v39  ;;  %v1866_v55 = vsel %vm1858_vm11, %v1854_v30, %v1862_v41  ;;  %v2376_v58 = vpack.c.bf16 %v1864_v50, %v1863_v49  ;;  %vm1896_vm12 = vcmp.ge.f32.partialorder %v1892_v46, 0.0 }
 0x1bd   :  { %v2381_v60 = vpack.c.bf16 %v1866_v55, %v1865_v52  ;;  %vm1897_vm13 = vcmp.ge.f32.partialorder %v1893_v47, 0.0  ;;  %vm1898_vm14 = vcmp.ge.f32.partialorder %v1894_v54, 0.0  ;;  %v1900_v61 = vmul.f32 0.01, %v1892_v46 }
 0x1be   :  { %2396 = vst [vmem:[%s3480_s4 + $0x20] sm:$0xff] %v2376_v58   ;;  %vm1899_vm15 = vcmp.ge.f32.partialorder %v1895_v42, 0.0  ;;  %v1901_v48 = vmul.f32 0.01, %v1893_v47  ;;  %v1902_v56 = vmul.f32 0.01, %v1894_v54 }
 0x1bf   :  { %2397 = vst [vmem:[%s3480_s4 + $0x28] sm:$0xff] %v2381_v60   ;;  %v1903_v62 = vmul.f32 0.01, %v1895_v42  ;;  %v1904_v63 = vsel %vm1896_vm12, %v1892_v46, %v1900_v61 }
 0x1c0   :  { %v1905_v0 = vsel %vm1897_vm13, %v1893_v47, %v1901_v48  ;;  %v1906_v8 = vsel %vm1898_vm14, %v1894_v54, %v1902_v56 }
 0x1c1   :  { %v1907_v1 = vsel %vm1899_vm15, %v1895_v42, %v1903_v62  ;;  %v2386_v2 = vpack.c.bf16 %v1905_v0, %v1904_v63 }
 0x1c2   :  { %v2391_v43 = vpack.c.bf16 %v1907_v1, %v1906_v8 }
 0x1c3   :  { %2398 = vst [vmem:[%s3480_s4 + $0x30] sm:$0xff] %v2386_v2  }
 0x1c4   :  { %2399 = vst [vmem:[%s3480_s4 + $0x38] sm:$0xff] %v2391_v43  }

// kernel: g_forward.8
= control target key start
LH: loop header
LB: loop body
LE: loop exit
PB: predicated region body
PF: predicated region fallthrough
CT: control target
= control target key end

     0   :  { %s4454_s1 = inlined_call_operand.vmem [shape: bf16[4,256,128], index: 1, kind: input, shape index: {}]   ;;  %s4455_s0 = inlined_call_operand.vmem [shape: bf16[4,128,256], index: 0, kind: input, shape index: {}]   ;;  %s4456_s2 = inlined_call_operand.vmem [shape: f32[1,128], index: 2, kind: input, shape index: {}]   ;;  %s4457_s3 = inlined_call_operand.vmem [shape: f32[1,128], index: 3, kind: input, shape index: {}]   ;;  %s4458_s4 = inlined_call_operand.vmem [shape: bf16[4,128,128], index: 4, kind: output, shape index: {}]  }
   0x1   :  { %v3176_v0 = vld [vmem:[%s4454_s1 + $0x40] sm:$0xff]   ;;  %v3180_v4 = vld [vmem:[%s4454_s1 + $0x48] sm:$0xff]   ;;  %v3184_v8 = vld [vmem:[%s4454_s1 + $0x50] sm:$0xff]  }
   0x2   :  { %v3177_v1 = vld [vmem:[%s4454_s1 + $0xc0] sm:$0xff]   ;;  %2920 = vmatprep.subr.bf16.mxu0 %v3176_v0  ;;  %v3181_v5 = vld [vmem:[%s4454_s1 + $0xc8] sm:$0xff]   ;;  %v3185_v9 = vld [vmem:[%s4454_s1 + $0xd0] sm:$0xff]  }
   0x3   :  { %v3178_v2 = vld [vmem:[%s4454_s1] sm:$0xff]   ;;  %2984 = vmatprep.subr.bf16.mxu1 %v3177_v1  ;;  %v3182_v6 = vld [vmem:[%s4454_s1 + $0x8] sm:$0xff]   ;;  %v3186_v10 = vld [vmem:[%s4454_s1 + $0x10] sm:$0xff]  }
   0x4   :  { %v3179_v3 = vld [vmem:[%s4454_s1 + $0x80] sm:$0xff]   ;;  %2921 = vmatpush3.bf16.msra.mxu0 %v3178_v2  ;;  %v3183_v7 = vld [vmem:[%s4454_s1 + $0x88] sm:$0xff]   ;;  %v3187_v11 = vld [vmem:[%s4454_s1 + $0x90] sm:$0xff]  }
   0x5   :  { %2985 = vmatpush3.bf16.msra.mxu1 %v3179_v3  ;;  %2922 = vmatprep.subr.bf16.mxu0 %v3180_v4  ;;  %v3188_v12 = vld [vmem:[%s4454_s1 + $0x58] sm:$0xff]   ;;  %v3192_v16 = vld [vmem:[%s4454_s1 + $0x60] sm:$0xff]   ;;  %v3196_v20 = vld [vmem:[%s4454_s1 + $0x68] sm:$0xff]  }
   0x6   :  { %2986 = vmatprep.subr.bf16.mxu1 %v3181_v5  ;;  %v3189_v13 = vld [vmem:[%s4454_s1 + $0xd8] sm:$0xff]   ;;  %v3193_v17 = vld [vmem:[%s4454_s1 + $0xe0] sm:$0xff]   ;;  %v3197_v21 = vld [vmem:[%s4454_s1 + $0xe8] sm:$0xff]  }
   0x7   :  { %v3190_v14 = vld [vmem:[%s4454_s1 + $0x18] sm:$0xff]   ;;  %v3194_v18 = vld [vmem:[%s4454_s1 + $0x20] sm:$0xff]   ;;  %v3198_v22 = vld [vmem:[%s4454_s1 + $0x28] sm:$0xff]  }
   0x8   :  { %2923 = vmatpush3.bf16.msra.mxu0 %v3182_v6  ;;  %v3191_v15 = vld [vmem:[%s4454_s1 + $0x98] sm:$0xff]   ;;  %v3195_v19 = vld [vmem:[%s4454_s1 + $0xa0] sm:$0xff]   ;;  %v3199_v23 = vld [vmem:[%s4454_s1 + $0xa8] sm:$0xff]  }
   0x9   :  { %2987 = vmatpush3.bf16.msra.mxu1 %v3183_v7  ;;  %2924 = vmatprep.subr.bf16.mxu0 %v3184_v8  ;;  %v3200_v24 = vld [vmem:[%s4454_s1 + $0x70] sm:$0xff]   ;;  %v3204_v28 = vld [vmem:[%s4454_s1 + $0x78] sm:$0xff]   ;;  %v3208_v32 = vld [vmem:[%s4455_s0] ss:$8 sps:$4 sm:$0xff]  }
   0xa   :  { %2988 = vmatprep.subr.bf16.mxu1 %v3185_v9  ;;  %v3201_v25 = vld [vmem:[%s4454_s1 + $0xf0] sm:$0xff]   ;;  %v3205_v29 = vld [vmem:[%s4454_s1 + $0xf8] sm:$0xff]   ;;  %v3210_v33 = vld [vmem:[%s4455_s0 + $0x4] ss:$8 sps:$4 sm:$0xff]  }
   0xb   :  { %v3202_v26 = vld [vmem:[%s4454_s1 + $0x30] sm:$0xff]   ;;  %v3206_v30 = vld [vmem:[%s4454_s1 + $0x38] sm:$0xff]   ;;  %v3211_v34 = vld [vmem:[%s4455_s0 + $0x80] ss:$8 sps:$4 sm:$0xff]   ;;  %274 = vmatprep.mubr.bf16.mxu0 %v3210_v33 }
   0xc   :  { %2925 = vmatpush3.bf16.msra.mxu0 %v3186_v10  ;;  %v3203_v27 = vld [vmem:[%s4454_s1 + $0xb0] sm:$0xff]   ;;  %v3207_v31 = vld [vmem:[%s4454_s1 + $0xb8] sm:$0xff]   ;;  %v3213_v35 = vld [vmem:[%s4455_s0 + $0x84] ss:$8 sps:$4 sm:$0xff]  }
   0xd   :  { %2989 = vmatpush3.bf16.msra.mxu1 %v3187_v11  ;;  %2926 = vmatprep.subr.bf16.mxu0 %v3188_v12  ;;  %v3214_v36 = vld [vmem:[%s4454_s1 + $0x140] sm:$0xff]   ;;  %v3218_v40 = vld [vmem:[%s4455_s0 + $0x14] ss:$8 sps:$4 sm:$0xff]   ;;  %v3222_v42 = vld [vmem:[%s4455_s0 + $0x10] ss:$8 sps:$4 sm:$0xff]  }
   0xe   :  { %2990 = vmatprep.subr.bf16.mxu1 %v3189_v13  ;;  %619 = vmatprep.mubr.bf16.mxu1 %v3213_v35  ;;  %v3215_v37 = vld [vmem:[%s4454_s1 + $0x100] sm:$0xff]   ;;  %v3220_v41 = vld [vmem:[%s4455_s0 + $0x94] ss:$8 sps:$4 sm:$0xff]   ;;  %v3223_v43 = vld [vmem:[%s4455_s0 + $0x90] ss:$8 sps:$4 sm:$0xff]  }
   0xf   :  { %v3216_v38 = vld [vmem:[%s4454_s1 + $0x1c0] sm:$0xff]   ;;  %v3224_v44 = vld [vmem:[%s4454_s1 + $0x148] sm:$0xff]   ;;  %v3234_v52 = vld [vmem:[%s4454_s1 + $0x150] sm:$0xff]  }
  0x10   :  { %2927 = vmatpush3.bf16.msra.mxu0 %v3190_v14  ;;  %v3217_v39 = vld [vmem:[%s4454_s1 + $0x180] sm:$0xff]   ;;  %v3225_v45 = vld [vmem:[%s4454_s1 + $0x108] sm:$0xff]   ;;  %v3235_v53 = vld [vmem:[%s4454_s1 + $0x110] sm:$0xff]  }
  0x11   :  { %2991 = vmatpush3.bf16.msra.mxu1 %v3191_v15  ;;  %2928 = vmatprep.subr.bf16.mxu0 %v3192_v16  ;;  %v3226_v46 = vld [vmem:[%s4454_s1 + $0x1c8] sm:$0xff]   ;;  %v3236_v54 = vld [vmem:[%s4454_s1 + $0x1d0] sm:$0xff]   ;;  %v3244_v60 = vld [vmem:[%s4454_s1 + $0x158] sm:$0xff]  }
  0x12   :  { %2992 = vmatprep.subr.bf16.mxu1 %v3193_v17  ;;  %v3227_v47 = vld [vmem:[%s4454_s1 + $0x188] sm:$0xff]   ;;  %v3237_v55 = vld [vmem:[%s4454_s1 + $0x190] sm:$0xff]   ;;  %v3245_v61 = vld [vmem:[%s4454_s1 + $0x118] sm:$0xff]  }
  0x13   :  { %v3228_v48 = vld [vmem:[%s4455_s0 + $0x24] ss:$8 sps:$4 sm:$0xff]   ;;  %v3232_v50 = vld [vmem:[%s4455_s0 + $0x20] ss:$8 sps:$4 sm:$0xff]   ;;  %v3238_v56 = vld [vmem:[%s4455_s0 + $0x34] ss:$8 sps:$4 sm:$0xff]  }
  0x14   :  { %2929 = vmatpush3.bf16.msra.mxu0 %v3194_v18  ;;  %v3230_v49 = vld [vmem:[%s4455_s0 + $0xa4] ss:$8 sps:$4 sm:$0xff]   ;;  %v3233_v51 = vld [vmem:[%s4455_s0 + $0xa0] ss:$8 sps:$4 sm:$0xff]   ;;  %v3240_v57 = vld [vmem:[%s4455_s0 + $0xb4] ss:$8 sps:$4 sm:$0xff]  }
  0x15   :  { %2993 = vmatpush3.bf16.msra.mxu1 %v3195_v19  ;;  %2930 = vmatprep.subr.bf16.mxu0 %v3196_v20  ;;  %v3242_v58 = vld [vmem:[%s4455_s0 + $0x30] ss:$8 sps:$4 sm:$0xff]   ;;  %v3248_v0 = vld [vmem:[%s4455_s0 + $0x44] ss:$8 sps:$4 sm:$0xff]   ;;  %v3252_v2 = vld [vmem:[%s4455_s0 + $0x40] ss:$8 sps:$4 sm:$0xff]  }
  0x16   :  { %2994 = vmatprep.subr.bf16.mxu1 %v3197_v21  ;;  %v3243_v59 = vld [vmem:[%s4455_s0 + $0xb0] ss:$8 sps:$4 sm:$0xff]   ;;  %v3250_v1 = vld [vmem:[%s4455_s0 + $0xc4] ss:$8 sps:$4 sm:$0xff]   ;;  %v3253_v4 = vld [vmem:[%s4455_s0 + $0xc0] ss:$8 sps:$4 sm:$0xff]  }
  0x17   :  { %v3246_v62 = vld [vmem:[%s4454_s1 + $0x1d8] sm:$0xff]   ;;  %v3254_v3 = vld [vmem:[%s4454_s1 + $0x160] sm:$0xff]   ;;  %v3264_v10 = vld [vmem:[%s4454_s1 + $0x168] sm:$0xff]  }
  0x18   :  { %2931 = vmatpush3.bf16.msra.mxu0 %v3198_v22  ;;  %v3247_v63 = vld [vmem:[%s4454_s1 + $0x198] sm:$0xff]   ;;  %v3255_v5 = vld [vmem:[%s4454_s1 + $0x120] sm:$0xff]   ;;  %v3265_v11 = vld [vmem:[%s4454_s1 + $0x128] sm:$0xff]  }
  0x19   :  { %2995 = vmatpush3.bf16.msra.mxu1 %v3199_v23  ;;  %2932 = vmatprep.subr.bf16.mxu0 %v3200_v24  ;;  %v3256_v6 = vld [vmem:[%s4454_s1 + $0x1e0] sm:$0xff]   ;;  %v3258_v8 = vld [vmem:[%s4455_s0 + $0x54] ss:$8 sps:$4 sm:$0xff]   ;;  %v3262_v12 = vld [vmem:[%s4455_s0 + $0x50] ss:$8 sps:$4 sm:$0xff]  }
  0x1a   :  { %2996 = vmatprep.subr.bf16.mxu1 %v3201_v25  ;;  %v3257_v7 = vld [vmem:[%s4454_s1 + $0x1a0] sm:$0xff]   ;;  %v3260_v9 = vld [vmem:[%s4455_s0 + $0xd4] ss:$8 sps:$4 sm:$0xff]   ;;  %v3266_v13 = vld [vmem:[%s4454_s1 + $0x1e8] sm:$0xff]  }
  0x1b   :  { %v3267_v14 = vld [vmem:[%s4454_s1 + $0x1a8] sm:$0xff]   ;;  %v3263_v15 = vld [vmem:[%s4455_s0 + $0xd0] ss:$8 sps:$4 sm:$0xff]   ;;  %v3278_v24 = vld [vmem:[%s4455_s0 + $0x74] ss:$8 sps:$4 sm:$0xff]  }
  0x1c   :  { %2933 = vmatpush3.bf16.msra.mxu0 %v3202_v26  ;;  %v3268_v16 = vld [vmem:[%s4455_s0 + $0x64] ss:$8 sps:$4 sm:$0xff]   ;;  %v3274_v18 = vld [vmem:[%s4454_s1 + $0x170] sm:$0xff]   ;;  %v3272_v22 = vld [vmem:[%s4455_s0 + $0x60] ss:$8 sps:$4 sm:$0xff]  }
  0x1d   :  { %2997 = vmatpush3.bf16.msra.mxu1 %v3203_v27  ;;  %2934 = vmatprep.subr.bf16.mxu0 %v3204_v28  ;;  %v3270_v17 = vld [vmem:[%s4455_s0 + $0xe4] ss:$8 sps:$4 sm:$0xff]   ;;  %v3275_v19 = vld [vmem:[%s4454_s1 + $0x130] sm:$0xff]   ;;  %v3273_v23 = vld [vmem:[%s4455_s0 + $0xe0] ss:$8 sps:$4 sm:$0xff]  }
  0x1e   :  { %2998 = vmatprep.subr.bf16.mxu1 %v3205_v29  ;;  %v3276_v20 = vld [vmem:[%s4454_s1 + $0x1f0] sm:$0xff]   ;;  %v3284_v26 = vld [vmem:[%s4454_s1 + $0x178] sm:$0xff]   ;;  %v3293_v33 = vld [vmem:[%s4455_s0 + $0x184] ss:$8 sps:$4 sm:$0xff]  }
  0x1f   :  { %v3277_v21 = vld [vmem:[%s4454_s1 + $0x1b0] sm:$0xff]   ;;  %v3285_v27 = vld [vmem:[%s4454_s1 + $0x138] sm:$0xff]   ;;  %v3291_v35 = vld [vmem:[%s4455_s0 + $0x180] ss:$8 sps:$4 sm:$0xff]  }
  0x20   :  { %2935 = vmatpush3.bf16.msra.mxu0 %v3206_v30  ;;  %v3280_v25 = vld [vmem:[%s4455_s0 + $0xf4] ss:$8 sps:$4 sm:$0xff]   ;;  %v3282_v30 = vld [vmem:[%s4455_s0 + $0x70] ss:$8 sps:$4 sm:$0xff]  }
  0x21   :  { %2999 = vmatpush3.bf16.msra.mxu1 %v3207_v31  ;;  %3048 = vmatprep.subr.bf16.mxu0 %v3214_v36  ;;  %v3286_v28 = vld [vmem:[%s4454_s1 + $0x1f8] sm:$0xff]  }
  0x22   :  { %3112 = vmatprep.subr.bf16.mxu1 %v3216_v38  ;;  %v3287_v29 = vld [vmem:[%s4454_s1 + $0x1b8] sm:$0xff]  }
  0x23   :  { %275 = vmatmul.mubr.bf16.vlgmr.msra.gmra.mrb[0].mxu0 %v3208_v32  ;;  %v3283_v31 = vld [vmem:[%s4455_s0 + $0xf0] ss:$8 sps:$4 sm:$0xff]   ;;  %v3290_v32 = vld [vmem:[%s4455_s0 + $0x104] ss:$8 sps:$4 sm:$0xff]   ;;  %v3294_v36 = vld [vmem:[%s4455_s0 + $0x114] ss:$8 sps:$4 sm:$0xff]  }
  0x24   :  { %620 = vmatmul.mubr.bf16.vlgmr.msra.gmra.mrb[0].mxu1 %v3211_v34  ;;  %3049 = vmatpush3.bf16.msra.mxu0 %v3215_v37  ;;  %v3288_v34 = vld [vmem:[%s4455_s0 + $0x100] ss:$8 sps:$4 sm:$0xff]   ;;  %v3296_v37 = vld [vmem:[%s4455_s0 + $0x194] ss:$8 sps:$4 sm:$0xff]   ;;  %v3298_v38 = vld [vmem:[%s4455_s0 + $0x110] ss:$8 sps:$4 sm:$0xff]  }
  0x25   :  { %3113 = vmatpush3.bf16.msra.mxu1 %v3217_v39  ;;  %282 = vmatprep.mubr.bf16.mxu0 %v3218_v40  ;;  %v3299_v39 = vld [vmem:[%s4455_s0 + $0x190] ss:$8 sps:$4 sm:$0xff]   ;;  %v3300_v40 = vld [vmem:[%s4455_s0 + $0x124] ss:$8 sps:$4 sm:$0xff]  }
  0x26   :  { %627 = vmatprep.mubr.bf16.mxu1 %v3220_v41  ;;  %3050 = vmatprep.subr.bf16.mxu0 %v3224_v44  ;;  %v3302_v41 = vld [vmem:[%s4455_s0 + $0x1a4] ss:$8 sps:$4 sm:$0xff]   ;;  %v3306_v44 = vld [vmem:[%s4455_s0 + $0x134] ss:$8 sps:$4 sm:$0xff]  }
  0x27   :  { %3114 = vmatprep.subr.bf16.mxu1 %v3226_v46  ;;  %v3310_v46 = vld [vmem:[%s4455_s0 + $0x130] ss:$8 sps:$4 sm:$0xff]  }
  0x28   :  { %3051 = vmatpush3.bf16.msra.mxu0 %v3225_v45  ;;  %v3308_v45 = vld [vmem:[%s4455_s0 + $0x1b4] ss:$8 sps:$4 sm:$0xff]  }
  0x29   :  { %3115 = vmatpush3.bf16.msra.mxu1 %v3227_v47  ;;  %3052 = vmatprep.subr.bf16.mxu0 %v3234_v52  ;;  %v3311_v47 = vld [vmem:[%s4455_s0 + $0x1b0] ss:$8 sps:$4 sm:$0xff]   ;;  %v3318_v52 = vld [vmem:[%s4455_s0 + $0x154] ss:$8 sps:$4 sm:$0xff]  }
  0x2a   :  { %3116 = vmatprep.subr.bf16.mxu1 %v3236_v54  ;;  %v3322_v54 = vld [vmem:[%s4455_s0 + $0x150] ss:$8 sps:$4 sm:$0xff]  }
  0x2b   :  { %283 = vmatmul.mubr.bf16.gmra.mrb[4].mxu0 %v3222_v42  ;;  %v3304_v42 = vld [vmem:[%s4455_s0 + $0x120] ss:$8 sps:$4 sm:$0xff]  }
  0x2c   :  { %628 = vmatmul.mubr.bf16.gmra.mrb[4].mxu1 %v3223_v43  ;;  %290 = vmatprep.mubr.bf16.mxu0 %v3228_v48  ;;  %v3305_v43 = vld [vmem:[%s4455_s0 + $0x1a0] ss:$8 sps:$4 sm:$0xff]   ;;  %v3312_v48 = vld [vmem:[%s4455_s0 + $0x144] ss:$8 sps:$4 sm:$0xff]  }
  0x2d   :  { %635 = vmatprep.mubr.bf16.mxu1 %v3230_v49  ;;  %3053 = vmatpush3.bf16.msra.mxu0 %v3235_v53  ;;  %v3314_v49 = vld [vmem:[%s4455_s0 + $0x1c4] ss:$8 sps:$4 sm:$0xff]   ;;  %v3320_v53 = vld [vmem:[%s4455_s0 + $0x1d4] ss:$8 sps:$4 sm:$0xff]  }
  0x2e   :  { %3117 = vmatpush3.bf16.msra.mxu1 %v3237_v55  ;;  %3054 = vmatprep.subr.bf16.mxu0 %v3244_v60  ;;  %v3323_v55 = vld [vmem:[%s4455_s0 + $0x1d0] ss:$8 sps:$4 sm:$0xff]   ;;  %v3330_v60 = vld [vmem:[%s4455_s0 + $0x174] ss:$8 sps:$4 sm:$0xff]  }
  0x2f   :  { %3118 = vmatprep.subr.bf16.mxu1 %v3246_v62  ;;  %v3334_v62 = vld [vmem:[%s4455_s0 + $0x170] ss:$8 sps:$4 sm:$0xff]  }
  0x31   :  { %3055 = vmatpush3.bf16.msra.mxu0 %v3245_v61  ;;  %v3332_v61 = vld [vmem:[%s4455_s0 + $0x1f4] ss:$8 sps:$4 sm:$0xff]  }
  0x32   :  { %3119 = vmatpush3.bf16.msra.mxu1 %v3247_v63  ;;  %3056 = vmatprep.subr.bf16.mxu0 %v3254_v3  ;;  %v3335_v63 = vld [vmem:[%s4455_s0 + $0x1f0] ss:$8 sps:$4 sm:$0xff]  }
  0x33   :  { %291 = vmatmul.mubr.bf16.gmra.mrb[8].mxu0 %v3232_v50  ;;  %3120 = vmatprep.subr.bf16.mxu1 %v3256_v6  ;;  %v3316_v50 = vld [vmem:[%s4455_s0 + $0x140] ss:$8 sps:$4 sm:$0xff]  }
  0x34   :  { %636 = vmatmul.mubr.bf16.gmra.mrb[8].mxu1 %v3233_v51  ;;  %298 = vmatprep.mubr.bf16.mxu0 %v3238_v56  ;;  %v3317_v51 = vld [vmem:[%s4455_s0 + $0x1c0] ss:$8 sps:$4 sm:$0xff]   ;;  %v3324_v56 = vld [vmem:[%s4455_s0 + $0x164] ss:$8 sps:$4 sm:$0xff]  }
  0x35   :  { %643 = vmatprep.mubr.bf16.mxu1 %v3240_v57  ;;  %3057 = vmatpush3.bf16.msra.mxu0 %v3255_v5  ;;  %v3326_v57 = vld [vmem:[%s4455_s0 + $0x1e4] ss:$8 sps:$4 sm:$0xff]  }
  0x36   :  { %3121 = vmatpush3.bf16.msra.mxu1 %v3257_v7  ;;  %3058 = vmatprep.subr.bf16.mxu0 %v3264_v10 }
  0x37   :  { %3122 = vmatprep.subr.bf16.mxu1 %v3266_v13 }
  0x39   :  { %3059 = vmatpush3.bf16.msra.mxu0 %v3265_v11 }
  0x3a   :  { %3123 = vmatpush3.bf16.msra.mxu1 %v3267_v14  ;;  %3060 = vmatprep.subr.bf16.mxu0 %v3274_v18 }
  0x3b   :  { %299 = vmatmul.mubr.bf16.gmra.mrb[12].mxu0 %v3242_v58  ;;  %3124 = vmatprep.subr.bf16.mxu1 %v3276_v20  ;;  %v3328_v58 = vld [vmem:[%s4455_s0 + $0x160] ss:$8 sps:$4 sm:$0xff]  }
  0x3c   :  { %644 = vmatmul.mubr.bf16.gmra.mrb[12].mxu1 %v3243_v59  ;;  %306 = vmatprep.mubr.bf16.mxu0 %v3248_v0  ;;  %v3329_v59 = vld [vmem:[%s4455_s0 + $0x1e0] ss:$8 sps:$4 sm:$0xff]  }
  0x3d   :  { %651 = vmatprep.mubr.bf16.mxu1 %v3250_v1  ;;  %3061 = vmatpush3.bf16.msra.mxu0 %v3275_v19 }
  0x3e   :  { %3125 = vmatpush3.bf16.msra.mxu1 %v3277_v21  ;;  %3062 = vmatprep.subr.bf16.mxu0 %v3284_v26 }
  0x3f   :  { %3126 = vmatprep.subr.bf16.mxu1 %v3286_v28 }
  0x41   :  { %3063 = vmatpush3.bf16.msra.mxu0 %v3285_v27 }
  0x42   :  { %3127 = vmatpush3.bf16.msra.mxu1 %v3287_v29 }
  0x43   :  { %307 = vmatmul.mubr.bf16.gmra.mrb[16].mxu0 %v3252_v2 }
  0x44   :  { %652 = vmatmul.mubr.bf16.gmra.mrb[16].mxu1 %v3253_v4  ;;  %314 = vmatprep.mubr.bf16.mxu0 %v3258_v8 }
  0x45   :  { %659 = vmatprep.mubr.bf16.mxu1 %v3260_v9 }
  0x4b   :  { %315 = vmatmul.mubr.bf16.gmra.mrb[20].mxu0 %v3262_v12 }
  0x4c   :  { %660 = vmatmul.mubr.bf16.gmra.mrb[20].mxu1 %v3263_v15  ;;  %322 = vmatprep.mubr.bf16.mxu0 %v3268_v16 }
  0x4d   :  { %667 = vmatprep.mubr.bf16.mxu1 %v3270_v17 }
  0x53   :  { %323 = vmatmul.mubr.bf16.gmra.mrb[24].mxu0 %v3272_v22 }
  0x54   :  { %668 = vmatmul.mubr.bf16.gmra.mrb[24].mxu1 %v3273_v23  ;;  %330 = vmatprep.mubr.bf16.mxu0 %v3278_v24 }
  0x55   :  { %675 = vmatprep.mubr.bf16.mxu1 %v3280_v25 }
  0x5b   :  { %331 = vmatmul.mubr.bf16.gmra.mrb[28].mxu0 %v3282_v30 }
  0x5c   :  { %676 = vmatmul.mubr.bf16.gmra.mrb[28].mxu1 %v3283_v31  ;;  %964 = vmatprep.mubr.bf16.mxu0 %v3290_v32 }
  0x5d   :  { %1309 = vmatprep.mubr.bf16.mxu1 %v3293_v33 }
  0x63   :  { %965 = vmatmul.mubr.bf16.vlgmr.msra.gmra.mrb[32].mxu0 %v3288_v34 }
  0x64   :  { %1310 = vmatmul.mubr.bf16.vlgmr.msra.gmra.mrb[32].mxu1 %v3291_v35  ;;  %972 = vmatprep.mubr.bf16.mxu0 %v3294_v36 }
  0x65   :  { %1317 = vmatprep.mubr.bf16.mxu1 %v3296_v37 }
  0x6b   :  { %973 = vmatmul.mubr.bf16.gmra.mrb[36].mxu0 %v3298_v38 }
  0x6c   :  { %1318 = vmatmul.mubr.bf16.gmra.mrb[36].mxu1 %v3299_v39  ;;  %980 = vmatprep.mubr.bf16.mxu0 %v3300_v40 }
  0x6d   :  { %1325 = vmatprep.mubr.bf16.mxu1 %v3302_v41 }
  0x73   :  { %981 = vmatmul.mubr.bf16.gmra.mrb[40].mxu0 %v3304_v42 }
  0x74   :  { %1326 = vmatmul.mubr.bf16.gmra.mrb[40].mxu1 %v3305_v43  ;;  %988 = vmatprep.mubr.bf16.mxu0 %v3306_v44 }
  0x75   :  { %1333 = vmatprep.mubr.bf16.mxu1 %v3308_v45 }
  0x7b   :  { %989 = vmatmul.mubr.bf16.gmra.mrb[44].mxu0 %v3310_v46 }
  0x7c   :  { %1334 = vmatmul.mubr.bf16.gmra.mrb[44].mxu1 %v3311_v47  ;;  %996 = vmatprep.mubr.bf16.mxu0 %v3312_v48 }
  0x7d   :  { %1341 = vmatprep.mubr.bf16.mxu1 %v3314_v49 }
  0x83   :  { %997 = vmatmul.mubr.bf16.gmra.mrb[48].mxu0 %v3316_v50 }
  0x84   :  { %1342 = vmatmul.mubr.bf16.gmra.mrb[48].mxu1 %v3317_v51  ;;  %1004 = vmatprep.mubr.bf16.mxu0 %v3318_v52 }
  0x85   :  { %1349 = vmatprep.mubr.bf16.mxu1 %v3320_v53 }
  0x8b   :  { %1005 = vmatmul.mubr.bf16.gmra.mrb[52].mxu0 %v3322_v54 }
  0x8c   :  { %1350 = vmatmul.mubr.bf16.gmra.mrb[52].mxu1 %v3323_v55  ;;  %1012 = vmatprep.mubr.bf16.mxu0 %v3324_v56 }
  0x8d   :  { %1357 = vmatprep.mubr.bf16.mxu1 %v3326_v57 }
  0x93   :  { %1013 = vmatmul.mubr.bf16.gmra.mrb[56].mxu0 %v3328_v58 }
  0x94   :  { %1358 = vmatmul.mubr.bf16.gmra.mrb[56].mxu1 %v3329_v59  ;;  %1020 = vmatprep.mubr.bf16.mxu0 %v3330_v60 }
  0x95   :  { %1365 = vmatprep.mubr.bf16.mxu1 %v3332_v61 }
  0x9b   :  { %1021 = vmatmul.mubr.bf16.gmra.mrb[60].mxu0 %v3334_v62 }
  0x9c   :  { %1366 = vmatmul.mubr.bf16.gmra.mrb[60].mxu1 %v3335_v63 }
  0xf6   :  { %v2936_v0 = vpop.f32.mrb[0].mxu0 }
  0xf7   :  { %v3000_v1 = vpop.f32.mrb[0].mxu1  ;;  %v2937_v2 = vpop.f32.mrb[1].mxu0 }
  0xf8   :  { %v3747_v3 = vadd.f32 %v2937_v2, %v2936_v0  ;;  %v3001_v4 = vpop.f32.mrb[1].mxu1  ;;  %v2939_v5 = vpop.f32.mrb[2].mxu0 }
  0xf9   :  { %v3749_v6 = vadd.f32 %v3001_v4, %v3000_v1  ;;  %v3003_v7 = vpop.f32.mrb[2].mxu1  ;;  %v2940_v8 = vpop.f32.mrb[3].mxu0 }
  0xfa   :  { %v3751_v9 = vadd.f32 %v2940_v8, %v2939_v5  ;;  %v3004_v10 = vpop.f32.mrb[3].mxu1 }
  0xfb   :  { %v3753_v11 = vadd.f32 %v3004_v10, %v3003_v7 }
  0xfe   :  { %v2942_v12 = vpop.f32.mrb[4].mxu0 }
  0xff   :  { %v3006_v13 = vpop.f32.mrb[4].mxu1  ;;  %v2943_v14 = vpop.f32.mrb[5].mxu0 }
 0x100   :  { %v3755_v15 = vadd.f32 %v2943_v14, %v2942_v12  ;;  %v3007_v16 = vpop.f32.mrb[5].mxu1  ;;  %v2945_v17 = vpop.f32.mrb[6].mxu0 }
 0x101   :  { %v3757_v18 = vadd.f32 %v3007_v16, %v3006_v13  ;;  %v3009_v19 = vpop.f32.mrb[6].mxu1  ;;  %v2946_v20 = vpop.f32.mrb[7].mxu0 }
 0x102   :  { %v3759_v21 = vadd.f32 %v2946_v20, %v2945_v17  ;;  %v3010_v22 = vpop.f32.mrb[7].mxu1 }
 0x103   :  { %v3761_v23 = vadd.f32 %v3010_v22, %v3009_v19 }
 0x106   :  { %v2948_v24 = vpop.f32.mrb[8].mxu0 }
 0x107   :  { %v3012_v25 = vpop.f32.mrb[8].mxu1  ;;  %v2949_v26 = vpop.f32.mrb[9].mxu0 }
 0x108   :  { %v3763_v27 = vadd.f32 %v2949_v26, %v2948_v24  ;;  %v3013_v28 = vpop.f32.mrb[9].mxu1  ;;  %v2951_v29 = vpop.f32.mrb[10].mxu0 }
 0x109   :  { %v3765_v30 = vadd.f32 %v3013_v28, %v3012_v25  ;;  %v3015_v31 = vpop.f32.mrb[10].mxu1  ;;  %v2952_v32 = vpop.f32.mrb[11].mxu0 }
 0x10a   :  { %v3767_v33 = vadd.f32 %v2952_v32, %v2951_v29  ;;  %v3016_v34 = vpop.f32.mrb[11].mxu1 }
 0x10b   :  { %v3769_v35 = vadd.f32 %v3016_v34, %v3015_v31 }
 0x10e   :  { %v2954_v36 = vpop.f32.mrb[12].mxu0 }
 0x10f   :  { %v3018_v37 = vpop.f32.mrb[12].mxu1  ;;  %v2955_v38 = vpop.f32.mrb[13].mxu0 }
 0x110   :  { %v3771_v39 = vadd.f32 %v2955_v38, %v2954_v36  ;;  %v3019_v40 = vpop.f32.mrb[13].mxu1  ;;  %v2957_v41 = vpop.f32.mrb[14].mxu0 }
 0x111   :  { %v3773_v42 = vadd.f32 %v3019_v40, %v3018_v37  ;;  %v3021_v43 = vpop.f32.mrb[14].mxu1  ;;  %v2958_v44 = vpop.f32.mrb[15].mxu0 }
 0x112   :  { %v3775_v45 = vadd.f32 %v2958_v44, %v2957_v41  ;;  %v3022_v46 = vpop.f32.mrb[15].mxu1 }
 0x113   :  { %v3777_v47 = vadd.f32 %v3022_v46, %v3021_v43 }
 0x116   :  { %v2960_v48 = vpop.f32.mrb[16].mxu0 }
 0x117   :  { %v3024_v49 = vpop.f32.mrb[16].mxu1  ;;  %v2961_v50 = vpop.f32.mrb[17].mxu0 }
 0x118   :  { %v3779_v51 = vadd.f32 %v2961_v50, %v2960_v48  ;;  %v3025_v52 = vpop.f32.mrb[17].mxu1  ;;  %v2963_v53 = vpop.f32.mrb[18].mxu0 }
 0x119   :  { %v3781_v54 = vadd.f32 %v3025_v52, %v3024_v49  ;;  %v3027_v55 = vpop.f32.mrb[18].mxu1  ;;  %v2964_v56 = vpop.f32.mrb[19].mxu0 }
 0x11a   :  { %v3783_v57 = vadd.f32 %v2964_v56, %v2963_v53  ;;  %v3028_v58 = vpop.f32.mrb[19].mxu1 }
 0x11b   :  { %4521 = vst [vmem:[#allocation2_spill] sm:$0xff] %v3781_v54  ;;  %v3785_v59 = vadd.f32 %v3028_v58, %v3027_v55 }
 0x11e   :  { %v2966_v60 = vpop.f32.mrb[20].mxu0 }
 0x11f   :  { %v3030_v61 = vpop.f32.mrb[20].mxu1  ;;  %v2967_v62 = vpop.f32.mrb[21].mxu0 }
 0x120   :  { %v3787_v63 = vadd.f32 %v2967_v62, %v2966_v60  ;;  %v3031_v0 = vpop.f32.mrb[21].mxu1  ;;  %v2969_v1 = vpop.f32.mrb[22].mxu0  ;;  %v684_v62 = vadd.f32 %v3753_v11, %v3749_v6 }
 0x121   :  { %v3789_v2 = vadd.f32 %v3031_v0, %v3030_v61  ;;  %v3033_v4 = vpop.f32.mrb[22].mxu1  ;;  %v2970_v5 = vpop.f32.mrb[23].mxu0  ;;  %v339_v61 = vadd.f32 %v3751_v9, %v3747_v3 }
 0x122   :  { %v3791_v7 = vadd.f32 %v2970_v5, %v2969_v1  ;;  %v3034_v8 = vpop.f32.mrb[23].mxu1 }
 0x123   :  { %v3793_v10 = vadd.f32 %v3034_v8, %v3033_v4  ;;  %v340_v5 = vadd.f32 %v3755_v15, %v339_v61  ;;  %v685_v8 = vadd.f32 %v3757_v18, %v684_v62 }
 0x126   :  { %v2972_v12 = vpop.f32.mrb[24].mxu0 }
 0x127   :  { %v3036_v13 = vpop.f32.mrb[24].mxu1  ;;  %v2973_v14 = vpop.f32.mrb[25].mxu0 }
 0x128   :  { %v3795_v16 = vadd.f32 %v2973_v14, %v2972_v12  ;;  %v3037_v17 = vpop.f32.mrb[25].mxu1  ;;  %v2975_v19 = vpop.f32.mrb[26].mxu0 }
 0x129   :  { %v3797_v20 = vadd.f32 %v3037_v17, %v3036_v13  ;;  %v3039_v22 = vpop.f32.mrb[26].mxu1  ;;  %v2976_v24 = vpop.f32.mrb[27].mxu0  ;;  %v341_v17 = vadd.f32 %v3759_v21, %v340_v5 }
 0x12a   :  { %v3799_v25 = vadd.f32 %v2976_v24, %v2975_v19  ;;  %v3040_v26 = vpop.f32.mrb[27].mxu1  ;;  %v686_v19 = vadd.f32 %v3761_v23, %v685_v8 }
 0x12b   :  { %4522 = vst [vmem:[#allocation3_spill] sm:$0xff] %v3797_v20  ;;  %v3801_v28 = vadd.f32 %v3040_v26, %v3039_v22 }
 0x12d   :  { %4523 = vst [vmem:[#allocation4_spill] sm:$0xff] %v3801_v28 }
 0x12e   :  { %v2978_v29 = vpop.f32.mrb[28].mxu0 }
 0x12f   :  { %v3042_v31 = vpop.f32.mrb[28].mxu1  ;;  %v2979_v32 = vpop.f32.mrb[29].mxu0 }
 0x130   :  { %v3803_v34 = vadd.f32 %v2979_v32, %v2978_v29  ;;  %v3043_v36 = vpop.f32.mrb[29].mxu1  ;;  %v2981_v37 = vpop.f32.mrb[30].mxu0 }
 0x131   :  { %v3805_v38 = vadd.f32 %v3043_v36, %v3042_v31  ;;  %v3045_v40 = vpop.f32.mrb[30].mxu1  ;;  %v2982_v41 = vpop.f32.mrb[31].mxu0  ;;  %v342_v36 = vadd.f32 %v3763_v27, %v341_v17 }
 0x132   :  { %v3807_v43 = vadd.f32 %v2982_v41, %v2981_v37  ;;  %v3046_v44 = vpop.f32.mrb[31].mxu1  ;;  %v687_v37 = vadd.f32 %v3765_v30, %v686_v19 }
 0x133   :  { %4524 = vst [vmem:[#allocation5_spill] sm:$0xff] %v3805_v38  ;;  %v3809_v46 = vadd.f32 %v3046_v44, %v3045_v40 }
 0x135   :  { %4525 = vst [vmem:[#allocation6_spill] sm:$0xff] %v3809_v46 }
 0x136   :  { %v3064_v48 = vpop.f32.mrb[32].mxu0 }
 0x137   :  { %v3128_v49 = vpop.f32.mrb[32].mxu1  ;;  %v3065_v50 = vpop.f32.mrb[33].mxu0 }
 0x138   :  { %v3811_v52 = vadd.f32 %v3065_v50, %v3064_v48  ;;  %v3129_v53 = vpop.f32.mrb[33].mxu1  ;;  %v3067_v55 = vpop.f32.mrb[34].mxu0  ;;  %v343_v48 = vadd.f32 %v3767_v33, %v342_v36 }
 0x139   :  { %v3813_v56 = vadd.f32 %v3129_v53, %v3128_v49  ;;  %v3131_v58 = vpop.f32.mrb[34].mxu1  ;;  %v3068_v60 = vpop.f32.mrb[35].mxu0  ;;  %v688_v49 = vadd.f32 %v3769_v35, %v687_v37 }
 0x13a   :  { %4526 = vst [vmem:[#allocation7_spill] sm:$0xff] %v3811_v52  ;;  %v3819_v0 = vadd.f32 %v3068_v60, %v3067_v55  ;;  %v3132_v1 = vpop.f32.mrb[35].mxu1 }
 0x13b   :  { %4527 = vst [vmem:[#allocation8_spill] sm:$0xff] %v3813_v56  ;;  %v3821_v4 = vadd.f32 %v3132_v1, %v3131_v58  ;;  %v344_v58 = vadd.f32 %v3771_v39, %v343_v48  ;;  %v689_v60 = vadd.f32 %v3773_v42, %v688_v49 }
 0x13c   :  { %4528 = vst [vmem:[#allocation9_spill] sm:$0xff] %v3819_v0 }
 0x13d   :  { %4529 = vst [vmem:[#allocation10_spill] sm:$0xff] %v3821_v4  ;;  %v345_v19 = vadd.f32 %v3775_v45, %v344_v58 }
 0x13e   :  { %v3070_v12 = vpop.f32.mrb[36].mxu0 }
 0x13f   :  { %v3134_v13 = vpop.f32.mrb[36].mxu1  ;;  %v3071_v14 = vpop.f32.mrb[37].mxu0 }
 0x140   :  { %v3827_v22 = vadd.f32 %v3071_v14, %v3070_v12  ;;  %v3135_v24 = vpop.f32.mrb[37].mxu1  ;;  %v3073_v26 = vpop.f32.mrb[38].mxu0 }
 0x141   :  { %v3829_v29 = vadd.f32 %v3135_v24, %v3134_v13  ;;  %v3137_v31 = vpop.f32.mrb[38].mxu1  ;;  %v3074_v32 = vpop.f32.mrb[39].mxu0  ;;  %v690_v24 = vadd.f32 %v3777_v47, %v689_v60 }
 0x142   :  { %4530 = vst [vmem:[#allocation11_spill] sm:$0xff] %v3827_v22  ;;  %v3833_v40 = vadd.f32 %v3074_v32, %v3073_v26  ;;  %v3138_v41 = vpop.f32.mrb[39].mxu1  ;;  %v1029_v26 = vadd.f32 %v3819_v0, %v3811_v52  ;;  %v346_v32 = vadd.f32 %v3779_v51, %v345_v19 }
 0x143   :  { %4531 = vst [vmem:[#allocation12_spill] sm:$0xff] %v3829_v29  ;;  %v3835_v44 = vadd.f32 %v3138_v41, %v3137_v31  ;;  %v1374_v31 = vadd.f32 %v3821_v4, %v3813_v56  ;;  %v691_v36 = vadd.f32 %v3781_v54, %v690_v24 }
 0x144   :  { %4532 = vst [vmem:[#allocation13_spill] sm:$0xff] %v3833_v40  ;;  %v1030_v37 = vadd.f32 %v3827_v22, %v1029_v26 }
 0x145   :  { %4533 = vst [vmem:[#allocation14_spill] sm:$0xff] %v3835_v44  ;;  %v1375_v48 = vadd.f32 %v3829_v29, %v1374_v31 }
 0x146   :  { %v3076_v50 = vpop.f32.mrb[40].mxu0 }
 0x147   :  { %v3140_v53 = vpop.f32.mrb[40].mxu1  ;;  %v3077_v55 = vpop.f32.mrb[41].mxu0  ;;  %v1376_v26 = vadd.f32 %v3835_v44, %v1375_v48 }
 0x148   :  { %v3841_v61 = vadd.f32 %v3077_v55, %v3076_v50  ;;  %v3141_v62 = vpop.f32.mrb[41].mxu1  ;;  %v3079_v1 = vpop.f32.mrb[42].mxu0 }
 0x149   :  { %v3843_v5 = vadd.f32 %v3141_v62, %v3140_v53  ;;  %v3143_v8 = vpop.f32.mrb[42].mxu1  ;;  %v3080_v12 = vpop.f32.mrb[43].mxu0 }
 0x14a   :  { %4534 = vst [vmem:[#allocation15_spill] sm:$0xff] %v3841_v61  ;;  %v3845_v13 = vadd.f32 %v3080_v12, %v3079_v1  ;;  %v3144_v14 = vpop.f32.mrb[43].mxu1  ;;  %v692_v12 = vadd.f32 %v3785_v59, %v691_v36 }
 0x14b   :  { %4535 = vst [vmem:[#allocation16_spill] sm:$0xff] %v3843_v5  ;;  %v3847_v17 = vadd.f32 %v3144_v14, %v3143_v8  ;;  %v347_v8 = vadd.f32 %v3783_v57, %v346_v32  ;;  %v1031_v14 = vadd.f32 %v3833_v40, %v1030_v37 }
 0x14c   :  { %4536 = vst [vmem:[#allocation17_spill] sm:$0xff] %v3845_v13 }
 0x14d   :  { %4537 = vst [vmem:[#allocation18_spill] sm:$0xff] %v3847_v17 }
 0x14e   :  { %v3082_v41 = vpop.f32.mrb[44].mxu0 }
 0x14f   :  { %v3146_v49 = vpop.f32.mrb[44].mxu1  ;;  %v3083_v50 = vpop.f32.mrb[45].mxu0 }
 0x150   :  { %v3859_v53 = vadd.f32 %v3083_v50, %v3082_v41  ;;  %v3147_v55 = vpop.f32.mrb[45].mxu1  ;;  %v3085_v58 = vpop.f32.mrb[46].mxu0  ;;  %v348_v41 = vadd.f32 %v3787_v63, %v347_v8  ;;  %v1032_v50 = vadd.f32 %v3841_v61, %v1031_v14 }
 0x151   :  { %v3861_v60 = vadd.f32 %v3147_v55, %v3146_v49  ;;  %v3149_v62 = vpop.f32.mrb[46].mxu1  ;;  %v3086_v1 = vpop.f32.mrb[47].mxu0  ;;  %v693_v49 = vadd.f32 %v3789_v2, %v692_v12  ;;  %v1377_v55 = vadd.f32 %v3843_v5, %v1376_v26 }
 0x152   :  { %4538 = vst [vmem:[#allocation19_spill] sm:$0xff] %v3859_v53  ;;  %v3866_v19 = vadd.f32 %v3086_v1, %v3085_v58  ;;  %v3150_v24 = vpop.f32.mrb[47].mxu1  ;;  %v349_v37 = vadd.f32 %v3791_v7, %v348_v41  ;;  %v1033_v1 = vadd.f32 %v3845_v13, %v1032_v50 }
 0x153   :  { %4539 = vst [vmem:[#allocation20_spill] sm:$0xff] %v3861_v60  ;;  %v3869_v31 = vadd.f32 %v3150_v24, %v3149_v62  ;;  %v694_v58 = vadd.f32 %v3793_v10, %v693_v49  ;;  %v1378_v8 = vadd.f32 %v3847_v17, %v1377_v55 }
 0x154   :  { %4540 = vst [vmem:[#allocation21_spill] sm:$0xff] %v3866_v19  ;;  %v350_v26 = vadd.f32 %v3795_v16, %v349_v37  ;;  %v1034_v41 = vadd.f32 %v3859_v53, %v1033_v1 }
 0x155   :  { %4541 = vst [vmem:[#allocation22_spill] sm:$0xff] %v3869_v31  ;;  %v695_v5 = vadd.f32 %v3797_v20, %v694_v58  ;;  %v1379_v50 = vadd.f32 %v3861_v60, %v1378_v8 }
 0x156   :  { %v3088_v32 = vpop.f32.mrb[48].mxu0  ;;  %v1035_v55 = vadd.f32 %v3866_v19, %v1034_v41 }
 0x157   :  { %v3152_v29 = vpop.f32.mrb[48].mxu1  ;;  %v3089_v36 = vpop.f32.mrb[49].mxu0  ;;  %v1380_v37 = vadd.f32 %v3869_v31, %v1379_v50 }
 0x158   :  { %v3878_v48 = vadd.f32 %v3089_v36, %v3088_v32  ;;  %v3153_v62 = vpop.f32.mrb[49].mxu1  ;;  %v3091_v24 = vpop.f32.mrb[50].mxu0  ;;  %v351_v36 = vadd.f32 %v3799_v25, %v350_v26 }
 0x159   :  { %v3881_v12 = vadd.f32 %v3153_v62, %v3152_v29  ;;  %v3155_v14 = vpop.f32.mrb[50].mxu1  ;;  %v3092_v44 = vpop.f32.mrb[51].mxu0  ;;  %v696_v29 = vadd.f32 %v3801_v28, %v695_v5 }
 0x15a   :  { %4542 = vst [vmem:[#allocation23_spill] sm:$0xff] %v3878_v48  ;;  %v3886_v4 = vadd.f32 %v3092_v44, %v3091_v24  ;;  %v3156_v49 = vpop.f32.mrb[51].mxu1  ;;  %v352_v1 = vadd.f32 %v3803_v34, %v351_v36  ;;  %v1036_v24 = vadd.f32 %v3878_v48, %v1035_v55 }
 0x15b   :  { %4543 = vst [vmem:[#allocation24_spill] sm:$0xff] %v3881_v12  ;;  %v3889_v32 = vadd.f32 %v3156_v49, %v3155_v14  ;;  %v697_v44 = vadd.f32 %v3805_v38, %v696_v29  ;;  %v1381_v26 = vadd.f32 %v3881_v12, %v1380_v37 }
 0x15c   :  { %4544 = vst [vmem:[#allocation25_spill] sm:$0xff] %v3886_v4  ;;  %v353_v36 = vadd.f32 %v3807_v43, %v352_v1  ;;  %v1037_v55 = vadd.f32 %v3886_v4, %v1036_v24 }
 0x15d   :  { %4545 = vst [vmem:[#allocation26_spill] sm:$0xff] %v3889_v32  ;;  %v698_v29 = vadd.f32 %v3809_v46, %v697_v44 }
 0x15e   :  { %v3094_v62 = vpop.f32.mrb[52].mxu0 }
 0x15f   :  { %v3158_v17 = vpop.f32.mrb[52].mxu1  ;;  %v3095_v58 = vpop.f32.mrb[53].mxu0 }
 0x160   :  { %v3898_v8 = vadd.f32 %v3095_v58, %v3094_v62  ;;  %v3159_v14 = vpop.f32.mrb[53].mxu1  ;;  %v3097_v49 = vpop.f32.mrb[54].mxu0  ;;  %v1382_v62 = vadd.f32 %v3889_v32, %v1381_v26 }
 0x161   :  { %v3901_v5 = vadd.f32 %v3159_v14, %v3158_v17  ;;  %v3161_v41 = vpop.f32.mrb[54].mxu1  ;;  %v3098_v60 = vpop.f32.mrb[55].mxu0 }
 0x162   :  { %4546 = vst [vmem:[#allocation27_spill] sm:$0xff] %v3898_v8  ;;  %v3903_v19 = vadd.f32 %v3098_v60, %v3097_v49  ;;  %v3162_v50 = vpop.f32.mrb[55].mxu1  ;;  %v1038_v58 = vadd.f32 %v3898_v8, %v1037_v55  ;;  %v354_v60 = vrot.slane %v353_v36, 4  ;;  %v699_v49 = vrot.slane %v698_v29, 4 }
 0x163   :  { %4547 = vst [vmem:[#allocation28_spill] sm:$0xff] %v3901_v5  ;;  %v3905_v31 = vadd.f32 %v3162_v50, %v3161_v41  ;;  %v1383_v17 = vadd.f32 %v3901_v5, %v1382_v62 }
 0x164   :  { %4548 = vst [vmem:[#allocation29_spill] sm:$0xff] %v3903_v19  ;;  %v1039_v24 = vadd.f32 %v3903_v19, %v1038_v58  ;;  %v355_v5 = vadd.f32 %v354_v60, %v353_v36  ;;  %v700_v8 = vadd.f32 %v699_v49, %v698_v29 }
 0x165   :  { %4549 = vst [vmem:[#allocation30_spill] sm:$0xff] %v3905_v31  ;;  %v1384_v32 = vadd.f32 %v3905_v31, %v1383_v17 }
 0x166   :  { %v3100_v37 = vpop.f32.mrb[56].mxu0  ;;  %v356_v38 = vrot.slane %v355_v5, 2  ;;  %v701_v28 = vrot.slane %v700_v8, 2 }
 0x167   :  { %v3164_v14 = vpop.f32.mrb[56].mxu1  ;;  %v3101_v12 = vpop.f32.mrb[57].mxu0 }
 0x168   :  { %v3913_v48 = vadd.f32 %v3101_v12, %v3100_v37  ;;  %v3165_v41 = vpop.f32.mrb[57].mxu1  ;;  %v3103_v50 = vpop.f32.mrb[58].mxu0 }
 0x169   :  { %v3915_v1 = vadd.f32 %v3165_v41, %v3164_v14  ;;  %v3167_v44 = vpop.f32.mrb[58].mxu1  ;;  %v3104_v46 = vpop.f32.mrb[59].mxu0 }
 0x16a   :  { %4550 = vst [vmem:[#allocation31_spill] sm:$0xff] %v3913_v48  ;;  %v3918_v26 = vadd.f32 %v3104_v46, %v3103_v50  ;;  %v3168_v55 = vpop.f32.mrb[59].mxu1  ;;  %v1040_v12 = vadd.f32 %v3913_v48, %v1039_v24 }
 0x16b   :  { %4551 = vst [vmem:[#allocation32_spill] sm:$0xff] %v3915_v1  ;;  %v3921_v62 = vadd.f32 %v3168_v55, %v3167_v44  ;;  %v1385_v37 = vadd.f32 %v3915_v1, %v1384_v32 }
 0x16c   :  { %4552 = vst [vmem:[#allocation33_spill] sm:$0xff] %v3918_v26  ;;  %v1041_v58 = vadd.f32 %v3918_v26, %v1040_v12  ;;  %v357_v12 = vadd.f32 %v356_v38, %v355_v5 }
 0x16d   :  { %4553 = vst [vmem:[#allocation34_spill] sm:$0xff] %v3921_v62  ;;  %v1386_v17 = vadd.f32 %v3921_v62, %v1385_v37 }
 0x16e   :  { %v3106_v4 = vpop.f32.mrb[60].mxu0 }
 0x16f   :  { %v3170_v14 = vpop.f32.mrb[60].mxu1  ;;  %v3107_v41 = vpop.f32.mrb[61].mxu0 }
 0x170   :  { %v3926_v46 = vadd.f32 %v3107_v41, %v3106_v4  ;;  %v3171_v50 = vpop.f32.mrb[61].mxu1  ;;  %v3109_v19 = vpop.f32.mrb[62].mxu0  ;;  %v702_v4 = vadd.f32 %v701_v28, %v700_v8 }
 0x171   :  { %v3929_v44 = vadd.f32 %v3171_v50, %v3170_v14  ;;  %v3173_v36 = vpop.f32.mrb[62].mxu1  ;;  %v3110_v29 = vpop.f32.mrb[63].mxu0  ;;  %v358_v50 = vrot.slane %v357_v12, 1 }
 0x172   :  { %4554 = vst [vmem:[#allocation35_spill] sm:$0xff] %v3926_v46  ;;  %v1042_v60 = vadd.f32 %v3926_v46, %v1041_v58  ;;  %v3932_v32 = vadd.f32 %v3110_v29, %v3109_v19  ;;  %v3174_v49 = vpop.f32.mrb[63].mxu1  ;;  %v703_v62 = vrot.slane %v702_v4, 1 }
 0x173   :  { %4555 = vst [vmem:[#allocation36_spill] sm:$0xff] %v3929_v44  ;;  %v1387_v24 = vadd.f32 %v3929_v44, %v1386_v17  ;;  %v3935_v55 = vadd.f32 %v3174_v49, %v3173_v36  ;;  %v359_v29 = vadd.f32 %v358_v50, %v357_v12 }
 0x174   :  { %4556 = vst [vmem:[#allocation37_spill] sm:$0xff] %v3932_v32  ;;  %v1043_v41 = vadd.f32 %v3932_v32, %v1042_v60  ;;  %v704_v46 = vadd.f32 %v703_v62, %v702_v4 }
 0x175   :  { %4557 = vst [vmem:[#allocation38_spill] sm:$0xff] %v3935_v55  ;;  %v1388_v1 = vadd.f32 %v3935_v55, %v1387_v24 }
 0x176   :  { %v1044_v37 = vrot.slane %v1043_v41, 4  ;;  %v705_v38 = vadd.f32 %v704_v46, %v359_v29 }
 0x177   :  { %v1389_v14 = vrot.slane %v1388_v1, 4 }
 0x178   :  { %v1045_v31 = vadd.f32 %v1044_v37, %v1043_v41 }
 0x179   :  { %v1390_v26 = vadd.f32 %v1389_v14, %v1388_v1 }
 0x17a   :  { %v1046_v58 = vrot.slane %v1045_v31, 2 }
 0x17b   :  { %v1391_v19 = vrot.slane %v1390_v26, 2 }
 0x17c   :  { %v1047_v48 = vadd.f32 %v1046_v58, %v1045_v31 }
 0x17d   :  { %v1392_v17 = vadd.f32 %v1391_v19, %v1390_v26 }
 0x17e   :  { %v1048_v36 = vrot.slane %v1047_v48, 1 }
 0x17f   :  { %v1393_v49 = vrot.slane %v1392_v17, 1 }
 0x180   :  { %v1049_v28 = vadd.f32 %v1048_v36, %v1047_v48 }
 0x181   :  { %v1394_v5 = vadd.f32 %v1393_v49, %v1392_v17 }
 0x182   :  { %v1050_v8 = vadd.f32 %v1049_v28, %v705_v38 }
 0x184   :  { %v1395_v60 = vadd.f32 %v1394_v5, %v1050_v8 }
 0x186   :  { %v3939_v24 = vmul.f32 0.001953125, %v1395_v60 }
 0x188   :  { %v1398_v55 = vsub.f32 %v3747_v3, %v3939_v24  ;;  %v1399_v1 = vsub.f32 %v3751_v9, %v3939_v24  ;;  %v1400_v62 = vsub.f32 %v3755_v15, %v3939_v24  ;;  %v1401_v46 = vsub.f32 %v3759_v21, %v3939_v24 }
 0x189   :  { %v1402_v48 = vsub.f32 %v3763_v27, %v3939_v24  ;;  %v1452_v41 = vsub.f32 %v3749_v6, %v3939_v24  ;;  %v1453_v37 = vsub.f32 %v3753_v11, %v3939_v24  ;;  %v1403_v14 = vsub.f32 %v3767_v33, %v3939_v24 }
 0x18a   :  { %v1414_v31 = vmul.f32 %v1398_v55, %v1398_v55  ;;  %v1415_v26 = vmul.f32 %v1399_v1, %v1399_v1  ;;  %v1416_v12 = vmul.f32 %v1400_v62, %v1400_v62  ;;  %v1417_v50 = vmul.f32 %v1401_v46, %v1401_v46 }
 0x18b   :  { %v1404_v58 = vsub.f32 %v3771_v39, %v3939_v24  ;;  %v1418_v19 = vmul.f32 %v1402_v48, %v1402_v48  ;;  %v1454_v17 = vsub.f32 %v3757_v18, %v3939_v24  ;;  %v1468_v36 = vmul.f32 %v1452_v41, %v1452_v41 }
 0x18c   :  { %v1430_v4 = vadd.f32 %v1415_v26, %v1414_v31  ;;  %v1469_v49 = vmul.f32 %v1453_v37, %v1453_v37  ;;  %v1405_v38 = vsub.f32 %v3775_v45, %v3939_v24  ;;  %v1419_v28 = vmul.f32 %v1403_v14, %v1403_v14 }
 0x18d   :  { %v1455_v5 = vsub.f32 %v3761_v23, %v3939_v24  ;;  %v1406_v60 = vsub.f32 %v3779_v51, %v3939_v24  ;;  %v1420_v1 = vmul.f32 %v1404_v58, %v1404_v58  ;;  %v1456_v31 = vsub.f32 %v3765_v30, %v3939_v24 }
 0x18e   :  { %v1431_v55 = vadd.f32 %v1430_v4, %v1416_v12  ;;  %v1470_v26 = vmul.f32 %v1454_v17, %v1454_v17  ;;  %v1484_v46 = vadd.f32 %v1469_v49, %v1468_v36  ;;  %v1407_v48 = vsub.f32 %v3783_v57, %v3939_v24 }
 0x18f   :  { %v1421_v12 = vmul.f32 %v1405_v38, %v1405_v38  ;;  %v1457_v41 = vsub.f32 %v3769_v35, %v3939_v24  ;;  %v1471_v37 = vmul.f32 %v1455_v5, %v1455_v5  ;;  %v1506_v58 = vsub.f32 %v3811_v52, %v3939_v24 }
 0x190   :  { %v1432_v29 = vadd.f32 %v1431_v55, %v1417_v50  ;;  %v1485_v14 = vadd.f32 %v1484_v46, %v1470_v26  ;;  %v1422_v50 = vmul.f32 %v1406_v60, %v1406_v60  ;;  %v1458_v17 = vsub.f32 %v3773_v42, %v3939_v24 }
 0x191   :  { %v1472_v36 = vmul.f32 %v1456_v31, %v1456_v31  ;;  %v1409_v38 = vsub.f32 %v3791_v7, %v3939_v24  ;;  %v1411_v60 = vsub.f32 %v3799_v25, %v3939_v24  ;;  %v1508_v31 = vsub.f32 %v3827_v22, %v3939_v24 }
 0x192   :  { %v1433_v8 = vadd.f32 %v1432_v29, %v1418_v19  ;;  %v1507_v19 = vsub.f32 %v3819_v0, %v3939_v24  ;;  %v1408_v29 = vsub.f32 %v3787_v63, %v3939_v24  ;;  %v1486_v49 = vadd.f32 %v1485_v14, %v1471_v37 }
 0x193   :  { %v1460_v14 = vsub.f32 %v3781_v54, %v3939_v24  ;;  %v3997_v0 = vsub.f32 %v3807_v43, %v3939_v24  ;;  %v1462_v22 = vsub.f32 %v3789_v2, %v3939_v24 }
 0x194   :  { %v1434_v62 = vadd.f32 %v1433_v8, %v1419_v28  ;;  %v1410_v28 = vsub.f32 %v3795_v16, %v3939_v24  ;;  %v1423_v8 = vmul.f32 %v1407_v48, %v1407_v48  ;;  %v1487_v26 = vadd.f32 %v1486_v49, %v1472_v36 }
 0x195   :  { %v1424_v37 = vmul.f32 %v1408_v29, %v1408_v29  ;;  %v1474_v48 = vmul.f32 %v1458_v17, %v1458_v17  ;;  %v1509_v36 = vsub.f32 %v3833_v40, %v3939_v24  ;;  %v1510_v17 = vsub.f32 %v3841_v61, %v3939_v24  ;;  %v4563_v61 = vld [vmem:[#allocation12_spill] sm:$0xff] }
 0x196   :  { %v1435_v4 = vadd.f32 %v1434_v62, %v1420_v1  ;;  %v1459_v1 = vsub.f32 %v3777_v47, %v3939_v24  ;;  %v1473_v62 = vmul.f32 %v1457_v41, %v1457_v41  ;;  %v1425_v41 = vmul.f32 %v1409_v38, %v1409_v38 }
 0x197   :  { %v1476_v38 = vmul.f32 %v1460_v14, %v1460_v14  ;;  %v1478_v14 = vmul.f32 %v1462_v22, %v1462_v22 }
 0x198   :  { %v1436_v55 = vadd.f32 %v1435_v4, %v1421_v12  ;;  %v1522_v12 = vmul.f32 %v1506_v58, %v1506_v58  ;;  %v1523_v4 = vmul.f32 %v1507_v19, %v1507_v19  ;;  %v1461_v58 = vsub.f32 %v3785_v59, %v3939_v24 }
 0x199   :  { %v1475_v19 = vmul.f32 %v1459_v1, %v1459_v1 }
 0x19a   :  { %v1437_v5 = vadd.f32 %v1436_v55, %v1422_v50  ;;  %v1488_v50 = vadd.f32 %v1487_v26, %v1473_v62  ;;  %v1412_v55 = vsub.f32 %v3803_v34, %v3939_v24  ;;  %v1538_v62 = vadd.f32 %v1523_v4, %v1522_v12 }
 0x19b   :  { %v1427_v26 = vmul.f32 %v1411_v60, %v1411_v60  ;;  %v1464_v60 = vsub.f32 %v3797_v20, %v3939_v24  ;;  %v1526_v12 = vmul.f32 %v1510_v17, %v1510_v17  ;;  %v4561_v17 = vld [vmem:[#allocation5_spill] sm:$0xff] }
 0x19c   :  { %v1438_v46 = vadd.f32 %v1437_v5, %v1423_v8  ;;  %v1489_v29 = vadd.f32 %v1488_v50, %v1474_v48  ;;  %v1426_v8 = vmul.f32 %v1410_v28, %v1410_v28  ;;  %v1524_v5 = vmul.f32 %v1508_v31, %v1508_v31 }
 0x19d   :  { %v1428_v54 = vmul.f32 %v1412_v55, %v1412_v55  ;;  %v1463_v28 = vsub.f32 %v3793_v10, %v3939_v24  ;;  %v1477_v48 = vmul.f32 %v1461_v58, %v1461_v58  ;;  %v1512_v31 = vsub.f32 %v3859_v53, %v3939_v24 }
 0x19e   :  { %v1439_v49 = vadd.f32 %v1438_v46, %v1424_v37  ;;  %v1490_v52 = vadd.f32 %v1489_v29, %v1475_v19  ;;  %v1511_v46 = vsub.f32 %v3845_v13, %v3939_v24  ;;  %v1525_v37 = vmul.f32 %v1509_v36, %v1509_v36  ;;  %v4559_v19 = vld [vmem:[#allocation4_spill] sm:$0xff] }
 0x19f   :  { %v1539_v40 = vadd.f32 %v1538_v62, %v1524_v5  ;;  %v1560_v36 = vsub.f32 %v3813_v56, %v3939_v24  ;;  %v1465_v58 = vsub.f32 %v4559_v19, %v3939_v24  ;;  %v1479_v22 = vmul.f32 %v1463_v28, %v1463_v28 }
 0x1a0   :  { %v1440_v1 = vadd.f32 %v1439_v49, %v1425_v41  ;;  %v1491_v50 = vadd.f32 %v1490_v52, %v1476_v38  ;;  %v4558_v41 = vld [vmem:[#allocation10_spill] sm:$0xff]  ;;  %v4560_v52 = vld [vmem:[#allocation21_spill] sm:$0xff]  ;;  %v1527_v5 = vmul.f32 %v1511_v46, %v1511_v46  ;;  %v1528_v53 = vmul.f32 %v1512_v31, %v1512_v31 }
 0x1a1   :  { %v1540_v4 = vadd.f32 %v1539_v40, %v1525_v37  ;;  %v1561_v49 = vsub.f32 %v4558_v41, %v3939_v24  ;;  %v1513_v29 = vsub.f32 %v4560_v52, %v3939_v24  ;;  %v1466_v40 = vsub.f32 %v4561_v17, %v3939_v24  ;;  %v4564_v46 = vld [vmem:[#allocation6_spill] sm:$0xff] }
 0x1a2   :  { %v1492_v55 = vadd.f32 %v1491_v50, %v1477_v48  ;;  %v1441_v38 = vadd.f32 %v1440_v1, %v1426_v8  ;;  %v1480_v48 = vmul.f32 %v1464_v60, %v1464_v60  ;;  %v4562_v50 = vld [vmem:[#allocation23_spill] sm:$0xff]  ;;  %v1562_v19 = vsub.f32 %v4563_v61, %v3939_v24  ;;  %v4565_v1 = vld [vmem:[#allocation25_spill] sm:$0xff]  ;;  %v4566_v31 = vld [vmem:[#allocation14_spill] sm:$0xff] }
 0x1a3   :  { %v1541_v62 = vadd.f32 %v1540_v4, %v1526_v12  ;;  %v1514_v56 = vsub.f32 %v4562_v50, %v3939_v24  ;;  %v1576_v20 = vmul.f32 %v1560_v36, %v1560_v36  ;;  %v1577_v52 = vmul.f32 %v1561_v49, %v1561_v49  ;;  %v4568_v50 = vld [vmem:[#allocation16_spill] sm:$0xff] }
 0x1a4   :  { %v1493_v37 = vadd.f32 %v1492_v55, %v1478_v14  ;;  %v1467_v8 = vsub.f32 %v4564_v46, %v3939_v24  ;;  %v1515_v12 = vsub.f32 %v4565_v1, %v3939_v24  ;;  %v1529_v28 = vmul.f32 %v1513_v29, %v1513_v29 }
 0x1a5   :  { %v1542_v41 = vadd.f32 %v1541_v62, %v1527_v5  ;;  %v1442_v60 = vadd.f32 %v1441_v38, %v1427_v26  ;;  %v1481_v14 = vmul.f32 %v1465_v58, %v1465_v58  ;;  %v1563_v5 = vsub.f32 %v4566_v31, %v3939_v24  ;;  %v4570_v58 = vld [vmem:[#allocation18_spill] sm:$0xff] }
 0x1a6   :  { %v1494_v13 = vadd.f32 %v1493_v37, %v1479_v22  ;;  %v1482_v62 = vmul.f32 %v1466_v40, %v1466_v40  ;;  %v4567_v22 = vld [vmem:[#allocation27_spill] sm:$0xff]  ;;  %v1530_v36 = vmul.f32 %v1514_v56, %v1514_v56  ;;  %v1564_v46 = vsub.f32 %v4568_v50, %v3939_v24 }
 0x1a7   :  { %v1543_v4 = vadd.f32 %v1542_v41, %v1528_v53  ;;  %v1516_v37 = vsub.f32 %v4567_v22, %v3939_v24  ;;  %v1578_v17 = vmul.f32 %v1562_v19, %v1562_v19  ;;  %v1592_v1 = vadd.f32 %v1577_v52, %v1576_v20  ;;  %v4569_v53 = vld [vmem:[#allocation29_spill] sm:$0xff] }
 0x1a8   :  { %v1495_v55 = vadd.f32 %v1494_v13, %v1480_v48  ;;  %v1517_v26 = vsub.f32 %v4569_v53, %v3939_v24  ;;  %v1531_v41 = vmul.f32 %v1515_v12, %v1515_v12  ;;  %v1565_v29 = vsub.f32 %v4570_v58, %v3939_v24 }
 0x1a9   :  { %v1544_v49 = vadd.f32 %v1543_v4, %v1529_v28  ;;  %v1443_v38 = vadd.f32 %v1442_v60, %v1428_v54  ;;  %v1579_v48 = vmul.f32 %v1563_v5, %v1563_v5  ;;  %v1593_v31 = vadd.f32 %v1592_v1, %v1578_v17  ;;  %v4571_v28 = vld [vmem:[#allocation31_spill] sm:$0xff]  ;;  %v4574_v17 = vld [vmem:[#allocation22_spill] sm:$0xff] }
 0x1aa   :  { %v1496_v61 = vadd.f32 %v1495_v55, %v1481_v14  ;;  %v1429_v56 = vmul.f32 %v3997_v0, %v3997_v0  ;;  %v1518_v4 = vsub.f32 %v4571_v28, %v3939_v24  ;;  %v1532_v19 = vmul.f32 %v1516_v37, %v1516_v37  ;;  %v4572_v14 = vld [vmem:[#allocation20_spill] sm:$0xff]  ;;  %v4575_v37 = vld [vmem:[#allocation35_spill] sm:$0xff] }
 0x1ab   :  { %v1545_v13 = vadd.f32 %v1544_v49, %v1530_v36  ;;  %v1483_v52 = vmul.f32 %v1467_v8, %v1467_v8  ;;  %v1566_v12 = vsub.f32 %v4572_v14, %v3939_v24  ;;  %v1580_v55 = vmul.f32 %v1564_v46, %v1564_v46  ;;  %v4573_v49 = vld [vmem:[#allocation33_spill] sm:$0xff]  ;;  %v4576_v46 = vld [vmem:[#allocation24_spill] sm:$0xff] }
 0x1ac   :  { %v1497_v40 = vadd.f32 %v1496_v61, %v1482_v62  ;;  %v1594_v36 = vadd.f32 %v1593_v31, %v1579_v48  ;;  %v1519_v54 = vsub.f32 %v4573_v49, %v3939_v24  ;;  %v1533_v61 = vmul.f32 %v1517_v26, %v1517_v26 }
 0x1ad   :  { %v1546_v20 = vadd.f32 %v1545_v13, %v1531_v41  ;;  %v1567_v1 = vsub.f32 %v4574_v17, %v3939_v24  ;;  %v1444_v0 = vadd.f32 %v1443_v38, %v1429_v56  ;;  %v1581_v62 = vmul.f32 %v1565_v29, %v1565_v29  ;;  %v4577_v38 = vld [vmem:[#allocation26_spill] sm:$0xff] }
 0x1ae   :  { %v1498_v5 = vadd.f32 %v1497_v40, %v1483_v52  ;;  %v1595_v58 = vadd.f32 %v1594_v36, %v1580_v55  ;;  %v1520_v8 = vsub.f32 %v4575_v37, %v3939_v24  ;;  %v1534_v41 = vmul.f32 %v1518_v4, %v1518_v4  ;;  %v4579_v17 = vld [vmem:[#allocation30_spill] sm:$0xff] }
 0x1af   :  { %v1547_v60 = vadd.f32 %v1546_v20, %v1532_v19  ;;  %v1568_v31 = vsub.f32 %v4576_v46, %v3939_v24  ;;  %v1582_v48 = vmul.f32 %v1566_v12, %v1566_v12  ;;  %v1521_v26 = vsub.f32 %v3932_v32, %v3939_v24 }
 0x1b0   :  { %v1596_v14 = vadd.f32 %v1595_v58, %v1581_v62  ;;  %v1535_v19 = vmul.f32 %v1519_v54, %v1519_v54  ;;  %v1569_v40 = vsub.f32 %v4577_v38, %v3939_v24  ;;  %v1445_v29 = vrot.slane %v1444_v0, 4 }
 0x1b1   :  { %v1548_v13 = vadd.f32 %v1547_v60, %v1533_v61  ;;  %v1499_v56 = vrot.slane %v1498_v5, 4  ;;  %v1583_v52 = vmul.f32 %v1567_v1, %v1567_v1  ;;  %v1536_v36 = vmul.f32 %v1520_v8, %v1520_v8  ;;  %v4578_v61 = vld [vmem:[#allocation28_spill] sm:$0xff] }
 0x1b2   :  { %v1597_v55 = vadd.f32 %v1596_v14, %v1582_v48  ;;  %v1570_v60 = vsub.f32 %v4578_v61, %v3939_v24  ;;  %v1584_v46 = vmul.f32 %v1568_v31, %v1568_v31  ;;  %v1537_v58 = vmul.f32 %v1521_v26, %v1521_v26  ;;  %v4580_v1 = vld [vmem:[#allocation32_spill] sm:$0xff] }
 0x1b3   :  { %v1549_v20 = vadd.f32 %v1548_v13, %v1534_v41  ;;  %v1571_v54 = vsub.f32 %v4579_v17, %v3939_v24  ;;  %v1446_v41 = vadd.f32 %v1445_v29, %v1444_v0  ;;  %v1500_v13 = vadd.f32 %v1499_v56, %v1498_v5 }
 0x1b4   :  { %v1598_v12 = vadd.f32 %v1597_v55, %v1583_v52  ;;  %v1585_v50 = vmul.f32 %v1569_v40, %v1569_v40  ;;  %v1572_v14 = vsub.f32 %v4580_v1, %v3939_v24  ;;  %v1586_v8 = vmul.f32 %v1570_v60, %v1570_v60  ;;  %v4582_v40 = vld [vmem:[#allocation38_spill] sm:$0xff] }
 0x1b5   :  { %v1550_v4 = vadd.f32 %v1549_v20, %v1535_v19  ;;  %v4581_v20 = vld [vmem:[#allocation34_spill] sm:$0xff]  ;;  %v1447_v52 = vrot.slane %v1446_v41, 2  ;;  %v1501_v26 = vrot.slane %v1500_v13, 2  ;;  %v1587_v55 = vmul.f32 %v1571_v54, %v1571_v54 }
 0x1b6   :  { %v1599_v38 = vadd.f32 %v1598_v12, %v1584_v46  ;;  %v1573_v31 = vsub.f32 %v4581_v20, %v3939_v24  ;;  %v1574_v0 = vsub.f32 %v3929_v44, %v3939_v24  ;;  %v1588_v5 = vmul.f32 %v1572_v14, %v1572_v14 }
 0x1b7   :  { %v1551_v62 = vadd.f32 %v1550_v4, %v1536_v36  ;;  %v1575_v29 = vsub.f32 %v4582_v40, %v3939_v24  ;;  %v1448_v56 = vadd.f32 %v1447_v52, %v1446_v41  ;;  %v1502_v60 = vadd.f32 %v1501_v26, %v1500_v13 }
 0x1b8   :  { %v1600_v48 = vadd.f32 %v1599_v38, %v1585_v50  ;;  %v1589_v50 = vmul.f32 %v1573_v31, %v1573_v31 }
 0x1b9   :  { %v1552_v32 = vadd.f32 %v1551_v62, %v1537_v58  ;;  %v1590_v58 = vmul.f32 %v1574_v0, %v1574_v0  ;;  %v1449_v20 = vrot.slane %v1448_v56, 1  ;;  %v1503_v1 = vrot.slane %v1502_v60, 1 }
 0x1ba   :  { %v1601_v36 = vadd.f32 %v1600_v48, %v1586_v8  ;;  %v1591_v54 = vmul.f32 %v1575_v29, %v1575_v29  ;;  %v1623_v29 = vlaneseq }
 0x1bb   :  { %v1553_v19 = vrot.slane %v1552_v32, 4  ;;  %v1504_v44 = vadd.f32 %v1503_v1, %v1502_v60  ;;  %v1617_v1 = vld [vmem:[%s4456_s2] sm:$0x1] }
 0x1bc   :  { %v1602_v46 = vadd.f32 %v1601_v36, %v1587_v55 }
 0x1bd   :  { %v1554_v4 = vadd.f32 %v1553_v19, %v1552_v32  ;;  %v1450_v19 = vadd.f32 %v1449_v20, %v1448_v56 }
 0x1be   :  { %v1603_v38 = vadd.f32 %v1602_v46, %v1588_v5 }
 0x1bf   :  { %v1555_v12 = vrot.slane %v1554_v4, 2  ;;  %v1505_v17 = vadd.f32 %v1504_v44, %v1450_v19  ;;  %v1619_v44 = vld [vmem:[%s4457_s3] sm:$0x1] }
 0x1c0   :  { %v1604_v62 = vadd.f32 %v1603_v38, %v1589_v50  ;;  %v1624_v50 = vshrl.u32 %v1623_v29, 7 }
 0x1c1   :  { %v1556_v32 = vadd.f32 %v1555_v12, %v1554_v4 }
 0x1c2   :  { %v1605_v8 = vadd.f32 %v1604_v62, %v1590_v58  ;;  %v1625_v20 = vsub.s32 0, %v1624_v50 }
 0x1c3   :  { %v1557_v55 = vrot.slane %v1556_v32, 1 }
 0x1c4   :  { %v1606_v48 = vadd.f32 %v1605_v8, %v1591_v54 }
 0x1c5   :  { %v1558_v41 = vadd.f32 %v1557_v55, %v1556_v32 }
 0x1c6   :  { %v1607_v14 = vrot.slane %v1606_v48, 4 }
 0x1c7   :  { %v1559_v31 = vadd.f32 %v1558_v41, %v1505_v17 }
 0x1c8   :  { %v1608_v36 = vadd.f32 %v1607_v14, %v1606_v48 }
 0x1ca   :  { %v1609_v40 = vrot.slane %v1608_v36, 2 }
 0x1cc   :  { %v1610_v13 = vadd.f32 %v1609_v40, %v1608_v36 }
 0x1ce   :  { %v1611_v52 = vrot.slane %v1610_v13, 1 }
 0x1d0   :  { %v1612_v26 = vadd.f32 %v1611_v52, %v1610_v13 }
 0x1d2   :  { %v1613_v0 = vadd.f32 %v1612_v26, %v1559_v31 }
 0x1d4   :  { %v1614_v5 = vmul.f32 0.001953125, %v1613_v0 }
 0x1d6   :  { %v1615_v46 = vadd.f32 1e-05, %v1614_v5 }
 0x1d8   :  { %3336 = vrsqrt.f32 %v1615_v46 }
 0x1e2   :  { %v3337_v4 = vpop.eup %3336 }
 0x1e3   :  { %v1618_v56 = vmul.f32 %v3337_v4, %v1617_v1 }
 0x1e5   :  { %v1620_v17 = vmul.f32 %v1618_v56, %v3939_v24  ;;  %v4080_v40 = vrot.slane %v1618_v56, %v1625_v20 }
 0x1e7   :  { %v1621_v60 = vsub.f32 %v1619_v44, %v1620_v17  ;;  %v1628_v38 = vmul.f32 %v3747_v3, %v4080_v40  ;;  %v1629_v12 = vmul.f32 %v3751_v9, %v4080_v40  ;;  %v1630_v58 = vmul.f32 %v3755_v15, %v4080_v40 }
 0x1e8   :  { %v1631_v62 = vmul.f32 %v3759_v21, %v4080_v40  ;;  %v1632_v54 = vmul.f32 %v3763_v27, %v4080_v40  ;;  %v1633_v24 = vmul.f32 %v3767_v33, %v4080_v40  ;;  %v1634_v8 = vmul.f32 %v3771_v39, %v4080_v40 }
 0x1e9   :  { %v1635_v3 = vmul.f32 %v3775_v45, %v4080_v40  ;;  %v1636_v9 = vmul.f32 %v3779_v51, %v4080_v40  ;;  %v1637_v15 = vmul.f32 %v3783_v57, %v4080_v40  ;;  %v1638_v21 = vmul.f32 %v3787_v63, %v4080_v40 }
 0x1ea   :  { %v1639_v27 = vmul.f32 %v3791_v7, %v4080_v40  ;;  %v1640_v33 = vmul.f32 %v3795_v16, %v4080_v40  ;;  %v1641_v39 = vmul.f32 %v3799_v25, %v4080_v40  ;;  %v1642_v45 = vmul.f32 %v3803_v34, %v4080_v40 }
 0x1eb   :  { %v1643_v51 = vmul.f32 %v3807_v43, %v4080_v40  ;;  %v4114_v32 = vrot.slane %v1621_v60, %v1625_v20  ;;  %v4118_v57 = vmul.f32 %v3749_v6, %v4080_v40  ;;  %v4122_v63 = vmul.f32 %v3753_v11, %v4080_v40 }
 0x1ec   :  { %v4126_v7 = vmul.f32 %v3757_v18, %v4080_v40  ;;  %v4130_v16 = vmul.f32 %v3761_v23, %v4080_v40  ;;  %v4134_v25 = vmul.f32 %v3765_v30, %v4080_v40  ;;  %v4138_v6 = vmul.f32 %v3769_v35, %v4080_v40 }
 0x1ed   :  { %v1650_v34 = vadd.f32 %v4114_v32, %v1628_v38  ;;  %v1651_v11 = vadd.f32 %v4114_v32, %v1629_v12  ;;  %v1652_v43 = vadd.f32 %v4114_v32, %v1630_v58  ;;  %v1653_v18 = vadd.f32 %v4114_v32, %v1631_v62 }
 0x1ee   :  { %v1654_v48 = vadd.f32 %v4114_v32, %v1632_v54  ;;  %v1655_v23 = vadd.f32 %v4114_v32, %v1633_v24  ;;  %v1656_v19 = vadd.f32 %v4114_v32, %v1634_v8  ;;  %v1657_v30 = vadd.f32 %v4114_v32, %v1635_v3 }
 0x1ef   :  { %v1658_v14 = vadd.f32 %v4114_v32, %v1636_v9  ;;  %v1659_v35 = vadd.f32 %v4114_v32, %v1637_v15  ;;  %v1660_v55 = vadd.f32 %v4114_v32, %v1638_v21  ;;  %v1661_v36 = vadd.f32 %v4114_v32, %v1639_v27 }
 0x1f0   :  { %v1662_v41 = vadd.f32 %v4114_v32, %v1640_v33  ;;  %v1663_v13 = vadd.f32 %v4114_v32, %v1641_v39  ;;  %v1664_v31 = vadd.f32 %v4114_v32, %v1642_v45  ;;  %v1665_v52 = vadd.f32 %v4114_v32, %v1643_v51 }
 0x1f1   :  { %vm1666_vm0 = vcmp.ge.f32.partialorder %v1650_v34, 0.0  ;;  %vm1667_vm1 = vcmp.ge.f32.partialorder %v1651_v11, 0.0  ;;  %vm1668_vm2 = vcmp.ge.f32.partialorder %v1652_v43, 0.0  ;;  %vm1669_vm3 = vcmp.ge.f32.partialorder %v1653_v18, 0.0 }
 0x1f2   :  { %vm1670_vm4 = vcmp.ge.f32.partialorder %v1654_v48, 0.0  ;;  %vm1671_vm5 = vcmp.ge.f32.partialorder %v1655_v23, 0.0  ;;  %vm1672_vm6 = vcmp.ge.f32.partialorder %v1656_v19, 0.0  ;;  %vm1673_vm7 = vcmp.ge.f32.partialorder %v1657_v30, 0.0 }
 0x1f3   :  { %vm1674_vm8 = vcmp.ge.f32.partialorder %v1658_v14, 0.0  ;;  %vm1675_vm9 = vcmp.ge.f32.partialorder %v1659_v35, 0.0  ;;  %vm1676_vm10 = vcmp.ge.f32.partialorder %v1660_v55, 0.0  ;;  %vm1677_vm11 = vcmp.ge.f32.partialorder %v1661_v36, 0.0 }
 0x1f4   :  { %vm1678_vm12 = vcmp.ge.f32.partialorder %v1662_v41, 0.0  ;;  %vm1679_vm13 = vcmp.ge.f32.partialorder %v1663_v13, 0.0  ;;  %vm1680_vm14 = vcmp.ge.f32.partialorder %v1664_v31, 0.0  ;;  %vm1681_vm15 = vcmp.ge.f32.partialorder %v1665_v52, 0.0 }
 0x1f5   :  { %v1682_v26 = vmul.f32 0.01, %v1650_v34  ;;  %v1683_v0 = vmul.f32 0.01, %v1651_v11  ;;  %v1684_v5 = vmul.f32 0.01, %v1652_v43  ;;  %v1800_v46 = vmul.f32 %v3773_v42, %v4080_v40 }
 0x1f6   :  { %v1685_v29 = vmul.f32 0.01, %v1653_v18  ;;  %v1686_v50 = vmul.f32 0.01, %v1654_v48  ;;  %v1687_v1 = vmul.f32 0.01, %v1655_v23  ;;  %v1801_v20 = vmul.f32 %v3777_v47, %v4080_v40 }
 0x1f7   :  { %v1688_v4 = vmul.f32 0.01, %v1656_v19  ;;  %v1689_v56 = vmul.f32 0.01, %v1657_v30  ;;  %v1690_v44 = vmul.f32 0.01, %v1658_v14  ;;  %v1698_v17 = vsel %vm1666_vm0, %v1650_v34, %v1682_v26 }
 0x1f8   :  { %v1691_v60 = vmul.f32 0.01, %v1659_v35  ;;  %v1692_v38 = vmul.f32 0.01, %v1660_v55  ;;  %v1693_v12 = vmul.f32 0.01, %v1661_v36  ;;  %v1699_v58 = vsel %vm1667_vm1, %v1651_v11, %v1683_v0 }
 0x1f9   :  { %v1694_v62 = vmul.f32 0.01, %v1662_v41  ;;  %v1695_v54 = vmul.f32 0.01, %v1663_v13  ;;  %v1696_v24 = vmul.f32 0.01, %v1664_v31  ;;  %v1700_v42 = vsel %vm1668_vm2, %v1652_v43, %v1684_v5 }
 0x1fa   :  { %v1697_v8 = vmul.f32 0.01, %v1665_v52  ;;  %v1701_v3 = vsel %vm1669_vm3, %v1653_v18, %v1685_v29  ;;  %v1702_v47 = vsel %vm1670_vm4, %v1654_v48, %v1686_v50  ;;  %v1703_v9 = vsel %vm1671_vm5, %v1655_v23, %v1687_v1  ;;  %v4585_v0 = vld [vmem:[#allocation4_spill] sm:$0xff]  ;;  %v4586_v29 = vld [vmem:[#allocation5_spill] sm:$0xff]  ;;  %v4587_v50 = vld [vmem:[#allocation6_spill] sm:$0xff] }
 0x1fb   :  { %v1704_v15 = vsel %vm1672_vm6, %v1656_v19, %v1688_v4  ;;  %v1705_v21 = vsel %vm1673_vm7, %v1657_v30, %v1689_v56  ;;  %v1706_v27 = vsel %vm1674_vm8, %v1658_v14, %v1690_v44  ;;  %v1707_v33 = vsel %vm1675_vm9, %v1659_v35, %v1691_v60 }
 0x1fc   :  { %v1708_v39 = vsel %vm1676_vm10, %v1660_v55, %v1692_v38  ;;  %v1709_v45 = vsel %vm1677_vm11, %v1661_v36, %v1693_v12  ;;  %v1710_v51 = vsel %vm1678_vm12, %v1662_v41, %v1694_v62  ;;  %v1711_v34 = vsel %vm1679_vm13, %v1663_v13, %v1695_v54  ;;  %v4583_v36 = vld [vmem:[#allocation2_spill] sm:$0xff] }
 0x1fd   :  { %v1712_v11 = vsel %vm1680_vm14, %v1664_v31, %v1696_v24  ;;  %v1713_v43 = vsel %vm1681_vm15, %v1665_v52, %v1697_v8  ;;  %v2732_v18 = vpack.c.bf16 %v1699_v58, %v1698_v17  ;;  %v2737_v48 = vpack.c.bf16 %v1701_v3, %v1700_v42  ;;  %v4584_v52 = vld [vmem:[#allocation3_spill] sm:$0xff] }
 0x1fe   :  { %v2742_v23 = vpack.c.bf16 %v1703_v9, %v1702_v47  ;;  %v2747_v19 = vpack.c.bf16 %v1705_v21, %v1704_v15  ;;  %v2752_v30 = vpack.c.bf16 %v1707_v33, %v1706_v27  ;;  %v2757_v14 = vpack.c.bf16 %v1709_v45, %v1708_v39  ;;  %v4588_v8 = vld [vmem:[#allocation7_spill] sm:$0xff] }
 0x1ff   :  { %2733 = vst [vmem:[%s4458_s4] sm:$0xff] %v2732_v18   ;;  %2889 = vst [vmem:[%s4458_s4 + $0x8] sm:$0xff] %v2737_v48   ;;  %v2762_v35 = vpack.c.bf16 %v1711_v34, %v1710_v51  ;;  %v2767_v55 = vpack.c.bf16 %v1713_v43, %v1712_v11  ;;  %v1802_v41 = vmul.f32 %v4583_v36, %v4080_v40 }
 0x200   :  { %v1803_v13 = vmul.f32 %v3785_v59, %v4080_v40  ;;  %2890 = vst [vmem:[%s4458_s4 + $0x10] sm:$0xff] %v2742_v23   ;;  %2891 = vst [vmem:[%s4458_s4 + $0x18] sm:$0xff] %v2747_v19   ;;  %v1804_v31 = vmul.f32 %v3789_v2, %v4080_v40  ;;  %v1805_v59 = vmul.f32 %v3793_v10, %v4080_v40 }
 0x201   :  { %2892 = vst [vmem:[%s4458_s4 + $0x20] sm:$0xff] %v2752_v30   ;;  %2893 = vst [vmem:[%s4458_s4 + $0x28] sm:$0xff] %v2757_v14   ;;  %v1806_v26 = vmul.f32 %v4584_v52, %v4080_v40  ;;  %v1807_v5 = vmul.f32 %v4585_v0, %v4080_v40  ;;  %v1808_v2 = vmul.f32 %v4586_v29, %v4080_v40 }
 0x202   :  { %2894 = vst [vmem:[%s4458_s4 + $0x30] sm:$0xff] %v2762_v35   ;;  %2895 = vst [vmem:[%s4458_s4 + $0x38] sm:$0xff] %v2767_v55   ;;  %v1809_v10 = vmul.f32 %v4587_v50, %v4080_v40  ;;  %v1810_v1 = vadd.f32 %v4118_v57, %v4114_v32  ;;  %v1811_v4 = vadd.f32 %v4122_v63, %v4114_v32 }
 0x203   :  { %v1812_v56 = vadd.f32 %v4126_v7, %v4114_v32  ;;  %v1813_v44 = vadd.f32 %v4130_v16, %v4114_v32  ;;  %v1814_v17 = vadd.f32 %v4134_v25, %v4114_v32  ;;  %v1815_v60 = vadd.f32 %v4138_v6, %v4114_v32 }
 0x204   :  { %v1816_v38 = vadd.f32 %v1800_v46, %v4114_v32  ;;  %v1817_v12 = vadd.f32 %v1801_v20, %v4114_v32  ;;  %v1818_v57 = vadd.f32 %v1802_v41, %v4114_v32  ;;  %v1819_v63 = vadd.f32 %v1803_v13, %v4114_v32 }
 0x205   :  { %v1820_v58 = vadd.f32 %v1804_v31, %v4114_v32  ;;  %v1821_v7 = vadd.f32 %v1805_v59, %v4114_v32  ;;  %v1822_v16 = vadd.f32 %v1806_v26, %v4114_v32  ;;  %v1823_v62 = vadd.f32 %v1807_v5, %v4114_v32 }
 0x206   :  { %v1824_v25 = vadd.f32 %v1808_v2, %v4114_v32  ;;  %v1825_v6 = vadd.f32 %v1809_v10, %v4114_v32  ;;  %vm1826_vm0 = vcmp.ge.f32.partialorder %v1810_v1, 0.0  ;;  %vm1827_vm1 = vcmp.ge.f32.partialorder %v1811_v4, 0.0 }
 0x207   :  { %vm1828_vm2 = vcmp.ge.f32.partialorder %v1812_v56, 0.0  ;;  %vm1829_vm3 = vcmp.ge.f32.partialorder %v1813_v44, 0.0  ;;  %vm1830_vm4 = vcmp.ge.f32.partialorder %v1814_v17, 0.0  ;;  %vm1831_vm5 = vcmp.ge.f32.partialorder %v1815_v60, 0.0 }
 0x208   :  { %vm1832_vm6 = vcmp.ge.f32.partialorder %v1816_v38, 0.0  ;;  %vm1833_vm7 = vcmp.ge.f32.partialorder %v1817_v12, 0.0  ;;  %vm1834_vm8 = vcmp.ge.f32.partialorder %v1818_v57, 0.0  ;;  %vm1835_vm9 = vcmp.ge.f32.partialorder %v1819_v63, 0.0 }
 0x209   :  { %vm1836_vm10 = vcmp.ge.f32.partialorder %v1820_v58, 0.0  ;;  %vm1837_vm11 = vcmp.ge.f32.partialorder %v1821_v7, 0.0  ;;  %vm1838_vm12 = vcmp.ge.f32.partialorder %v1822_v16, 0.0  ;;  %vm1839_vm13 = vcmp.ge.f32.partialorder %v1823_v62, 0.0 }
 0x20a   :  { %vm1840_vm14 = vcmp.ge.f32.partialorder %v1824_v25, 0.0  ;;  %vm1841_vm15 = vcmp.ge.f32.partialorder %v1825_v6, 0.0  ;;  %v1842_v46 = vmul.f32 0.01, %v1810_v1  ;;  %v1843_v20 = vmul.f32 0.01, %v1811_v4 }
 0x20b   :  { %v1844_v54 = vmul.f32 0.01, %v1812_v56  ;;  %v1845_v24 = vmul.f32 0.01, %v1813_v44  ;;  %v1846_v42 = vmul.f32 0.01, %v1814_v17  ;;  %v1955_v3 = vmul.f32 %v4588_v8, %v4080_v40 }
 0x20c   :  { %v1847_v47 = vmul.f32 0.01, %v1815_v60  ;;  %v1848_v9 = vmul.f32 0.01, %v1816_v38  ;;  %v1849_v15 = vmul.f32 0.01, %v1817_v12  ;;  %v1858_v21 = vsel %vm1826_vm0, %v1810_v1, %v1842_v46 }
 0x20d   :  { %v1850_v27 = vmul.f32 0.01, %v1818_v57  ;;  %v1851_v33 = vmul.f32 0.01, %v1819_v63  ;;  %v1852_v39 = vmul.f32 0.01, %v1820_v58  ;;  %v1859_v45 = vsel %vm1827_vm1, %v1811_v4, %v1843_v20 }
 0x20e   :  { %v1853_v51 = vmul.f32 0.01, %v1821_v7  ;;  %v1854_v34 = vmul.f32 0.01, %v1822_v16  ;;  %v1855_v11 = vmul.f32 0.01, %v1823_v62  ;;  %v1860_v43 = vsel %vm1828_vm2, %v1812_v56, %v1844_v54 }
 0x20f   :  { %v1856_v18 = vmul.f32 0.01, %v1824_v25  ;;  %v1857_v48 = vmul.f32 0.01, %v1825_v6  ;;  %v1861_v23 = vsel %vm1829_vm3, %v1813_v44, %v1845_v24  ;;  %v1862_v19 = vsel %vm1830_vm4, %v1814_v17, %v1846_v42  ;;  %v4589_v56 = vld [vmem:[#allocation9_spill] sm:$0xff]  ;;  %v4590_v17 = vld [vmem:[#allocation11_spill] sm:$0xff] }
 0x210   :  { %v1863_v30 = vsel %vm1831_vm5, %v1815_v60, %v1847_v47  ;;  %v1864_v14 = vsel %vm1832_vm6, %v1816_v38, %v1848_v9  ;;  %v1865_v35 = vsel %vm1833_vm7, %v1817_v12, %v1849_v15  ;;  %v1866_v55 = vsel %vm1834_vm8, %v1818_v57, %v1850_v27  ;;  %v4591_v38 = vld [vmem:[#allocation13_spill] sm:$0xff]  ;;  %v4592_v57 = vld [vmem:[#allocation15_spill] sm:$0xff] }
 0x211   :  { %v1867_v36 = vsel %vm1835_vm9, %v1819_v63, %v1851_v33  ;;  %v1868_v41 = vsel %vm1836_vm10, %v1820_v58, %v1852_v39  ;;  %v1869_v13 = vsel %vm1837_vm11, %v1821_v7, %v1853_v51  ;;  %v1870_v31 = vsel %vm1838_vm12, %v1822_v16, %v1854_v34  ;;  %v4593_v58 = vld [vmem:[#allocation17_spill] sm:$0xff]  ;;  %v4594_v16 = vld [vmem:[#allocation19_spill] sm:$0xff] }
 0x212   :  { %v1871_v59 = vsel %vm1839_vm13, %v1823_v62, %v1855_v11  ;;  %v1872_v52 = vsel %vm1840_vm14, %v1824_v25, %v1856_v18  ;;  %v1873_v26 = vsel %vm1841_vm15, %v1825_v6, %v1857_v48  ;;  %v2772_v0 = vpack.c.bf16 %v1859_v45, %v1858_v21  ;;  %v4595_v25 = vld [vmem:[#allocation21_spill] sm:$0xff]  ;;  %v4596_v46 = vld [vmem:[#allocation23_spill] sm:$0xff] }
 0x213   :  { %v2777_v5 = vpack.c.bf16 %v1861_v23, %v1860_v43  ;;  %v2782_v29 = vpack.c.bf16 %v1863_v30, %v1862_v19  ;;  %v2787_v2 = vpack.c.bf16 %v1865_v35, %v1864_v14  ;;  %v2792_v50 = vpack.c.bf16 %v1867_v36, %v1866_v55  ;;  %v4597_v54 = vld [vmem:[#allocation25_spill] sm:$0xff]  ;;  %v4599_v36 = vld [vmem:[#allocation8_spill] sm:$0xff] }
 0x214   :  { %2896 = vst [vmem:[%s4458_s4 + $0x40] sm:$0xff] %v2772_v0   ;;  %v2797_v10 = vpack.c.bf16 %v1869_v13, %v1868_v41  ;;  %v2802_v1 = vpack.c.bf16 %v1871_v59, %v1870_v31  ;;  %v2807_v4 = vpack.c.bf16 %v1873_v26, %v1872_v52  ;;  %v1956_v44 = vmul.f32 %v4589_v56, %v4080_v40  ;;  %v4598_v21 = vld [vmem:[#allocation37_spill] sm:$0xff] }
 0x215   :  { %2897 = vst [vmem:[%s4458_s4 + $0x48] sm:$0xff] %v2777_v5   ;;  %2898 = vst [vmem:[%s4458_s4 + $0x50] sm:$0xff] %v2782_v29   ;;  %v1957_v60 = vmul.f32 %v4590_v17, %v4080_v40  ;;  %v1958_v12 = vmul.f32 %v4591_v38, %v4080_v40  ;;  %v1959_v63 = vmul.f32 %v4592_v57, %v4080_v40 }
 0x216   :  { %2899 = vst [vmem:[%s4458_s4 + $0x58] sm:$0xff] %v2787_v2   ;;  %2900 = vst [vmem:[%s4458_s4 + $0x60] sm:$0xff] %v2792_v50   ;;  %v1960_v7 = vmul.f32 %v4593_v58, %v4080_v40  ;;  %v1961_v62 = vmul.f32 %v4594_v16, %v4080_v40  ;;  %v1962_v6 = vmul.f32 %v4595_v25, %v4080_v40 }
 0x217   :  { %2901 = vst [vmem:[%s4458_s4 + $0x68] sm:$0xff] %v2797_v10   ;;  %2902 = vst [vmem:[%s4458_s4 + $0x70] sm:$0xff] %v2802_v1   ;;  %v1963_v20 = vmul.f32 %v4596_v46, %v4080_v40  ;;  %v1964_v24 = vmul.f32 %v4597_v54, %v4080_v40  ;;  %v1965_v42 = vmul.f32 %v4567_v22, %v4080_v40 }
 0x218   :  { %2903 = vst [vmem:[%s4458_s4 + $0x78] sm:$0xff] %v2807_v4   ;;  %v1966_v8 = vmul.f32 %v4569_v53, %v4080_v40  ;;  %v1967_v47 = vmul.f32 %v4571_v28, %v4080_v40  ;;  %v1968_v9 = vmul.f32 %v4573_v49, %v4080_v40  ;;  %v1969_v15 = vmul.f32 %v4575_v37, %v4080_v40 }
 0x219   :  { %v1970_v27 = vmul.f32 %v4598_v21, %v4080_v40  ;;  %v1971_v33 = vadd.f32 %v1955_v3, %v4114_v32  ;;  %v1972_v39 = vadd.f32 %v1956_v44, %v4114_v32  ;;  %v1973_v22 = vadd.f32 %v1957_v60, %v4114_v32 }
 0x21a   :  { %v1974_v53 = vadd.f32 %v1958_v12, %v4114_v32  ;;  %v1975_v45 = vadd.f32 %v1959_v63, %v4114_v32  ;;  %v1976_v28 = vadd.f32 %v1960_v7, %v4114_v32  ;;  %v1977_v49 = vadd.f32 %v1961_v62, %v4114_v32 }
 0x21b   :  { %v1978_v51 = vadd.f32 %v1962_v6, %v4114_v32  ;;  %v1979_v37 = vadd.f32 %v1963_v20, %v4114_v32  ;;  %v1980_v34 = vadd.f32 %v1964_v24, %v4114_v32  ;;  %v1981_v3 = vadd.f32 %v1965_v42, %v4114_v32 }
 0x21c   :  { %v1982_v11 = vadd.f32 %v1966_v8, %v4114_v32  ;;  %v1983_v43 = vadd.f32 %v1967_v47, %v4114_v32  ;;  %v1984_v18 = vadd.f32 %v1968_v9, %v4114_v32  ;;  %v1985_v48 = vadd.f32 %v1969_v15, %v4114_v32  ;;  %v4600_v15 = vld [vmem:[#allocation10_spill] sm:$0xff] }
 0x21d   :  { %v1986_v23 = vadd.f32 %v1970_v27, %v4114_v32  ;;  %vm1987_vm0 = vcmp.ge.f32.partialorder %v1971_v33, 0.0  ;;  %vm1988_vm1 = vcmp.ge.f32.partialorder %v1972_v39, 0.0  ;;  %vm1989_vm2 = vcmp.ge.f32.partialorder %v1973_v22, 0.0  ;;  %v4601_v27 = vld [vmem:[#allocation12_spill] sm:$0xff] }
 0x21e   :  { %vm1990_vm3 = vcmp.ge.f32.partialorder %v1974_v53, 0.0  ;;  %vm1991_vm4 = vcmp.ge.f32.partialorder %v1975_v45, 0.0  ;;  %vm1992_vm5 = vcmp.ge.f32.partialorder %v1976_v28, 0.0  ;;  %vm1993_vm6 = vcmp.ge.f32.partialorder %v1977_v49, 0.0 }
 0x21f   :  { %vm1994_vm7 = vcmp.ge.f32.partialorder %v1978_v51, 0.0  ;;  %vm1995_vm8 = vcmp.ge.f32.partialorder %v1979_v37, 0.0  ;;  %vm1996_vm9 = vcmp.ge.f32.partialorder %v1980_v34, 0.0  ;;  %vm1997_vm10 = vcmp.ge.f32.partialorder %v1981_v3, 0.0 }
 0x220   :  { %vm1998_vm11 = vcmp.ge.f32.partialorder %v1982_v11, 0.0  ;;  %vm1999_vm12 = vcmp.ge.f32.partialorder %v1983_v43, 0.0  ;;  %vm2000_vm13 = vcmp.ge.f32.partialorder %v1984_v18, 0.0  ;;  %vm2001_vm14 = vcmp.ge.f32.partialorder %v1985_v48, 0.0 }
 0x221   :  { %vm2002_vm15 = vcmp.ge.f32.partialorder %v1986_v23, 0.0  ;;  %v2003_v19 = vmul.f32 0.01, %v1971_v33  ;;  %v2004_v30 = vmul.f32 0.01, %v1972_v39  ;;  %v2116_v41 = vmul.f32 %v4599_v36, %v4080_v40 }
 0x222   :  { %v2005_v14 = vmul.f32 0.01, %v1973_v22  ;;  %v2006_v35 = vmul.f32 0.01, %v1974_v53  ;;  %v2007_v55 = vmul.f32 0.01, %v1975_v45  ;;  %v2117_v21 = vmul.f32 %v4600_v15, %v4080_v40 }
 0x223   :  { %v2008_v13 = vmul.f32 0.01, %v1976_v28  ;;  %v2009_v31 = vmul.f32 0.01, %v1977_v49  ;;  %v2010_v59 = vmul.f32 0.01, %v1978_v51  ;;  %v2019_v52 = vsel %vm1987_vm0, %v1971_v33, %v2003_v19 }
 0x224   :  { %v2011_v26 = vmul.f32 0.01, %v1979_v37  ;;  %v2012_v0 = vmul.f32 0.01, %v1980_v34  ;;  %v2013_v5 = vmul.f32 0.01, %v1981_v3  ;;  %v2020_v29 = vsel %vm1988_vm1, %v1972_v39, %v2004_v30 }
 0x225   :  { %v2014_v2 = vmul.f32 0.01, %v1982_v11  ;;  %v2015_v50 = vmul.f32 0.01, %v1983_v43  ;;  %v2016_v10 = vmul.f32 0.01, %v1984_v18  ;;  %v2021_v1 = vsel %vm1989_vm2, %v1973_v22, %v2005_v14 }
 0x226   :  { %v2017_v4 = vmul.f32 0.01, %v1985_v48  ;;  %v2018_v56 = vmul.f32 0.01, %v1986_v23  ;;  %v2022_v44 = vsel %vm1990_vm3, %v1974_v53, %v2006_v35  ;;  %v2023_v17 = vsel %vm1991_vm4, %v1975_v45, %v2007_v55  ;;  %v4602_v39 = vld [vmem:[#allocation14_spill] sm:$0xff]  ;;  %v4603_v53 = vld [vmem:[#allocation16_spill] sm:$0xff] }
 0x227   :  { %v2024_v60 = vsel %vm1992_vm5, %v1976_v28, %v2008_v13  ;;  %v2025_v38 = vsel %vm1993_vm6, %v1977_v49, %v2009_v31  ;;  %v2026_v12 = vsel %vm1994_vm7, %v1978_v51, %v2010_v59  ;;  %v2027_v57 = vsel %vm1995_vm8, %v1979_v37, %v2011_v26  ;;  %v4604_v28 = vld [vmem:[#allocation18_spill] sm:$0xff]  ;;  %v4605_v51 = vld [vmem:[#allocation20_spill] sm:$0xff] }
 0x228   :  { %v2028_v63 = vsel %vm1996_vm9, %v1980_v34, %v2012_v0  ;;  %v2029_v58 = vsel %vm1997_vm10, %v1981_v3, %v2013_v5  ;;  %v2030_v7 = vsel %vm1998_vm11, %v1982_v11, %v2014_v2  ;;  %v2031_v16 = vsel %vm1999_vm12, %v1983_v43, %v2015_v50  ;;  %v4606_v34 = vld [vmem:[#allocation22_spill] sm:$0xff]  ;;  %v4607_v11 = vld [vmem:[#allocation24_spill] sm:$0xff] }
 0x229   :  { %v2032_v62 = vsel %vm2000_vm13, %v1984_v18, %v2016_v10  ;;  %v2033_v25 = vsel %vm2001_vm14, %v1985_v48, %v2017_v4  ;;  %v2034_v6 = vsel %vm2002_vm15, %v1986_v23, %v2018_v56  ;;  %v2812_v46 = vpack.c.bf16 %v2020_v29, %v2019_v52  ;;  %v4608_v18 = vld [vmem:[#allocation26_spill] sm:$0xff]  ;;  %v4610_v14 = vld [vmem:[#allocation32_spill] sm:$0xff] }
 0x22a   :  { %v2817_v20 = vpack.c.bf16 %v2022_v44, %v2021_v1  ;;  %v2822_v54 = vpack.c.bf16 %v2024_v60, %v2023_v17  ;;  %v2827_v24 = vpack.c.bf16 %v2026_v12, %v2025_v38  ;;  %v2832_v42 = vpack.c.bf16 %v2028_v63, %v2027_v57  ;;  %v4609_v19 = vld [vmem:[#allocation30_spill] sm:$0xff]  ;;  %v4612_v13 = vld [vmem:[#allocation36_spill] sm:$0xff] }
 0x22b   :  { %2904 = vst [vmem:[%s4458_s4 + $0x80] sm:$0xff] %v2812_v46   ;;  %v2837_v8 = vpack.c.bf16 %v2030_v7, %v2029_v58  ;;  %v2842_v47 = vpack.c.bf16 %v2032_v62, %v2031_v16  ;;  %v2847_v9 = vpack.c.bf16 %v2034_v6, %v2033_v25  ;;  %v2118_v33 = vmul.f32 %v4601_v27, %v4080_v40  ;;  %v4611_v55 = vld [vmem:[#allocation34_spill] sm:$0xff] }
 0x22c   :  { %2905 = vst [vmem:[%s4458_s4 + $0x88] sm:$0xff] %v2817_v20   ;;  %2906 = vst [vmem:[%s4458_s4 + $0x90] sm:$0xff] %v2822_v54   ;;  %v2119_v22 = vmul.f32 %v4602_v39, %v4080_v40  ;;  %v2120_v45 = vmul.f32 %v4603_v53, %v4080_v40  ;;  %v2121_v49 = vmul.f32 %v4604_v28, %v4080_v40  ;;  %v4613_v59 = vld [vmem:[#allocation38_spill] sm:$0xff] }
 0x22d   :  { %2907 = vst [vmem:[%s4458_s4 + $0x98] sm:$0xff] %v2827_v24   ;;  %2908 = vst [vmem:[%s4458_s4 + $0xa0] sm:$0xff] %v2832_v42   ;;  %v2122_v37 = vmul.f32 %v4605_v51, %v4080_v40  ;;  %v2123_v3 = vmul.f32 %v4606_v34, %v4080_v40  ;;  %v2124_v43 = vmul.f32 %v4607_v11, %v4080_v40 }
 0x22e   :  { %2909 = vst [vmem:[%s4458_s4 + $0xa8] sm:$0xff] %v2837_v8   ;;  %2910 = vst [vmem:[%s4458_s4 + $0xb0] sm:$0xff] %v2842_v47   ;;  %v2125_v48 = vmul.f32 %v4608_v18, %v4080_v40  ;;  %v2126_v23 = vmul.f32 %v4578_v61, %v4080_v40  ;;  %v2127_v30 = vmul.f32 %v4609_v19, %v4080_v40 }
 0x22f   :  { %2911 = vst [vmem:[%s4458_s4 + $0xb8] sm:$0xff] %v2847_v9   ;;  %v2128_v35 = vmul.f32 %v4610_v14, %v4080_v40  ;;  %v2129_v36 = vmul.f32 %v4611_v55, %v4080_v40  ;;  %v2130_v31 = vmul.f32 %v4612_v13, %v4080_v40  ;;  %v2131_v52 = vmul.f32 %v4613_v59, %v4080_v40 }
 0x230   :  { %v2132_v26 = vadd.f32 %v2116_v41, %v4114_v32  ;;  %v2133_v0 = vadd.f32 %v2117_v21, %v4114_v32  ;;  %v2134_v61 = vadd.f32 %v2118_v33, %v4114_v32  ;;  %v2135_v5 = vadd.f32 %v2119_v22, %v4114_v32 }
 0x231   :  { %v2136_v29 = vadd.f32 %v2120_v45, %v4114_v32  ;;  %v2137_v2 = vadd.f32 %v2121_v49, %v4114_v32  ;;  %v2138_v50 = vadd.f32 %v2122_v37, %v4114_v32  ;;  %v2139_v10 = vadd.f32 %v2123_v3, %v4114_v32 }
 0x232   :  { %v2140_v1 = vadd.f32 %v2124_v43, %v4114_v32  ;;  %v2141_v40 = vadd.f32 %v2125_v48, %v4114_v32  ;;  %v2142_v41 = vadd.f32 %v2126_v23, %v4114_v32  ;;  %v2143_v4 = vadd.f32 %v2127_v30, %v4114_v32 }
 0x233   :  { %v2144_v56 = vadd.f32 %v2128_v35, %v4114_v32  ;;  %v2145_v44 = vadd.f32 %v2129_v36, %v4114_v32  ;;  %v2146_v17 = vadd.f32 %v2130_v31, %v4114_v32  ;;  %v2147_v60 = vadd.f32 %v2131_v52, %v4114_v32 }
 0x234   :  { %vm2148_vm0 = vcmp.ge.f32.partialorder %v2132_v26, 0.0  ;;  %vm2149_vm1 = vcmp.ge.f32.partialorder %v2133_v0, 0.0  ;;  %vm2150_vm2 = vcmp.ge.f32.partialorder %v2134_v61, 0.0  ;;  %vm2151_vm3 = vcmp.ge.f32.partialorder %v2135_v5, 0.0 }
 0x235   :  { %vm2152_vm4 = vcmp.ge.f32.partialorder %v2136_v29, 0.0  ;;  %vm2153_vm5 = vcmp.ge.f32.partialorder %v2137_v2, 0.0  ;;  %vm2154_vm6 = vcmp.ge.f32.partialorder %v2138_v50, 0.0  ;;  %vm2155_vm7 = vcmp.ge.f32.partialorder %v2139_v10, 0.0 }
 0x236   :  { %vm2156_vm8 = vcmp.ge.f32.partialorder %v2140_v1, 0.0  ;;  %vm2157_vm9 = vcmp.ge.f32.partialorder %v2141_v40, 0.0  ;;  %vm2158_vm10 = vcmp.ge.f32.partialorder %v2142_v41, 0.0  ;;  %vm2159_vm11 = vcmp.ge.f32.partialorder %v2143_v4, 0.0 }
 0x237   :  { %vm2160_vm12 = vcmp.ge.f32.partialorder %v2144_v56, 0.0  ;;  %vm2161_vm13 = vcmp.ge.f32.partialorder %v2145_v44, 0.0  ;;  %vm2162_vm14 = vcmp.ge.f32.partialorder %v2146_v17, 0.0  ;;  %vm2163_vm15 = vcmp.ge.f32.partialorder %v2147_v60, 0.0 }
 0x238   :  { %v2164_v38 = vmul.f32 0.01, %v2132_v26  ;;  %v2165_v12 = vmul.f32 0.01, %v2133_v0  ;;  %v2166_v57 = vmul.f32 0.01, %v2134_v61 }
 0x239   :  { %v2167_v32 = vmul.f32 0.01, %v2135_v5  ;;  %v2168_v63 = vmul.f32 0.01, %v2136_v29  ;;  %v2169_v58 = vmul.f32 0.01, %v2137_v2 }
 0x23a   :  { %v2170_v7 = vmul.f32 0.01, %v2138_v50  ;;  %v2171_v16 = vmul.f32 0.01, %v2139_v10  ;;  %v2180_v62 = vsel %vm2148_vm0, %v2132_v26, %v2164_v38  ;;  %v2172_v25 = vmul.f32 0.01, %v2140_v1 }
 0x23b   :  { %v2173_v6 = vmul.f32 0.01, %v2141_v40  ;;  %v2174_v46 = vmul.f32 0.01, %v2142_v41  ;;  %v2181_v20 = vsel %vm2149_vm1, %v2133_v0, %v2165_v12  ;;  %v2175_v54 = vmul.f32 0.01, %v2143_v4 }
 0x23c   :  { %v2176_v24 = vmul.f32 0.01, %v2144_v56  ;;  %v2177_v42 = vmul.f32 0.01, %v2145_v44  ;;  %v2182_v8 = vsel %vm2150_vm2, %v2134_v61, %v2166_v57  ;;  %v2178_v47 = vmul.f32 0.01, %v2146_v17 }
 0x23d   :  { %v2179_v9 = vmul.f32 0.01, %v2147_v60  ;;  %v2183_v15 = vsel %vm2151_vm3, %v2135_v5, %v2167_v32  ;;  %v2184_v21 = vsel %vm2152_vm4, %v2136_v29, %v2168_v63  ;;  %v2185_v27 = vsel %vm2153_vm5, %v2137_v2, %v2169_v58 }
 0x23e   :  { %v2186_v33 = vsel %vm2154_vm6, %v2138_v50, %v2170_v7  ;;  %v2187_v39 = vsel %vm2155_vm7, %v2139_v10, %v2171_v16  ;;  %v2188_v22 = vsel %vm2156_vm8, %v2140_v1, %v2172_v25  ;;  %v2189_v53 = vsel %vm2157_vm9, %v2141_v40, %v2173_v6 }
 0x23f   :  { %v2190_v45 = vsel %vm2158_vm10, %v2142_v41, %v2174_v46  ;;  %v2191_v28 = vsel %vm2159_vm11, %v2143_v4, %v2175_v54  ;;  %v2192_v49 = vsel %vm2160_vm12, %v2144_v56, %v2176_v24  ;;  %v2193_v51 = vsel %vm2161_vm13, %v2145_v44, %v2177_v42 }
 0x240   :  { %v2194_v37 = vsel %vm2162_vm14, %v2146_v17, %v2178_v47  ;;  %v2195_v34 = vsel %vm2163_vm15, %v2147_v60, %v2179_v9  ;;  %v2852_v3 = vpack.c.bf16 %v2181_v20, %v2180_v62  ;;  %v2857_v11 = vpack.c.bf16 %v2183_v15, %v2182_v8 }
 0x241   :  { %v2862_v43 = vpack.c.bf16 %v2185_v27, %v2184_v21  ;;  %v2867_v18 = vpack.c.bf16 %v2187_v39, %v2186_v33  ;;  %v2872_v48 = vpack.c.bf16 %v2189_v53, %v2188_v22  ;;  %v2877_v23 = vpack.c.bf16 %v2191_v28, %v2190_v45 }
 0x242   :  { %2912 = vst [vmem:[%s4458_s4 + $0xc0] sm:$0xff] %v2852_v3   ;;  %v2882_v19 = vpack.c.bf16 %v2193_v51, %v2192_v49  ;;  %v2887_v30 = vpack.c.bf16 %v2195_v34, %v2194_v37  ;;  %2913 = vst [vmem:[%s4458_s4 + $0xc8] sm:$0xff] %v2857_v11  }
 0x243   :  { %2914 = vst [vmem:[%s4458_s4 + $0xd0] sm:$0xff] %v2862_v43   ;;  %2915 = vst [vmem:[%s4458_s4 + $0xd8] sm:$0xff] %v2867_v18  }
 0x244   :  { %2916 = vst [vmem:[%s4458_s4 + $0xe0] sm:$0xff] %v2872_v48   ;;  %2917 = vst [vmem:[%s4458_s4 + $0xe8] sm:$0xff] %v2877_v23  }
 0x245   :  { %2918 = vst [vmem:[%s4458_s4 + $0xf0] sm:$0xff] %v2882_v19   ;;  %2919 = vst [vmem:[%s4458_s4 + $0xf8] sm:$0xff] %v2887_v30  }

// kernel: g_forward.9
= control target key start
LH: loop header
LB: loop body
LE: loop exit
PB: predicated region body
PF: predicated region fallthrough
CT: control target
= control target key end

     0   :  { %s9061_s1 = inlined_call_operand.vmem [shape: bf16[4,128,128], index: 1, kind: input, shape index: {}]   ;;  %s9062_s0 = inlined_call_operand.vmem [shape: bf16[4,512,128], index: 0, kind: input, shape index: {}]   ;;  %s9063_s2 = inlined_call_operand.vmem [shape: f32[1,128], index: 2, kind: input, shape index: {}]   ;;  %s9064_s3 = inlined_call_operand.vmem [shape: f32[4,512,128], index: 3, kind: output, shape index: {}]  }
   0x1   :  { %v5616_v0 = vld [vmem:[%s9061_s1] sm:$0xff]   ;;  %v5618_v2 = vld [vmem:[%s9061_s1 + $0x8] sm:$0xff]   ;;  %v5620_v4 = vld [vmem:[%s9061_s1 + $0x10] sm:$0xff]  }
   0x2   :  { %v5617_v1 = vld [vmem:[%s9061_s1 + $0x40] sm:$0xff]   ;;  %5296 = vmatprep.subr.bf16.mxu0 %v5616_v0  ;;  %v5619_v3 = vld [vmem:[%s9061_s1 + $0x48] sm:$0xff]   ;;  %v5621_v5 = vld [vmem:[%s9061_s1 + $0x50] sm:$0xff]  }
   0x3   :  { %5376 = vmatprep.subr.bf16.mxu1 %v5617_v1  ;;  %5297 = vmatpush3.bf16.msra.mxu0 %v5616_v0  ;;  %v5622_v6 = vld [vmem:[%s9061_s1 + $0x18] sm:$0xff]   ;;  %v5624_v8 = vld [vmem:[%s9061_s1 + $0x20] sm:$0xff]   ;;  %v5626_v10 = vld [vmem:[%s9061_s1 + $0x28] sm:$0xff]  }
   0x4   :  { %5377 = vmatpush3.bf16.msra.mxu1 %v5617_v1  ;;  %5298 = vmatprep.subr.bf16.mxu0 %v5618_v2  ;;  %v5623_v7 = vld [vmem:[%s9061_s1 + $0x58] sm:$0xff]   ;;  %v5625_v9 = vld [vmem:[%s9061_s1 + $0x60] sm:$0xff]   ;;  %v5627_v11 = vld [vmem:[%s9061_s1 + $0x68] sm:$0xff]  }
   0x5   :  { %5378 = vmatprep.subr.bf16.mxu1 %v5619_v3  ;;  %v5632_v12 = vld [vmem:[%s9062_s0] sm:$0xff]   ;;  %v5628_v14 = vld [vmem:[%s9061_s1 + $0x30] sm:$0xff]   ;;  %v5630_v16 = vld [vmem:[%s9061_s1 + $0x38] sm:$0xff]  }
   0x6   :  { %v5633_v13 = vld [vmem:[%s9062_s0 + $0x100] sm:$0xff]   ;;  %5312 = vmatprep.mubr.bf16.mxu0 %v5632_v12  ;;  %v5629_v15 = vld [vmem:[%s9061_s1 + $0x70] sm:$0xff]   ;;  %v5631_v17 = vld [vmem:[%s9061_s1 + $0x78] sm:$0xff]  }
   0x7   :  { %5299 = vmatpush3.bf16.msra.mxu0 %v5618_v2  ;;  %5392 = vmatprep.mubr.bf16.mxu1 %v5633_v13  ;;  %v5634_v18 = vld [vmem:[%s9062_s0 + $0x8] sm:$0xff]   ;;  %v5636_v19 = vld [vmem:[%s9061_s1 + $0x80] sm:$0xff]   ;;  %v5638_v22 = vld [vmem:[%s9062_s0 + $0x10] sm:$0xff]  }
   0x8   :  { %5379 = vmatpush3.bf16.msra.mxu1 %v5619_v3  ;;  %5300 = vmatprep.subr.bf16.mxu0 %v5620_v4  ;;  %v5637_v20 = vld [vmem:[%s9061_s1 + $0xc0] sm:$0xff]   ;;  %v5635_v21 = vld [vmem:[%s9062_s0 + $0x108] sm:$0xff]   ;;  %v5639_v23 = vld [vmem:[%s9062_s0 + $0x110] sm:$0xff]  }
   0x9   :  { %5380 = vmatprep.subr.bf16.mxu1 %v5621_v5  ;;  %v5646_v24 = vld [vmem:[%s9061_s1 + $0x88] sm:$0xff]   ;;  %v5640_v26 = vld [vmem:[%s9062_s0 + $0x18] sm:$0xff]   ;;  %v5642_v28 = vld [vmem:[%s9062_s0 + $0x20] sm:$0xff]  }
   0xa   :  { %v5647_v25 = vld [vmem:[%s9061_s1 + $0xc8] sm:$0xff]   ;;  %v5641_v27 = vld [vmem:[%s9062_s0 + $0x118] sm:$0xff]   ;;  %v5643_v29 = vld [vmem:[%s9062_s0 + $0x120] sm:$0xff]  }
   0xb   :  { %5301 = vmatpush3.bf16.msra.mxu0 %v5620_v4  ;;  %v5656_v30 = vld [vmem:[%s9061_s1 + $0x90] sm:$0xff]   ;;  %v5644_v32 = vld [vmem:[%s9062_s0 + $0x28] sm:$0xff]   ;;  %v5666_v36 = vld [vmem:[%s9061_s1 + $0x98] sm:$0xff]  }
   0xc   :  { %5381 = vmatpush3.bf16.msra.mxu1 %v5621_v5  ;;  %5302 = vmatprep.subr.bf16.mxu0 %v5622_v6  ;;  %v5657_v31 = vld [vmem:[%s9061_s1 + $0xd0] sm:$0xff]   ;;  %v5645_v33 = vld [vmem:[%s9062_s0 + $0x128] sm:$0xff]   ;;  %v5667_v37 = vld [vmem:[%s9061_s1 + $0xd8] sm:$0xff]  }
   0xd   :  { %5382 = vmatprep.subr.bf16.mxu1 %v5623_v7  ;;  %v5648_v34 = vld [vmem:[%s9062_s0 + $0x30] sm:$0xff]   ;;  %v5650_v38 = vld [vmem:[%s9062_s0 + $0x38] sm:$0xff]   ;;  %v5652_v40 = vld [vmem:[%s9062_s0 + $0x40] sm:$0xff]  }
   0xe   :  { %v5649_v35 = vld [vmem:[%s9062_s0 + $0x130] sm:$0xff]   ;;  %v5651_v39 = vld [vmem:[%s9062_s0 + $0x138] sm:$0xff]   ;;  %v5653_v41 = vld [vmem:[%s9062_s0 + $0x140] sm:$0xff]  }
   0xf   :  { %5303 = vmatpush3.bf16.msra.mxu0 %v5622_v6  ;;  %v5654_v42 = vld [vmem:[%s9062_s0 + $0x48] sm:$0xff]   ;;  %v5676_v43 = vld [vmem:[%s9061_s1 + $0xa0] sm:$0xff]   ;;  %v5658_v46 = vld [vmem:[%s9062_s0 + $0x50] sm:$0xff]  }
  0x10   :  { %5383 = vmatpush3.bf16.msra.mxu1 %v5623_v7  ;;  %5304 = vmatprep.subr.bf16.mxu0 %v5624_v8  ;;  %v5677_v44 = vld [vmem:[%s9061_s1 + $0xe0] sm:$0xff]   ;;  %v5655_v45 = vld [vmem:[%s9062_s0 + $0x148] sm:$0xff]   ;;  %v5659_v47 = vld [vmem:[%s9062_s0 + $0x150] sm:$0xff]  }
  0x11   :  { %5384 = vmatprep.subr.bf16.mxu1 %v5625_v9  ;;  %v5660_v48 = vld [vmem:[%s9062_s0 + $0x58] sm:$0xff]   ;;  %v5662_v50 = vld [vmem:[%s9062_s0 + $0x60] sm:$0xff]   ;;  %v5686_v51 = vld [vmem:[%s9061_s1 + $0xa8] sm:$0xff]  }
  0x12   :  { %v5661_v49 = vld [vmem:[%s9062_s0 + $0x158] sm:$0xff]   ;;  %v5687_v52 = vld [vmem:[%s9061_s1 + $0xe8] sm:$0xff]   ;;  %v5663_v53 = vld [vmem:[%s9062_s0 + $0x160] sm:$0xff]  }
  0x13   :  { %5305 = vmatpush3.bf16.msra.mxu0 %v5624_v8  ;;  %v5664_v54 = vld [vmem:[%s9062_s0 + $0x68] sm:$0xff]   ;;  %v5668_v56 = vld [vmem:[%s9062_s0 + $0x70] sm:$0xff]   ;;  %v5670_v60 = vld [vmem:[%s9062_s0 + $0x78] sm:$0xff]  }
  0x14   :  { %5385 = vmatpush3.bf16.msra.mxu1 %v5625_v9  ;;  %5306 = vmatprep.subr.bf16.mxu0 %v5626_v10  ;;  %v5665_v55 = vld [vmem:[%s9062_s0 + $0x168] sm:$0xff]   ;;  %v5669_v57 = vld [vmem:[%s9062_s0 + $0x170] sm:$0xff]   ;;  %v5671_v61 = vld [vmem:[%s9062_s0 + $0x178] sm:$0xff]  }
  0x15   :  { %5386 = vmatprep.subr.bf16.mxu1 %v5627_v11  ;;  %v5696_v58 = vld [vmem:[%s9061_s1 + $0xb0] sm:$0xff]   ;;  %v5672_v62 = vld [vmem:[%s9062_s0 + $0x80] sm:$0xff]   ;;  %v5706_v0 = vld [vmem:[%s9061_s1 + $0xb8] sm:$0xff]  }
  0x16   :  { %v5697_v59 = vld [vmem:[%s9061_s1 + $0xf0] sm:$0xff]   ;;  %v5673_v63 = vld [vmem:[%s9062_s0 + $0x180] sm:$0xff]   ;;  %v5707_v1 = vld [vmem:[%s9061_s1 + $0xf8] sm:$0xff]  }
  0x17   :  { %5307 = vmatpush3.bf16.msra.mxu0 %v5626_v10  ;;  %v5674_v2 = vld [vmem:[%s9062_s0 + $0x88] sm:$0xff]   ;;  %v5678_v4 = vld [vmem:[%s9062_s0 + $0x90] sm:$0xff]   ;;  %v5680_v6 = vld [vmem:[%s9062_s0 + $0x98] sm:$0xff]  }
  0x18   :  { %5387 = vmatpush3.bf16.msra.mxu1 %v5627_v11  ;;  %5308 = vmatprep.subr.bf16.mxu0 %v5628_v14  ;;  %v5675_v3 = vld [vmem:[%s9062_s0 + $0x188] sm:$0xff]   ;;  %v5679_v5 = vld [vmem:[%s9062_s0 + $0x190] sm:$0xff]   ;;  %v5681_v7 = vld [vmem:[%s9062_s0 + $0x198] sm:$0xff]  }
  0x19   :  { %5388 = vmatprep.subr.bf16.mxu1 %v5629_v15  ;;  %v5682_v8 = vld [vmem:[%s9062_s0 + $0xa0] sm:$0xff]   ;;  %v5684_v10 = vld [vmem:[%s9062_s0 + $0xa8] sm:$0xff]   ;;  %v5688_v12 = vld [vmem:[%s9062_s0 + $0xb0] sm:$0xff]  }
  0x1a   :  { %v5683_v9 = vld [vmem:[%s9062_s0 + $0x1a0] sm:$0xff]   ;;  %v5685_v11 = vld [vmem:[%s9062_s0 + $0x1a8] sm:$0xff]   ;;  %v5689_v13 = vld [vmem:[%s9062_s0 + $0x1b0] sm:$0xff]  }
  0x1b   :  { %5309 = vmatpush3.bf16.msra.mxu0 %v5628_v14  ;;  %v5690_v14 = vld [vmem:[%s9062_s0 + $0xb8] sm:$0xff]  }
  0x1c   :  { %5389 = vmatpush3.bf16.msra.mxu1 %v5629_v15  ;;  %5310 = vmatprep.subr.bf16.mxu0 %v5630_v16  ;;  %v5691_v15 = vld [vmem:[%s9062_s0 + $0x1b8] sm:$0xff]  }
  0x1d   :  { %5390 = vmatprep.subr.bf16.mxu1 %v5631_v17 }
  0x1f   :  { %5311 = vmatpush3.bf16.msra.mxu0 %v5630_v16  ;;  %v5692_v16 = vld [vmem:[%s9062_s0 + $0xc0] sm:$0xff]  }
  0x20   :  { %5391 = vmatpush3.bf16.msra.mxu1 %v5631_v17  ;;  %5456 = vmatprep.subr.bf16.mxu0 %v5636_v19  ;;  %v5693_v17 = vld [vmem:[%s9062_s0 + $0x1c0] sm:$0xff]  }
  0x21   :  { %5536 = vmatprep.subr.bf16.mxu1 %v5637_v20 }
  0x22   :  { %5313 = vmatmul.mubr.bf16.vlgmr.msra.gmra.mrb[0].mxu0 %v5634_v18  ;;  %v5694_v18 = vld [vmem:[%s9062_s0 + $0xc8] sm:$0xff]  }
  0x23   :  { %5393 = vmatmul.mubr.bf16.vlgmr.msra.gmra.mrb[0].mxu1 %v5635_v21  ;;  %5457 = vmatpush3.bf16.msra.mxu0 %v5636_v19  ;;  %v5695_v19 = vld [vmem:[%s9062_s0 + $0x1c8] sm:$0xff]   ;;  %v5699_v21 = vld [vmem:[%s9062_s0 + $0x1d0] sm:$0xff]  }
  0x24   :  { %5537 = vmatpush3.bf16.msra.mxu1 %v5637_v20  ;;  %5316 = vmatprep.mubr.bf16.mxu0 %v5638_v22  ;;  %v5698_v20 = vld [vmem:[%s9062_s0 + $0xd0] sm:$0xff]   ;;  %v5700_v22 = vld [vmem:[%s9062_s0 + $0xd8] sm:$0xff]  }
  0x25   :  { %5396 = vmatprep.mubr.bf16.mxu1 %v5639_v23  ;;  %5458 = vmatprep.subr.bf16.mxu0 %v5646_v24  ;;  %v5701_v23 = vld [vmem:[%s9062_s0 + $0x1d8] sm:$0xff]  }
  0x26   :  { %5538 = vmatprep.subr.bf16.mxu1 %v5647_v25 }
  0x27   :  { %5459 = vmatpush3.bf16.msra.mxu0 %v5646_v24  ;;  %v5702_v24 = vld [vmem:[%s9062_s0 + $0xe0] sm:$0xff]  }
  0x28   :  { %5539 = vmatpush3.bf16.msra.mxu1 %v5647_v25  ;;  %5460 = vmatprep.subr.bf16.mxu0 %v5656_v30  ;;  %v5703_v25 = vld [vmem:[%s9062_s0 + $0x1e0] sm:$0xff]  }
  0x29   :  { %5540 = vmatprep.subr.bf16.mxu1 %v5657_v31 }
  0x2a   :  { %5317 = vmatmul.mubr.bf16.gmra.mrb[4].mxu0 %v5640_v26  ;;  %v5704_v26 = vld [vmem:[%s9062_s0 + $0xe8] sm:$0xff]  }
  0x2b   :  { %5397 = vmatmul.mubr.bf16.gmra.mrb[4].mxu1 %v5641_v27  ;;  %5320 = vmatprep.mubr.bf16.mxu0 %v5642_v28  ;;  %v5705_v27 = vld [vmem:[%s9062_s0 + $0x1e8] sm:$0xff]   ;;  %v5708_v28 = vld [vmem:[%s9062_s0 + $0xf0] sm:$0xff]  }
  0x2c   :  { %5400 = vmatprep.mubr.bf16.mxu1 %v5643_v29  ;;  %5461 = vmatpush3.bf16.msra.mxu0 %v5656_v30  ;;  %v5709_v29 = vld [vmem:[%s9062_s0 + $0x1f0] sm:$0xff]   ;;  %v5710_v30 = vld [vmem:[%s9062_s0 + $0xf8] sm:$0xff]  }
  0x2d   :  { %5541 = vmatpush3.bf16.msra.mxu1 %v5657_v31  ;;  %5462 = vmatprep.subr.bf16.mxu0 %v5666_v36  ;;  %v5711_v31 = vld [vmem:[%s9062_s0 + $0x1f8] sm:$0xff]  }
  0x2e   :  { %5542 = vmatprep.subr.bf16.mxu1 %v5667_v37 }
  0x30   :  { %5463 = vmatpush3.bf16.msra.mxu0 %v5666_v36  ;;  %v5716_v36 = vld [vmem:[%s9062_s0 + $0x210] sm:$0xff]  }
  0x31   :  { %5543 = vmatpush3.bf16.msra.mxu1 %v5667_v37  ;;  %5464 = vmatprep.subr.bf16.mxu0 %v5676_v43  ;;  %v5717_v37 = vld [vmem:[%s9062_s0 + $0x310] sm:$0xff]  }
  0x32   :  { %5321 = vmatmul.mubr.bf16.gmra.mrb[8].mxu0 %v5644_v32  ;;  %5544 = vmatprep.subr.bf16.mxu1 %v5677_v44  ;;  %v5712_v32 = vld [vmem:[%s9062_s0 + $0x200] sm:$0xff]  }
  0x33   :  { %5401 = vmatmul.mubr.bf16.gmra.mrb[8].mxu1 %v5645_v33  ;;  %5324 = vmatprep.mubr.bf16.mxu0 %v5648_v34  ;;  %v5713_v33 = vld [vmem:[%s9062_s0 + $0x300] sm:$0xff]   ;;  %v5714_v34 = vld [vmem:[%s9062_s0 + $0x208] sm:$0xff]  }
  0x34   :  { %5404 = vmatprep.mubr.bf16.mxu1 %v5649_v35  ;;  %5465 = vmatpush3.bf16.msra.mxu0 %v5676_v43  ;;  %v5715_v35 = vld [vmem:[%s9062_s0 + $0x308] sm:$0xff]  }
  0x35   :  { %5545 = vmatpush3.bf16.msra.mxu1 %v5677_v44  ;;  %5466 = vmatprep.subr.bf16.mxu0 %v5686_v51  ;;  %v5723_v43 = vld [vmem:[%s9062_s0 + $0x328] sm:$0xff]   ;;  %v5724_v44 = vld [vmem:[%s9062_s0 + $0x230] sm:$0xff]  }
  0x36   :  { %5546 = vmatprep.subr.bf16.mxu1 %v5687_v52 }
  0x38   :  { %5467 = vmatpush3.bf16.msra.mxu0 %v5686_v51  ;;  %v5731_v51 = vld [vmem:[%s9062_s0 + $0x348] sm:$0xff]  }
  0x39   :  { %5547 = vmatpush3.bf16.msra.mxu1 %v5687_v52  ;;  %5468 = vmatprep.subr.bf16.mxu0 %v5696_v58  ;;  %v5732_v52 = vld [vmem:[%s9062_s0 + $0x250] sm:$0xff]  }
  0x3a   :  { %5325 = vmatmul.mubr.bf16.gmra.mrb[12].mxu0 %v5650_v38  ;;  %5548 = vmatprep.subr.bf16.mxu1 %v5697_v59  ;;  %v5718_v38 = vld [vmem:[%s9062_s0 + $0x218] sm:$0xff]  }
  0x3b   :  { %5405 = vmatmul.mubr.bf16.gmra.mrb[12].mxu1 %v5651_v39  ;;  %5328 = vmatprep.mubr.bf16.mxu0 %v5652_v40  ;;  %v5719_v39 = vld [vmem:[%s9062_s0 + $0x318] sm:$0xff]   ;;  %v5720_v40 = vld [vmem:[%s9062_s0 + $0x220] sm:$0xff]  }
  0x3c   :  { %5408 = vmatprep.mubr.bf16.mxu1 %v5653_v41  ;;  %5469 = vmatpush3.bf16.msra.mxu0 %v5696_v58  ;;  %v5721_v41 = vld [vmem:[%s9062_s0 + $0x320] sm:$0xff]   ;;  %v5738_v58 = vld [vmem:[%s9062_s0 + $0x268] sm:$0xff]  }
  0x3d   :  { %5549 = vmatpush3.bf16.msra.mxu1 %v5697_v59  ;;  %5470 = vmatprep.subr.bf16.mxu0 %v5706_v0  ;;  %v5739_v59 = vld [vmem:[%s9062_s0 + $0x368] sm:$0xff]  }
  0x3e   :  { %5550 = vmatprep.subr.bf16.mxu1 %v5707_v1 }
  0x40   :  { %5471 = vmatpush3.bf16.msra.mxu0 %v5706_v0  ;;  %v5744_v0 = vld [vmem:[%s9062_s0 + $0x280] sm:$0xff]  }
  0x41   :  { %5551 = vmatpush3.bf16.msra.mxu1 %v5707_v1  ;;  %v5745_v1 = vld [vmem:[%s9062_s0 + $0x380] sm:$0xff]  }
  0x42   :  { %5329 = vmatmul.mubr.bf16.gmra.mrb[16].mxu0 %v5654_v42  ;;  %v5722_v42 = vld [vmem:[%s9062_s0 + $0x228] sm:$0xff]  }
  0x43   :  { %5409 = vmatmul.mubr.bf16.gmra.mrb[16].mxu1 %v5655_v45  ;;  %5332 = vmatprep.mubr.bf16.mxu0 %v5658_v46  ;;  %v5725_v45 = vld [vmem:[%s9062_s0 + $0x330] sm:$0xff]   ;;  %v5726_v46 = vld [vmem:[%s9062_s0 + $0x238] sm:$0xff]  }
  0x44   :  { %5412 = vmatprep.mubr.bf16.mxu1 %v5659_v47  ;;  %v5727_v47 = vld [vmem:[%s9062_s0 + $0x338] sm:$0xff]  }
  0x4a   :  { %5333 = vmatmul.mubr.bf16.gmra.mrb[20].mxu0 %v5660_v48  ;;  %v5728_v48 = vld [vmem:[%s9062_s0 + $0x240] sm:$0xff]  }
  0x4b   :  { %5413 = vmatmul.mubr.bf16.gmra.mrb[20].mxu1 %v5661_v49  ;;  %5336 = vmatprep.mubr.bf16.mxu0 %v5662_v50  ;;  %v5729_v49 = vld [vmem:[%s9062_s0 + $0x340] sm:$0xff]   ;;  %v5730_v50 = vld [vmem:[%s9062_s0 + $0x248] sm:$0xff]  }
  0x4c   :  { %5416 = vmatprep.mubr.bf16.mxu1 %v5663_v53  ;;  %v5733_v53 = vld [vmem:[%s9062_s0 + $0x350] sm:$0xff]  }
  0x52   :  { %5337 = vmatmul.mubr.bf16.gmra.mrb[24].mxu0 %v5664_v54  ;;  %v5734_v54 = vld [vmem:[%s9062_s0 + $0x258] sm:$0xff]  }
  0x53   :  { %5417 = vmatmul.mubr.bf16.gmra.mrb[24].mxu1 %v5665_v55  ;;  %5340 = vmatprep.mubr.bf16.mxu0 %v5668_v56  ;;  %v5735_v55 = vld [vmem:[%s9062_s0 + $0x358] sm:$0xff]   ;;  %v5736_v56 = vld [vmem:[%s9062_s0 + $0x260] sm:$0xff]  }
  0x54   :  { %5420 = vmatprep.mubr.bf16.mxu1 %v5669_v57  ;;  %v5737_v57 = vld [vmem:[%s9062_s0 + $0x360] sm:$0xff]  }
  0x5a   :  { %5341 = vmatmul.mubr.bf16.gmra.mrb[28].mxu0 %v5670_v60  ;;  %v5740_v60 = vld [vmem:[%s9062_s0 + $0x270] sm:$0xff]  }
  0x5b   :  { %5421 = vmatmul.mubr.bf16.gmra.mrb[28].mxu1 %v5671_v61  ;;  %5344 = vmatprep.mubr.bf16.mxu0 %v5672_v62  ;;  %v5741_v61 = vld [vmem:[%s9062_s0 + $0x370] sm:$0xff]   ;;  %v5742_v62 = vld [vmem:[%s9062_s0 + $0x278] sm:$0xff]  }
  0x5c   :  { %5424 = vmatprep.mubr.bf16.mxu1 %v5673_v63  ;;  %v5743_v63 = vld [vmem:[%s9062_s0 + $0x378] sm:$0xff]  }
  0x62   :  { %5345 = vmatmul.mubr.bf16.gmra.mrb[32].mxu0 %v5674_v2  ;;  %v5746_v2 = vld [vmem:[%s9062_s0 + $0x288] sm:$0xff]  }
  0x63   :  { %5425 = vmatmul.mubr.bf16.gmra.mrb[32].mxu1 %v5675_v3  ;;  %5348 = vmatprep.mubr.bf16.mxu0 %v5678_v4  ;;  %v5747_v3 = vld [vmem:[%s9062_s0 + $0x388] sm:$0xff]   ;;  %v5748_v4 = vld [vmem:[%s9062_s0 + $0x290] sm:$0xff]  }
  0x64   :  { %5428 = vmatprep.mubr.bf16.mxu1 %v5679_v5  ;;  %v5749_v5 = vld [vmem:[%s9062_s0 + $0x390] sm:$0xff]  }
  0x6a   :  { %5349 = vmatmul.mubr.bf16.gmra.mrb[36].mxu0 %v5680_v6  ;;  %v5750_v6 = vld [vmem:[%s9062_s0 + $0x298] sm:$0xff]  }
  0x6b   :  { %5429 = vmatmul.mubr.bf16.gmra.mrb[36].mxu1 %v5681_v7  ;;  %5352 = vmatprep.mubr.bf16.mxu0 %v5682_v8  ;;  %v5751_v7 = vld [vmem:[%s9062_s0 + $0x398] sm:$0xff]   ;;  %v5752_v8 = vld [vmem:[%s9062_s0 + $0x2a0] sm:$0xff]  }
  0x6c   :  { %5432 = vmatprep.mubr.bf16.mxu1 %v5683_v9  ;;  %v5753_v9 = vld [vmem:[%s9062_s0 + $0x3a0] sm:$0xff]  }
  0x72   :  { %5353 = vmatmul.mubr.bf16.gmra.mrb[40].mxu0 %v5684_v10  ;;  %v5754_v10 = vld [vmem:[%s9062_s0 + $0x2a8] sm:$0xff]  }
  0x73   :  { %5433 = vmatmul.mubr.bf16.gmra.mrb[40].mxu1 %v5685_v11  ;;  %5356 = vmatprep.mubr.bf16.mxu0 %v5688_v12  ;;  %v5755_v11 = vld [vmem:[%s9062_s0 + $0x3a8] sm:$0xff]   ;;  %v5756_v12 = vld [vmem:[%s9062_s0 + $0x2b0] sm:$0xff]  }
  0x74   :  { %5436 = vmatprep.mubr.bf16.mxu1 %v5689_v13  ;;  %v5757_v13 = vld [vmem:[%s9062_s0 + $0x3b0] sm:$0xff]  }
  0x7a   :  { %5357 = vmatmul.mubr.bf16.gmra.mrb[44].mxu0 %v5690_v14  ;;  %v7253_v14 = vld [vmem:[%s9063_s2] ss:$0 sm:$0xff] }
  0x7b   :  { %5437 = vmatmul.mubr.bf16.gmra.mrb[44].mxu1 %v5691_v15  ;;  %5360 = vmatprep.mubr.bf16.mxu0 %v5692_v16 }
  0x7c   :  { %5440 = vmatprep.mubr.bf16.mxu1 %v5693_v17 }
  0x82   :  { %5361 = vmatmul.mubr.bf16.gmra.mrb[48].mxu0 %v5694_v18 }
  0x83   :  { %5441 = vmatmul.mubr.bf16.gmra.mrb[48].mxu1 %v5695_v19  ;;  %5364 = vmatprep.mubr.bf16.mxu0 %v5698_v20  ;;  %v5758_v19 = vld [vmem:[%s9062_s0 + $0x2b8] sm:$0xff]  }
  0x84   :  { %5444 = vmatprep.mubr.bf16.mxu1 %v5699_v21 }
  0x8a   :  { %5365 = vmatmul.mubr.bf16.gmra.mrb[52].mxu0 %v5700_v22 }
  0x8b   :  { %5445 = vmatmul.mubr.bf16.gmra.mrb[52].mxu1 %v5701_v23  ;;  %5368 = vmatprep.mubr.bf16.mxu0 %v5702_v24  ;;  %v5759_v24 = vld [vmem:[%s9062_s0 + $0x3b8] sm:$0xff]  }
  0x8c   :  { %5448 = vmatprep.mubr.bf16.mxu1 %v5703_v25  ;;  %v5760_v25 = vld [vmem:[%s9062_s0 + $0x2c0] sm:$0xff]  }
  0x92   :  { %5369 = vmatmul.mubr.bf16.gmra.mrb[56].mxu0 %v5704_v26 }
  0x93   :  { %5449 = vmatmul.mubr.bf16.gmra.mrb[56].mxu1 %v5705_v27  ;;  %5372 = vmatprep.mubr.bf16.mxu0 %v5708_v28 }
  0x94   :  { %5452 = vmatprep.mubr.bf16.mxu1 %v5709_v29 }
  0x9a   :  { %5373 = vmatmul.mubr.bf16.gmra.mrb[60].mxu0 %v5710_v30 }
  0x9b   :  { %5453 = vmatmul.mubr.bf16.gmra.mrb[60].mxu1 %v5711_v31  ;;  %5472 = vmatprep.mubr.bf16.mxu0 %v5712_v32  ;;  %v5761_v31 = vld [vmem:[%s9062_s0 + $0x3c0] sm:$0xff]  }
  0x9c   :  { %5552 = vmatprep.mubr.bf16.mxu1 %v5713_v33 }
  0xa2   :  { %5473 = vmatmul.mubr.bf16.vlgmr.msra.gmra.mrb[64].mxu0 %v5714_v34 }
  0xa3   :  { %5553 = vmatmul.mubr.bf16.vlgmr.msra.gmra.mrb[64].mxu1 %v5715_v35  ;;  %5476 = vmatprep.mubr.bf16.mxu0 %v5716_v36 }
  0xa4   :  { %5556 = vmatprep.mubr.bf16.mxu1 %v5717_v37 }
  0xaa   :  { %5477 = vmatmul.mubr.bf16.gmra.mrb[68].mxu0 %v5718_v38 }
  0xab   :  { %5557 = vmatmul.mubr.bf16.gmra.mrb[68].mxu1 %v5719_v39  ;;  %5480 = vmatprep.mubr.bf16.mxu0 %v5720_v40 }
  0xac   :  { %5560 = vmatprep.mubr.bf16.mxu1 %v5721_v41 }
  0xb2   :  { %5481 = vmatmul.mubr.bf16.gmra.mrb[72].mxu0 %v5722_v42 }
  0xb3   :  { %5561 = vmatmul.mubr.bf16.gmra.mrb[72].mxu1 %v5723_v43  ;;  %5484 = vmatprep.mubr.bf16.mxu0 %v5724_v44 }
  0xb4   :  { %5564 = vmatprep.mubr.bf16.mxu1 %v5725_v45 }
  0xba   :  { %5485 = vmatmul.mubr.bf16.gmra.mrb[76].mxu0 %v5726_v46 }
  0xbb   :  { %5565 = vmatmul.mubr.bf16.gmra.mrb[76].mxu1 %v5727_v47  ;;  %5488 = vmatprep.mubr.bf16.mxu0 %v5728_v48  ;;  %v5762_v47 = vld [vmem:[%s9062_s0 + $0x2c8] sm:$0xff]  }
  0xbc   :  { %5568 = vmatprep.mubr.bf16.mxu1 %v5729_v49 }
  0xc2   :  { %5489 = vmatmul.mubr.bf16.gmra.mrb[80].mxu0 %v5730_v50 }
  0xc3   :  { %5569 = vmatmul.mubr.bf16.gmra.mrb[80].mxu1 %v5731_v51  ;;  %5492 = vmatprep.mubr.bf16.mxu0 %v5732_v52  ;;  %v5763_v52 = vld [vmem:[%s9062_s0 + $0x3c8] sm:$0xff]  }
  0xc4   :  { %5572 = vmatprep.mubr.bf16.mxu1 %v5733_v53  ;;  %v5764_v53 = vld [vmem:[%s9062_s0 + $0x2d0] sm:$0xff]  }
  0xca   :  { %5493 = vmatmul.mubr.bf16.gmra.mrb[84].mxu0 %v5734_v54 }
  0xcb   :  { %5573 = vmatmul.mubr.bf16.gmra.mrb[84].mxu1 %v5735_v55  ;;  %5496 = vmatprep.mubr.bf16.mxu0 %v5736_v56 }
  0xcc   :  { %5576 = vmatprep.mubr.bf16.mxu1 %v5737_v57 }
  0xd2   :  { %5497 = vmatmul.mubr.bf16.gmra.mrb[88].mxu0 %v5738_v58 }
  0xd3   :  { %5577 = vmatmul.mubr.bf16.gmra.mrb[88].mxu1 %v5739_v59  ;;  %5500 = vmatprep.mubr.bf16.mxu0 %v5740_v60  ;;  %v5765_v59 = vld [vmem:[%s9062_s0 + $0x3d0] sm:$0xff]  }
  0xd4   :  { %5580 = vmatprep.mubr.bf16.mxu1 %v5741_v61 }
  0xda   :  { %5501 = vmatmul.mubr.bf16.gmra.mrb[92].mxu0 %v5742_v62 }
  0xdb   :  { %5581 = vmatmul.mubr.bf16.gmra.mrb[92].mxu1 %v5743_v63  ;;  %5504 = vmatprep.mubr.bf16.mxu0 %v5744_v0 }
  0xdc   :  { %5584 = vmatprep.mubr.bf16.mxu1 %v5745_v1 }
  0xe2   :  { %5505 = vmatmul.mubr.bf16.gmra.mrb[96].mxu0 %v5746_v2 }
  0xe3   :  { %5585 = vmatmul.mubr.bf16.gmra.mrb[96].mxu1 %v5747_v3  ;;  %5508 = vmatprep.mubr.bf16.mxu0 %v5748_v4 }
  0xe4   :  { %5588 = vmatprep.mubr.bf16.mxu1 %v5749_v5 }
  0xea   :  { %5509 = vmatmul.mubr.bf16.gmra.mrb[100].mxu0 %v5750_v6 }
  0xeb   :  { %5589 = vmatmul.mubr.bf16.gmra.mrb[100].mxu1 %v5751_v7  ;;  %5512 = vmatprep.mubr.bf16.mxu0 %v5752_v8 }
  0xec   :  { %5592 = vmatprep.mubr.bf16.mxu1 %v5753_v9  ;;  %v5766_v9 = vld [vmem:[%s9062_s0 + $0x2d8] sm:$0xff]  }
  0xf2   :  { %5513 = vmatmul.mubr.bf16.gmra.mrb[104].mxu0 %v5754_v10 }
  0xf3   :  { %5593 = vmatmul.mubr.bf16.gmra.mrb[104].mxu1 %v5755_v11  ;;  %5516 = vmatprep.mubr.bf16.mxu0 %v5756_v12 }
  0xf4   :  { %5596 = vmatprep.mubr.bf16.mxu1 %v5757_v13 }
  0xf5   :  { %v5314_v15 = vpop.f32.mrb[0].mxu0 }
  0xf6   :  { %v385_v16 = vadd.f32 %v5314_v15, %v7253_v14  ;;  %v5394_v17 = vpop.f32.mrb[0].mxu1  ;;  %v376_v18 = vpop.f32.mrb[1].mxu0  ;;  %v5767_v15 = vld [vmem:[%s9062_s0 + $0x3d8] sm:$0xff]  }
  0xf7   :  { %v1451_v20 = vadd.f32 %v5394_v17, %v7253_v14  ;;  %v377_v21 = vadd.f32 %v7253_v14, %v376_v18  ;;  %v1442_v22 = vpop.f32.mrb[1].mxu1  ;;  %v5315_v23 = vpop.f32.mrb[2].mxu0 }
  0xf8   :  { %v4327_v26 = vmul.f32 -1.442695, %v385_v16  ;;  %v1443_v27 = vadd.f32 %v7253_v14, %v1442_v22  ;;  %v388_v28 = vadd.f32 %v5315_v23, %v7253_v14  ;;  %v5395_v29 = vpop.f32.mrb[2].mxu1  ;;  %v379_v30 = vpop.f32.mrb[3].mxu0  ;;  %v5768_v16 = vld [vmem:[%s9062_s0 + $0x2e0] sm:$0xff]  }
  0xf9   :  { %v4512_v32 = vmul.f32 -1.442695, %v1451_v20  ;;  %v4325_v33 = vmul.f32 -1.442695, %v377_v21  ;;  %v1454_v34 = vadd.f32 %v5395_v29, %v7253_v14  ;;  %v380_v35 = vadd.f32 %v7253_v14, %v379_v30  ;;  %v1445_v36 = vpop.f32.mrb[3].mxu1  ;;  %v5769_v21 = vld [vmem:[%s9062_s0 + $0x3e0] sm:$0xff]  }
  0xfa   :  { %5776 = vpow2.f32 %v4327_v26  ;;  %v4510_v37 = vmul.f32 -1.442695, %v1443_v27  ;;  %v4328_v38 = vmul.f32 -1.442695, %v388_v28  ;;  %v1446_v39 = vadd.f32 %v7253_v14, %v1445_v36  ;;  %5517 = vmatmul.mubr.bf16.gmra.mrb[108].mxu0 %v5758_v19 }
  0xfb   :  { %5778 = vpow2.f32 %v4512_v32  ;;  %v4513_v40 = vmul.f32 -1.442695, %v1454_v34  ;;  %5597 = vmatmul.mubr.bf16.gmra.mrb[108].mxu1 %v5759_v24  ;;  %5520 = vmatprep.mubr.bf16.mxu0 %v5760_v25  ;;  %v4326_v41 = vmul.f32 -1.442695, %v380_v35 }
  0xfc   :  { %5780 = vpow2.f32 %v4325_v33  ;;  %5600 = vmatprep.mubr.bf16.mxu1 %v5761_v31  ;;  %v4511_v42 = vmul.f32 -1.442695, %v1446_v39 }
  0xfd   :  { %5782 = vpow2.f32 %v4510_v37  ;;  %v5318_v43 = vpop.f32.mrb[4].mxu0 }
  0xfe   :  { %5784 = vpow2.f32 %v4328_v38  ;;  %v401_v44 = vadd.f32 %v5318_v43, %v7253_v14  ;;  %v5398_v45 = vpop.f32.mrb[4].mxu1  ;;  %v392_v46 = vpop.f32.mrb[5].mxu0 }
  0xff   :  { %5786 = vpow2.f32 %v4513_v40  ;;  %v1467_v48 = vadd.f32 %v5398_v45, %v7253_v14  ;;  %v393_v49 = vadd.f32 %v7253_v14, %v392_v46  ;;  %v1458_v50 = vpop.f32.mrb[5].mxu1  ;;  %v5319_v51 = vpop.f32.mrb[6].mxu0 }
 0x100   :  { %5788 = vpow2.f32 %v4326_v41  ;;  %v4331_v54 = vmul.f32 -1.442695, %v401_v44  ;;  %v1459_v55 = vadd.f32 %v7253_v14, %v1458_v50  ;;  %v404_v56 = vadd.f32 %v5319_v51, %v7253_v14  ;;  %v5399_v57 = vpop.f32.mrb[6].mxu1  ;;  %v395_v58 = vpop.f32.mrb[7].mxu0  ;;  %v5770_v41 = vld [vmem:[%s9062_s0 + $0x2e8] sm:$0xff]  }
 0x101   :  { %5790 = vpow2.f32 %v4511_v42  ;;  %v4516_v60 = vmul.f32 -1.442695, %v1467_v48  ;;  %v4329_v61 = vmul.f32 -1.442695, %v393_v49  ;;  %v1461_v62 = vpop.f32.mrb[7].mxu1  ;;  %v1470_v31 = vadd.f32 %v5399_v57, %v7253_v14  ;;  %v5772_v48 = vld [vmem:[%s9062_s0 + $0x2f0] sm:$0xff]  }
 0x102   :  { %5792 = vpow2.f32 %v4331_v54  ;;  %v4514_v63 = vmul.f32 -1.442695, %v1459_v55  ;;  %v4332_v0 = vmul.f32 -1.442695, %v404_v56  ;;  %5521 = vmatmul.mubr.bf16.gmra.mrb[112].mxu0 %v5762_v47  ;;  %v396_v34 = vadd.f32 %v7253_v14, %v395_v58  ;;  %v5771_v47 = vld [vmem:[%s9062_s0 + $0x3e8] sm:$0xff]   ;;  %v5773_v55 = vld [vmem:[%s9062_s0 + $0x3f0] sm:$0xff]  }
 0x103   :  { %5794 = vpow2.f32 %v4516_v60  ;;  %5601 = vmatmul.mubr.bf16.gmra.mrb[112].mxu1 %v5763_v52  ;;  %5524 = vmatprep.mubr.bf16.mxu0 %v5764_v53  ;;  %v1462_v38 = vadd.f32 %v7253_v14, %v1461_v62  ;;  %v4517_v51 = vmul.f32 -1.442695, %v1470_v31 }
 0x104   :  { %v5777_v1 = vpop.eup %5776  ;;  %5796 = vpow2.f32 %v4329_v61  ;;  %5604 = vmatprep.mubr.bf16.mxu1 %v5765_v59  ;;  %v4330_v58 = vmul.f32 -1.442695, %v396_v34 }
 0x105   :  { %v5779_v2 = vpop.eup %5778  ;;  %v825_v3 = vadd.f32 1.0, %v5777_v1  ;;  %5798 = vpow2.f32 %v4514_v63  ;;  %v5322_v4 = vpop.f32.mrb[8].mxu0  ;;  %v4515_v62 = vmul.f32 -1.442695, %v1462_v38 }
 0x106   :  { %v5781_v5 = vpop.eup %5780  ;;  %v1891_v6 = vadd.f32 1.0, %v5779_v2  ;;  %5800 = vpow2.f32 %v4332_v0  ;;  %v5402_v7 = vpop.f32.mrb[8].mxu1  ;;  %v417_v44 = vadd.f32 %v5322_v4, %v7253_v14 }
 0x107   :  { %v7292_v8 = vpop.f32.mrb[9].mxu0  ;;  %v5783_v10 = vpop.eup %5782  ;;  %5802 = vrcp.f32 %v825_v3  ;;  %v823_v11 = vadd.f32 1.0, %v5781_v5  ;;  %v1483_v52 = vadd.f32 %v5402_v7, %v7253_v14 }
 0x108   :  { %v7297_v12 = vpop.f32.mrb[9].mxu1  ;;  %v7299_v13 = vpop.f32.mrb[10].mxu0  ;;  %5804 = vrcp.f32 %v1891_v6  ;;  %v1889_v18 = vadd.f32 1.0, %v5783_v10  ;;  %v409_v59 = vadd.f32 %v7253_v14, %v7292_v8  ;;  %v4335_v1 = vmul.f32 -1.442695, %v417_v44 }
 0x109   :  { %v5785_v17 = vpop.eup %5784  ;;  %v7307_v19 = vpop.f32.mrb[10].mxu1  ;;  %5806 = vrcp.f32 %v823_v11  ;;  %v1475_v63 = vadd.f32 %v7253_v14, %v7297_v12  ;;  %v420_v2 = vadd.f32 %v7299_v13, %v7253_v14  ;;  %v4520_v4 = vmul.f32 -1.442695, %v1483_v52 }
 0x10a   :  { %v7309_v20 = vpop.f32.mrb[11].mxu0  ;;  %v5787_v22 = vpop.eup %5786  ;;  %v826_v23 = vadd.f32 1.0, %v5785_v17  ;;  %5808 = vrcp.f32 %v1889_v18  ;;  %5525 = vmatmul.mubr.bf16.gmra.mrb[116].mxu0 %v5766_v9  ;;  %v1486_v5 = vadd.f32 %v7307_v19, %v7253_v14  ;;  %v4333_v7 = vmul.f32 -1.442695, %v409_v59 }
 0x10b   :  { %v7314_v24 = vpop.f32.mrb[11].mxu1  ;;  %v5789_v25 = vpop.eup %5788  ;;  %v1892_v26 = vadd.f32 1.0, %v5787_v22  ;;  %5605 = vmatmul.mubr.bf16.gmra.mrb[116].mxu1 %v5767_v15  ;;  %5528 = vmatprep.mubr.bf16.mxu0 %v5768_v16  ;;  %v412_v8 = vadd.f32 %v7253_v14, %v7309_v20  ;;  %v4518_v11 = vmul.f32 -1.442695, %v1475_v63  ;;  %v5774_v16 = vld [vmem:[%s9062_s0 + $0x2f8] sm:$0xff]  }
 0x10c   :  { %v5791_v27 = vpop.eup %5790  ;;  %5810 = vrcp.f32 %v826_v23  ;;  %v824_v28 = vadd.f32 1.0, %v5789_v25  ;;  %5608 = vmatprep.mubr.bf16.mxu1 %v5769_v21  ;;  %v1478_v12 = vadd.f32 %v7253_v14, %v7314_v24  ;;  %v4336_v18 = vmul.f32 -1.442695, %v420_v2  ;;  %v5775_v22 = vld [vmem:[%s9062_s0 + $0x3f8] sm:$0xff]  }
 0x10d   :  { %v5793_v29 = vpop.eup %5792  ;;  %5812 = vrcp.f32 %v1892_v26  ;;  %v1890_v30 = vadd.f32 1.0, %v5791_v27  ;;  %v7318_v35 = vpop.f32.mrb[12].mxu0  ;;  %v4521_v24 = vmul.f32 -1.442695, %v1486_v5 }
 0x10e   :  { %v5795_v32 = vpop.eup %5794  ;;  %5814 = vrcp.f32 %v824_v28  ;;  %v829_v33 = vadd.f32 1.0, %v5793_v29  ;;  %v7321_v39 = vpop.f32.mrb[12].mxu1  ;;  %v433_v19 = vadd.f32 %v7318_v35, %v7253_v14  ;;  %v4334_v29 = vmul.f32 -1.442695, %v412_v8 }
 0x10f   :  { %v5797_v36 = vpop.eup %5796  ;;  %5816 = vrcp.f32 %v1890_v30  ;;  %v1895_v37 = vadd.f32 1.0, %v5795_v32  ;;  %v7323_v40 = vpop.f32.mrb[13].mxu0  ;;  %v1499_v25 = vadd.f32 %v7321_v39, %v7253_v14  ;;  %v4519_v32 = vmul.f32 -1.442695, %v1478_v12 }
 0x110   :  { %v5799_v42 = vpop.eup %5798  ;;  %5818 = vrcp.f32 %v829_v33  ;;  %v827_v43 = vadd.f32 1.0, %v5797_v36  ;;  %v7329_v45 = vpop.f32.mrb[13].mxu1  ;;  %v4339_v34 = vmul.f32 -1.442695, %v433_v19 }
 0x111   :  { %v7331_v46 = vpop.f32.mrb[14].mxu0  ;;  %v5801_v49 = vpop.eup %5800  ;;  %5820 = vrcp.f32 %v1895_v37  ;;  %v1893_v50 = vadd.f32 1.0, %v5799_v42  ;;  %v4524_v36 = vmul.f32 -1.442695, %v1499_v25  ;;  %v1491_v12 = vadd.f32 %v7253_v14, %v7329_v45 }
 0x112   :  { %v7340_v53 = vpop.f32.mrb[14].mxu1  ;;  %v7342_v54 = vpop.f32.mrb[15].mxu0  ;;  %5822 = vrcp.f32 %v827_v43  ;;  %v830_v57 = vadd.f32 1.0, %v5801_v49  ;;  %5529 = vmatmul.mubr.bf16.gmra.mrb[120].mxu0 %v5770_v41 }
 0x113   :  { %v5803_v56 = vpop.eup %5802  ;;  %v7349_v60 = vpop.f32.mrb[15].mxu1  ;;  %5824 = vrcp.f32 %v1893_v50  ;;  %5609 = vmatmul.mubr.bf16.gmra.mrb[120].mxu1 %v5771_v47  ;;  %5532 = vmatprep.mubr.bf16.mxu0 %v5772_v48  ;;  %v1502_v45 = vadd.f32 %v7340_v53, %v7253_v14 }
 0x114   :  { %v5805_v61 = vpop.eup %5804  ;;  %1017 = vst [vmem:[%s9064_s3 + $0x10] sm:$0xff] %v5803_v56  ;;  %5826 = vrcp.f32 %v830_v57  ;;  %5612 = vmatprep.mubr.bf16.mxu1 %v5773_v55 }
 0x115   :  { %v5807_v0 = vpop.eup %5806  ;;  %4576 = vst [vmem:[%s9064_s3 + $0x210] sm:$0xff] %v5805_v61  ;;  %5828 = vpow2.f32 %v4517_v51  ;;  %v7371_v9 = vpop.f32.mrb[16].mxu0 }
 0x116   :  { %v5809_v3 = vpop.eup %5808  ;;  %1015 = vst [vmem:[%s9064_s3] sm:$0xff] %v5807_v0  ;;  %5830 = vpow2.f32 %v4330_v58  ;;  %v7378_v13 = vpop.f32.mrb[16].mxu1 }
 0x117   :  { %v5811_v6 = vpop.eup %5810  ;;  %4574 = vst [vmem:[%s9064_s3 + $0x200] sm:$0xff] %v5809_v3  ;;  %5832 = vpow2.f32 %v4515_v62  ;;  %v7380_v15 = vpop.f32.mrb[17].mxu0 }
 0x118   :  { %v5813_v10 = vpop.eup %5812  ;;  %1018 = vst [vmem:[%s9064_s3 + $0x18] sm:$0xff] %v5811_v6  ;;  %5834 = vpow2.f32 %v4335_v1  ;;  %v7390_v20 = vpop.f32.mrb[17].mxu1  ;;  %v425_v6 = vadd.f32 %v7253_v14, %v7323_v40  ;;  %v436_v40 = vadd.f32 %v7331_v46, %v7253_v14 }
 0x119   :  { %v5815_v17 = vpop.eup %5814  ;;  %4577 = vst [vmem:[%s9064_s3 + $0x218] sm:$0xff] %v5813_v10  ;;  %v7392_v21 = vpop.f32.mrb[18].mxu0  ;;  %5836 = vpow2.f32 %v4520_v4 }
 0x11a   :  { %v5817_v23 = vpop.eup %5816  ;;  %1016 = vst [vmem:[%s9064_s3 + $0x8] sm:$0xff] %v5815_v17  ;;  %v7402_v26 = vpop.f32.mrb[18].mxu1  ;;  %5838 = vpow2.f32 %v4333_v7  ;;  %5533 = vmatmul.mubr.bf16.gmra.mrb[124].mxu0 %v5774_v16  ;;  %v4340_v53 = vmul.f32 -1.442695, %v436_v40 }
 0x11b   :  { %v7404_v27 = vpop.f32.mrb[19].mxu0  ;;  %v5819_v28 = vpop.eup %5818  ;;  %4575 = vst [vmem:[%s9064_s3 + $0x208] sm:$0xff] %v5817_v23  ;;  %5840 = vpow2.f32 %v4518_v11  ;;  %5613 = vmatmul.mubr.bf16.gmra.mrb[124].mxu1 %v5775_v22 }
 0x11c   :  { %v7409_v30 = vpop.f32.mrb[19].mxu1  ;;  %v5821_v31 = vpop.eup %5820  ;;  %1021 = vst [vmem:[%s9064_s3 + $0x30] sm:$0xff] %v5819_v28  ;;  %5842 = vpow2.f32 %v4336_v18 }
 0x11d   :  { %v5823_v33 = vpop.eup %5822  ;;  %4580 = vst [vmem:[%s9064_s3 + $0x230] sm:$0xff] %v5821_v31  ;;  %5844 = vpow2.f32 %v4521_v24  ;;  %v7423_v38 = vpop.f32.mrb[20].mxu0 }
 0x11e   :  { %v5825_v35 = vpop.eup %5824  ;;  %1019 = vst [vmem:[%s9064_s3 + $0x20] sm:$0xff] %v5823_v33  ;;  %5846 = vpow2.f32 %v4334_v29  ;;  %v7428_v41 = vpop.f32.mrb[20].mxu1  ;;  %v428_v33 = vadd.f32 %v7253_v14, %v7342_v54  ;;  %v4525_v54 = vmul.f32 -1.442695, %v1502_v45 }
 0x11f   :  { %v5827_v37 = vpop.eup %5826  ;;  %4578 = vst [vmem:[%s9064_s3 + $0x220] sm:$0xff] %v5825_v35  ;;  %5848 = vpow2.f32 %v4519_v32  ;;  %v7430_v42 = vpop.f32.mrb[21].mxu0  ;;  %v4337_v32 = vmul.f32 -1.442695, %v425_v6  ;;  %v4522_v35 = vmul.f32 -1.442695, %v1491_v12 }
 0x120   :  { %v5829_v39 = vpop.eup %5828  ;;  %1022 = vst [vmem:[%s9064_s3 + $0x38] sm:$0xff] %v5827_v37  ;;  %5850 = vpow2.f32 %v4339_v34  ;;  %v7432_v47 = vpop.f32.mrb[21].mxu1 }
 0x121   :  { %v5831_v43 = vpop.eup %5830  ;;  %v1896_v44 = vadd.f32 1.0, %v5829_v39  ;;  %v7434_v48 = vpop.f32.mrb[22].mxu0  ;;  %5852 = vpow2.f32 %v4524_v36  ;;  %v1494_v36 = vadd.f32 %v7253_v14, %v7349_v60  ;;  %v449_v39 = vadd.f32 %v7371_v9, %v7253_v14 }
 0x122   :  { %v5833_v49 = vpop.eup %5832  ;;  %v828_v50 = vadd.f32 1.0, %v5831_v43  ;;  %v7436_v51 = vpop.f32.mrb[22].mxu1  ;;  %v1515_v60 = vadd.f32 %v7378_v13, %v7253_v14  ;;  %v441_v9 = vadd.f32 %v7253_v14, %v7380_v15 }
 0x123   :  { %v7438_v52 = vpop.f32.mrb[23].mxu0  ;;  %v5835_v55 = vpop.eup %5834  ;;  %5854 = vrcp.f32 %v1896_v44  ;;  %v1894_v56 = vadd.f32 1.0, %v5833_v49  ;;  %v4523_v13 = vmul.f32 -1.442695, %v1494_v36  ;;  %v4343_v15 = vmul.f32 -1.442695, %v449_v39 }
 0x124   :  { %v7440_v57 = vpop.f32.mrb[23].mxu1  ;;  %v5837_v58 = vpop.eup %5836  ;;  %5856 = vrcp.f32 %v828_v50  ;;  %v833_v59 = vadd.f32 1.0, %v5835_v55  ;;  %v4338_v50 = vmul.f32 -1.442695, %v428_v33 }
 0x125   :  { %v5839_v61 = vpop.eup %5838  ;;  %5858 = vrcp.f32 %v1894_v56  ;;  %v1899_v62 = vadd.f32 1.0, %v5837_v58  ;;  %v7442_v3 = vpop.f32.mrb[24].mxu0 }
 0x126   :  { %v5841_v63 = vpop.eup %5840  ;;  %5860 = vrcp.f32 %v833_v59  ;;  %v831_v0 = vadd.f32 1.0, %v5839_v61  ;;  %v7446_v7 = vpop.f32.mrb[24].mxu1  ;;  %v1507_v59 = vadd.f32 %v7253_v14, %v7390_v20  ;;  %v4528_v20 = vmul.f32 -1.442695, %v1515_v60 }
 0x127   :  { %v5843_v1 = vpop.eup %5842  ;;  %5862 = vrcp.f32 %v1899_v62  ;;  %v1897_v2 = vadd.f32 1.0, %v5841_v63  ;;  %v7448_v8 = vpop.f32.mrb[25].mxu0 }
 0x128   :  { %v5845_v4 = vpop.eup %5844  ;;  %5864 = vrcp.f32 %v831_v0  ;;  %v834_v5 = vadd.f32 1.0, %v5843_v1  ;;  %v7452_v16 = vpop.f32.mrb[25].mxu1  ;;  %v452_v0 = vadd.f32 %v7392_v21, %v7253_v14  ;;  %v4341_v21 = vmul.f32 -1.442695, %v441_v9 }
 0x129   :  { %v5847_v10 = vpop.eup %5846  ;;  %5866 = vrcp.f32 %v1897_v2  ;;  %v1900_v11 = vadd.f32 1.0, %v5845_v4  ;;  %v7454_v17 = vpop.f32.mrb[26].mxu0 }
 0x12a   :  { %v5849_v18 = vpop.eup %5848  ;;  %5868 = vrcp.f32 %v834_v5  ;;  %v832_v19 = vadd.f32 1.0, %v5847_v10  ;;  %v7458_v22 = vpop.f32.mrb[26].mxu1  ;;  %v1518_v5 = vadd.f32 %v7402_v26, %v7253_v14 }
 0x12b   :  { %v7460_v23 = vpop.f32.mrb[27].mxu0  ;;  %v5851_v24 = vpop.eup %5850  ;;  %5870 = vrcp.f32 %v1900_v11  ;;  %v1898_v25 = vadd.f32 1.0, %v5849_v18  ;;  %v444_v11 = vadd.f32 %v7253_v14, %v7404_v27  ;;  %v4526_v18 = vmul.f32 -1.442695, %v1507_v59 }
 0x12c   :  { %v7464_v28 = vpop.f32.mrb[27].mxu1  ;;  %v5853_v29 = vpop.eup %5852  ;;  %5872 = vrcp.f32 %v832_v19  ;;  %v837_v31 = vadd.f32 1.0, %v5851_v24  ;;  %v4344_v19 = vmul.f32 -1.442695, %v452_v0  ;;  %v4529_v27 = vmul.f32 -1.442695, %v1518_v5 }
 0x12d   :  { %v5855_v46 = vpop.eup %5854  ;;  %5874 = vrcp.f32 %v1898_v25  ;;  %v1903_v34 = vadd.f32 1.0, %v5853_v29  ;;  %v7480_v44 = vpop.f32.mrb[28].mxu0  ;;  %v4342_v45 = vmul.f32 -1.442695, %v444_v11 }
 0x12e   :  { %v5857_v37 = vpop.eup %5856  ;;  %4581 = vst [vmem:[%s9064_s3 + $0x238] sm:$0xff] %v5855_v46  ;;  %5876 = vrcp.f32 %v837_v31  ;;  %v7487_v55 = vpop.f32.mrb[28].mxu1 }
 0x12f   :  { %v5859_v43 = vpop.eup %5858  ;;  %1020 = vst [vmem:[%s9064_s3 + $0x28] sm:$0xff] %v5857_v37  ;;  %5878 = vrcp.f32 %v1903_v34  ;;  %v7489_v56 = vpop.f32.mrb[29].mxu0 }
 0x130   :  { %v5861_v49 = vpop.eup %5860  ;;  %4579 = vst [vmem:[%s9064_s3 + $0x228] sm:$0xff] %v5859_v43  ;;  %5880 = vpow2.f32 %v4337_v32  ;;  %v7496_v61 = vpop.f32.mrb[29].mxu1 }
 0x131   :  { %v5863_v58 = vpop.eup %5862  ;;  %1025 = vst [vmem:[%s9064_s3 + $0x50] sm:$0xff] %v5861_v49  ;;  %5882 = vpow2.f32 %v4522_v35  ;;  %v7498_v62 = vpop.f32.mrb[30].mxu0 }
 0x132   :  { %v5865_v63 = vpop.eup %5864  ;;  %4584 = vst [vmem:[%s9064_s3 + $0x250] sm:$0xff] %v5863_v58  ;;  %5884 = vpow2.f32 %v4340_v53  ;;  %v7505_v1 = vpop.f32.mrb[30].mxu1 }
 0x133   :  { %v7507_v2 = vpop.f32.mrb[31].mxu0  ;;  %v5867_v4 = vpop.eup %5866  ;;  %1023 = vst [vmem:[%s9064_s3 + $0x40] sm:$0xff] %v5865_v63  ;;  %5886 = vpow2.f32 %v4525_v54 }
 0x134   :  { %v7514_v6 = vpop.f32.mrb[31].mxu1  ;;  %v5869_v10 = vpop.eup %5868  ;;  %4582 = vst [vmem:[%s9064_s3 + $0x240] sm:$0xff] %v5867_v4  ;;  %5888 = vpow2.f32 %v4338_v50 }
 0x135   :  { %v5871_v12 = vpop.eup %5870  ;;  %1026 = vst [vmem:[%s9064_s3 + $0x58] sm:$0xff] %v5869_v10  ;;  %5890 = vpow2.f32 %v4523_v13  ;;  %v7530_v24 = vpop.f32.mrb[32].mxu0 }
 0x136   :  { %v5873_v26 = vpop.eup %5872  ;;  %4585 = vst [vmem:[%s9064_s3 + $0x258] sm:$0xff] %v5871_v12  ;;  %5892 = vpow2.f32 %v4343_v15  ;;  %v7535_v29 = vpop.f32.mrb[32].mxu1 }
 0x137   :  { %v5875_v40 = vpop.eup %5874  ;;  %1024 = vst [vmem:[%s9064_s3 + $0x48] sm:$0xff] %v5873_v26  ;;  %5894 = vpow2.f32 %v4528_v20  ;;  %v7537_v31 = vpop.f32.mrb[33].mxu0 }
 0x138   :  { %v5877_v25 = vpop.eup %5876  ;;  %4583 = vst [vmem:[%s9064_s3 + $0x248] sm:$0xff] %v5875_v40  ;;  %5896 = vpow2.f32 %v4341_v21  ;;  %v7542_v33 = vpop.f32.mrb[33].mxu1 }
 0x139   :  { %v5879_v32 = vpop.eup %5878  ;;  %1029 = vst [vmem:[%s9064_s3 + $0x70] sm:$0xff] %v5877_v25  ;;  %5898 = vpow2.f32 %v4526_v18  ;;  %v7544_v46 = vpop.f32.mrb[34].mxu0  ;;  %v1510_v18 = vadd.f32 %v7253_v14, %v7409_v30  ;;  %v465_v25 = vadd.f32 %v7423_v38, %v7253_v14  ;;  %v1523_v38 = vadd.f32 %v7253_v14, %v7432_v47 }
 0x13a   :  { %v5881_v34 = vpop.eup %5880  ;;  %4588 = vst [vmem:[%s9064_s3 + $0x270] sm:$0xff] %v5879_v32  ;;  %5900 = vpow2.f32 %v4344_v19  ;;  %v7549_v35 = vpop.f32.mrb[34].mxu1 }
 0x13b   :  { %v7551_v36 = vpop.f32.mrb[35].mxu0  ;;  %v5883_v37 = vpop.eup %5882  ;;  %v835_v53 = vadd.f32 1.0, %v5881_v34  ;;  %5902 = vpow2.f32 %v4529_v27 }
 0x13c   :  { %v7553_v39 = vpop.f32.mrb[35].mxu1  ;;  %v5885_v43 = vpop.eup %5884  ;;  %v1901_v54 = vadd.f32 1.0, %v5883_v37  ;;  %5904 = vpow2.f32 %v4342_v45  ;;  %v1531_v37 = vadd.f32 %v7428_v41, %v7253_v14  ;;  %v468_v41 = vadd.f32 %v7434_v48, %v7253_v14 }
 0x13d   :  { %v5887_v60 = vpop.eup %5886  ;;  %5906 = vrcp.f32 %v835_v53  ;;  %v838_v49 = vadd.f32 1.0, %v5885_v43  ;;  %v7555_v59 = vpop.f32.mrb[36].mxu0  ;;  %v457_v43 = vadd.f32 %v7253_v14, %v7430_v42 }
 0x13e   :  { %v5889_v50 = vpop.eup %5888  ;;  %5908 = vrcp.f32 %v1901_v54  ;;  %v1904_v9 = vadd.f32 1.0, %v5887_v60  ;;  %v7557_v0 = vpop.f32.mrb[36].mxu1  ;;  %v4532_v42 = vmul.f32 -1.442695, %v1531_v37  ;;  %v481_v37 = vadd.f32 %v7442_v3, %v7253_v14 }
 0x13f   :  { %v5891_v58 = vpop.eup %5890  ;;  %5910 = vrcp.f32 %v838_v49  ;;  %v836_v13 = vadd.f32 1.0, %v5889_v50  ;;  %v7559_v4 = vpop.f32.mrb[37].mxu0  ;;  %v4527_v49 = vmul.f32 -1.442695, %v1510_v18  ;;  %v4345_v48 = vmul.f32 -1.442695, %v457_v43 }
 0x140   :  { %v5893_v63 = vpop.eup %5892  ;;  %5912 = vrcp.f32 %v1904_v9  ;;  %v1902_v15 = vadd.f32 1.0, %v5891_v58  ;;  %v7561_v10 = vpop.f32.mrb[37].mxu1  ;;  %v4347_v58 = vmul.f32 -1.442695, %v465_v25  ;;  %v1547_v43 = vadd.f32 %v7446_v7, %v7253_v14 }
 0x141   :  { %v5895_v20 = vpop.eup %5894  ;;  %5914 = vrcp.f32 %v836_v13  ;;  %v841_v5 = vadd.f32 1.0, %v5893_v63  ;;  %v7563_v21 = vpop.f32.mrb[38].mxu0  ;;  %v473_v3 = vadd.f32 %v7253_v14, %v7448_v8  ;;  %v1539_v7 = vadd.f32 %v7253_v14, %v7452_v16 }
 0x142   :  { %v5897_v11 = vpop.eup %5896  ;;  %5916 = vrcp.f32 %v1902_v15  ;;  %v1907_v12 = vadd.f32 1.0, %v5895_v20  ;;  %v7567_v26 = vpop.f32.mrb[38].mxu1  ;;  %v1534_v15 = vadd.f32 %v7436_v51, %v7253_v14  ;;  %v4530_v51 = vmul.f32 -1.442695, %v1523_v38 }
 0x143   :  { %v7569_v19 = vpop.f32.mrb[39].mxu0  ;;  %v5899_v40 = vpop.eup %5898  ;;  %5918 = vrcp.f32 %v841_v5  ;;  %v839_v27 = vadd.f32 1.0, %v5897_v11  ;;  %v460_v11 = vadd.f32 %v7253_v14, %v7438_v52  ;;  %v4348_v52 = vmul.f32 -1.442695, %v468_v41 }
 0x144   :  { %v7573_v45 = vpop.f32.mrb[39].mxu1  ;;  %v5901_v32 = vpop.eup %5900  ;;  %5920 = vrcp.f32 %v1907_v12  ;;  %v1905_v34 = vadd.f32 1.0, %v5899_v40  ;;  %v4536_v41 = vmul.f32 -1.442695, %v1547_v43  ;;  %v4349_v16 = vmul.f32 -1.442695, %v473_v3 }
 0x145   :  { %v5903_v53 = vpop.eup %5902  ;;  %5922 = vrcp.f32 %v839_v27  ;;  %v842_v30 = vadd.f32 1.0, %v5901_v32  ;;  %v7583_v13 = vpop.f32.mrb[40].mxu0  ;;  %v1526_v27 = vadd.f32 %v7253_v14, %v7440_v57  ;;  %v4533_v57 = vmul.f32 -1.442695, %v1534_v15 }
 0x146   :  { %v5905_v54 = vpop.eup %5904  ;;  %5924 = vrcp.f32 %v1905_v34  ;;  %v1908_v60 = vadd.f32 1.0, %v5903_v53  ;;  %v7590_v47 = vpop.f32.mrb[40].mxu1 }
 0x147   :  { %v5907_v50 = vpop.eup %5906  ;;  %5926 = vrcp.f32 %v842_v30  ;;  %v840_v9 = vadd.f32 1.0, %v5905_v54  ;;  %v7592_v20 = vpop.f32.mrb[41].mxu0  ;;  %v4531_v38 = vmul.f32 -1.442695, %v1526_v27 }
 0x148   :  { %v5909_v63 = vpop.eup %5908  ;;  %1027 = vst [vmem:[%s9064_s3 + $0x60] sm:$0xff] %v5907_v50  ;;  %5928 = vrcp.f32 %v1908_v60  ;;  %v7599_v12 = vpop.f32.mrb[41].mxu1  ;;  %v4346_v60 = vmul.f32 -1.442695, %v460_v11  ;;  %v4534_v11 = vmul.f32 -1.442695, %v1539_v7 }
 0x149   :  { %v5911_v5 = vpop.eup %5910  ;;  %4586 = vst [vmem:[%s9064_s3 + $0x260] sm:$0xff] %v5909_v63  ;;  %5930 = vrcp.f32 %v840_v9  ;;  %v7601_v18 = vpop.f32.mrb[42].mxu0  ;;  %v4351_v9 = vmul.f32 -1.442695, %v481_v37 }
 0x14a   :  { %v5913_v40 = vpop.eup %5912  ;;  %1030 = vst [vmem:[%s9064_s3 + $0x78] sm:$0xff] %v5911_v5  ;;  %5932 = vpow2.f32 %v4527_v49  ;;  %v7608_v25 = vpop.f32.mrb[42].mxu1 }
 0x14b   :  { %v7610_v32 = vpop.f32.mrb[43].mxu0  ;;  %v5915_v34 = vpop.eup %5914  ;;  %4589 = vst [vmem:[%s9064_s3 + $0x278] sm:$0xff] %v5913_v40  ;;  %5934 = vpow2.f32 %v4347_v58 }
 0x14c   :  { %v7617_v53 = vpop.f32.mrb[43].mxu1  ;;  %v5917_v30 = vpop.eup %5916  ;;  %1028 = vst [vmem:[%s9064_s3 + $0x68] sm:$0xff] %v5915_v34  ;;  %5936 = vpow2.f32 %v4532_v42 }
 0x14d   :  { %v5919_v54 = vpop.eup %5918  ;;  %4587 = vst [vmem:[%s9064_s3 + $0x268] sm:$0xff] %v5917_v30  ;;  %5938 = vpow2.f32 %v4345_v48  ;;  %v7637_v58 = vpop.f32.mrb[44].mxu0 }
 0x14e   :  { %v5921_v49 = vpop.eup %5920  ;;  %1033 = vst [vmem:[%s9064_s3 + $0x90] sm:$0xff] %v5919_v54  ;;  %5940 = vpow2.f32 %v4530_v51  ;;  %v7642_v63 = vpop.f32.mrb[44].mxu1 }
 0x14f   :  { %v5923_v50 = vpop.eup %5922  ;;  %4592 = vst [vmem:[%s9064_s3 + $0x290] sm:$0xff] %v5921_v49  ;;  %5942 = vpow2.f32 %v4348_v52  ;;  %v7644_v42 = vpop.f32.mrb[45].mxu0 }
 0x150   :  { %v5925_v8 = vpop.eup %5924  ;;  %1031 = vst [vmem:[%s9064_s3 + $0x80] sm:$0xff] %v5923_v50  ;;  %5944 = vpow2.f32 %v4533_v57  ;;  %v7649_v15 = vpop.f32.mrb[45].mxu1 }
 0x151   :  { %v5927_v14 = vpop.eup %5926  ;;  %4590 = vst [vmem:[%s9064_s3 + $0x280] sm:$0xff] %v5925_v8  ;;  %5946 = vpow2.f32 %v4346_v60  ;;  %v7651_v5 = vpop.f32.mrb[46].mxu0 }
 0x152   :  { %v5929_v48 = vpop.eup %5928  ;;  %1034 = vst [vmem:[%s9064_s3 + $0x98] sm:$0xff] %v5927_v14  ;;  %5948 = vpow2.f32 %v4531_v38  ;;  %v7656_v40 = vpop.f32.mrb[46].mxu1 }
 0x153   :  { %v7658_v51 = vpop.f32.mrb[47].mxu0  ;;  %v5931_v27 = vpop.eup %5930  ;;  %4593 = vst [vmem:[%s9064_s3 + $0x298] sm:$0xff] %v5929_v48  ;;  %5950 = vpow2.f32 %v4351_v9 }
 0x154   :  { %v7663_v34 = vpop.f32.mrb[47].mxu1  ;;  %v5933_v52 = vpop.eup %5932  ;;  %1032 = vst [vmem:[%s9064_s3 + $0x88] sm:$0xff] %v5931_v27  ;;  %5952 = vpow2.f32 %v4536_v41 }
 0x155   :  { %v5935_v37 = vpop.eup %5934  ;;  %v1906_v30 = vadd.f32 1.0, %v5933_v52  ;;  %5954 = vpow2.f32 %v4349_v16  ;;  %v7668_v3 = vpop.f32.mrb[48].mxu0 }
 0x156   :  { %v5937_v57 = vpop.eup %5936  ;;  %v845_v43 = vadd.f32 1.0, %v5935_v37  ;;  %5956 = vpow2.f32 %v4534_v11  ;;  %v7670_v7 = vpop.f32.mrb[48].mxu1 }
 0x157   :  { %v5939_v54 = vpop.eup %5938  ;;  %5958 = vrcp.f32 %v1906_v30  ;;  %v1911_v60 = vadd.f32 1.0, %v5937_v57  ;;  %v7672_v50 = vpop.f32.mrb[49].mxu0 }
 0x158   :  { %v5941_v49 = vpop.eup %5940  ;;  %5960 = vrcp.f32 %v845_v43  ;;  %v843_v38 = vadd.f32 1.0, %v5939_v54  ;;  %v7674_v41 = vpop.f32.mrb[49].mxu1  ;;  %v7687_v54 = vld [vmem:[%s9063_s2] ss:$0 sm:$0xff] }
 0x159   :  { %v5943_v9 = vpop.eup %5942  ;;  %5962 = vrcp.f32 %v1911_v60  ;;  %v1909_v8 = vadd.f32 1.0, %v5941_v49  ;;  %v7676_v14 = vpop.f32.mrb[50].mxu0  ;;  %v484_v60 = vadd.f32 %v7687_v54, %v7454_v17 }
 0x15a   :  { %9065 = vst [vmem:[#allocation2_spill] sm:$0xff] %v7676_v14  ;;  %v5945_v16 = vpop.eup %5944  ;;  %5964 = vrcp.f32 %v843_v38  ;;  %v846_v48 = vadd.f32 1.0, %v5943_v9  ;;  %v7678_v11 = vpop.f32.mrb[50].mxu1  ;;  %v1550_v9 = vadd.f32 %v7687_v54, %v7458_v22  ;;  %v497_v22 = vadd.f32 %v7687_v54, %v7480_v44 }
 0x15b   :  { %9066 = vst [vmem:[#allocation3_spill] sm:$0xff] %v7678_v11  ;;  %v7680_v27 = vpop.f32.mrb[51].mxu0  ;;  %v5947_v52 = vpop.eup %5946  ;;  %5966 = vrcp.f32 %v1909_v8  ;;  %v1912_v37 = vadd.f32 1.0, %v5945_v16 }
 0x15c   :  { %9067 = vst [vmem:[#allocation4_spill] sm:$0xff] %v7680_v27  ;;  %v7682_v30 = vpop.f32.mrb[51].mxu1  ;;  %v5949_v57 = vpop.eup %5948  ;;  %5968 = vrcp.f32 %v846_v48  ;;  %v844_v43 = vadd.f32 1.0, %v5947_v52  ;;  %v476_v48 = vadd.f32 %v7687_v54, %v7460_v23  ;;  %v1542_v27 = vadd.f32 %v7687_v54, %v7464_v28 }
 0x15d   :  { %9068 = vst [vmem:[#allocation5_spill] sm:$0xff] %v7682_v30  ;;  %v5951_v49 = vpop.eup %5950  ;;  %5970 = vrcp.f32 %v1912_v37  ;;  %v1910_v38 = vadd.f32 1.0, %v5949_v57  ;;  %v7697_v11 = vpop.f32.mrb[52].mxu0  ;;  %v4352_v57 = vmul.f32 -1.442695, %v484_v60  ;;  %v1563_v28 = vadd.f32 %v7687_v54, %v7487_v55 }
 0x15e   :  { %v5953_v8 = vpop.eup %5952  ;;  %5972 = vrcp.f32 %v844_v43  ;;  %v849_v16 = vadd.f32 1.0, %v5951_v49  ;;  %9069 = vst [vmem:[#allocation6_spill] sm:$0xff] %v7697_v11  ;;  %v7701_v43 = vpop.f32.mrb[52].mxu1  ;;  %v4350_v44 = vmul.f32 -1.442695, %v476_v48  ;;  %v489_v60 = vadd.f32 %v7687_v54, %v7489_v56 }
 0x15f   :  { %v5955_v52 = vpop.eup %5954  ;;  %5974 = vrcp.f32 %v1910_v38  ;;  %v1915_v30 = vadd.f32 1.0, %v5953_v8  ;;  %v7703_v49 = vpop.f32.mrb[53].mxu0  ;;  %v4537_v8 = vmul.f32 -1.442695, %v1550_v9  ;;  %v4535_v55 = vmul.f32 -1.442695, %v1542_v27 }
 0x160   :  { %v5957_v17 = vpop.eup %5956  ;;  %5976 = vrcp.f32 %v849_v16  ;;  %v847_v37 = vadd.f32 1.0, %v5955_v52  ;;  %v7707_v14 = vpop.f32.mrb[53].mxu1  ;;  %v4355_v56 = vmul.f32 -1.442695, %v497_v22  ;;  %v4540_v27 = vmul.f32 -1.442695, %v1563_v28 }
 0x161   :  { %v5959_v23 = vpop.eup %5958  ;;  %5978 = vrcp.f32 %v1915_v30  ;;  %v1913_v38 = vadd.f32 1.0, %v5957_v17  ;;  %v7709_v11 = vpop.f32.mrb[54].mxu0  ;;  %v1555_v17 = vadd.f32 %v7687_v54, %v7496_v61  ;;  %v1566_v61 = vadd.f32 %v7687_v54, %v7505_v1 }
 0x162   :  { %v5961_v16 = vpop.eup %5960  ;;  %4591 = vst [vmem:[%s9064_s3 + $0x288] sm:$0xff] %v5959_v23  ;;  %5980 = vrcp.f32 %v847_v37  ;;  %v7716_v30 = vpop.f32.mrb[54].mxu1  ;;  %v500_v37 = vadd.f32 %v7687_v54, %v7498_v62  ;;  %v492_v62 = vadd.f32 %v7687_v54, %v7507_v2  ;;  %v1558_v1 = vadd.f32 %v7687_v54, %v7514_v6 }
 0x163   :  { %v7718_v9 = vpop.f32.mrb[55].mxu0  ;;  %v5963_v52 = vpop.eup %5962  ;;  %1037 = vst [vmem:[%s9064_s3 + $0xb0] sm:$0xff] %v5961_v16  ;;  %5982 = vrcp.f32 %v1913_v38  ;;  %v513_v2 = vadd.f32 %v7687_v54, %v7530_v24  ;;  %v4541_v6 = vmul.f32 -1.442695, %v1566_v61 }
 0x164   :  { %9070 = vst [vmem:[#allocation7_spill] sm:$0xff] %v7718_v9  ;;  %v7725_v23 = vpop.f32.mrb[55].mxu1  ;;  %v5965_v48 = vpop.eup %5964  ;;  %4596 = vst [vmem:[%s9064_s3 + $0x2b0] sm:$0xff] %v5963_v52  ;;  %5984 = vpow2.f32 %v4352_v57  ;;  %v4353_v57 = vmul.f32 -1.442695, %v489_v60 }
 0x165   :  { %v5967_v9 = vpop.eup %5966  ;;  %1035 = vst [vmem:[%s9064_s3 + $0xa0] sm:$0xff] %v5965_v48  ;;  %5986 = vpow2.f32 %v4537_v8  ;;  %v4538_v8 = vmul.f32 -1.442695, %v1555_v17  ;;  %v7747_v28 = vpop.f32.mrb[56].mxu0  ;;  %v4354_v24 = vmul.f32 -1.442695, %v492_v62 }
 0x166   :  { %v5969_v38 = vpop.eup %5968  ;;  %4594 = vst [vmem:[%s9064_s3 + $0x2a0] sm:$0xff] %v5967_v9  ;;  %5988 = vpow2.f32 %v4350_v44  ;;  %v4356_v44 = vmul.f32 -1.442695, %v500_v37  ;;  %v7754_v60 = vpop.f32.mrb[56].mxu1 }
 0x167   :  { %v5971_v22 = vpop.eup %5970  ;;  %1038 = vst [vmem:[%s9064_s3 + $0xb8] sm:$0xff] %v5969_v38  ;;  %5990 = vpow2.f32 %v4535_v55  ;;  %v7756_v9 = vpop.f32.mrb[57].mxu0 }
 0x168   :  { %v5973_v16 = vpop.eup %5972  ;;  %4597 = vst [vmem:[%s9064_s3 + $0x2b8] sm:$0xff] %v5971_v22  ;;  %5992 = vpow2.f32 %v4355_v56  ;;  %v7761_v55 = vpop.f32.mrb[57].mxu1 }
 0x169   :  { %v5975_v52 = vpop.eup %5974  ;;  %1036 = vst [vmem:[%s9064_s3 + $0xa8] sm:$0xff] %v5973_v16  ;;  %5994 = vpow2.f32 %v4540_v27  ;;  %v7763_v17 = vpop.f32.mrb[58].mxu0  ;;  %v4539_v27 = vmul.f32 -1.442695, %v1558_v1 }
 0x16a   :  { %v5977_v48 = vpop.eup %5976  ;;  %4595 = vst [vmem:[%s9064_s3 + $0x2a8] sm:$0xff] %v5975_v52  ;;  %5996 = vpow2.f32 %v4353_v57  ;;  %v7768_v56 = vpop.f32.mrb[58].mxu1  ;;  %v4359_v57 = vmul.f32 -1.442695, %v513_v2 }
 0x16b   :  { %v7770_v37 = vpop.f32.mrb[59].mxu0  ;;  %v5979_v38 = vpop.eup %5978  ;;  %1041 = vst [vmem:[%s9064_s3 + $0xd0] sm:$0xff] %v5977_v48  ;;  %5998 = vpow2.f32 %v4538_v8 }
 0x16c   :  { %9071 = vst [vmem:[#allocation8_spill] sm:$0xff] %v7770_v37  ;;  %v7775_v61 = vpop.f32.mrb[59].mxu1  ;;  %v5981_v22 = vpop.eup %5980  ;;  %4600 = vst [vmem:[%s9064_s3 + $0x2d0] sm:$0xff] %v5979_v38  ;;  %6000 = vpow2.f32 %v4356_v44 }
 0x16d   :  { %9072 = vst [vmem:[#allocation9_spill] sm:$0xff] %v7775_v61  ;;  %v5983_v62 = vpop.eup %5982  ;;  %1039 = vst [vmem:[%s9064_s3 + $0xc0] sm:$0xff] %v5981_v22  ;;  %6002 = vpow2.f32 %v4541_v6  ;;  %v7786_v52 = vpop.f32.mrb[60].mxu0 }
 0x16e   :  { %v5985_v16 = vpop.eup %5984  ;;  %4598 = vst [vmem:[%s9064_s3 + $0x2c0] sm:$0xff] %v5983_v62  ;;  %6004 = vpow2.f32 %v4354_v24  ;;  %9073 = vst [vmem:[#allocation10_spill] sm:$0xff] %v7786_v52  ;;  %v7788_v2 = vpop.f32.mrb[60].mxu1 }
 0x16f   :  { %v5987_v8 = vpop.eup %5986  ;;  %v850_v1 = vadd.f32 1.0, %v5985_v16  ;;  %6006 = vpow2.f32 %v4539_v27  ;;  %9074 = vst [vmem:[#allocation11_spill] sm:$0xff] %v7788_v2  ;;  %v7790_v38 = vpop.f32.mrb[61].mxu0 }
 0x170   :  { %v5989_v48 = vpop.eup %5988  ;;  %v1916_v44 = vadd.f32 1.0, %v5987_v8  ;;  %6008 = vpow2.f32 %v4359_v57  ;;  %9075 = vst [vmem:[#allocation12_spill] sm:$0xff] %v7790_v38  ;;  %v7792_v61 = vpop.f32.mrb[61].mxu1 }
 0x171   :  { %v5991_v22 = vpop.eup %5990  ;;  %6010 = vrcp.f32 %v850_v1  ;;  %v848_v6 = vadd.f32 1.0, %v5989_v48  ;;  %9076 = vst [vmem:[#allocation13_spill] sm:$0xff] %v7792_v61  ;;  %v7794_v37 = vpop.f32.mrb[62].mxu0 }
 0x172   :  { %9077 = vst [vmem:[#allocation14_spill] sm:$0xff] %v7794_v37  ;;  %v5993_v24 = vpop.eup %5992  ;;  %6012 = vrcp.f32 %v1916_v44  ;;  %v1914_v62 = vadd.f32 1.0, %v5991_v22  ;;  %v7796_v27 = vpop.f32.mrb[62].mxu1  ;;  %v1579_v44 = vadd.f32 %v7687_v54, %v7535_v29 }
 0x173   :  { %v7798_v16 = vpop.f32.mrb[63].mxu0  ;;  %v5995_v8 = vpop.eup %5994  ;;  %6014 = vrcp.f32 %v848_v6  ;;  %v853_v57 = vadd.f32 1.0, %v5993_v24  ;;  %v505_v6 = vadd.f32 %v7687_v54, %v7537_v31 }
 0x174   :  { %9078 = vst [vmem:[#allocation15_spill] sm:$0xff] %v7798_v16  ;;  %v7800_v2 = vpop.f32.mrb[63].mxu1  ;;  %v5997_v38 = vpop.eup %5996  ;;  %6016 = vrcp.f32 %v1914_v62  ;;  %v1919_v1 = vadd.f32 1.0, %v5995_v8 }
 0x175   :  { %9079 = vst [vmem:[#allocation16_spill] sm:$0xff] %v7800_v2  ;;  %v5999_v48 = vpop.eup %5998  ;;  %6018 = vrcp.f32 %v853_v57  ;;  %v851_v61 = vadd.f32 1.0, %v5997_v38  ;;  %v7806_v24 = vpop.f32.mrb[64].mxu0  ;;  %v1571_v38 = vadd.f32 %v7687_v54, %v7542_v33 }
 0x176   :  { %v6001_v52 = vpop.eup %6000  ;;  %6020 = vrcp.f32 %v1919_v1  ;;  %v1917_v37 = vadd.f32 1.0, %v5999_v48  ;;  %9080 = vst [vmem:[#allocation17_spill] sm:$0xff] %v7806_v24  ;;  %v7810_v8 = vpop.f32.mrb[64].mxu1  ;;  %v4544_v48 = vmul.f32 -1.442695, %v1579_v44 }
 0x177   :  { %v6003_v22 = vpop.eup %6002  ;;  %6022 = vrcp.f32 %v851_v61  ;;  %v854_v16 = vadd.f32 1.0, %v6001_v52  ;;  %9081 = vst [vmem:[#allocation18_spill] sm:$0xff] %v7810_v8  ;;  %v7812_v57 = vpop.f32.mrb[65].mxu0  ;;  %v516_v61 = vadd.f32 %v7687_v54, %v7544_v46  ;;  %v4357_v24 = vmul.f32 -1.442695, %v505_v6 }
 0x178   :  { %v6005_v2 = vpop.eup %6004  ;;  %6024 = vrcp.f32 %v1917_v37  ;;  %v1920_v62 = vadd.f32 1.0, %v6003_v22  ;;  %9082 = vst [vmem:[#allocation19_spill] sm:$0xff] %v7812_v57  ;;  %v1582_v37 = vadd.f32 %v7687_v54, %v7549_v35  ;;  %v508_v57 = vadd.f32 %v7687_v54, %v7551_v36  ;;  %v7820_v8 = vpop.f32.mrb[65].mxu1 }
 0x179   :  { %v6007_v1 = vpop.eup %6006  ;;  %6026 = vrcp.f32 %v854_v16  ;;  %v852_v29 = vadd.f32 1.0, %v6005_v2  ;;  %v4542_v46 = vmul.f32 -1.442695, %v1571_v38  ;;  %v1574_v16 = vadd.f32 %v7687_v54, %v7553_v39  ;;  %v7832_v6 = vpop.f32.mrb[66].mxu0 }
 0x17a   :  { %v6009_v52 = vpop.eup %6008  ;;  %6028 = vrcp.f32 %v1920_v62  ;;  %v1918_v31 = vadd.f32 1.0, %v6007_v1  ;;  %v4360_v44 = vmul.f32 -1.442695, %v516_v61  ;;  %v529_v36 = vadd.f32 %v7687_v54, %v7555_v59  ;;  %v7834_v62 = vpop.f32.mrb[66].mxu1 }
 0x17b   :  { %v6011_v22 = vpop.eup %6010  ;;  %6030 = vrcp.f32 %v852_v29  ;;  %v857_v33 = vadd.f32 1.0, %v6009_v52  ;;  %v4545_v39 = vmul.f32 -1.442695, %v1582_v37  ;;  %v1595_v38 = vadd.f32 %v7687_v54, %v7557_v0  ;;  %v7846_v52 = vpop.f32.mrb[67].mxu0 }
 0x17c   :  { %v6013_v2 = vpop.eup %6012  ;;  %1042 = vst [vmem:[%s9064_s3 + $0xd8] sm:$0xff] %v6011_v22  ;;  %6032 = vrcp.f32 %v1918_v31  ;;  %v4358_v59 = vmul.f32 -1.442695, %v508_v57  ;;  %v521_v61 = vadd.f32 %v7687_v54, %v7559_v4  ;;  %v7848_v31 = vpop.f32.mrb[67].mxu1  ;;  %v4543_v0 = vmul.f32 -1.442695, %v1574_v16 }
 0x17d   :  { %v6015_v35 = vpop.eup %6014  ;;  %4601 = vst [vmem:[%s9064_s3 + $0x2d8] sm:$0xff] %v6013_v2  ;;  %6034 = vrcp.f32 %v857_v33  ;;  %v4363_v4 = vmul.f32 -1.442695, %v529_v36  ;;  %v4548_v33 = vmul.f32 -1.442695, %v1595_v38 }
 0x17e   :  { %v6017_v1 = vpop.eup %6016  ;;  %1040 = vst [vmem:[%s9064_s3 + $0xc8] sm:$0xff] %v6015_v35  ;;  %6036 = vpow2.f32 %v4544_v48  ;;  %v1587_v48 = vadd.f32 %v7687_v54, %v7561_v10  ;;  %v1598_v10 = vadd.f32 %v7687_v54, %v7567_v26  ;;  %v7876_v36 = vpop.f32.mrb[68].mxu1 }
 0x17f   :  { %v6019_v29 = vpop.eup %6018  ;;  %4599 = vst [vmem:[%s9064_s3 + $0x2c8] sm:$0xff] %v6017_v1  ;;  %6038 = vpow2.f32 %v4357_v24  ;;  %v532_v24 = vadd.f32 %v7687_v54, %v7563_v21 }
 0x180   :  { %v6021_v22 = vpop.eup %6020  ;;  %1045 = vst [vmem:[%s9064_s3 + $0xf0] sm:$0xff] %v6019_v29  ;;  %6040 = vpow2.f32 %v4542_v46  ;;  %v4361_v46 = vmul.f32 -1.442695, %v521_v61  ;;  %v4546_v21 = vmul.f32 -1.442695, %v1587_v48  ;;  %v7883_v29 = vpop.f32.mrb[69].mxu1 }
 0x181   :  { %v6023_v37 = vpop.eup %6022  ;;  %4604 = vst [vmem:[%s9064_s3 + $0x2f0] sm:$0xff] %v6021_v22  ;;  %6042 = vpow2.f32 %v4360_v44  ;;  %v4364_v26 = vmul.f32 -1.442695, %v532_v24  ;;  %v7874_v44 = vpop.f32.mrb[68].mxu0 }
 0x182   :  { %v6025_v57 = vpop.eup %6024  ;;  %1043 = vst [vmem:[%s9064_s3 + $0xe0] sm:$0xff] %v6023_v37  ;;  %6044 = vpow2.f32 %v4545_v39  ;;  %v4549_v39 = vmul.f32 -1.442695, %v1598_v10  ;;  %v7881_v38 = vpop.f32.mrb[69].mxu0 }
 0x183   :  { %v6027_v2 = vpop.eup %6026  ;;  %4602 = vst [vmem:[%s9064_s3 + $0x2e0] sm:$0xff] %v6025_v57  ;;  %6046 = vpow2.f32 %v4358_v59  ;;  %v7888_v61 = vpop.f32.mrb[70].mxu0 }
 0x184   :  { %v6029_v16 = vpop.eup %6028  ;;  %1046 = vst [vmem:[%s9064_s3 + $0xf8] sm:$0xff] %v6027_v2  ;;  %6048 = vpow2.f32 %v4543_v0  ;;  %v7890_v22 = vpop.f32.mrb[70].mxu1 }
 0x185   :  { %v6031_v35 = vpop.eup %6030  ;;  %4605 = vst [vmem:[%s9064_s3 + $0x2f8] sm:$0xff] %v6029_v16  ;;  %6050 = vpow2.f32 %v4363_v4  ;;  %v7895_v48 = vpop.f32.mrb[71].mxu0 }
 0x186   :  { %v6033_v1 = vpop.eup %6032  ;;  %1044 = vst [vmem:[%s9064_s3 + $0xe8] sm:$0xff] %v6031_v35  ;;  %6052 = vpow2.f32 %v4548_v33  ;;  %9083 = vst [vmem:[#allocation20_spill] sm:$0xff] %v7895_v48  ;;  %v7897_v37 = vpop.f32.mrb[71].mxu1 }
 0x187   :  { %v6035_v59 = vpop.eup %6034  ;;  %4603 = vst [vmem:[%s9064_s3 + $0x2e8] sm:$0xff] %v6033_v1  ;;  %6054 = vpow2.f32 %v4361_v46  ;;  %9084 = vst [vmem:[#allocation21_spill] sm:$0xff] %v7897_v37 }
 0x188   :  { %v6037_v0 = vpop.eup %6036  ;;  %1049 = vst [vmem:[%s9064_s3 + $0x110] sm:$0xff] %v6035_v59  ;;  %6056 = vpow2.f32 %v4546_v21 }
 0x189   :  { %v6039_v4 = vpop.eup %6038  ;;  %v1923_v24 = vadd.f32 1.0, %v6037_v0  ;;  %6058 = vpow2.f32 %v4364_v26 }
 0x18a   :  { %v6041_v57 = vpop.eup %6040  ;;  %v855_v33 = vadd.f32 1.0, %v6039_v4  ;;  %6060 = vpow2.f32 %v4549_v39  ;;  %v524_v39 = vadd.f32 %v7687_v54, %v7569_v19 }
 0x18b   :  { %v6043_v10 = vpop.eup %6042  ;;  %6062 = vrcp.f32 %v1923_v24  ;;  %v1921_v2 = vadd.f32 1.0, %v6041_v57  ;;  %v1590_v57 = vadd.f32 %v7687_v54, %v7573_v45 }
 0x18c   :  { %v6045_v46 = vpop.eup %6044  ;;  %6064 = vrcp.f32 %v855_v33  ;;  %v858_v16 = vadd.f32 1.0, %v6043_v10 }
 0x18d   :  { %v6047_v35 = vpop.eup %6046  ;;  %6066 = vrcp.f32 %v1921_v2  ;;  %v1924_v1 = vadd.f32 1.0, %v6045_v46  ;;  %v545_v2 = vadd.f32 %v7687_v54, %v7583_v13  ;;  %v1603_v13 = vadd.f32 %v7687_v54, %v7599_v12 }
 0x18e   :  { %v6049_v21 = vpop.eup %6048  ;;  %6068 = vrcp.f32 %v858_v16  ;;  %v856_v59 = vadd.f32 1.0, %v6047_v35  ;;  %v1614_v12 = vadd.f32 %v7687_v54, %v7608_v25  ;;  %v1606_v25 = vadd.f32 %v7687_v54, %v7617_v53 }
 0x18f   :  { %v6051_v48 = vpop.eup %6050  ;;  %6070 = vrcp.f32 %v1924_v1  ;;  %v1922_v37 = vadd.f32 1.0, %v6049_v21  ;;  %v537_v1 = vadd.f32 %v7687_v54, %v7592_v20 }
 0x190   :  { %v6053_v0 = vpop.eup %6052  ;;  %6072 = vrcp.f32 %v856_v59  ;;  %v861_v26 = vadd.f32 1.0, %v6051_v48  ;;  %v1611_v48 = vadd.f32 %v7687_v54, %v7590_v47  ;;  %v4547_v59 = vmul.f32 -1.442695, %v1590_v57 }
 0x191   :  { %v6055_v4 = vpop.eup %6054  ;;  %6074 = vrcp.f32 %v1922_v37  ;;  %v1927_v24 = vadd.f32 1.0, %v6053_v0  ;;  %v4362_v37 = vmul.f32 -1.442695, %v524_v39  ;;  %v4367_v47 = vmul.f32 -1.442695, %v545_v2 }
 0x192   :  { %v6057_v33 = vpop.eup %6056  ;;  %6076 = vrcp.f32 %v861_v26  ;;  %v859_v10 = vadd.f32 1.0, %v6055_v4  ;;  %v548_v26 = vadd.f32 %v7687_v54, %v7601_v18  ;;  %v4552_v20 = vmul.f32 -1.442695, %v1611_v48 }
 0x193   :  { %v6059_v46 = vpop.eup %6058  ;;  %6078 = vrcp.f32 %v1927_v24  ;;  %v1925_v16 = vadd.f32 1.0, %v6057_v33  ;;  %v4365_v24 = vmul.f32 -1.442695, %v537_v1  ;;  %v540_v18 = vadd.f32 %v7687_v54, %v7610_v32 }
 0x194   :  { %v6061_v35 = vpop.eup %6060  ;;  %6080 = vrcp.f32 %v859_v10  ;;  %v862_v19 = vadd.f32 1.0, %v6059_v46  ;;  %v4550_v33 = vmul.f32 -1.442695, %v1603_v13  ;;  %v4368_v2 = vmul.f32 -1.442695, %v548_v26  ;;  %v7936_v46 = vpop.f32.mrb[72].mxu0 }
 0x195   :  { %v6063_v45 = vpop.eup %6062  ;;  %6082 = vrcp.f32 %v1925_v16  ;;  %v1928_v21 = vadd.f32 1.0, %v6061_v35  ;;  %v561_v32 = vadd.f32 %v7687_v54, %v7637_v58  ;;  %v7938_v16 = vpop.f32.mrb[72].mxu1  ;;  %v4553_v53 = vmul.f32 -1.442695, %v1614_v12 }
 0x196   :  { %v6065_v0 = vpop.eup %6064  ;;  %4608 = vst [vmem:[%s9064_s3 + $0x310] sm:$0xff] %v6063_v45  ;;  %6084 = vrcp.f32 %v862_v19  ;;  %v1627_v35 = vadd.f32 %v7687_v54, %v7642_v63  ;;  %v7945_v19 = vpop.f32.mrb[73].mxu0  ;;  %v4366_v58 = vmul.f32 -1.442695, %v540_v18  ;;  %v553_v45 = vadd.f32 %v7687_v54, %v7644_v42 }
 0x197   :  { %v6067_v39 = vpop.eup %6066  ;;  %1047 = vst [vmem:[%s9064_s3 + $0x100] sm:$0xff] %v6065_v0  ;;  %6086 = vrcp.f32 %v1928_v21  ;;  %v7954_v21 = vpop.f32.mrb[74].mxu0  ;;  %v4551_v63 = vmul.f32 -1.442695, %v1606_v25  ;;  %v4371_v42 = vmul.f32 -1.442695, %v561_v32 }
 0x198   :  { %v6069_v4 = vpop.eup %6068  ;;  %4606 = vst [vmem:[%s9064_s3 + $0x300] sm:$0xff] %v6067_v39  ;;  %6088 = vpow2.f32 %v4362_v37  ;;  %v7947_v37 = vpop.f32.mrb[73].mxu1 }
 0x199   :  { %v6071_v57 = vpop.eup %6070  ;;  %1050 = vst [vmem:[%s9064_s3 + $0x118] sm:$0xff] %v6069_v4  ;;  %6090 = vpow2.f32 %v4547_v59  ;;  %v7956_v59 = vpop.f32.mrb[74].mxu1  ;;  %v4369_v4 = vmul.f32 -1.442695, %v553_v45 }
 0x19a   :  { %v6073_v10 = vpop.eup %6072  ;;  %4609 = vst [vmem:[%s9064_s3 + $0x318] sm:$0xff] %v6071_v57  ;;  %6092 = vpow2.f32 %v4367_v47  ;;  %v7961_v0 = vpop.f32.mrb[75].mxu0 }
 0x19b   :  { %v6075_v48 = vpop.eup %6074  ;;  %1048 = vst [vmem:[%s9064_s3 + $0x108] sm:$0xff] %v6073_v10  ;;  %6094 = vpow2.f32 %v4552_v20  ;;  %v7963_v47 = vpop.f32.mrb[75].mxu1  ;;  %v4556_v20 = vmul.f32 -1.442695, %v1627_v35 }
 0x19c   :  { %v6077_v1 = vpop.eup %6076  ;;  %4607 = vst [vmem:[%s9064_s3 + $0x308] sm:$0xff] %v6075_v48  ;;  %6096 = vpow2.f32 %v4365_v24  ;;  %v7980_v57 = vpop.f32.mrb[76].mxu0 }
 0x19d   :  { %v6079_v13 = vpop.eup %6078  ;;  %1053 = vst [vmem:[%s9064_s3 + $0x130] sm:$0xff] %v6077_v1  ;;  %6098 = vpow2.f32 %v4550_v33  ;;  %v7982_v33 = vpop.f32.mrb[76].mxu1 }
 0x19e   :  { %v6081_v26 = vpop.eup %6080  ;;  %4612 = vst [vmem:[%s9064_s3 + $0x330] sm:$0xff] %v6079_v13  ;;  %6100 = vpow2.f32 %v4368_v2  ;;  %v7984_v2 = vpop.f32.mrb[77].mxu0 }
 0x19f   :  { %v6083_v39 = vpop.eup %6082  ;;  %1051 = vst [vmem:[%s9064_s3 + $0x120] sm:$0xff] %v6081_v26  ;;  %6102 = vpow2.f32 %v4553_v53  ;;  %v7986_v32 = vpop.f32.mrb[77].mxu1 }
 0x1a0   :  { %v6085_v12 = vpop.eup %6084  ;;  %4610 = vst [vmem:[%s9064_s3 + $0x320] sm:$0xff] %v6083_v39  ;;  %6104 = vpow2.f32 %v4366_v58  ;;  %v7988_v35 = vpop.f32.mrb[78].mxu0 }
 0x1a1   :  { %v6087_v24 = vpop.eup %6086  ;;  %1054 = vst [vmem:[%s9064_s3 + $0x138] sm:$0xff] %v6085_v12  ;;  %6106 = vpow2.f32 %v4551_v63 }
 0x1a2   :  { %v6089_v18 = vpop.eup %6088  ;;  %4613 = vst [vmem:[%s9064_s3 + $0x338] sm:$0xff] %v6087_v24  ;;  %6108 = vpow2.f32 %v4371_v42 }
 0x1a3   :  { %v6091_v25 = vpop.eup %6090  ;;  %v860_v10 = vadd.f32 1.0, %v6089_v18  ;;  %6110 = vpow2.f32 %v4556_v20  ;;  %v1619_v18 = vadd.f32 %v7687_v54, %v7649_v15 }
 0x1a4   :  { %v6093_v48 = vpop.eup %6092  ;;  %v1926_v53 = vadd.f32 1.0, %v6091_v25  ;;  %6112 = vpow2.f32 %v4369_v4 }
 0x1a5   :  { %v6095_v1 = vpop.eup %6094  ;;  %6114 = vrcp.f32 %v860_v10  ;;  %v865_v58 = vadd.f32 1.0, %v6093_v48  ;;  %v564_v48 = vadd.f32 %v7687_v54, %v7651_v5 }
 0x1a6   :  { %v6097_v45 = vpop.eup %6096  ;;  %6116 = vrcp.f32 %v1926_v53  ;;  %v1931_v13 = vadd.f32 1.0, %v6095_v1 }
 0x1a7   :  { %v6099_v63 = vpop.eup %6098  ;;  %6118 = vrcp.f32 %v865_v58  ;;  %v863_v26 = vadd.f32 1.0, %v6097_v45  ;;  %v1630_v58 = vadd.f32 %v7687_v54, %v7656_v40  ;;  %v577_v40 = vadd.f32 %v7687_v54, %v7668_v3 }
 0x1a8   :  { %v6101_v42 = vpop.eup %6100  ;;  %6120 = vrcp.f32 %v1931_v13  ;;  %v1929_v39 = vadd.f32 1.0, %v6099_v63  ;;  %v556_v63 = vadd.f32 %v7687_v54, %v7658_v51  ;;  %v569_v3 = vadd.f32 %v7687_v54, %v7672_v50 }
 0x1a9   :  { %v6103_v20 = vpop.eup %6102  ;;  %6122 = vrcp.f32 %v863_v26  ;;  %v866_v12 = vadd.f32 1.0, %v6101_v42  ;;  %v4554_v42 = vmul.f32 -1.442695, %v1619_v18  ;;  %v4557_v51 = vmul.f32 -1.442695, %v1630_v58 }
 0x1aa   :  { %v6105_v24 = vpop.eup %6104  ;;  %6124 = vrcp.f32 %v1929_v39  ;;  %v1932_v4 = vadd.f32 1.0, %v6103_v20  ;;  %v1622_v39 = vadd.f32 %v7687_v54, %v7663_v34  ;;  %v1643_v18 = vadd.f32 %v7687_v54, %v7670_v7 }
 0x1ab   :  { %v6107_v25 = vpop.eup %6106  ;;  %6126 = vrcp.f32 %v866_v12  ;;  %v864_v10 = vadd.f32 1.0, %v6105_v24  ;;  %v4372_v12 = vmul.f32 -1.442695, %v564_v48  ;;  %v8002_v24 = vpop.f32.mrb[78].mxu1  ;;  %v4375_v50 = vmul.f32 -1.442695, %v577_v40 }
 0x1ac   :  { %v6109_v53 = vpop.eup %6108  ;;  %6128 = vrcp.f32 %v1932_v4  ;;  %v1930_v1 = vadd.f32 1.0, %v6107_v25  ;;  %v4370_v25 = vmul.f32 -1.442695, %v556_v63  ;;  %v8016_v48 = vpop.f32.mrb[79].mxu1  ;;  %v4555_v7 = vmul.f32 -1.442695, %v1622_v39 }
 0x1ad   :  { %v6111_v45 = vpop.eup %6110  ;;  %6130 = vrcp.f32 %v864_v10  ;;  %v869_v13 = vadd.f32 1.0, %v6109_v53  ;;  %v8014_v10 = vpop.f32.mrb[79].mxu0  ;;  %v4373_v39 = vmul.f32 -1.442695, %v569_v3 }
 0x1ae   :  { %v6113_v26 = vpop.eup %6112  ;;  %6132 = vrcp.f32 %v1930_v1  ;;  %v1935_v15 = vadd.f32 1.0, %v6111_v45  ;;  %v1635_v1 = vadd.f32 %v7687_v54, %v7674_v41  ;;  %v9085_v45 = vld [vmem:[#allocation2_spill] sm:$0xff]  ;;  %v8048_v3 = vpop.f32.mrb[80].mxu1 }
 0x1af   :  { %v6115_v5 = vpop.eup %6114  ;;  %6134 = vrcp.f32 %v869_v13  ;;  %v867_v20 = vadd.f32 1.0, %v6113_v26  ;;  %v580_v13 = vadd.f32 %v7687_v54, %v9085_v45  ;;  %v4560_v26 = vmul.f32 -1.442695, %v1643_v18 }
 0x1b0   :  { %v6117_v4 = vpop.eup %6116  ;;  %1052 = vst [vmem:[%s9064_s3 + $0x128] sm:$0xff] %v6115_v5  ;;  %6136 = vrcp.f32 %v1935_v15  ;;  %v9086_v15 = vld [vmem:[#allocation3_spill] sm:$0xff]  ;;  %v9087_v5 = vld [vmem:[#allocation4_spill] sm:$0xff]  ;;  %v4558_v40 = vmul.f32 -1.442695, %v1635_v1 }
 0x1b1   :  { %v6119_v34 = vpop.eup %6118  ;;  %4611 = vst [vmem:[%s9064_s3 + $0x328] sm:$0xff] %v6117_v4  ;;  %6138 = vrcp.f32 %v867_v20  ;;  %v1646_v41 = vadd.f32 %v7687_v54, %v9086_v15  ;;  %v572_v20 = vadd.f32 %v7687_v54, %v9087_v5  ;;  %v9088_v4 = vld [vmem:[#allocation5_spill] sm:$0xff] }
 0x1b2   :  { %v6121_v53 = vpop.eup %6120  ;;  %1057 = vst [vmem:[%s9064_s3 + $0x150] sm:$0xff] %v6119_v34  ;;  %6140 = vpow2.f32 %v4554_v42  ;;  %v4376_v34 = vmul.f32 -1.442695, %v580_v13 }
 0x1b3   :  { %v6123_v58 = vpop.eup %6122  ;;  %4616 = vst [vmem:[%s9064_s3 + $0x350] sm:$0xff] %v6121_v53  ;;  %6142 = vpow2.f32 %v4372_v12 }
 0x1b4   :  { %v6125_v63 = vpop.eup %6124  ;;  %1055 = vst [vmem:[%s9064_s3 + $0x140] sm:$0xff] %v6123_v58  ;;  %6144 = vpow2.f32 %v4557_v51  ;;  %v1638_v51 = vadd.f32 %v7687_v54, %v9088_v4  ;;  %v8055_v58 = vpop.f32.mrb[81].mxu1 }
 0x1b5   :  { %v6127_v42 = vpop.eup %6126  ;;  %4614 = vst [vmem:[%s9064_s3 + $0x340] sm:$0xff] %v6125_v63  ;;  %6146 = vpow2.f32 %v4370_v25  ;;  %v8046_v25 = vpop.f32.mrb[80].mxu0 }
 0x1b6   :  { %v6129_v12 = vpop.eup %6128  ;;  %1058 = vst [vmem:[%s9064_s3 + $0x158] sm:$0xff] %v6127_v42  ;;  %6148 = vpow2.f32 %v4555_v7  ;;  %v4561_v7 = vmul.f32 -1.442695, %v1646_v41  ;;  %v8053_v1 = vpop.f32.mrb[81].mxu0 }
 0x1b7   :  { %v6131_v18 = vpop.eup %6130  ;;  %4617 = vst [vmem:[%s9064_s3 + $0x358] sm:$0xff] %v6129_v12  ;;  %6150 = vpow2.f32 %v4375_v50  ;;  %v4374_v50 = vmul.f32 -1.442695, %v572_v20  ;;  %v8060_v13 = vpop.f32.mrb[82].mxu0 }
 0x1b8   :  { %v6133_v53 = vpop.eup %6132  ;;  %1056 = vst [vmem:[%s9064_s3 + $0x148] sm:$0xff] %v6131_v18  ;;  %6152 = vpow2.f32 %v4560_v26  ;;  %v8062_v63 = vpop.f32.mrb[82].mxu1  ;;  %v4559_v26 = vmul.f32 -1.442695, %v1638_v51 }
 0x1b9   :  { %v6135_v45 = vpop.eup %6134  ;;  %4615 = vst [vmem:[%s9064_s3 + $0x348] sm:$0xff] %v6133_v53  ;;  %6154 = vpow2.f32 %v4373_v39  ;;  %v8067_v41 = vpop.f32.mrb[83].mxu0 }
 0x1ba   :  { %v6137_v15 = vpop.eup %6136  ;;  %1061 = vst [vmem:[%s9064_s3 + $0x170] sm:$0xff] %v6135_v45  ;;  %6156 = vpow2.f32 %v4558_v40  ;;  %9089 = vst [vmem:[#allocation2_spill] sm:$0xff] %v8067_v41  ;;  %v8069_v42 = vpop.f32.mrb[83].mxu1 }
 0x1bb   :  { %9090 = vst [vmem:[#allocation3_spill] sm:$0xff] %v8069_v42  ;;  %v6139_v5 = vpop.eup %6138  ;;  %4620 = vst [vmem:[%s9064_s3 + $0x370] sm:$0xff] %v6137_v15  ;;  %6158 = vpow2.f32 %v4376_v34  ;;  %v8077_v53 = vpop.f32.mrb[84].mxu0 }
 0x1bc   :  { %v6141_v39 = vpop.eup %6140  ;;  %1059 = vst [vmem:[%s9064_s3 + $0x160] sm:$0xff] %v6139_v5  ;;  %6160 = vpow2.f32 %v4561_v7  ;;  %9091 = vst [vmem:[#allocation4_spill] sm:$0xff] %v8077_v53  ;;  %v8079_v45 = vpop.f32.mrb[84].mxu1 }
 0x1bd   :  { %v6143_v20 = vpop.eup %6142  ;;  %v1933_v12 = vadd.f32 1.0, %v6141_v39  ;;  %6162 = vpow2.f32 %v4374_v50  ;;  %9092 = vst [vmem:[#allocation5_spill] sm:$0xff] %v8079_v45 }
 0x1be   :  { %v6145_v40 = vpop.eup %6144  ;;  %v870_v4 = vadd.f32 1.0, %v6143_v20  ;;  %6164 = vpow2.f32 %v4559_v26 }
 0x1bf   :  { %v6147_v51 = vpop.eup %6146  ;;  %6166 = vrcp.f32 %v1933_v12  ;;  %v1936_v18 = vadd.f32 1.0, %v6145_v40  ;;  %v9093_v40 = vld [vmem:[#allocation6_spill] sm:$0xff] }
 0x1c0   :  { %v6149_v34 = vpop.eup %6148  ;;  %6168 = vrcp.f32 %v870_v4  ;;  %v868_v15 = vadd.f32 1.0, %v6147_v51  ;;  %v593_v53 = vadd.f32 %v7687_v54, %v9093_v40  ;;  %v1659_v4 = vadd.f32 %v7687_v54, %v7701_v43  ;;  %v8098_v40 = vpop.f32.mrb[85].mxu0 }
 0x1c1   :  { %v6151_v42 = vpop.eup %6150  ;;  %6170 = vrcp.f32 %v1936_v18  ;;  %v1934_v5 = vadd.f32 1.0, %v6149_v34 }
 0x1c2   :  { %v6153_v7 = vpop.eup %6152  ;;  %6172 = vrcp.f32 %v868_v15  ;;  %v873_v39 = vadd.f32 1.0, %v6151_v42  ;;  %v585_v42 = vadd.f32 %v7687_v54, %v7703_v49  ;;  %v1662_v49 = vadd.f32 %v7687_v54, %v7716_v30 }
 0x1c3   :  { %v6155_v50 = vpop.eup %6154  ;;  %6174 = vrcp.f32 %v1934_v5  ;;  %v1939_v20 = vadd.f32 1.0, %v6153_v7  ;;  %v1651_v5 = vadd.f32 %v7687_v54, %v7707_v14 }
 0x1c4   :  { %v6157_v26 = vpop.eup %6156  ;;  %6176 = vrcp.f32 %v873_v39  ;;  %v871_v12 = vadd.f32 1.0, %v6155_v50  ;;  %v4379_v50 = vmul.f32 -1.442695, %v593_v53  ;;  %v4377_v14 = vmul.f32 -1.442695, %v585_v42 }
 0x1c5   :  { %v6159_v41 = vpop.eup %6158  ;;  %6178 = vrcp.f32 %v1939_v20  ;;  %v1937_v45 = vadd.f32 1.0, %v6157_v26  ;;  %v596_v20 = vadd.f32 %v7687_v54, %v7709_v11  ;;  %v8100_v11 = vpop.f32.mrb[85].mxu1  ;;  %v4562_v30 = vmul.f32 -1.442695, %v1651_v5 }
 0x1c6   :  { %v6161_v51 = vpop.eup %6160  ;;  %6180 = vrcp.f32 %v871_v12  ;;  %v874_v18 = vadd.f32 1.0, %v6159_v41  ;;  %v4564_v41 = vmul.f32 -1.442695, %v1659_v4  ;;  %v8108_v4 = vld [vmem:[%s9063_s2] ss:$0 sm:$0xff]  ;;  %v8119_v5 = vpop.f32.mrb[86].mxu1 }
 0x1c7   :  { %v6163_v34 = vpop.eup %6162  ;;  %6182 = vrcp.f32 %v1937_v45  ;;  %v1940_v15 = vadd.f32 1.0, %v6161_v51  ;;  %v9094_v45 = vld [vmem:[#allocation7_spill] sm:$0xff]  ;;  %v4380_v42 = vmul.f32 -1.442695, %v596_v20 }
 0x1c8   :  { %v6165_v7 = vpop.eup %6164  ;;  %6184 = vrcp.f32 %v874_v18  ;;  %v872_v39 = vadd.f32 1.0, %v6163_v34  ;;  %v588_v53 = vadd.f32 %v7687_v54, %v9094_v45  ;;  %v1654_v18 = vadd.f32 %v8108_v4, %v7725_v23 }
 0x1c9   :  { %v6167_v43 = vpop.eup %6166  ;;  %6186 = vrcp.f32 %v1940_v15  ;;  %v1938_v26 = vadd.f32 1.0, %v6165_v7  ;;  %v609_v34 = vadd.f32 %v8108_v4, %v7747_v28  ;;  %v8117_v15 = vpop.f32.mrb[86].mxu0  ;;  %v4565_v23 = vmul.f32 -1.442695, %v1662_v49 }
 0x1ca   :  { %v6169_v12 = vpop.eup %6168  ;;  %4618 = vst [vmem:[%s9064_s3 + $0x360] sm:$0xff] %v6167_v43  ;;  %6188 = vrcp.f32 %v872_v39  ;;  %v1675_v39 = vadd.f32 %v8108_v4, %v7754_v60  ;;  %v4378_v28 = vmul.f32 -1.442695, %v588_v53  ;;  %v8131_v20 = vpop.f32.mrb[87].mxu0  ;;  %v4563_v60 = vmul.f32 -1.442695, %v1654_v18 }
 0x1cb   :  { %v6171_v51 = vpop.eup %6170  ;;  %1062 = vst [vmem:[%s9064_s3 + $0x178] sm:$0xff] %v6169_v12  ;;  %6190 = vrcp.f32 %v1938_v26  ;;  %v8133_v26 = vpop.f32.mrb[87].mxu1 }
 0x1cc   :  { %v6173_v54 = vpop.eup %6172  ;;  %4621 = vst [vmem:[%s9064_s3 + $0x378] sm:$0xff] %v6171_v51  ;;  %6192 = vpow2.f32 %v4379_v50  ;;  %v601_v50 = vadd.f32 %v8108_v4, %v7756_v9  ;;  %v4383_v9 = vmul.f32 -1.442695, %v609_v34  ;;  %v4568_v53 = vmul.f32 -1.442695, %v1675_v39  ;;  %v8159_v34 = vpop.f32.mrb[88].mxu1 }
 0x1cd   :  { %v6175_v7 = vpop.eup %6174  ;;  %1060 = vst [vmem:[%s9064_s3 + $0x168] sm:$0xff] %v6173_v54  ;;  %6194 = vpow2.f32 %v4564_v41  ;;  %v1667_v41 = vadd.f32 %v8108_v4, %v7761_v55  ;;  %v8166_v39 = vpop.f32.mrb[89].mxu1 }
 0x1ce   :  { %v6177_v43 = vpop.eup %6176  ;;  %4619 = vst [vmem:[%s9064_s3 + $0x368] sm:$0xff] %v6175_v7  ;;  %6196 = vpow2.f32 %v4377_v14  ;;  %v612_v14 = vadd.f32 %v8108_v4, %v7763_v17  ;;  %v4381_v55 = vmul.f32 -1.442695, %v601_v50  ;;  %9096 = vst [vmem:[#allocation7_spill] sm:$0xff] %v8166_v39  ;;  %v8173_v50 = vpop.f32.mrb[90].mxu1  ;;  %v9104_v39 = vld [vmem:[#allocation12_spill] sm:$0xff] }
 0x1cf   :  { %v6179_v12 = vpop.eup %6178  ;;  %1065 = vst [vmem:[%s9064_s3 + $0x190] sm:$0xff] %v6177_v43  ;;  %6198 = vpow2.f32 %v4562_v30  ;;  %v4566_v17 = vmul.f32 -1.442695, %v1667_v41  ;;  %9098 = vst [vmem:[#allocation23_spill] sm:$0xff] %v8173_v50 }
 0x1d0   :  { %v6181_v49 = vpop.eup %6180  ;;  %4624 = vst [vmem:[%s9064_s3 + $0x390] sm:$0xff] %v6179_v12  ;;  %6200 = vpow2.f32 %v4380_v42  ;;  %v4384_v54 = vmul.f32 -1.442695, %v612_v14  ;;  %v8157_v42 = vpop.f32.mrb[88].mxu0 }
 0x1d1   :  { %v6183_v45 = vpop.eup %6182  ;;  %1063 = vst [vmem:[%s9064_s3 + $0x180] sm:$0xff] %v6181_v49  ;;  %6202 = vpow2.f32 %v4565_v23  ;;  %v8164_v23 = vpop.f32.mrb[89].mxu0 }
 0x1d2   :  { %v6185_v51 = vpop.eup %6184  ;;  %4622 = vst [vmem:[%s9064_s3 + $0x380] sm:$0xff] %v6183_v45  ;;  %6204 = vpow2.f32 %v4378_v28  ;;  %9095 = vst [vmem:[#allocation6_spill] sm:$0xff] %v8164_v23  ;;  %v8171_v28 = vpop.f32.mrb[90].mxu0 }
 0x1d3   :  { %v6187_v30 = vpop.eup %6186  ;;  %1066 = vst [vmem:[%s9064_s3 + $0x198] sm:$0xff] %v6185_v51  ;;  %6206 = vpow2.f32 %v4563_v60  ;;  %9097 = vst [vmem:[#allocation22_spill] sm:$0xff] %v8171_v28  ;;  %v8175_v41 = vpop.f32.mrb[91].mxu0 }
 0x1d4   :  { %v6189_v18 = vpop.eup %6188  ;;  %4625 = vst [vmem:[%s9064_s3 + $0x398] sm:$0xff] %v6187_v30  ;;  %6208 = vpow2.f32 %v4383_v9  ;;  %9099 = vst [vmem:[#allocation24_spill] sm:$0xff] %v8175_v41  ;;  %v8189_v23 = vpop.f32.mrb[91].mxu1 }
 0x1d5   :  { %v6191_v7 = vpop.eup %6190  ;;  %1064 = vst [vmem:[%s9064_s3 + $0x188] sm:$0xff] %v6189_v18  ;;  %6210 = vpow2.f32 %v4568_v53 }
 0x1d6   :  { %v6193_v43 = vpop.eup %6192  ;;  %4623 = vst [vmem:[%s9064_s3 + $0x388] sm:$0xff] %v6191_v7  ;;  %6212 = vpow2.f32 %v4381_v55 }
 0x1d7   :  { %v6195_v12 = vpop.eup %6194  ;;  %v877_v60 = vadd.f32 1.0, %v6193_v43  ;;  %6214 = vpow2.f32 %v4566_v17 }
 0x1d8   :  { %v6197_v49 = vpop.eup %6196  ;;  %v1943_v9 = vadd.f32 1.0, %v6195_v12  ;;  %6216 = vpow2.f32 %v4384_v54  ;;  %v1678_v54 = vadd.f32 %v8108_v4, %v7768_v56 }
 0x1d9   :  { %v6199_v14 = vpop.eup %6198  ;;  %6218 = vrcp.f32 %v877_v60  ;;  %v875_v45 = vadd.f32 1.0, %v6197_v49  ;;  %v9100_v49 = vld [vmem:[#allocation8_spill] sm:$0xff] }
 0x1da   :  { %v6201_v53 = vpop.eup %6200  ;;  %6220 = vrcp.f32 %v1943_v9  ;;  %v1941_v51 = vadd.f32 1.0, %v6199_v14  ;;  %v604_v9 = vadd.f32 %v8108_v4, %v9100_v49 }
 0x1db   :  { %v6203_v30 = vpop.eup %6202  ;;  %6222 = vrcp.f32 %v875_v45  ;;  %v878_v55 = vadd.f32 1.0, %v6201_v53  ;;  %v9101_v53 = vld [vmem:[#allocation9_spill] sm:$0xff] }
 0x1dc   :  { %v6205_v18 = vpop.eup %6204  ;;  %6224 = vrcp.f32 %v1941_v51  ;;  %v1944_v7 = vadd.f32 1.0, %v6203_v30  ;;  %v1670_v51 = vadd.f32 %v8108_v4, %v9101_v53  ;;  %v617_v53 = vadd.f32 %v8108_v4, %v9104_v39  ;;  %v9106_v39 = vld [vmem:[#allocation14_spill] sm:$0xff] }
 0x1dd   :  { %v6207_v50 = vpop.eup %6206  ;;  %6226 = vrcp.f32 %v878_v55  ;;  %v876_v17 = vadd.f32 1.0, %v6205_v18  ;;  %v9102_v18 = vld [vmem:[#allocation10_spill] sm:$0xff] }
 0x1de   :  { %v6209_v43 = vpop.eup %6208  ;;  %6228 = vrcp.f32 %v1944_v7  ;;  %v1942_v41 = vadd.f32 1.0, %v6207_v50  ;;  %v625_v50 = vadd.f32 %v8108_v4, %v9102_v18 }
 0x1df   :  { %v6211_v12 = vpop.eup %6210  ;;  %6230 = vrcp.f32 %v876_v17  ;;  %v881_v60 = vadd.f32 1.0, %v6209_v43  ;;  %v4569_v17 = vmul.f32 -1.442695, %v1678_v54  ;;  %v9103_v43 = vld [vmem:[#allocation11_spill] sm:$0xff]  ;;  %v9105_v54 = vld [vmem:[#allocation13_spill] sm:$0xff] }
 0x1e0   :  { %v6213_v14 = vpop.eup %6212  ;;  %6232 = vrcp.f32 %v1942_v41  ;;  %v1947_v45 = vadd.f32 1.0, %v6211_v12  ;;  %v1691_v28 = vadd.f32 %v8108_v4, %v9103_v43  ;;  %v4382_v12 = vmul.f32 -1.442695, %v604_v9 }
 0x1e1   :  { %v6215_v30 = vpop.eup %6214  ;;  %6234 = vrcp.f32 %v881_v60  ;;  %v879_v55 = vadd.f32 1.0, %v6213_v14  ;;  %v4567_v14 = vmul.f32 -1.442695, %v1670_v51  ;;  %v4387_v9 = vmul.f32 -1.442695, %v625_v50 }
 0x1e2   :  { %v6217_v7 = vpop.eup %6216  ;;  %6236 = vrcp.f32 %v1947_v45  ;;  %v1945_v56 = vadd.f32 1.0, %v6215_v30  ;;  %v1683_v45 = vadd.f32 %v8108_v4, %v9105_v54  ;;  %v4572_v51 = vmul.f32 -1.442695, %v1691_v28  ;;  %v9108_v28 = vld [vmem:[#allocation16_spill] sm:$0xff] }
 0x1e3   :  { %v6219_v49 = vpop.eup %6218  ;;  %6238 = vrcp.f32 %v879_v55  ;;  %v882_v41 = vadd.f32 1.0, %v6217_v7  ;;  %v628_v55 = vadd.f32 %v8108_v4, %v9106_v39  ;;  %v1694_v7 = vadd.f32 %v8108_v4, %v7796_v27  ;;  %v8226_v39 = vpop.f32.mrb[92].mxu0 }
 0x1e4   :  { %v6221_v60 = vpop.eup %6220  ;;  %1069 = vst [vmem:[%s9064_s3 + $0x1b0] sm:$0xff] %v6219_v49  ;;  %6240 = vrcp.f32 %v1945_v56  ;;  %v8209_v56 = vld [vmem:[%s9063_s2] ss:$0 sm:$0xff]  ;;  %v4385_v50 = vmul.f32 -1.442695, %v617_v53  ;;  %v9107_v49 = vld [vmem:[#allocation15_spill] sm:$0xff] }
 0x1e5   :  { %v6223_v30 = vpop.eup %6222  ;;  %4628 = vst [vmem:[%s9064_s3 + $0x3b0] sm:$0xff] %v6221_v60  ;;  %6242 = vrcp.f32 %v882_v41  ;;  %v620_v41 = vadd.f32 %v8108_v4, %v9107_v49  ;;  %v4570_v27 = vmul.f32 -1.442695, %v1683_v45  ;;  %v1686_v60 = vadd.f32 %v8108_v4, %v9108_v28  ;;  %v9109_v53 = vld [vmem:[#allocation17_spill] sm:$0xff]  ;;  %v8235_v49 = vpop.f32.mrb[93].mxu0 }
 0x1e6   :  { %v6225_v18 = vpop.eup %6224  ;;  %1067 = vst [vmem:[%s9064_s3 + $0x1a0] sm:$0xff] %v6223_v30  ;;  %6244 = vpow2.f32 %v4569_v17  ;;  %v2518_v30 = vadd.f32 %v9109_v53, %v8209_v56  ;;  %v4573_v4 = vmul.f32 -1.442695, %v1694_v7  ;;  %v8242_v28 = vpop.f32.mrb[94].mxu0 }
 0x1e7   :  { %v6227_v43 = vpop.eup %6226  ;;  %4626 = vst [vmem:[%s9064_s3 + $0x3a0] sm:$0xff] %v6225_v18  ;;  %6246 = vpow2.f32 %v4382_v12  ;;  %v4388_v12 = vmul.f32 -1.442695, %v628_v55  ;;  %v8228_v18 = vpop.f32.mrb[92].mxu1  ;;  %v4571_v7 = vmul.f32 -1.442695, %v1686_v60 }
 0x1e8   :  { %v6229_v17 = vpop.eup %6228  ;;  %1070 = vst [vmem:[%s9064_s3 + $0x1b8] sm:$0xff] %v6227_v43  ;;  %6248 = vpow2.f32 %v4567_v14  ;;  %v9110_v14 = vld [vmem:[#allocation18_spill] sm:$0xff] }
 0x1e9   :  { %v6231_v54 = vpop.eup %6230  ;;  %4629 = vst [vmem:[%s9064_s3 + $0x3b8] sm:$0xff] %v6229_v17  ;;  %6250 = vpow2.f32 %v4387_v9  ;;  %v3585_v45 = vadd.f32 %v9110_v14, %v8209_v56  ;;  %v8237_v9 = vpop.f32.mrb[93].mxu1  ;;  %v4386_v17 = vmul.f32 -1.442695, %v620_v41 }
 0x1ea   :  { %v6233_v43 = vpop.eup %6232  ;;  %1068 = vst [vmem:[%s9064_s3 + $0x1a8] sm:$0xff] %v6231_v54  ;;  %6252 = vpow2.f32 %v4572_v51  ;;  %9111 = vst [vmem:[#allocation8_spill] sm:$0xff] %v8237_v9  ;;  %v8244_v53 = vpop.f32.mrb[94].mxu1 }
 0x1eb   :  { %v6235_v55 = vpop.eup %6234  ;;  %4627 = vst [vmem:[%s9064_s3 + $0x3a8] sm:$0xff] %v6233_v43  ;;  %6254 = vpow2.f32 %v4385_v50  ;;  %9112 = vst [vmem:[#allocation9_spill] sm:$0xff] %v8244_v53  ;;  %v8249_v54 = vpop.f32.mrb[95].mxu0  ;;  %v4761_v50 = vmul.f32 -1.442695, %v2518_v30  ;;  %v9119_v53 = vld [vmem:[#allocation19_spill] sm:$0xff] }
 0x1ec   :  { %v6237_v51 = vpop.eup %6236  ;;  %1073 = vst [vmem:[%s9064_s3 + $0x1d0] sm:$0xff] %v6235_v55  ;;  %6256 = vpow2.f32 %v4570_v27  ;;  %9113 = vst [vmem:[#allocation10_spill] sm:$0xff] %v8249_v54  ;;  %v8251_v14 = vpop.f32.mrb[95].mxu1  ;;  %v5010_v43 = vmul.f32 -1.442695, %v3585_v45 }
 0x1ed   :  { %9114 = vst [vmem:[#allocation11_spill] sm:$0xff] %v8251_v14  ;;  %v6239_v9 = vpop.eup %6238  ;;  %4632 = vst [vmem:[%s9064_s3 + $0x3d0] sm:$0xff] %v6237_v51  ;;  %6258 = vpow2.f32 %v4388_v12  ;;  %v8265_v55 = vpop.f32.mrb[96].mxu0 }
 0x1ee   :  { %v6241_v41 = vpop.eup %6240  ;;  %1071 = vst [vmem:[%s9064_s3 + $0x1c0] sm:$0xff] %v6239_v9  ;;  %6260 = vpow2.f32 %v4573_v4  ;;  %9115 = vst [vmem:[#allocation12_spill] sm:$0xff] %v8265_v55  ;;  %v8267_v9 = vpop.f32.mrb[96].mxu1 }
 0x1ef   :  { %v6243_v27 = vpop.eup %6242  ;;  %4630 = vst [vmem:[%s9064_s3 + $0x3c0] sm:$0xff] %v6241_v41  ;;  %6262 = vpow2.f32 %v4386_v17  ;;  %9116 = vst [vmem:[#allocation13_spill] sm:$0xff] %v8267_v9  ;;  %v8269_v51 = vpop.f32.mrb[97].mxu0 }
 0x1f0   :  { %v6245_v60 = vpop.eup %6244  ;;  %1074 = vst [vmem:[%s9064_s3 + $0x1d8] sm:$0xff] %v6243_v27  ;;  %6264 = vpow2.f32 %v4571_v7  ;;  %9117 = vst [vmem:[#allocation14_spill] sm:$0xff] %v8269_v51  ;;  %v8271_v41 = vpop.f32.mrb[97].mxu1 }
 0x1f1   :  { %v6247_v12 = vpop.eup %6246  ;;  %v1948_v30 = vadd.f32 1.0, %v6245_v60  ;;  %6266 = vpow2.f32 %v4761_v50  ;;  %9118 = vst [vmem:[#allocation15_spill] sm:$0xff] %v8271_v41  ;;  %v2510_v41 = vadd.f32 %v8209_v56, %v9119_v53 }
 0x1f2   :  { %v6249_v4 = vpop.eup %6248  ;;  %v880_v45 = vadd.f32 1.0, %v6247_v12  ;;  %6268 = vpow2.f32 %v5010_v43 }
 0x1f3   :  { %v6251_v17 = vpop.eup %6250  ;;  %6270 = vrcp.f32 %v1948_v30  ;;  %v1946_v14 = vadd.f32 1.0, %v6249_v4 }
 0x1f4   :  { %v6253_v54 = vpop.eup %6252  ;;  %6272 = vrcp.f32 %v880_v45  ;;  %v885_v7 = vadd.f32 1.0, %v6251_v17  ;;  %v3577_v45 = vadd.f32 %v8209_v56, %v7820_v8  ;;  %v2521_v17 = vadd.f32 %v7832_v6, %v8209_v56 }
 0x1f5   :  { %v6255_v27 = vpop.eup %6254  ;;  %6274 = vrcp.f32 %v1946_v14  ;;  %v1951_v50 = vadd.f32 1.0, %v6253_v54  ;;  %v3580_v6 = vadd.f32 %v8209_v56, %v7848_v31 }
 0x1f6   :  { %v6257_v60 = vpop.eup %6256  ;;  %6276 = vrcp.f32 %v885_v7  ;;  %v883_v55 = vadd.f32 1.0, %v6255_v27 }
 0x1f7   :  { %v6259_v9 = vpop.eup %6258  ;;  %6278 = vrcp.f32 %v1951_v50  ;;  %v1949_v12 = vadd.f32 1.0, %v6257_v60  ;;  %v4759_v50 = vmul.f32 -1.442695, %v2510_v41  ;;  %v2513_v60 = vadd.f32 %v8209_v56, %v7846_v52  ;;  %v8292_v52 = vpop.f32.mrb[98].mxu1 }
 0x1f8   :  { %v6261_v43 = vpop.eup %6260  ;;  %6280 = vrcp.f32 %v883_v55  ;;  %v886_v51 = vadd.f32 1.0, %v6259_v9  ;;  %v3588_v55 = vadd.f32 %v7834_v62, %v8209_v56  ;;  %v4762_v62 = vmul.f32 -1.442695, %v2521_v17 }
 0x1f9   :  { %v6263_v30 = vpop.eup %6262  ;;  %6282 = vrcp.f32 %v1949_v12  ;;  %v1952_v4 = vadd.f32 1.0, %v6261_v43  ;;  %v5008_v12 = vmul.f32 -1.442695, %v3577_v45  ;;  %v2534_v41 = vadd.f32 %v7874_v44, %v8209_v56 }
 0x1fa   :  { %v6265_v14 = vpop.eup %6264  ;;  %6284 = vrcp.f32 %v886_v51  ;;  %v884_v54 = vadd.f32 1.0, %v6263_v30  ;;  %v8290_v30 = vpop.f32.mrb[98].mxu0  ;;  %v5011_v31 = vmul.f32 -1.442695, %v3588_v55  ;;  %v3601_v45 = vadd.f32 %v7876_v36, %v8209_v56 }
 0x1fb   :  { %v6267_v7 = vpop.eup %6266  ;;  %6286 = vrcp.f32 %v1952_v4  ;;  %v1950_v27 = vadd.f32 1.0, %v6265_v14  ;;  %v4760_v44 = vmul.f32 -1.442695, %v2513_v60  ;;  %v8304_v17 = vpop.f32.mrb[99].mxu0  ;;  %v5009_v36 = vmul.f32 -1.442695, %v3580_v6 }
 0x1fc   :  { %v6269_v9 = vpop.eup %6268  ;;  %6288 = vrcp.f32 %v884_v54  ;;  %v2958_v53 = vadd.f32 1.0, %v6267_v7  ;;  %v2526_v54 = vadd.f32 %v8209_v56, %v7881_v38  ;;  %v8306_v7 = vpop.f32.mrb[99].mxu1  ;;  %v3593_v55 = vadd.f32 %v8209_v56, %v7883_v29 }
 0x1fd   :  { %v6271_v8 = vpop.eup %6270  ;;  %6290 = vrcp.f32 %v1950_v27  ;;  %v4025_v51 = vadd.f32 1.0, %v6269_v9  ;;  %v4765_v38 = vmul.f32 -1.442695, %v2534_v41  ;;  %v5014_v60 = vmul.f32 -1.442695, %v3601_v45  ;;  %v8334_v41 = vpop.f32.mrb[100].mxu0 }
 0x1fe   :  { %v6273_v43 = vpop.eup %6272  ;;  %4633 = vst [vmem:[%s9064_s3 + $0x3d8] sm:$0xff] %v6271_v8  ;;  %6292 = vrcp.f32 %v2958_v53  ;;  %v2537_v53 = vadd.f32 %v7888_v61, %v8209_v56  ;;  %v3604_v29 = vadd.f32 %v7890_v22, %v8209_v56 }
 0x1ff   :  { %v6275_v4 = vpop.eup %6274  ;;  %1072 = vst [vmem:[%s9064_s3 + $0x1c8] sm:$0xff] %v6273_v43  ;;  %6294 = vrcp.f32 %v4025_v51  ;;  %v4763_v51 = vmul.f32 -1.442695, %v2526_v54  ;;  %v5012_v43 = vmul.f32 -1.442695, %v3593_v55 }
 0x200   :  { %v6277_v14 = vpop.eup %6276  ;;  %4631 = vst [vmem:[%s9064_s3 + $0x3c8] sm:$0xff] %v6275_v4  ;;  %6296 = vpow2.f32 %v4759_v50  ;;  %v4766_v22 = vmul.f32 -1.442695, %v2537_v53  ;;  %v8336_v4 = vpop.f32.mrb[100].mxu1  ;;  %v5015_v45 = vmul.f32 -1.442695, %v3604_v29 }
 0x201   :  { %v6279_v27 = vpop.eup %6278  ;;  %1077 = vst [vmem:[%s9064_s3 + $0x1f0] sm:$0xff] %v6277_v14  ;;  %6298 = vpow2.f32 %v5008_v12  ;;  %v9120_v12 = vld [vmem:[#allocation20_spill] sm:$0xff]  ;;  %v8341_v14 = vpop.f32.mrb[101].mxu0 }
 0x202   :  { %v6281_v9 = vpop.eup %6280  ;;  %4636 = vst [vmem:[%s9064_s3 + $0x3f0] sm:$0xff] %v6279_v27  ;;  %6300 = vpow2.f32 %v4762_v62  ;;  %v2529_v61 = vadd.f32 %v8209_v56, %v9120_v12 }
 0x203   :  { %v6283_v50 = vpop.eup %6282  ;;  %1075 = vst [vmem:[%s9064_s3 + $0x1e0] sm:$0xff] %v6281_v9  ;;  %6302 = vpow2.f32 %v5011_v31 }
 0x204   :  { %v6285_v8 = vpop.eup %6284  ;;  %4634 = vst [vmem:[%s9064_s3 + $0x3e0] sm:$0xff] %v6283_v50  ;;  %6304 = vpow2.f32 %v4760_v44  ;;  %v8343_v44 = vpop.f32.mrb[101].mxu1  ;;  %v4764_v27 = vmul.f32 -1.442695, %v2529_v61 }
 0x205   :  { %v6287_v6 = vpop.eup %6286  ;;  %1078 = vst [vmem:[%s9064_s3 + $0x1f8] sm:$0xff] %v6285_v8  ;;  %6306 = vpow2.f32 %v5009_v36  ;;  %v8348_v36 = vpop.f32.mrb[102].mxu0 }
 0x206   :  { %v6289_v62 = vpop.eup %6288  ;;  %4637 = vst [vmem:[%s9064_s3 + $0x3f8] sm:$0xff] %v6287_v6  ;;  %6308 = vpow2.f32 %v4765_v38  ;;  %v8350_v55 = vpop.f32.mrb[102].mxu1 }
 0x207   :  { %v6291_v31 = vpop.eup %6290  ;;  %1076 = vst [vmem:[%s9064_s3 + $0x1e8] sm:$0xff] %v6289_v62  ;;  %6310 = vpow2.f32 %v5014_v60  ;;  %v8355_v38 = vpop.f32.mrb[103].mxu0 }
 0x208   :  { %v6293_v54 = vpop.eup %6292  ;;  %4635 = vst [vmem:[%s9064_s3 + $0x3e8] sm:$0xff] %v6291_v31  ;;  %6312 = vpow2.f32 %v4763_v51  ;;  %v8357_v53 = vpop.f32.mrb[103].mxu1 }
 0x209   :  { %v6295_v9 = vpop.eup %6294  ;;  %4825 = vst [vmem:[%s9064_s3 + $0x410] sm:$0xff] %v6293_v54  ;;  %6314 = vpow2.f32 %v5012_v43  ;;  %9121 = vst [vmem:[#allocation16_spill] sm:$0xff] %v8357_v53  ;;  %v8362_v62 = vpop.f32.mrb[104].mxu0 }
 0x20a   :  { %v6297_v50 = vpop.eup %6296  ;;  %5074 = vst [vmem:[%s9064_s3 + $0x610] sm:$0xff] %v6295_v9  ;;  %6316 = vpow2.f32 %v4766_v22 }
 0x20b   :  { %v6299_v60 = vpop.eup %6298  ;;  %v2956_v29 = vadd.f32 1.0, %v6297_v50  ;;  %6318 = vpow2.f32 %v5015_v45 }
 0x20c   :  { %v6301_v8 = vpop.eup %6300  ;;  %v4023_v51 = vadd.f32 1.0, %v6299_v60  ;;  %6320 = vpow2.f32 %v4764_v27  ;;  %v9122_v60 = vld [vmem:[#allocation21_spill] sm:$0xff] }
 0x20d   :  { %v6303_v12 = vpop.eup %6302  ;;  %6322 = vrcp.f32 %v2956_v29  ;;  %v2959_v61 = vadd.f32 1.0, %v6301_v8  ;;  %v3596_v29 = vadd.f32 %v8209_v56, %v9122_v60 }
 0x20e   :  { %v6305_v6 = vpop.eup %6304  ;;  %6324 = vrcp.f32 %v4023_v51  ;;  %v4026_v43 = vadd.f32 1.0, %v6303_v12  ;;  %v2550_v12 = vadd.f32 %v7936_v46, %v8209_v56 }
 0x20f   :  { %v6307_v31 = vpop.eup %6306  ;;  %6326 = vrcp.f32 %v2959_v61  ;;  %v2957_v54 = vadd.f32 1.0, %v6305_v6 }
 0x210   :  { %v6309_v53 = vpop.eup %6308  ;;  %6328 = vrcp.f32 %v4026_v43  ;;  %v4024_v22 = vadd.f32 1.0, %v6307_v31  ;;  %v3617_v43 = vadd.f32 %v7938_v16, %v8209_v56  ;;  %v4769_v60 = vmul.f32 -1.442695, %v2550_v12 }
 0x211   :  { %v6311_v9 = vpop.eup %6310  ;;  %6330 = vrcp.f32 %v2957_v54  ;;  %v2962_v45 = vadd.f32 1.0, %v6309_v53  ;;  %v2542_v54 = vadd.f32 %v8209_v56, %v7945_v19  ;;  %v2553_v16 = vadd.f32 %v7954_v21, %v8209_v56 }
 0x212   :  { %v6313_v50 = vpop.eup %6312  ;;  %6332 = vrcp.f32 %v4024_v22  ;;  %v4029_v27 = vadd.f32 1.0, %v6311_v9  ;;  %v5018_v19 = vmul.f32 -1.442695, %v3617_v43  ;;  %v2545_v21 = vadd.f32 %v8209_v56, %v7961_v0 }
 0x213   :  { %v6315_v8 = vpop.eup %6314  ;;  %6334 = vrcp.f32 %v2962_v45  ;;  %v2960_v51 = vadd.f32 1.0, %v6313_v50  ;;  %v5013_v45 = vmul.f32 -1.442695, %v3596_v29  ;;  %v3609_v50 = vadd.f32 %v8209_v56, %v7947_v37 }
 0x214   :  { %v6317_v61 = vpop.eup %6316  ;;  %6336 = vrcp.f32 %v4029_v27  ;;  %v4027_v6 = vadd.f32 1.0, %v6315_v8  ;;  %v8376_v8 = vpop.f32.mrb[104].mxu1  ;;  %v3620_v29 = vadd.f32 %v7956_v59, %v8209_v56  ;;  %v4767_v12 = vmul.f32 -1.442695, %v2542_v54 }
 0x215   :  { %v6319_v31 = vpop.eup %6318  ;;  %6338 = vrcp.f32 %v2960_v51  ;;  %v2963_v53 = vadd.f32 1.0, %v6317_v61  ;;  %v8388_v61 = vpop.f32.mrb[105].mxu0  ;;  %v5016_v59 = vmul.f32 -1.442695, %v3609_v50  ;;  %v3612_v43 = vadd.f32 %v8209_v56, %v7963_v47 }
 0x216   :  { %v6321_v22 = vpop.eup %6320  ;;  %6340 = vrcp.f32 %v4027_v6  ;;  %v4030_v9 = vadd.f32 1.0, %v6319_v31  ;;  %v8390_v6 = vpop.f32.mrb[105].mxu1  ;;  %v4770_v0 = vmul.f32 -1.442695, %v2553_v16  ;;  %v2566_v54 = vadd.f32 %v7980_v57, %v8209_v56 }
 0x217   :  { %v6323_v46 = vpop.eup %6322  ;;  %6342 = vrcp.f32 %v2963_v53  ;;  %v2961_v27 = vadd.f32 1.0, %v6321_v22  ;;  %v8402_v22 = vpop.f32.mrb[106].mxu0  ;;  %v5019_v47 = vmul.f32 -1.442695, %v3620_v29  ;;  %v4768_v57 = vmul.f32 -1.442695, %v2545_v21 }
 0x218   :  { %v6325_v51 = vpop.eup %6324  ;;  %4823 = vst [vmem:[%s9064_s3 + $0x400] sm:$0xff] %v6323_v46  ;;  %6344 = vrcp.f32 %v4030_v9  ;;  %v8404_v9 = vpop.f32.mrb[106].mxu1 }
 0x219   :  { %v6327_v37 = vpop.eup %6326  ;;  %5072 = vst [vmem:[%s9064_s3 + $0x600] sm:$0xff] %v6325_v51  ;;  %6346 = vrcp.f32 %v2961_v27  ;;  %v2558_v27 = vadd.f32 %v8209_v56, %v7984_v2  ;;  %v8418_v16 = vpop.f32.mrb[107].mxu1  ;;  %v4773_v2 = vmul.f32 -1.442695, %v2566_v54 }
 0x21a   :  { %v6329_v31 = vpop.eup %6328  ;;  %4826 = vst [vmem:[%s9064_s3 + $0x418] sm:$0xff] %v6327_v37  ;;  %6348 = vpow2.f32 %v5013_v45  ;;  %v3633_v45 = vadd.f32 %v7982_v33, %v8209_v56  ;;  %v5017_v33 = vmul.f32 -1.442695, %v3612_v43 }
 0x21b   :  { %v6331_v53 = vpop.eup %6330  ;;  %5075 = vst [vmem:[%s9064_s3 + $0x618] sm:$0xff] %v6329_v31  ;;  %6350 = vpow2.f32 %v4769_v60  ;;  %v8416_v60 = vpop.f32.mrb[107].mxu0 }
 0x21c   :  { %v6333_v46 = vpop.eup %6332  ;;  %4824 = vst [vmem:[%s9064_s3 + $0x408] sm:$0xff] %v6331_v53  ;;  %6352 = vpow2.f32 %v5018_v19  ;;  %v3625_v19 = vadd.f32 %v8209_v56, %v7986_v32  ;;  %v4771_v32 = vmul.f32 -1.442695, %v2558_v27  ;;  %v8440_v53 = vpop.f32.mrb[108].mxu0 }
 0x21d   :  { %v6335_v50 = vpop.eup %6334  ;;  %5073 = vst [vmem:[%s9064_s3 + $0x608] sm:$0xff] %v6333_v46  ;;  %6354 = vpow2.f32 %v4767_v12  ;;  %v5022_v12 = vmul.f32 -1.442695, %v3633_v45  ;;  %v8447_v46 = vpop.f32.mrb[109].mxu0 }
 0x21e   :  { %v6337_v51 = vpop.eup %6336  ;;  %4829 = vst [vmem:[%s9064_s3 + $0x430] sm:$0xff] %v6335_v50  ;;  %6356 = vpow2.f32 %v5016_v59  ;;  %v5020_v59 = vmul.f32 -1.442695, %v3625_v19 }
 0x21f   :  { %v6339_v29 = vpop.eup %6338  ;;  %5078 = vst [vmem:[%s9064_s3 + $0x630] sm:$0xff] %v6337_v51  ;;  %6358 = vpow2.f32 %v4770_v0  ;;  %v8442_v0 = vpop.f32.mrb[108].mxu1 }
 0x220   :  { %v6341_v37 = vpop.eup %6340  ;;  %4827 = vst [vmem:[%s9064_s3 + $0x420] sm:$0xff] %v6339_v29  ;;  %6360 = vpow2.f32 %v5019_v47  ;;  %v8449_v47 = vpop.f32.mrb[109].mxu1 }
 0x221   :  { %v6343_v21 = vpop.eup %6342  ;;  %5076 = vst [vmem:[%s9064_s3 + $0x620] sm:$0xff] %v6341_v37  ;;  %6362 = vpow2.f32 %v4768_v57  ;;  %v8451_v57 = vpop.f32.mrb[110].mxu0 }
 0x222   :  { %v6345_v31 = vpop.eup %6344  ;;  %4830 = vst [vmem:[%s9064_s3 + $0x438] sm:$0xff] %v6343_v21  ;;  %6364 = vpow2.f32 %v5017_v33  ;;  %9123 = vst [vmem:[#allocation17_spill] sm:$0xff] %v8451_v57  ;;  %v8453_v27 = vpop.f32.mrb[110].mxu1 }
 0x223   :  { %v6347_v43 = vpop.eup %6346  ;;  %5079 = vst [vmem:[%s9064_s3 + $0x638] sm:$0xff] %v6345_v31  ;;  %6366 = vpow2.f32 %v4773_v2  ;;  %9124 = vst [vmem:[#allocation18_spill] sm:$0xff] %v8453_v27 }
 0x224   :  { %v6349_v54 = vpop.eup %6348  ;;  %4828 = vst [vmem:[%s9064_s3 + $0x428] sm:$0xff] %v6347_v43  ;;  %6368 = vpow2.f32 %v5022_v12 }
 0x225   :  { %v6351_v45 = vpop.eup %6350  ;;  %v4028_v50 = vadd.f32 1.0, %v6349_v54  ;;  %6370 = vpow2.f32 %v4771_v32 }
 0x226   :  { %v6353_v51 = vpop.eup %6352  ;;  %v2966_v33 = vadd.f32 1.0, %v6351_v45  ;;  %6372 = vpow2.f32 %v5020_v59  ;;  %v2569_v59 = vadd.f32 %v7988_v35, %v8209_v56 }
 0x227   :  { %v6355_v19 = vpop.eup %6354  ;;  %6374 = vrcp.f32 %v4028_v50  ;;  %v4033_v29 = vadd.f32 1.0, %v6353_v51  ;;  %v3636_v51 = vadd.f32 %v8002_v24, %v8209_v56 }
 0x228   :  { %v6357_v2 = vpop.eup %6356  ;;  %6376 = vrcp.f32 %v2966_v33  ;;  %v2964_v37 = vadd.f32 1.0, %v6355_v19 }
 0x229   :  { %v6359_v12 = vpop.eup %6358  ;;  %6378 = vrcp.f32 %v4033_v29  ;;  %v4031_v21 = vadd.f32 1.0, %v6357_v2  ;;  %v2561_v29 = vadd.f32 %v8209_v56, %v8014_v10  ;;  %v3649_v10 = vadd.f32 %v8048_v3, %v8209_v56 }
 0x22a   :  { %v6361_v31 = vpop.eup %6360  ;;  %6380 = vrcp.f32 %v2964_v37  ;;  %v2967_v43 = vadd.f32 1.0, %v6359_v12  ;;  %v3628_v12 = vadd.f32 %v8209_v56, %v8016_v48 }
 0x22b   :  { %v6363_v32 = vpop.eup %6362  ;;  %6382 = vrcp.f32 %v4031_v21  ;;  %v4034_v54 = vadd.f32 1.0, %v6361_v31  ;;  %v4774_v31 = vmul.f32 -1.442695, %v2569_v59  ;;  %v4772_v48 = vmul.f32 -1.442695, %v2561_v29  ;;  %v8472_v59 = vpop.f32.mrb[111].mxu0 }
 0x22c   :  { %v6365_v57 = vpop.eup %6364  ;;  %6384 = vrcp.f32 %v2967_v43  ;;  %v2965_v27 = vadd.f32 1.0, %v6363_v32  ;;  %v5023_v43 = vmul.f32 -1.442695, %v3636_v51  ;;  %v5021_v3 = vmul.f32 -1.442695, %v3628_v12  ;;  %v9125_v12 = vld [vmem:[#allocation2_spill] sm:$0xff] }
 0x22d   :  { %v6367_v45 = vpop.eup %6366  ;;  %6386 = vrcp.f32 %v4034_v54  ;;  %v4032_v50 = vadd.f32 1.0, %v6365_v57  ;;  %v2582_v57 = vadd.f32 %v8046_v25, %v8209_v56  ;;  %v2574_v54 = vadd.f32 %v8209_v56, %v8053_v1  ;;  %v8474_v25 = vpop.f32.mrb[111].mxu1 }
 0x22e   :  { %v6369_v33 = vpop.eup %6368  ;;  %6388 = vrcp.f32 %v2965_v27  ;;  %v2970_v19 = vadd.f32 1.0, %v6367_v45  ;;  %v5026_v29 = vmul.f32 -1.442695, %v3649_v10  ;;  %v8506_v10 = vpop.f32.mrb[112].mxu0 }
 0x22f   :  { %v6371_v2 = vpop.eup %6370  ;;  %6390 = vrcp.f32 %v4032_v50  ;;  %v4037_v37 = vadd.f32 1.0, %v6369_v33  ;;  %v3641_v50 = vadd.f32 %v8209_v56, %v8055_v58  ;;  %v4777_v1 = vmul.f32 -1.442695, %v2582_v57 }
 0x230   :  { %v6373_v21 = vpop.eup %6372  ;;  %6392 = vrcp.f32 %v2970_v19  ;;  %v2968_v35 = vadd.f32 1.0, %v6371_v2  ;;  %v2585_v33 = vadd.f32 %v8060_v13, %v8209_v56  ;;  %v3652_v58 = vadd.f32 %v8062_v63, %v8209_v56 }
 0x231   :  { %v6375_v24 = vpop.eup %6374  ;;  %6394 = vrcp.f32 %v4037_v37  ;;  %v4035_v27 = vadd.f32 1.0, %v6373_v21  ;;  %v4775_v37 = vmul.f32 -1.442695, %v2574_v54  ;;  %v2577_v13 = vadd.f32 %v8209_v56, %v9125_v12 }
 0x232   :  { %v6377_v32 = vpop.eup %6376  ;;  %5077 = vst [vmem:[%s9064_s3 + $0x628] sm:$0xff] %v6375_v24  ;;  %6396 = vrcp.f32 %v2968_v35  ;;  %v5024_v35 = vmul.f32 -1.442695, %v3641_v50  ;;  %v4778_v24 = vmul.f32 -1.442695, %v2585_v33 }
 0x233   :  { %v6379_v45 = vpop.eup %6378  ;;  %4833 = vst [vmem:[%s9064_s3 + $0x450] sm:$0xff] %v6377_v32  ;;  %6398 = vrcp.f32 %v4035_v27  ;;  %v9127_v27 = vld [vmem:[#allocation4_spill] sm:$0xff]  ;;  %v8508_v32 = vpop.f32.mrb[112].mxu1  ;;  %v5027_v54 = vmul.f32 -1.442695, %v3652_v58 }
 0x234   :  { %v6381_v51 = vpop.eup %6380  ;;  %5082 = vst [vmem:[%s9064_s3 + $0x650] sm:$0xff] %v6379_v45  ;;  %6400 = vpow2.f32 %v4774_v31  ;;  %v9126_v31 = vld [vmem:[#allocation3_spill] sm:$0xff]  ;;  %v8513_v45 = vpop.f32.mrb[113].mxu0 }
 0x235   :  { %v6383_v19 = vpop.eup %6382  ;;  %4831 = vst [vmem:[%s9064_s3 + $0x440] sm:$0xff] %v6381_v51  ;;  %6402 = vpow2.f32 %v5023_v43  ;;  %v3644_v63 = vadd.f32 %v8209_v56, %v9126_v31  ;;  %v2598_v43 = vadd.f32 %v9127_v27, %v8209_v56  ;;  %v4776_v51 = vmul.f32 -1.442695, %v2577_v13 }
 0x236   :  { %v6385_v2 = vpop.eup %6384  ;;  %5080 = vst [vmem:[%s9064_s3 + $0x640] sm:$0xff] %v6383_v19  ;;  %6404 = vpow2.f32 %v4772_v48 }
 0x237   :  { %v6387_v21 = vpop.eup %6386  ;;  %4834 = vst [vmem:[%s9064_s3 + $0x458] sm:$0xff] %v6385_v2  ;;  %6406 = vpow2.f32 %v5021_v3  ;;  %v8515_v3 = vpop.f32.mrb[113].mxu1 }
 0x238   :  { %v6389_v57 = vpop.eup %6388  ;;  %5083 = vst [vmem:[%s9064_s3 + $0x658] sm:$0xff] %v6387_v21  ;;  %6408 = vpow2.f32 %v4777_v1  ;;  %v8520_v1 = vpop.f32.mrb[114].mxu0 }
 0x239   :  { %v6391_v48 = vpop.eup %6390  ;;  %4832 = vst [vmem:[%s9064_s3 + $0x448] sm:$0xff] %v6389_v57  ;;  %6410 = vpow2.f32 %v5026_v29  ;;  %v8522_v33 = vpop.f32.mrb[114].mxu1  ;;  %v5025_v29 = vmul.f32 -1.442695, %v3644_v63 }
 0x23a   :  { %v6393_v50 = vpop.eup %6392  ;;  %5081 = vst [vmem:[%s9064_s3 + $0x648] sm:$0xff] %v6391_v48  ;;  %6412 = vpow2.f32 %v4775_v37  ;;  %v8527_v58 = vpop.f32.mrb[115].mxu0  ;;  %v4781_v37 = vmul.f32 -1.442695, %v2598_v43 }
 0x23b   :  { %v6395_v19 = vpop.eup %6394  ;;  %4837 = vst [vmem:[%s9064_s3 + $0x470] sm:$0xff] %v6393_v50  ;;  %6414 = vpow2.f32 %v5024_v35  ;;  %v8529_v2 = vpop.f32.mrb[115].mxu1 }
 0x23c   :  { %v6397_v12 = vpop.eup %6396  ;;  %5086 = vst [vmem:[%s9064_s3 + $0x670] sm:$0xff] %v6395_v19  ;;  %6416 = vpow2.f32 %v4778_v24  ;;  %v8540_v24 = vpop.f32.mrb[116].mxu0 }
 0x23d   :  { %v6399_v13 = vpop.eup %6398  ;;  %4835 = vst [vmem:[%s9064_s3 + $0x460] sm:$0xff] %v6397_v12  ;;  %6418 = vpow2.f32 %v5027_v54  ;;  %9128 = vst [vmem:[#allocation19_spill] sm:$0xff] %v8540_v24  ;;  %v8542_v27 = vpop.f32.mrb[116].mxu1 }
 0x23e   :  { %v6401_v21 = vpop.eup %6400  ;;  %5084 = vst [vmem:[%s9064_s3 + $0x660] sm:$0xff] %v6399_v13  ;;  %6420 = vpow2.f32 %v4776_v51  ;;  %9129 = vst [vmem:[#allocation20_spill] sm:$0xff] %v8542_v27  ;;  %v8544_v54 = vpop.f32.mrb[117].mxu0 }
 0x23f   :  { %v6403_v35 = vpop.eup %6402  ;;  %v2971_v31 = vadd.f32 1.0, %v6401_v21  ;;  %6422 = vpow2.f32 %v5025_v29  ;;  %9130 = vst [vmem:[#allocation21_spill] sm:$0xff] %v8544_v54 }
 0x240   :  { %v6405_v63 = vpop.eup %6404  ;;  %v4038_v57 = vadd.f32 1.0, %v6403_v35  ;;  %6424 = vpow2.f32 %v4781_v37 }
 0x241   :  { %v6407_v43 = vpop.eup %6406  ;;  %6426 = vrcp.f32 %v2971_v31  ;;  %v2969_v48 = vadd.f32 1.0, %v6405_v63  ;;  %v9131_v31 = vld [vmem:[#allocation5_spill] sm:$0xff] }
 0x242   :  { %v6409_v50 = vpop.eup %6408  ;;  %6428 = vrcp.f32 %v4038_v57  ;;  %v4036_v19 = vadd.f32 1.0, %v6407_v43  ;;  %v3665_v63 = vadd.f32 %v9131_v31, %v8209_v56  ;;  %v2590_v57 = vadd.f32 %v8209_v56, %v8098_v40 }
 0x243   :  { %v6411_v12 = vpop.eup %6410  ;;  %6430 = vrcp.f32 %v2969_v48  ;;  %v2974_v51 = vadd.f32 1.0, %v6409_v50  ;;  %v3657_v50 = vadd.f32 %v8209_v56, %v8100_v11  ;;  %v2593_v11 = vadd.f32 %v8209_v56, %v8131_v20 }
 0x244   :  { %v6413_v13 = vpop.eup %6412  ;;  %6432 = vrcp.f32 %v4036_v19  ;;  %v4041_v29 = vadd.f32 1.0, %v6411_v12  ;;  %v3660_v31 = vadd.f32 %v8209_v56, %v8133_v26  ;;  %v2614_v20 = vadd.f32 %v8157_v42, %v8209_v56 }
 0x245   :  { %v6415_v21 = vpop.eup %6414  ;;  %6434 = vrcp.f32 %v2974_v51  ;;  %v2972_v37 = vadd.f32 1.0, %v6413_v13  ;;  %v2601_v51 = vadd.f32 %v8117_v15, %v8209_v56  ;;  %v5028_v15 = vmul.f32 -1.442695, %v3657_v50 }
 0x246   :  { %v6417_v35 = vpop.eup %6416  ;;  %6436 = vrcp.f32 %v4041_v29  ;;  %v4039_v27 = vadd.f32 1.0, %v6415_v21  ;;  %v5030_v21 = vmul.f32 -1.442695, %v3665_v63  ;;  %v3681_v50 = vadd.f32 %v8159_v34, %v8209_v56 }
 0x247   :  { %v6419_v24 = vpop.eup %6418  ;;  %6438 = vrcp.f32 %v2972_v37  ;;  %v2975_v54 = vadd.f32 1.0, %v6417_v35  ;;  %v3668_v37 = vadd.f32 %v8119_v5, %v8209_v56  ;;  %v8558_v35 = vpop.f32.mrb[117].mxu1  ;;  %v4782_v63 = vmul.f32 -1.442695, %v2601_v51 }
 0x248   :  { %v6421_v43 = vpop.eup %6420  ;;  %6440 = vrcp.f32 %v4039_v27  ;;  %v4042_v48 = vadd.f32 1.0, %v6419_v24  ;;  %v4779_v24 = vmul.f32 -1.442695, %v2590_v57  ;;  %v8570_v57 = vpop.f32.mrb[118].mxu0  ;;  %v4780_v42 = vmul.f32 -1.442695, %v2593_v11 }
 0x249   :  { %v6423_v19 = vpop.eup %6422  ;;  %6442 = vrcp.f32 %v2975_v54  ;;  %v2973_v12 = vadd.f32 1.0, %v6421_v43  ;;  %v8572_v43 = vpop.f32.mrb[118].mxu1  ;;  %v5031_v26 = vmul.f32 -1.442695, %v3668_v37  ;;  %v5029_v34 = vmul.f32 -1.442695, %v3660_v31 }
 0x24a   :  { %v6425_v13 = vpop.eup %6424  ;;  %6444 = vrcp.f32 %v4042_v48  ;;  %v4040_v29 = vadd.f32 1.0, %v6423_v19  ;;  %v9134_v11 = vld [vmem:[#allocation22_spill] sm:$0xff]  ;;  %v9135_v31 = vld [vmem:[#allocation23_spill] sm:$0xff] }
 0x24b   :  { %v6427_v40 = vpop.eup %6426  ;;  %6446 = vrcp.f32 %v2973_v12  ;;  %v2978_v27 = vadd.f32 1.0, %v6425_v13  ;;  %v9132_v12 = vld [vmem:[#allocation6_spill] sm:$0xff]  ;;  %v8584_v13 = vpop.f32.mrb[119].mxu0 }
 0x24c   :  { %v6429_v54 = vpop.eup %6428  ;;  %4838 = vst [vmem:[%s9064_s3 + $0x478] sm:$0xff] %v6427_v40  ;;  %6448 = vrcp.f32 %v4040_v29  ;;  %v2606_v51 = vadd.f32 %v8209_v56, %v9132_v12  ;;  %v8586_v29 = vpop.f32.mrb[119].mxu1 }
 0x24d   :  { %v6431_v5 = vpop.eup %6430  ;;  %5087 = vst [vmem:[%s9064_s3 + $0x678] sm:$0xff] %v6429_v54  ;;  %6450 = vrcp.f32 %v2978_v27  ;;  %v2617_v54 = vadd.f32 %v9134_v11, %v8209_v56 }
 0x24e   :  { %v6433_v48 = vpop.eup %6432  ;;  %4836 = vst [vmem:[%s9064_s3 + $0x468] sm:$0xff] %v6431_v5  ;;  %6452 = vpow2.f32 %v5030_v21  ;;  %v9133_v21 = vld [vmem:[#allocation7_spill] sm:$0xff] }
 0x24f   :  { %v6435_v19 = vpop.eup %6434  ;;  %5085 = vst [vmem:[%s9064_s3 + $0x668] sm:$0xff] %v6433_v48  ;;  %6454 = vpow2.f32 %v4779_v24  ;;  %v3673_v37 = vadd.f32 %v8209_v56, %v9133_v21  ;;  %v4785_v24 = vmul.f32 -1.442695, %v2614_v20  ;;  %v3684_v48 = vadd.f32 %v9135_v31, %v8209_v56 }
 0x250   :  { %v6437_v40 = vpop.eup %6436  ;;  %4841 = vst [vmem:[%s9064_s3 + $0x490] sm:$0xff] %v6435_v19  ;;  %6456 = vpow2.f32 %v5028_v15  ;;  %v5034_v15 = vmul.f32 -1.442695, %v3681_v50  ;;  %v4786_v56 = vmul.f32 -1.442695, %v2617_v54  ;;  %v8614_v50 = vpop.f32.mrb[120].mxu1 }
 0x251   :  { %v6439_v27 = vpop.eup %6438  ;;  %5090 = vst [vmem:[%s9064_s3 + $0x690] sm:$0xff] %v6437_v40  ;;  %6458 = vpow2.f32 %v4782_v63  ;;  %v4783_v63 = vmul.f32 -1.442695, %v2606_v51  ;;  %v5032_v12 = vmul.f32 -1.442695, %v3673_v37  ;;  %v8621_v21 = vpop.f32.mrb[121].mxu1 }
 0x252   :  { %v6441_v5 = vpop.eup %6440  ;;  %4839 = vst [vmem:[%s9064_s3 + $0x480] sm:$0xff] %v6439_v27  ;;  %6460 = vpow2.f32 %v5031_v26  ;;  %v8612_v26 = vpop.f32.mrb[120].mxu0  ;;  %v5035_v51 = vmul.f32 -1.442695, %v3684_v48  ;;  %9136 = vst [vmem:[#allocation2_spill] sm:$0xff] %v8621_v21 }
 0x253   :  { %v6443_v19 = vpop.eup %6442  ;;  %5088 = vst [vmem:[%s9064_s3 + $0x680] sm:$0xff] %v6441_v5  ;;  %6462 = vpow2.f32 %v4780_v42 }
 0x254   :  { %v6445_v20 = vpop.eup %6444  ;;  %4842 = vst [vmem:[%s9064_s3 + $0x498] sm:$0xff] %v6443_v19  ;;  %6464 = vpow2.f32 %v5029_v34  ;;  %v8619_v34 = vpop.f32.mrb[121].mxu0 }
 0x255   :  { %v6447_v40 = vpop.eup %6446  ;;  %5091 = vst [vmem:[%s9064_s3 + $0x698] sm:$0xff] %v6445_v20  ;;  %6466 = vpow2.f32 %v4785_v24  ;;  %v8626_v27 = vpop.f32.mrb[122].mxu0 }
 0x256   :  { %v6449_v42 = vpop.eup %6448  ;;  %4840 = vst [vmem:[%s9064_s3 + $0x488] sm:$0xff] %v6447_v40  ;;  %6468 = vpow2.f32 %v5034_v15  ;;  %9137 = vst [vmem:[#allocation3_spill] sm:$0xff] %v8626_v27  ;;  %v8628_v24 = vpop.f32.mrb[122].mxu1 }
 0x257   :  { %v6451_v37 = vpop.eup %6450  ;;  %5089 = vst [vmem:[%s9064_s3 + $0x688] sm:$0xff] %v6449_v42  ;;  %6470 = vpow2.f32 %v4783_v63  ;;  %9138 = vst [vmem:[#allocation4_spill] sm:$0xff] %v8628_v24  ;;  %v8633_v54 = vpop.f32.mrb[123].mxu0 }
 0x258   :  { %v6453_v11 = vpop.eup %6452  ;;  %4845 = vst [vmem:[%s9064_s3 + $0x4b0] sm:$0xff] %v6451_v37  ;;  %6472 = vpow2.f32 %v5032_v12  ;;  %9139 = vst [vmem:[#allocation5_spill] sm:$0xff] %v8633_v54  ;;  %v8635_v5 = vpop.f32.mrb[123].mxu1 }
 0x259   :  { %9140 = vst [vmem:[#allocation6_spill] sm:$0xff] %v8635_v5  ;;  %v6455_v15 = vpop.eup %6454  ;;  %v4045_v31 = vadd.f32 1.0, %v6453_v11  ;;  %6474 = vpow2.f32 %v4786_v56 }
 0x25a   :  { %v6457_v48 = vpop.eup %6456  ;;  %v2976_v19 = vadd.f32 1.0, %v6455_v15  ;;  %6476 = vpow2.f32 %v5035_v51  ;;  %v8640_v51 = vld [vmem:[%s9063_s2] ss:$0 sm:$0xff]  ;;  %v9141_v15 = vld [vmem:[#allocation24_spill] sm:$0xff] }
 0x25b   :  { %v6459_v63 = vpop.eup %6458  ;;  %6478 = vrcp.f32 %v4045_v31  ;;  %v4043_v20 = vadd.f32 1.0, %v6457_v48  ;;  %v2609_v31 = vadd.f32 %v8640_v51, %v9141_v15 }
 0x25c   :  { %v6461_v40 = vpop.eup %6460  ;;  %6480 = vrcp.f32 %v2976_v19  ;;  %v2979_v42 = vadd.f32 1.0, %v6459_v63 }
 0x25d   :  { %v6463_v24 = vpop.eup %6462  ;;  %6482 = vrcp.f32 %v4043_v20  ;;  %v4046_v37 = vadd.f32 1.0, %v6461_v40 }
 0x25e   :  { %v6465_v12 = vpop.eup %6464  ;;  %6484 = vrcp.f32 %v2979_v42  ;;  %v2977_v54 = vadd.f32 1.0, %v6463_v24  ;;  %v3676_v24 = vadd.f32 %v8640_v51, %v8189_v23  ;;  %v3697_v42 = vadd.f32 %v8640_v51, %v8228_v18 }
 0x25f   :  { %v6467_v27 = vpop.eup %6466  ;;  %6486 = vrcp.f32 %v4046_v37  ;;  %v4044_v5 = vadd.f32 1.0, %v6465_v12 }
 0x260   :  { %v6469_v11 = vpop.eup %6468  ;;  %6488 = vrcp.f32 %v2977_v54  ;;  %v2982_v56 = vadd.f32 1.0, %v6467_v27  ;;  %v2630_v27 = vadd.f32 %v8640_v51, %v8226_v39  ;;  %v5033_v15 = vmul.f32 -1.442695, %v3676_v24  ;;  %v9143_v24 = vld [vmem:[#allocation9_spill] sm:$0xff] }
 0x261   :  { %v6471_v48 = vpop.eup %6470  ;;  %6490 = vrcp.f32 %v4044_v5  ;;  %v4049_v19 = vadd.f32 1.0, %v6469_v11  ;;  %v4784_v5 = vmul.f32 -1.442695, %v2609_v31  ;;  %v2622_v11 = vadd.f32 %v8640_v51, %v8235_v49 }
 0x262   :  { %v6473_v63 = vpop.eup %6472  ;;  %6492 = vrcp.f32 %v2982_v56  ;;  %v2980_v20 = vadd.f32 1.0, %v6471_v48  ;;  %v9142_v48 = vld [vmem:[#allocation8_spill] sm:$0xff]  ;;  %v4789_v18 = vmul.f32 -1.442695, %v2630_v27  ;;  %v2633_v31 = vadd.f32 %v8640_v51, %v8242_v28 }
 0x263   :  { %v6475_v54 = vpop.eup %6474  ;;  %6494 = vrcp.f32 %v4049_v19  ;;  %v4047_v40 = vadd.f32 1.0, %v6473_v63  ;;  %v3689_v39 = vadd.f32 %v8640_v51, %v9142_v48  ;;  %v5038_v49 = vmul.f32 -1.442695, %v3697_v42  ;;  %v9145_v42 = vld [vmem:[#allocation11_spill] sm:$0xff]  ;;  %v8681_v48 = vpop.f32.mrb[124].mxu1 }
 0x264   :  { %v6477_v37 = vpop.eup %6476  ;;  %6496 = vrcp.f32 %v2980_v20  ;;  %v2983_v12 = vadd.f32 1.0, %v6475_v54  ;;  %v3700_v63 = vadd.f32 %v8640_v51, %v9143_v24  ;;  %v4787_v27 = vmul.f32 -1.442695, %v2622_v11  ;;  %v9144_v54 = vld [vmem:[#allocation10_spill] sm:$0xff]  ;;  %v9146_v11 = vld [vmem:[#allocation12_spill] sm:$0xff] }
 0x265   :  { %v6479_v23 = vpop.eup %6478  ;;  %6498 = vrcp.f32 %v4047_v40  ;;  %v4050_v56 = vadd.f32 1.0, %v6477_v37  ;;  %v2625_v28 = vadd.f32 %v8640_v51, %v9144_v54  ;;  %v3692_v37 = vadd.f32 %v8640_v51, %v9145_v42 }
 0x266   :  { %v6481_v21 = vpop.eup %6480  ;;  %5094 = vst [vmem:[%s9064_s3 + $0x6b0] sm:$0xff] %v6479_v23  ;;  %6500 = vrcp.f32 %v2983_v12  ;;  %v2646_v23 = vadd.f32 %v8640_v51, %v9146_v11 }
 0x267   :  { %v6483_v19 = vpop.eup %6482  ;;  %4843 = vst [vmem:[%s9064_s3 + $0x4a0] sm:$0xff] %v6481_v21  ;;  %6502 = vrcp.f32 %v4050_v56  ;;  %v5036_v21 = vmul.f32 -1.442695, %v3689_v39  ;;  %v8679_v56 = vpop.f32.mrb[124].mxu0  ;;  %v9147_v39 = vld [vmem:[#allocation13_spill] sm:$0xff] }
 0x268   :  { %v6485_v20 = vpop.eup %6484  ;;  %5092 = vst [vmem:[%s9064_s3 + $0x6a0] sm:$0xff] %v6483_v19  ;;  %6504 = vpow2.f32 %v4784_v5  ;;  %v4790_v5 = vmul.f32 -1.442695, %v2633_v31  ;;  %v3713_v24 = vadd.f32 %v8640_v51, %v9147_v39  ;;  %v4788_v54 = vmul.f32 -1.442695, %v2625_v28 }
 0x269   :  { %v6487_v40 = vpop.eup %6486  ;;  %4846 = vst [vmem:[%s9064_s3 + $0x4b8] sm:$0xff] %v6485_v20  ;;  %6506 = vpow2.f32 %v5033_v15  ;;  %v5039_v15 = vmul.f32 -1.442695, %v3700_v63  ;;  %v8688_v20 = vpop.f32.mrb[125].mxu0  ;;  %v5037_v11 = vmul.f32 -1.442695, %v3692_v37 }
 0x26a   :  { %v6489_v12 = vpop.eup %6488  ;;  %5095 = vst [vmem:[%s9064_s3 + $0x6b8] sm:$0xff] %v6487_v40  ;;  %6508 = vpow2.f32 %v4789_v18  ;;  %v8690_v18 = vpop.f32.mrb[125].mxu1  ;;  %v9149_v40 = vld [vmem:[#allocation14_spill] sm:$0xff]  ;;  %v4793_v28 = vmul.f32 -1.442695, %v2646_v23 }
 0x26b   :  { %v6491_v19 = vpop.eup %6490  ;;  %4844 = vst [vmem:[%s9064_s3 + $0x4a8] sm:$0xff] %v6489_v12  ;;  %6510 = vpow2.f32 %v5038_v49  ;;  %9148 = vst [vmem:[#allocation7_spill] sm:$0xff] %v8690_v18  ;;  %v2638_v42 = vadd.f32 %v8640_v51, %v9149_v40  ;;  %v8697_v12 = vpop.f32.mrb[126].mxu0 }
 0x26c   :  { %v6493_v31 = vpop.eup %6492  ;;  %5093 = vst [vmem:[%s9064_s3 + $0x6a8] sm:$0xff] %v6491_v19  ;;  %6512 = vpow2.f32 %v4787_v27  ;;  %v8699_v49 = vpop.f32.mrb[126].mxu1 }
 0x26d   :  { %v6495_v63 = vpop.eup %6494  ;;  %4849 = vst [vmem:[%s9064_s3 + $0x4d0] sm:$0xff] %v6493_v31  ;;  %6514 = vpow2.f32 %v5036_v21  ;;  %v8704_v39 = vpop.f32.mrb[127].mxu0  ;;  %v5042_v31 = vmul.f32 -1.442695, %v3713_v24  ;;  %v4791_v37 = vmul.f32 -1.442695, %v2638_v42 }
 0x26e   :  { %9150 = vst [vmem:[#allocation22_spill] sm:$0xff] %v8704_v39  ;;  %v8706_v18 = vpop.f32.mrb[127].mxu1  ;;  %v6497_v27 = vpop.eup %6496  ;;  %5098 = vst [vmem:[%s9064_s3 + $0x6d0] sm:$0xff] %v6495_v63  ;;  %6516 = vpow2.f32 %v4790_v5 }
 0x26f   :  { %9151 = vst [vmem:[#allocation23_spill] sm:$0xff] %v8706_v18  ;;  %v6499_v19 = vpop.eup %6498  ;;  %4847 = vst [vmem:[%s9064_s3 + $0x4c0] sm:$0xff] %v6497_v27  ;;  %6518 = vpow2.f32 %v5039_v15 }
 0x270   :  { %v6501_v21 = vpop.eup %6500  ;;  %5096 = vst [vmem:[%s9064_s3 + $0x6c0] sm:$0xff] %v6499_v19  ;;  %6520 = vpow2.f32 %v4788_v54 }
 0x271   :  { %v6503_v40 = vpop.eup %6502  ;;  %4850 = vst [vmem:[%s9064_s3 + $0x4d8] sm:$0xff] %v6501_v21  ;;  %6522 = vpow2.f32 %v5037_v11 }
 0x272   :  { %v6505_v5 = vpop.eup %6504  ;;  %5099 = vst [vmem:[%s9064_s3 + $0x6d8] sm:$0xff] %v6503_v40  ;;  %6524 = vpow2.f32 %v4793_v28 }
 0x273   :  { %v6507_v23 = vpop.eup %6506  ;;  %v2981_v15 = vadd.f32 1.0, %v6505_v5  ;;  %6526 = vpow2.f32 %v5042_v31 }
 0x274   :  { %v6509_v24 = vpop.eup %6508  ;;  %v4048_v63 = vadd.f32 1.0, %v6507_v23  ;;  %6528 = vpow2.f32 %v4791_v37  ;;  %v9152_v23 = vld [vmem:[#allocation15_spill] sm:$0xff] }
 0x275   :  { %v6511_v54 = vpop.eup %6510  ;;  %6530 = vrcp.f32 %v2981_v15  ;;  %v2986_v42 = vadd.f32 1.0, %v6509_v24  ;;  %v3705_v37 = vadd.f32 %v8640_v51, %v9152_v23 }
 0x276   :  { %v6513_v27 = vpop.eup %6512  ;;  %6532 = vrcp.f32 %v4048_v63  ;;  %v4053_v19 = vadd.f32 1.0, %v6511_v54  ;;  %v2649_v63 = vadd.f32 %v8640_v51, %v8290_v30 }
 0x277   :  { %v6515_v21 = vpop.eup %6514  ;;  %6534 = vrcp.f32 %v2986_v42  ;;  %v2984_v11 = vadd.f32 1.0, %v6513_v27  ;;  %v3716_v27 = vadd.f32 %v8640_v51, %v8292_v52  ;;  %v2662_v52 = vadd.f32 %v8640_v51, %v8334_v41 }
 0x278   :  { %v6517_v18 = vpop.eup %6516  ;;  %6536 = vrcp.f32 %v4053_v19  ;;  %v4051_v39 = vadd.f32 1.0, %v6515_v21  ;;  %v2654_v41 = vadd.f32 %v8640_v51, %v8341_v14  ;;  %v2665_v14 = vadd.f32 %v8640_v51, %v8348_v36 }
 0x279   :  { %v6519_v40 = vpop.eup %6518  ;;  %6538 = vrcp.f32 %v2984_v11  ;;  %v2987_v28 = vadd.f32 1.0, %v6517_v18  ;;  %v2657_v36 = vadd.f32 %v8640_v51, %v8355_v38 }
 0x27a   :  { %v6521_v5 = vpop.eup %6520  ;;  %6540 = vrcp.f32 %v4051_v39  ;;  %v4054_v31 = vadd.f32 1.0, %v6519_v40  ;;  %v2641_v39 = vadd.f32 %v8640_v51, %v8304_v17  ;;  %v5040_v40 = vmul.f32 -1.442695, %v3705_v37 }
 0x27b   :  { %v6523_v15 = vpop.eup %6522  ;;  %6542 = vrcp.f32 %v2987_v28  ;;  %v2985_v24 = vadd.f32 1.0, %v6521_v5  ;;  %v3708_v28 = vadd.f32 %v8640_v51, %v8306_v7  ;;  %v5043_v17 = vmul.f32 -1.442695, %v3716_v27 }
 0x27c   :  { %v6525_v54 = vpop.eup %6524  ;;  %6544 = vrcp.f32 %v4054_v31  ;;  %v4052_v42 = vadd.f32 1.0, %v6523_v15  ;;  %v4794_v31 = vmul.f32 -1.442695, %v2649_v63  ;;  %v3729_v37 = vadd.f32 %v8640_v51, %v8336_v4 }
 0x27d   :  { %v6527_v19 = vpop.eup %6526  ;;  %6546 = vrcp.f32 %v2985_v24  ;;  %v2990_v18 = vadd.f32 1.0, %v6525_v54  ;;  %v4792_v7 = vmul.f32 -1.442695, %v2641_v39  ;;  %v5041_v63 = vmul.f32 -1.442695, %v3708_v28 }
 0x27e   :  { %v6529_v21 = vpop.eup %6528  ;;  %6548 = vrcp.f32 %v4052_v42  ;;  %v4057_v11 = vadd.f32 1.0, %v6527_v19  ;;  %v3721_v4 = vadd.f32 %v8640_v51, %v8343_v44  ;;  %v4797_v42 = vmul.f32 -1.442695, %v2662_v52 }
 0x27f   :  { %v6531_v30 = vpop.eup %6530  ;;  %6550 = vrcp.f32 %v2990_v18  ;;  %v2988_v5 = vadd.f32 1.0, %v6529_v21  ;;  %v5046_v19 = vmul.f32 -1.442695, %v3729_v37  ;;  %v3732_v44 = vadd.f32 %v8640_v51, %v8350_v55 }
 0x280   :  { %v6533_v23 = vpop.eup %6532  ;;  %4848 = vst [vmem:[%s9064_s3 + $0x4c8] sm:$0xff] %v6531_v30  ;;  %6552 = vrcp.f32 %v4057_v11  ;;  %v4795_v39 = vmul.f32 -1.442695, %v2654_v41  ;;  %v5044_v11 = vmul.f32 -1.442695, %v3721_v4 }
 0x281   :  { %v6535_v15 = vpop.eup %6534  ;;  %5097 = vst [vmem:[%s9064_s3 + $0x6c8] sm:$0xff] %v6533_v23  ;;  %6554 = vrcp.f32 %v2988_v5  ;;  %v4798_v30 = vmul.f32 -1.442695, %v2665_v14  ;;  %v5047_v38 = vmul.f32 -1.442695, %v3732_v44 }
 0x282   :  { %v6537_v24 = vpop.eup %6536  ;;  %4853 = vst [vmem:[%s9064_s3 + $0x4f0] sm:$0xff] %v6535_v15  ;;  %6556 = vpow2.f32 %v5040_v40  ;;  %v9153_v40 = vld [vmem:[#allocation16_spill] sm:$0xff]  ;;  %v4796_v52 = vmul.f32 -1.442695, %v2657_v36 }
 0x283   :  { %v6539_v54 = vpop.eup %6538  ;;  %5102 = vst [vmem:[%s9064_s3 + $0x6f0] sm:$0xff] %v6537_v24  ;;  %6558 = vpow2.f32 %v4794_v31  ;;  %v3724_v55 = vadd.f32 %v8640_v51, %v9153_v40  ;;  %v2678_v40 = vadd.f32 %v8640_v51, %v8362_v62 }
 0x284   :  { %v6541_v27 = vpop.eup %6540  ;;  %4851 = vst [vmem:[%s9064_s3 + $0x4e0] sm:$0xff] %v6539_v54  ;;  %6560 = vpow2.f32 %v5043_v17 }
 0x285   :  { %v6543_v18 = vpop.eup %6542  ;;  %5100 = vst [vmem:[%s9064_s3 + $0x6e0] sm:$0xff] %v6541_v27  ;;  %6562 = vpow2.f32 %v4792_v7  ;;  %v5045_v17 = vmul.f32 -1.442695, %v3724_v55 }
 0x286   :  { %v6545_v21 = vpop.eup %6544  ;;  %4854 = vst [vmem:[%s9064_s3 + $0x4f8] sm:$0xff] %v6543_v18  ;;  %6564 = vpow2.f32 %v5041_v63 }
 0x287   :  { %v6547_v28 = vpop.eup %6546  ;;  %5103 = vst [vmem:[%s9064_s3 + $0x6f8] sm:$0xff] %v6545_v21  ;;  %6566 = vpow2.f32 %v4797_v42 }
 0x288   :  { %v6549_v5 = vpop.eup %6548  ;;  %4852 = vst [vmem:[%s9064_s3 + $0x4e8] sm:$0xff] %v6547_v28  ;;  %6568 = vpow2.f32 %v5046_v19 }
 0x289   :  { %v6551_v31 = vpop.eup %6550  ;;  %5101 = vst [vmem:[%s9064_s3 + $0x6e8] sm:$0xff] %v6549_v5  ;;  %6570 = vpow2.f32 %v4795_v39 }
 0x28a   :  { %v6553_v23 = vpop.eup %6552  ;;  %4857 = vst [vmem:[%s9064_s3 + $0x510] sm:$0xff] %v6551_v31  ;;  %6572 = vpow2.f32 %v5044_v11  ;;  %v2670_v31 = vadd.f32 %v8640_v51, %v8388_v61  ;;  %v3748_v61 = vadd.f32 %v8640_v51, %v8404_v9  ;;  %v3740_v9 = vadd.f32 %v8640_v51, %v8418_v16 }
 0x28b   :  { %v6555_v37 = vpop.eup %6554  ;;  %5106 = vst [vmem:[%s9064_s3 + $0x710] sm:$0xff] %v6553_v23  ;;  %6574 = vpow2.f32 %v4798_v30  ;;  %v3745_v30 = vadd.f32 %v8640_v51, %v8376_v8  ;;  %v3761_v16 = vadd.f32 %v8640_v51, %v8442_v0  ;;  %v3753_v0 = vadd.f32 %v8640_v51, %v8449_v47 }
 0x28c   :  { %v6557_v15 = vpop.eup %6556  ;;  %4855 = vst [vmem:[%s9064_s3 + $0x500] sm:$0xff] %v6555_v37  ;;  %6576 = vpow2.f32 %v5047_v38 }
 0x28d   :  { %v6559_v7 = vpop.eup %6558  ;;  %v4055_v41 = vadd.f32 1.0, %v6557_v15  ;;  %6578 = vpow2.f32 %v4796_v52  ;;  %v4801_v15 = vmul.f32 -1.442695, %v2678_v40  ;;  %v9154_v40 = vld [vmem:[#allocation17_spill] sm:$0xff] }
 0x28e   :  { %v6561_v24 = vpop.eup %6560  ;;  %v2991_v63 = vadd.f32 1.0, %v6559_v7  ;;  %6580 = vpow2.f32 %v5045_v17  ;;  %v3737_v17 = vadd.f32 %v8640_v51, %v8390_v6  ;;  %v2681_v7 = vadd.f32 %v8640_v51, %v8402_v22 }
 0x28f   :  { %v6563_v4 = vpop.eup %6562  ;;  %6582 = vrcp.f32 %v4055_v41  ;;  %v4058_v54 = vadd.f32 1.0, %v6561_v24  ;;  %v5050_v24 = vmul.f32 -1.442695, %v3745_v30  ;;  %v4799_v6 = vmul.f32 -1.442695, %v2670_v31 }
 0x290   :  { %v6565_v42 = vpop.eup %6564  ;;  %6584 = vrcp.f32 %v2991_v63  ;;  %v2989_v14 = vadd.f32 1.0, %v6563_v4  ;;  %v2673_v4 = vadd.f32 %v8640_v51, %v8416_v60  ;;  %v5048_v22 = vmul.f32 -1.442695, %v3737_v17 }
 0x291   :  { %v6567_v27 = vpop.eup %6566  ;;  %6586 = vrcp.f32 %v4058_v54  ;;  %v4056_v19 = vadd.f32 1.0, %v6565_v42  ;;  %v2694_v60 = vadd.f32 %v8640_v51, %v8440_v53  ;;  %v2686_v53 = vadd.f32 %v8640_v51, %v8447_v46 }
 0x292   :  { %v6569_v44 = vpop.eup %6568  ;;  %6588 = vrcp.f32 %v2989_v14  ;;  %v2994_v18 = vadd.f32 1.0, %v6567_v27  ;;  %v4802_v14 = vmul.f32 -1.442695, %v2681_v7  ;;  %v2697_v46 = vadd.f32 %v8640_v51, %v9154_v40 }
 0x293   :  { %v6571_v39 = vpop.eup %6570  ;;  %6590 = vrcp.f32 %v4056_v19  ;;  %v4061_v36 = vadd.f32 1.0, %v6569_v44  ;;  %v5051_v19 = vmul.f32 -1.442695, %v3748_v61  ;;  %v4803_v47 = vmul.f32 -1.442695, %v2686_v53 }
 0x294   :  { %v6573_v21 = vpop.eup %6572  ;;  %6592 = vrcp.f32 %v2994_v18  ;;  %v2992_v11 = vadd.f32 1.0, %v6571_v39  ;;  %v4800_v18 = vmul.f32 -1.442695, %v2673_v4 }
 0x295   :  { %v6575_v55 = vpop.eup %6574  ;;  %6594 = vrcp.f32 %v4061_v36  ;;  %v4059_v28 = vadd.f32 1.0, %v6573_v21  ;;  %v5049_v36 = vmul.f32 -1.442695, %v3740_v9 }
 0x296   :  { %v6577_v5 = vpop.eup %6576  ;;  %6596 = vrcp.f32 %v2992_v11  ;;  %v2995_v38 = vadd.f32 1.0, %v6575_v55  ;;  %v4805_v11 = vmul.f32 -1.442695, %v2694_v60  ;;  %v9155_v60 = vld [vmem:[#allocation18_spill] sm:$0xff] }
 0x297   :  { %v6579_v52 = vpop.eup %6578  ;;  %6598 = vrcp.f32 %v4059_v28  ;;  %v4062_v23 = vadd.f32 1.0, %v6577_v5  ;;  %v5054_v28 = vmul.f32 -1.442695, %v3761_v16 }
 0x298   :  { %v6581_v37 = vpop.eup %6580  ;;  %6600 = vrcp.f32 %v2995_v38  ;;  %v2993_v62 = vadd.f32 1.0, %v6579_v52  ;;  %v5052_v38 = vmul.f32 -1.442695, %v3753_v0  ;;  %v4806_v52 = vmul.f32 -1.442695, %v2697_v46 }
 0x299   :  { %v6583_v8 = vpop.eup %6582  ;;  %6602 = vrcp.f32 %v4062_v23  ;;  %v4060_v41 = vadd.f32 1.0, %v6581_v37 }
 0x29a   :  { %v6585_v63 = vpop.eup %6584  ;;  %5104 = vst [vmem:[%s9064_s3 + $0x700] sm:$0xff] %v6583_v8  ;;  %6604 = vrcp.f32 %v2993_v62 }
 0x29b   :  { %v6587_v54 = vpop.eup %6586  ;;  %4858 = vst [vmem:[%s9064_s3 + $0x518] sm:$0xff] %v6585_v63  ;;  %6606 = vrcp.f32 %v4060_v41 }
 0x29c   :  { %v6589_v42 = vpop.eup %6588  ;;  %5107 = vst [vmem:[%s9064_s3 + $0x718] sm:$0xff] %v6587_v54  ;;  %6608 = vpow2.f32 %v4801_v15 }
 0x29d   :  { %v6591_v27 = vpop.eup %6590  ;;  %4856 = vst [vmem:[%s9064_s3 + $0x508] sm:$0xff] %v6589_v42  ;;  %6610 = vpow2.f32 %v5050_v24 }
 0x29e   :  { %v6593_v44 = vpop.eup %6592  ;;  %5105 = vst [vmem:[%s9064_s3 + $0x708] sm:$0xff] %v6591_v27  ;;  %6612 = vpow2.f32 %v4799_v6  ;;  %v3764_v27 = vadd.f32 %v8640_v51, %v9155_v60 }
 0x29f   :  { %v6595_v39 = vpop.eup %6594  ;;  %4861 = vst [vmem:[%s9064_s3 + $0x530] sm:$0xff] %v6593_v44  ;;  %6614 = vpow2.f32 %v5048_v22  ;;  %v2689_v44 = vadd.f32 %v8640_v51, %v8472_v59 }
 0x2a0   :  { %v6597_v21 = vpop.eup %6596  ;;  %5110 = vst [vmem:[%s9064_s3 + $0x730] sm:$0xff] %v6595_v39  ;;  %6616 = vpow2.f32 %v4802_v14  ;;  %v3756_v39 = vadd.f32 %v8640_v51, %v8474_v25  ;;  %v5055_v46 = vmul.f32 -1.442695, %v3764_v27  ;;  %v2702_v25 = vadd.f32 %v8640_v51, %v8513_v45 }
 0x2a1   :  { %v6599_v55 = vpop.eup %6598  ;;  %4859 = vst [vmem:[%s9064_s3 + $0x520] sm:$0xff] %v6597_v21  ;;  %6618 = vpow2.f32 %v5051_v19  ;;  %v2710_v21 = vadd.f32 %v8640_v51, %v8506_v10  ;;  %v2713_v45 = vadd.f32 %v8640_v51, %v8520_v1  ;;  %v2705_v1 = vadd.f32 %v8640_v51, %v8527_v58 }
 0x2a2   :  { %v6601_v30 = vpop.eup %6600  ;;  %5108 = vst [vmem:[%s9064_s3 + $0x720] sm:$0xff] %v6599_v55  ;;  %6620 = vpow2.f32 %v4800_v18  ;;  %v3777_v55 = vadd.f32 %v8640_v51, %v8508_v32  ;;  %v5053_v10 = vmul.f32 -1.442695, %v3756_v39 }
 0x2a3   :  { %v6603_v5 = vpop.eup %6602  ;;  %4862 = vst [vmem:[%s9064_s3 + $0x538] sm:$0xff] %v6601_v30  ;;  %6622 = vpow2.f32 %v5049_v36  ;;  %v4804_v30 = vmul.f32 -1.442695, %v2689_v44  ;;  %v4809_v32 = vmul.f32 -1.442695, %v2710_v21 }
 0x2a4   :  { %v6605_v31 = vpop.eup %6604  ;;  %5111 = vst [vmem:[%s9064_s3 + $0x738] sm:$0xff] %v6603_v5  ;;  %6624 = vpow2.f32 %v4805_v11  ;;  %v3769_v5 = vadd.f32 %v8640_v51, %v8515_v3  ;;  %v3780_v3 = vadd.f32 %v8640_v51, %v8522_v33  ;;  %v3772_v33 = vadd.f32 %v8640_v51, %v8529_v2 }
 0x2a5   :  { %v6607_v23 = vpop.eup %6606  ;;  %4860 = vst [vmem:[%s9064_s3 + $0x528] sm:$0xff] %v6605_v31  ;;  %6626 = vpow2.f32 %v5054_v28 }
 0x2a6   :  { %v6609_v17 = vpop.eup %6608  ;;  %5109 = vst [vmem:[%s9064_s3 + $0x728] sm:$0xff] %v6607_v23  ;;  %6628 = vpow2.f32 %v4803_v47 }
 0x2a7   :  { %v6611_v37 = vpop.eup %6610  ;;  %v2998_v62 = vadd.f32 1.0, %v6609_v17  ;;  %6630 = vpow2.f32 %v5052_v38  ;;  %v4807_v17 = vmul.f32 -1.442695, %v2702_v25  ;;  %v9158_v25 = vld [vmem:[#allocation21_spill] sm:$0xff] }
 0x2a8   :  { %v6613_v15 = vpop.eup %6612  ;;  %v4065_v7 = vadd.f32 1.0, %v6611_v37  ;;  %6632 = vpow2.f32 %v4806_v52  ;;  %v5058_v52 = vmul.f32 -1.442695, %v3777_v55 }
 0x2a9   :  { %v6615_v8 = vpop.eup %6614  ;;  %6634 = vrcp.f32 %v2998_v62  ;;  %v2996_v41 = vadd.f32 1.0, %v6613_v15  ;;  %v5056_v62 = vmul.f32 -1.442695, %v3769_v5 }
 0x2aa   :  { %v6617_v24 = vpop.eup %6616  ;;  %6636 = vrcp.f32 %v4065_v7  ;;  %v4063_v61 = vadd.f32 1.0, %v6615_v8  ;;  %v4810_v7 = vmul.f32 -1.442695, %v2713_v45  ;;  %v9156_v8 = vld [vmem:[#allocation19_spill] sm:$0xff] }
 0x2ab   :  { %v6619_v63 = vpop.eup %6618  ;;  %6638 = vrcp.f32 %v2996_v41  ;;  %v2999_v6 = vadd.f32 1.0, %v6617_v24  ;;  %v2726_v58 = vadd.f32 %v8640_v51, %v9156_v8  ;;  %v5059_v24 = vmul.f32 -1.442695, %v3780_v3 }
 0x2ac   :  { %v6621_v4 = vpop.eup %6620  ;;  %6640 = vrcp.f32 %v4063_v61  ;;  %v4066_v54 = vadd.f32 1.0, %v6619_v63  ;;  %v9157_v61 = vld [vmem:[#allocation20_spill] sm:$0xff]  ;;  %v2742_v8 = vadd.f32 %v8640_v51, %v8612_v26  ;;  %v2734_v26 = vadd.f32 %v8640_v51, %v8619_v34 }
 0x2ad   :  { %v6623_v22 = vpop.eup %6622  ;;  %6642 = vrcp.f32 %v2999_v6  ;;  %v2997_v9 = vadd.f32 1.0, %v6621_v4  ;;  %v3793_v2 = vadd.f32 %v8640_v51, %v9157_v61  ;;  %v4808_v6 = vmul.f32 -1.442695, %v2705_v1 }
 0x2ae   :  { %v6625_v42 = vpop.eup %6624  ;;  %6644 = vrcp.f32 %v4066_v54  ;;  %v4064_v14 = vadd.f32 1.0, %v6623_v22  ;;  %v5057_v54 = vmul.f32 -1.442695, %v3772_v33 }
 0x2af   :  { %v6627_v19 = vpop.eup %6626  ;;  %6646 = vrcp.f32 %v2997_v9  ;;  %v3002_v16 = vadd.f32 1.0, %v6625_v42  ;;  %v4813_v9 = vmul.f32 -1.442695, %v2726_v58 }
 0x2b0   :  { %v6629_v18 = vpop.eup %6628  ;;  %6648 = vrcp.f32 %v4064_v14  ;;  %v4069_v53 = vadd.f32 1.0, %v6627_v19  ;;  %v5062_v14 = vmul.f32 -1.442695, %v3793_v2 }
 0x2b1   :  { %v6631_v36 = vpop.eup %6630  ;;  %6650 = vrcp.f32 %v3002_v16  ;;  %v3000_v0 = vadd.f32 1.0, %v6629_v18 }
 0x2b2   :  { %v6633_v11 = vpop.eup %6632  ;;  %6652 = vrcp.f32 %v4069_v53  ;;  %v4067_v40 = vadd.f32 1.0, %v6631_v36 }
 0x2b3   :  { %v6635_v59 = vpop.eup %6634  ;;  %6654 = vrcp.f32 %v3000_v0  ;;  %v3003_v28 = vadd.f32 1.0, %v6633_v11 }
 0x2b4   :  { %v6637_v47 = vpop.eup %6636  ;;  %4865 = vst [vmem:[%s9064_s3 + $0x550] sm:$0xff] %v6635_v59  ;;  %6656 = vrcp.f32 %v4067_v40 }
 0x2b5   :  { %v6639_v38 = vpop.eup %6638  ;;  %5114 = vst [vmem:[%s9064_s3 + $0x750] sm:$0xff] %v6637_v47  ;;  %6658 = vrcp.f32 %v3003_v28  ;;  %v2718_v47 = vadd.f32 %v8640_v51, %v9158_v25 }
 0x2b6   :  { %v6641_v31 = vpop.eup %6640  ;;  %4863 = vst [vmem:[%s9064_s3 + $0x540] sm:$0xff] %v6639_v38  ;;  %6660 = vpow2.f32 %v5055_v46  ;;  %v3785_v38 = vadd.f32 %v8640_v51, %v8558_v35 }
 0x2b7   :  { %v6643_v23 = vpop.eup %6642  ;;  %5112 = vst [vmem:[%s9064_s3 + $0x740] sm:$0xff] %v6641_v31  ;;  %6662 = vpow2.f32 %v4804_v30  ;;  %v2729_v31 = vadd.f32 %v8640_v51, %v8570_v57  ;;  %v3788_v57 = vadd.f32 %v8640_v51, %v8586_v29  ;;  %v3809_v29 = vadd.f32 %v8640_v51, %v8614_v50 }
 0x2b8   :  { %v6645_v37 = vpop.eup %6644  ;;  %4866 = vst [vmem:[%s9064_s3 + $0x558] sm:$0xff] %v6643_v23  ;;  %6664 = vpow2.f32 %v5053_v10  ;;  %v3796_v23 = vadd.f32 %v8640_v51, %v8572_v43 }
 0x2b9   :  { %v6647_v15 = vpop.eup %6646  ;;  %5115 = vst [vmem:[%s9064_s3 + $0x758] sm:$0xff] %v6645_v37  ;;  %6666 = vpow2.f32 %v4809_v32  ;;  %v4811_v37 = vmul.f32 -1.442695, %v2718_v47  ;;  %v4814_v43 = vmul.f32 -1.442695, %v2729_v31 }
 0x2ba   :  { %v6649_v41 = vpop.eup %6648  ;;  %4864 = vst [vmem:[%s9064_s3 + $0x548] sm:$0xff] %v6647_v15  ;;  %6668 = vpow2.f32 %v5058_v52  ;;  %v5060_v15 = vmul.f32 -1.442695, %v3785_v38  ;;  %v5061_v2 = vmul.f32 -1.442695, %v3788_v57 }
 0x2bb   :  { %v6651_v63 = vpop.eup %6650  ;;  %5113 = vst [vmem:[%s9064_s3 + $0x748] sm:$0xff] %v6649_v41  ;;  %6670 = vpow2.f32 %v4807_v17 }
 0x2bc   :  { %v6653_v4 = vpop.eup %6652  ;;  %4869 = vst [vmem:[%s9064_s3 + $0x570] sm:$0xff] %v6651_v63  ;;  %6672 = vpow2.f32 %v5056_v62  ;;  %v2721_v62 = vadd.f32 %v8640_v51, %v8584_v13  ;;  %v5063_v13 = vmul.f32 -1.442695, %v3796_v23  ;;  %v9159_v63 = vld [vmem:[#allocation2_spill] sm:$0xff] }
 0x2bd   :  { %v6655_v22 = vpop.eup %6654  ;;  %5118 = vst [vmem:[%s9064_s3 + $0x770] sm:$0xff] %v6653_v4  ;;  %6674 = vpow2.f32 %v4810_v7  ;;  %v3801_v50 = vadd.f32 %v8640_v51, %v9159_v63  ;;  %v4817_v4 = vmul.f32 -1.442695, %v2742_v8 }
 0x2be   :  { %v6657_v42 = vpop.eup %6656  ;;  %4867 = vst [vmem:[%s9064_s3 + $0x560] sm:$0xff] %v6655_v22  ;;  %6676 = vpow2.f32 %v5059_v24  ;;  %v4812_v24 = vmul.f32 -1.442695, %v2721_v62 }
 0x2bf   :  { %v6659_v60 = vpop.eup %6658  ;;  %5116 = vst [vmem:[%s9064_s3 + $0x760] sm:$0xff] %v6657_v42  ;;  %6678 = vpow2.f32 %v4808_v6  ;;  %v9161_v42 = vld [vmem:[#allocation4_spill] sm:$0xff] }
 0x2c0   :  { %v6661_v27 = vpop.eup %6660  ;;  %4870 = vst [vmem:[%s9064_s3 + $0x578] sm:$0xff] %v6659_v60  ;;  %6680 = vpow2.f32 %v5057_v54  ;;  %v9160_v54 = vld [vmem:[#allocation3_spill] sm:$0xff] }
 0x2c1   :  { %v6663_v19 = vpop.eup %6662  ;;  %v4070_v16 = vadd.f32 1.0, %v6661_v27  ;;  %6682 = vpow2.f32 %v4813_v9  ;;  %v2745_v34 = vadd.f32 %v8640_v51, %v9160_v54  ;;  %v5066_v9 = vmul.f32 -1.442695, %v3809_v29  ;;  %v9165_v54 = vld [vmem:[#allocation22_spill] sm:$0xff] }
 0x2c2   :  { %v6665_v44 = vpop.eup %6664  ;;  %v3001_v18 = vadd.f32 1.0, %v6663_v19  ;;  %6684 = vpow2.f32 %v5062_v14  ;;  %v3812_v14 = vadd.f32 %v8640_v51, %v9161_v42  ;;  %v4815_v27 = vmul.f32 -1.442695, %v2734_v26  ;;  %v9162_v19 = vld [vmem:[#allocation5_spill] sm:$0xff] }
 0x2c3   :  { %v6667_v53 = vpop.eup %6666  ;;  %6686 = vrcp.f32 %v4070_v16  ;;  %v4068_v39 = vadd.f32 1.0, %v6665_v44  ;;  %v2737_v16 = vadd.f32 %v8640_v51, %v9162_v19 }
 0x2c4   :  { %v6669_v36 = vpop.eup %6668  ;;  %6688 = vrcp.f32 %v3001_v18  ;;  %v3006_v0 = vadd.f32 1.0, %v6667_v53  ;;  %v5064_v18 = vmul.f32 -1.442695, %v3801_v50  ;;  %v5067_v51 = vmul.f32 -1.442695, %v3812_v14 }
 0x2c5   :  { %v6671_v21 = vpop.eup %6670  ;;  %6690 = vrcp.f32 %v4068_v39  ;;  %v4073_v11 = vadd.f32 1.0, %v6669_v36  ;;  %v4818_v39 = vmul.f32 -1.442695, %v2745_v34 }
 0x2c6   :  { %v6673_v40 = vpop.eup %6672  ;;  %6692 = vrcp.f32 %v3006_v0  ;;  %v3004_v46 = vadd.f32 1.0, %v6671_v21  ;;  %v4816_v21 = vmul.f32 -1.442695, %v2737_v16 }
 0x2c7   :  { %v6675_v55 = vpop.eup %6674  ;;  %6694 = vrcp.f32 %v4073_v11  ;;  %v4071_v59 = vadd.f32 1.0, %v6673_v40 }
 0x2c8   :  { %v6677_v28 = vpop.eup %6676  ;;  %6696 = vrcp.f32 %v3004_v46  ;;  %v3007_v30 = vadd.f32 1.0, %v6675_v55 }
 0x2c9   :  { %v6679_v10 = vpop.eup %6678  ;;  %6698 = vrcp.f32 %v4071_v59  ;;  %v4074_v5 = vadd.f32 1.0, %v6677_v28 }
 0x2ca   :  { %v6681_v32 = vpop.eup %6680  ;;  %6700 = vrcp.f32 %v3007_v30  ;;  %v3005_v45 = vadd.f32 1.0, %v6679_v10 }
 0x2cb   :  { %v6683_v52 = vpop.eup %6682  ;;  %6702 = vrcp.f32 %v4074_v5  ;;  %v4072_v3 = vadd.f32 1.0, %v6681_v32 }
 0x2cc   :  { %v6685_v17 = vpop.eup %6684  ;;  %6704 = vrcp.f32 %v3005_v45  ;;  %v3010_v1 = vadd.f32 1.0, %v6683_v52 }
 0x2cd   :  { %v6687_v35 = vpop.eup %6686  ;;  %6706 = vrcp.f32 %v4072_v3  ;;  %v4077_v33 = vadd.f32 1.0, %v6685_v17  ;;  %v6803_v17 = vld [vmem:[%s9063_s2] ss:$0 sm:$0xff] }
 0x2ce   :  { %v6689_v7 = vpop.eup %6688  ;;  %5119 = vst [vmem:[%s9064_s3 + $0x778] sm:$0xff] %v6687_v35  ;;  %6708 = vrcp.f32 %v3010_v1  ;;  %v9163_v1 = vld [vmem:[#allocation6_spill] sm:$0xff]  ;;  %v2761_v63 = vadd.f32 %v6803_v17, %v8697_v12  ;;  %v2753_v34 = vadd.f32 %v6803_v17, %v9165_v54 }
 0x2cf   :  { %v6691_v58 = vpop.eup %6690  ;;  %4868 = vst [vmem:[%s9064_s3 + $0x568] sm:$0xff] %v6689_v7  ;;  %6710 = vrcp.f32 %v4077_v33  ;;  %v2758_v33 = vadd.f32 %v6803_v17, %v8679_v56  ;;  %v3825_v7 = vadd.f32 %v6803_v17, %v8681_v48 }
 0x2d0   :  { %v6693_v41 = vpop.eup %6692  ;;  %5117 = vst [vmem:[%s9064_s3 + $0x768] sm:$0xff] %v6691_v58  ;;  %6712 = vpow2.f32 %v4811_v37  ;;  %v3804_v37 = vadd.f32 %v6803_v17, %v9163_v1  ;;  %v2750_v58 = vadd.f32 %v6803_v17, %v8688_v20  ;;  %v3828_v20 = vadd.f32 %v6803_v17, %v8699_v49 }
 0x2d1   :  { %v6695_v61 = vpop.eup %6694  ;;  %4873 = vst [vmem:[%s9064_s3 + $0x590] sm:$0xff] %v6693_v41  ;;  %6714 = vpow2.f32 %v5060_v15  ;;  %v4821_v56 = vmul.f32 -1.442695, %v2758_v33  ;;  %v5070_v48 = vmul.f32 -1.442695, %v3825_v7 }
 0x2d2   :  { %v6697_v6 = vpop.eup %6696  ;;  %5122 = vst [vmem:[%s9064_s3 + $0x790] sm:$0xff] %v6695_v61  ;;  %6716 = vpow2.f32 %v4814_v43  ;;  %v5065_v41 = vmul.f32 -1.442695, %v3804_v37  ;;  %v4822_v49 = vmul.f32 -1.442695, %v2761_v63 }
 0x2d3   :  { %v6699_v22 = vpop.eup %6698  ;;  %4871 = vst [vmem:[%s9064_s3 + $0x580] sm:$0xff] %v6697_v6  ;;  %6718 = vpow2.f32 %v5063_v13  ;;  %v4820_v16 = vmul.f32 -1.442695, %v2753_v34 }
 0x2d4   :  { %v6701_v60 = vpop.eup %6700  ;;  %5120 = vst [vmem:[%s9064_s3 + $0x780] sm:$0xff] %v6699_v22  ;;  %6720 = vpow2.f32 %v4812_v24  ;;  %v9164_v24 = vld [vmem:[#allocation7_spill] sm:$0xff] }
 0x2d5   :  { %v6703_v44 = vpop.eup %6702  ;;  %4874 = vst [vmem:[%s9064_s3 + $0x598] sm:$0xff] %v6701_v60  ;;  %6722 = vpow2.f32 %v5061_v2  ;;  %v3817_v26 = vadd.f32 %v6803_v17, %v9164_v24 }
 0x2d6   :  { %v6705_v53 = vpop.eup %6704  ;;  %5123 = vst [vmem:[%s9064_s3 + $0x798] sm:$0xff] %v6703_v44  ;;  %6724 = vpow2.f32 %v4817_v4  ;;  %v4819_v4 = vmul.f32 -1.442695, %v2750_v58 }
 0x2d7   :  { %v6707_v36 = vpop.eup %6706  ;;  %4872 = vst [vmem:[%s9064_s3 + $0x588] sm:$0xff] %v6705_v53  ;;  %6726 = vpow2.f32 %v5066_v9  ;;  %v5068_v12 = vmul.f32 -1.442695, %v3817_v26  ;;  %v9166_v9 = vld [vmem:[#allocation23_spill] sm:$0xff] }
 0x2d8   :  { %v6709_v0 = vpop.eup %6708  ;;  %5121 = vst [vmem:[%s9064_s3 + $0x788] sm:$0xff] %v6707_v36  ;;  %6728 = vpow2.f32 %v4815_v27  ;;  %v3820_v42 = vadd.f32 %v6803_v17, %v9166_v9  ;;  %v5071_v27 = vmul.f32 -1.442695, %v3828_v20 }
 0x2d9   :  { %v6711_v11 = vpop.eup %6710  ;;  %4877 = vst [vmem:[%s9064_s3 + $0x5b0] sm:$0xff] %v6709_v0  ;;  %6730 = vpow2.f32 %v5064_v18 }
 0x2da   :  { %v6713_v40 = vpop.eup %6712  ;;  %5126 = vst [vmem:[%s9064_s3 + $0x7b0] sm:$0xff] %v6711_v11  ;;  %6732 = vpow2.f32 %v4818_v39  ;;  %v5069_v18 = vmul.f32 -1.442695, %v3820_v42 }
 0x2db   :  { %v6715_v46 = vpop.eup %6714  ;;  %v3008_v55 = vadd.f32 1.0, %v6713_v40  ;;  %6734 = vpow2.f32 %v5067_v51 }
 0x2dc   :  { %v6717_v59 = vpop.eup %6716  ;;  %v4075_v28 = vadd.f32 1.0, %v6715_v46  ;;  %6736 = vpow2.f32 %v4816_v21 }
 0x2dd   :  { %v6719_v30 = vpop.eup %6718  ;;  %6738 = vrcp.f32 %v3008_v55  ;;  %v3011_v25 = vadd.f32 1.0, %v6717_v59 }
 0x2de   :  { %v6721_v47 = vpop.eup %6720  ;;  %6740 = vrcp.f32 %v4075_v28  ;;  %v4078_v10 = vadd.f32 1.0, %v6719_v30 }
 0x2df   :  { %v6723_v5 = vpop.eup %6722  ;;  %6742 = vrcp.f32 %v3011_v25  ;;  %v3009_v38 = vadd.f32 1.0, %v6721_v47 }
 0x2e0   :  { %v6725_v32 = vpop.eup %6724  ;;  %6744 = vrcp.f32 %v4078_v10  ;;  %v4076_v45 = vadd.f32 1.0, %v6723_v5 }
 0x2e1   :  { %v6727_v31 = vpop.eup %6726  ;;  %6746 = vrcp.f32 %v3009_v38  ;;  %v3014_v52 = vadd.f32 1.0, %v6725_v32 }
 0x2e2   :  { %v6729_v3 = vpop.eup %6728  ;;  %6748 = vrcp.f32 %v4076_v45  ;;  %v4081_v23 = vadd.f32 1.0, %v6727_v31 }
 0x2e3   :  { %v6731_v62 = vpop.eup %6730  ;;  %6750 = vrcp.f32 %v3014_v52  ;;  %v3012_v35 = vadd.f32 1.0, %v6729_v3 }
 0x2e4   :  { %v6733_v15 = vpop.eup %6732  ;;  %6752 = vrcp.f32 %v4081_v23  ;;  %v4079_v57 = vadd.f32 1.0, %v6731_v62 }
 0x2e5   :  { %v6735_v43 = vpop.eup %6734  ;;  %6754 = vrcp.f32 %v3012_v35  ;;  %v3015_v8 = vadd.f32 1.0, %v6733_v15 }
 0x2e6   :  { %v6737_v13 = vpop.eup %6736  ;;  %6756 = vrcp.f32 %v4079_v57  ;;  %v4082_v29 = vadd.f32 1.0, %v6735_v43 }
 0x2e7   :  { %v6739_v61 = vpop.eup %6738  ;;  %6758 = vrcp.f32 %v3015_v8  ;;  %v3013_v2 = vadd.f32 1.0, %v6737_v13 }
 0x2e8   :  { %v6741_v50 = vpop.eup %6740  ;;  %4875 = vst [vmem:[%s9064_s3 + $0x5a0] sm:$0xff] %v6739_v61  ;;  %6760 = vrcp.f32 %v4082_v29 }
 0x2e9   :  { %v6743_v6 = vpop.eup %6742  ;;  %5124 = vst [vmem:[%s9064_s3 + $0x7a0] sm:$0xff] %v6741_v50  ;;  %6762 = vrcp.f32 %v3013_v2 }
 0x2ea   :  { %v6745_v22 = vpop.eup %6744  ;;  %4878 = vst [vmem:[%s9064_s3 + $0x5b8] sm:$0xff] %v6743_v6  ;;  %6764 = vpow2.f32 %v5065_v41 }
 0x2eb   :  { %v6747_v14 = vpop.eup %6746  ;;  %5127 = vst [vmem:[%s9064_s3 + $0x7b8] sm:$0xff] %v6745_v22  ;;  %6766 = vpow2.f32 %v4821_v56 }
 0x2ec   :  { %v6749_v60 = vpop.eup %6748  ;;  %4876 = vst [vmem:[%s9064_s3 + $0x5a8] sm:$0xff] %v6747_v14  ;;  %6768 = vpow2.f32 %v5070_v48 }
 0x2ed   :  { %v6751_v19 = vpop.eup %6750  ;;  %5125 = vst [vmem:[%s9064_s3 + $0x7a8] sm:$0xff] %v6749_v60  ;;  %6770 = vpow2.f32 %v4819_v4 }
 0x2ee   :  { %v6753_v44 = vpop.eup %6752  ;;  %4881 = vst [vmem:[%s9064_s3 + $0x5d0] sm:$0xff] %v6751_v19  ;;  %6772 = vpow2.f32 %v5068_v12 }
 0x2ef   :  { %v6755_v53 = vpop.eup %6754  ;;  %5130 = vst [vmem:[%s9064_s3 + $0x7d0] sm:$0xff] %v6753_v44  ;;  %6774 = vpow2.f32 %v4822_v49 }
 0x2f0   :  { %v6757_v39 = vpop.eup %6756  ;;  %4879 = vst [vmem:[%s9064_s3 + $0x5c0] sm:$0xff] %v6755_v53  ;;  %6776 = vpow2.f32 %v5071_v27 }
 0x2f1   :  { %v6759_v36 = vpop.eup %6758  ;;  %5128 = vst [vmem:[%s9064_s3 + $0x7c0] sm:$0xff] %v6757_v39  ;;  %6778 = vpow2.f32 %v4820_v16 }
 0x2f2   :  { %v6761_v51 = vpop.eup %6760  ;;  %4882 = vst [vmem:[%s9064_s3 + $0x5d8] sm:$0xff] %v6759_v36  ;;  %6780 = vpow2.f32 %v5069_v18 }
 0x2f3   :  { %v6763_v0 = vpop.eup %6762  ;;  %5131 = vst [vmem:[%s9064_s3 + $0x7d8] sm:$0xff] %v6761_v51 }
 0x2f4   :  { %v6765_v21 = vpop.eup %6764  ;;  %4880 = vst [vmem:[%s9064_s3 + $0x5c8] sm:$0xff] %v6763_v0 }
 0x2f5   :  { %v6767_v11 = vpop.eup %6766  ;;  %v4080_v40 = vadd.f32 1.0, %v6765_v21 }
 0x2f6   :  { %v6769_v46 = vpop.eup %6768  ;;  %v3018_v55 = vadd.f32 1.0, %v6767_v11 }
 0x2f7   :  { %v6771_v59 = vpop.eup %6770  ;;  %6782 = vrcp.f32 %v4080_v40  ;;  %v4085_v28 = vadd.f32 1.0, %v6769_v46 }
 0x2f8   :  { %v6773_v30 = vpop.eup %6772  ;;  %6784 = vrcp.f32 %v3018_v55  ;;  %v3016_v25 = vadd.f32 1.0, %v6771_v59 }
 0x2f9   :  { %v6775_v47 = vpop.eup %6774  ;;  %6786 = vrcp.f32 %v4085_v28  ;;  %v4083_v10 = vadd.f32 1.0, %v6773_v30 }
 0x2fa   :  { %v6777_v5 = vpop.eup %6776  ;;  %6788 = vrcp.f32 %v3016_v25  ;;  %v3019_v38 = vadd.f32 1.0, %v6775_v47 }
 0x2fb   :  { %v6779_v32 = vpop.eup %6778  ;;  %6790 = vrcp.f32 %v4083_v10  ;;  %v4086_v45 = vadd.f32 1.0, %v6777_v5 }
 0x2fc   :  { %v6781_v31 = vpop.eup %6780  ;;  %6792 = vrcp.f32 %v3019_v38  ;;  %v3017_v52 = vadd.f32 1.0, %v6779_v32 }
 0x2fd   :  { %6794 = vrcp.f32 %v4086_v45  ;;  %v4084_v3 = vadd.f32 1.0, %v6781_v31 }
 0x2fe   :  { %6796 = vrcp.f32 %v3017_v52 }
 0x2ff   :  { %6798 = vrcp.f32 %v4084_v3 }
 0x301   :  { %v6783_v23 = vpop.eup %6782 }
 0x302   :  { %v6785_v17 = vpop.eup %6784  ;;  %5129 = vst [vmem:[%s9064_s3 + $0x7c8] sm:$0xff] %v6783_v23 }
 0x303   :  { %v6787_v1 = vpop.eup %6786  ;;  %4885 = vst [vmem:[%s9064_s3 + $0x5f0] sm:$0xff] %v6785_v17 }
 0x304   :  { %v6789_v37 = vpop.eup %6788  ;;  %5134 = vst [vmem:[%s9064_s3 + $0x7f0] sm:$0xff] %v6787_v1 }
 0x305   :  { %v6791_v62 = vpop.eup %6790  ;;  %4883 = vst [vmem:[%s9064_s3 + $0x5e0] sm:$0xff] %v6789_v37 }
 0x306   :  { %v6793_v35 = vpop.eup %6792  ;;  %5132 = vst [vmem:[%s9064_s3 + $0x7e0] sm:$0xff] %v6791_v62 }
 0x307   :  { %v6795_v33 = vpop.eup %6794  ;;  %4886 = vst [vmem:[%s9064_s3 + $0x5f8] sm:$0xff] %v6793_v35 }
 0x308   :  { %v6797_v15 = vpop.eup %6796  ;;  %5135 = vst [vmem:[%s9064_s3 + $0x7f8] sm:$0xff] %v6795_v33 }
 0x309   :  { %v6799_v57 = vpop.eup %6798  ;;  %4884 = vst [vmem:[%s9064_s3 + $0x5e8] sm:$0xff] %v6797_v15 }
 0x30a   :  { %5133 = vst [vmem:[%s9064_s3 + $0x7e8] sm:$0xff] %v6799_v57 }

</bundles_post_ra>
